<compile_context>
chip_gen: v7x
topology: tpu7x:2x2x1
jax: 0.10.0
libtpu: 0.0.40
codegen_flags: <defaults>
</compile_context>

<pallas_src>
import functools

import jax
import jax.numpy as jnp
from jax.experimental import pallas as pl
from jax.experimental.pallas import tpu as pltpu

EPS = 1e-5
LANE = 128


def _pad_up(n, m):
    return ((n + m - 1) // m) * m


@functools.lru_cache(maxsize=None)
def _vmem_limit_bytes():
    # ~60% of physical VMEM: ~38 MiB on v7x (64 MiB), ~76 MiB on v5e/v6e (128 MiB).
    try:
        return int(pltpu.get_tpu_info().vmem_capacity_bytes * 0.6)
    except Exception:
        return 48 * 1024 * 1024


def _cparams():
    return pltpu.CompilerParams(dimension_semantics=("parallel",),
                                vmem_limit_bytes=_vmem_limit_bytes())


# ---------------------------------------------------------------------------
# Fused conv kernel: (scale/shift + PReLU on the input) -> KxK conv via per-tap
# MXU matmuls on a VMEM-resident padded image -> BN partial stats.  Optionally
# also computes the 1x1 projection shortcut in the same grid step.
# ---------------------------------------------------------------------------
def _conv_bn_stats_kernel(KH, KW, stride, padding, with_shortcut, *refs):
    if with_shortcut:
        (x_ref, w_ref, sc_ref, sh_ref, a_ref, xs_ref, ws_ref,
         y_ref, ysum_ref, ysq_ref, ys_ref, yssum_ref, yssq_ref, pad_ref) = refs
    else:
        (x_ref, w_ref, sc_ref, sh_ref, a_ref,
         y_ref, ysum_ref, ysq_ref, pad_ref) = refs

    _, Hi, Wi, Cin = x_ref.shape
    _, Ho, Wo, Cout = y_ref.shape

    # Fused per-channel scale/shift (BN of the producing conv) + PReLU, in f32.
    # conv1 passes scale=1, shift=0, alpha=1 which is an exact identity.
    alpha = a_ref[0, 0]
    z = x_ref[0].astype(jnp.float32) * sc_ref[0] + sh_ref[0]
    act = jnp.where(z >= 0.0, z, alpha * z).astype(pad_ref.dtype)

    # Zero-padded activated image lives only in VMEM (never round-trips HBM).
    pad_ref[...] = jnp.zeros(pad_ref.shape, pad_ref.dtype)
    pad_ref[padding:padding + Hi, padding:padding + Wi, :] = act

    # One MXU matmul per tap, accumulated in f32.
    acc = jnp.zeros((Ho * Wo, Cout), jnp.float32)
    for t in range(KH * KW):
        ky, kx = t // KW, t % KW
        if stride == 1:
            win = pad_ref[ky:ky + Ho, kx:kx + Wo, :]
        else:
            # TODO(synk): the stride>1 strided-window load path is not exercised by the
            # self-test below; switch to a space-to-depth pre-pass if it fails to lower.
            win = pad_ref[pl.ds(ky, Ho, stride), pl.ds(kx, Wo, stride), :]
        acc = acc + jnp.dot(win.reshape(Ho * Wo, Cin), w_ref[t],
                            preferred_element_type=jnp.float32)

    y_ref[...] = acc.reshape(1, Ho, Wo, Cout).astype(y_ref.dtype)
    # Per-image BN partials (every row is a real output position: no masking needed).
    ysum_ref[...] = jnp.sum(acc, axis=0)[None, None, :]
    ysq_ref[...] = jnp.sum(acc * acc, axis=0)[None, None, :]

    if with_shortcut:
        Cs = xs_ref.shape[-1]
        ysh = jnp.dot(xs_ref[0].reshape(Ho * Wo, Cs), ws_ref[...],
                      preferred_element_type=jnp.float32)
        ys_ref[...] = ysh.reshape(1, Ho, Wo, Cout).astype(ys_ref.dtype)
        yssum_ref[...] = jnp.sum(ysh, axis=0)[None, None, :]
        yssq_ref[...] = jnp.sum(ysh * ysh, axis=0)[None, None, :]


def conv2d_bn_stats(x, w, in_scale, in_shift, alpha, *, stride, padding,
                    shortcut=None, compute_dtype=jnp.float32):
    """Bias-free KxK conv (NHWC, channels padded to 128 lanes) with
      - fused per-channel input scale/shift + PReLU (identity for the first conv),
      - optional fused 1x1 projection shortcut (input pre-strided in the wrapper),
      - per-image BN sum / sum-of-squares partials for the conv outputs.
    Conv biases are omitted: they are exactly cancelled by batch-statistics BatchNorm.
    """
    N, Hi, Wi, Cin = x.shape
    KH, KW, _, Cout = w.shape
    Ho = (Hi + 2 * padding - KH) // stride + 1
    Wo = (Wi + 2 * padding - KW) // stride + 1
    with_shortcut = shortcut is not None

    wk = w.reshape(KH * KW, Cin, Cout).astype(compute_dtype)
    sc = in_scale.astype(jnp.float32).reshape(1, 1, Cin)
    sh = in_shift.astype(jnp.float32).reshape(1, 1, Cin)
    al = jnp.asarray(alpha, jnp.float32).reshape(1, 1)

    img_in = lambda n: (n, 0, 0, 0)
    vec = lambda n: (0, 0, 0)
    stat = lambda n: (n, 0, 0)

    in_specs = [
        pl.BlockSpec((1, Hi, Wi, Cin), img_in),
        # TODO(synk): for Cout >= 512 on v7x add a Cout grid axis so the resident weight
        # block is (KH*KW, Cin, tn) instead of the full Cout width.
        pl.BlockSpec((KH * KW, Cin, Cout), lambda n: (0, 0, 0)),
        pl.BlockSpec((1, 1, Cin), vec),
        pl.BlockSpec((1, 1, Cin), vec),
        pl.BlockSpec(memory_space=pltpu.MemorySpace.SMEM),
    ]
    operands = [x.astype(compute_dtype), wk, sc, sh, al]
    out_shape = [
        jax.ShapeDtypeStruct((N, Ho, Wo, Cout), compute_dtype),
        jax.ShapeDtypeStruct((N, 1, Cout), jnp.float32),
        jax.ShapeDtypeStruct((N, 1, Cout), jnp.float32),
    ]
    out_specs = [
        pl.BlockSpec((1, Ho, Wo, Cout), img_in),
        pl.BlockSpec((1, 1, Cout), stat),
        pl.BlockSpec((1, 1, Cout), stat),
    ]
    flops = 2 * N * Ho * Wo * KH * KW * Cin * Cout

    if with_shortcut:
        xs, ws = shortcut
        Cs = xs.shape[-1]
        in_specs += [pl.BlockSpec((1, Ho, Wo, Cs), img_in),
                     pl.BlockSpec((Cs, Cout), lambda n: (0, 0))]
        operands += [xs.astype(compute_dtype), ws.astype(compute_dtype)]
        out_shape += [jax.ShapeDtypeStruct((N, Ho, Wo, Cout), compute_dtype),
                      jax.ShapeDtypeStruct((N, 1, Cout), jnp.float32),
                      jax.ShapeDtypeStruct((N, 1, Cout), jnp.float32)]
        out_specs += [pl.BlockSpec((1, Ho, Wo, Cout), img_in),
                      pl.BlockSpec((1, 1, Cout), stat),
                      pl.BlockSpec((1, 1, Cout), stat)]
        flops += 2 * N * Ho * Wo * Cs * Cout

    isz = jnp.dtype(compute_dtype).itemsize
    bytes_accessed = (N * Hi * Wi * Cin + KH * KW * Cin * Cout
                      + N * Ho * Wo * Cout) * isz
    if with_shortcut:
        bytes_accessed += (shortcut[0].size + shortcut[1].size
                           + N * Ho * Wo * Cout) * isz

    # TODO(synk): for very large spatial extents (or batch == 1) add a halo'd row-band
    # grid axis instead of whole-image blocks so VMEM stays bounded and both v7x cores
    # get work even at N == 1.
    return pl.pallas_call(
        functools.partial(_conv_bn_stats_kernel, KH, KW, stride, padding, with_shortcut),
        out_shape=tuple(out_shape),
        grid=(N,),
        in_specs=in_specs,
        out_specs=out_specs,
        scratch_shapes=[pltpu.VMEM((Hi + 2 * padding, Wi + 2 * padding, Cin),
                                   compute_dtype)],
        compiler_params=_cparams(),
        cost_estimate=pl.CostEstimate(flops=int(flops), transcendentals=0,
                                      bytes_accessed=int(bytes_accessed)),
    )(*operands)


# ---------------------------------------------------------------------------
# Final stage: BN2(y2) + (BN_s(ys) | identity shortcut) -> add -> ReLU.
# Identity shortcut passes scale=1, shift=0, so one kernel covers both cases.
# ---------------------------------------------------------------------------
def _bn_add_relu_kernel(y2_ref, sc2_ref, sh2_ref, s_ref, scs_ref, shs_ref, o_ref):
    z2 = y2_ref[0].astype(jnp.float32) * sc2_ref[0] + sh2_ref[0]
    zs = s_ref[0].astype(jnp.float32) * scs_ref[0] + shs_ref[0]
    o_ref[...] = jnp.maximum(z2 + zs, 0.0)[None].astype(o_ref.dtype)


def bn_add_relu(y2, sc2, sh2, s, scs, shs, out_dtype):
    N, Ho, Wo, C = y2.shape
    img = lambda n: (n, 0, 0, 0)
    vec = lambda n: (0, 0, 0)
    return pl.pallas_call(
        _bn_add_relu_kernel,
        out_shape=jax.ShapeDtypeStruct((N, Ho, Wo, C), out_dtype),
        grid=(N,),
        in_specs=[pl.BlockSpec((1, Ho, Wo, C), img),
                  pl.BlockSpec((1, 1, C), vec),
                  pl.BlockSpec((1, 1, C), vec),
                  pl.BlockSpec((1, Ho, Wo, C), img),
                  pl.BlockSpec((1, 1, C), vec),
                  pl.BlockSpec((1, 1, C), vec)],
        out_specs=pl.BlockSpec((1, Ho, Wo, C), img),
        compiler_params=_cparams(),
    )(y2, sc2.reshape(1, 1, C), sh2.reshape(1, 1, C),
      s, scs.reshape(1, 1, C), shs.reshape(1, 1, C))


# ---------------------------------------------------------------------------
# BN finalize (O(C) per-channel scalars), parameter padding helpers.
# ---------------------------------------------------------------------------
def _bn_scale_shift(ssum, ssq, count, gamma, beta):
    mean = ssum / count
    var = jnp.maximum(ssq / count - mean * mean, 0.0)   # biased (training-mode) variance
    scale = gamma * jax.lax.rsqrt(var + EPS)
    return scale, beta - mean * scale


def _pad_filter(w, cin_p, cout_p):
    kh, kw, ci, co = w.shape
    return jnp.pad(w, ((0, 0), (0, 0), (0, cin_p - ci), (0, cout_p - co)))


def _pad_channels(v, cp):
    return jnp.pad(v, (0, cp - v.shape[0]))


# ---------------------------------------------------------------------------
# ResidualBlock parameters + forward.
# ---------------------------------------------------------------------------
def init_residual_block(key, inchannel, outchannel, stride):
    ks = jax.random.split(key, 12)
    p = {
        "w1": 0.2 * jax.random.normal(ks[0], (3, 3, inchannel, outchannel), jnp.float32),
        "b1": 0.1 * jax.random.normal(ks[1], (outchannel,), jnp.float32),
        "g1": 1.0 + 0.1 * jax.random.normal(ks[2], (outchannel,), jnp.float32),
        "be1": 0.1 * jax.random.normal(ks[3], (outchannel,), jnp.float32),
        "alpha": jnp.float32(0.25),  # nn.PReLU() default single slope
        "w2": 0.2 * jax.random.normal(ks[4], (3, 3, outchannel, outchannel), jnp.float32),
        "b2": 0.1 * jax.random.normal(ks[5], (outchannel,), jnp.float32),
        "g2": 1.0 + 0.1 * jax.random.normal(ks[6], (outchannel,), jnp.float32),
        "be2": 0.1 * jax.random.normal(ks[7], (outchannel,), jnp.float32),
    }
    if stride != 1 or inchannel != outchannel:
        p.update({
            "ws": 0.2 * jax.random.normal(ks[8], (1, 1, inchannel, outchannel), jnp.float32),
            "bs": 0.1 * jax.random.normal(ks[9], (outchannel,), jnp.float32),
            "gs": 1.0 + 0.1 * jax.random.normal(ks[10], (outchannel,), jnp.float32),
            "bes": 0.1 * jax.random.normal(ks[11], (outchannel,), jnp.float32),
        })
    return p


def residual_block_forward(params, x_nchw, *, stride, conv_shortcut,
                           compute_dtype=jnp.float32):
    # Conv biases (b1/b2/bs) are NOT applied in the kernels: a bias feeding a
    # batch-statistics BatchNorm is exactly cancelled by the mean subtraction.
    x = jnp.transpose(x_nchw, (0, 2, 3, 1))                       # NCHW -> NHWC
    N, Hi, Wi, Cin = x.shape
    Cout = params["w1"].shape[-1]
    Cin_p, Cout_p = _pad_up(Cin, LANE), _pad_up(Cout, LANE)

    # One pass: channel-pad to 128 lanes (lane-dense stores everywhere) + dtype cast.
    xc = jnp.pad(x, ((0, 0), (0, 0), (0, 0), (0, Cin_p - Cin))).astype(compute_dtype)

    ident = jnp.ones((Cin_p,), jnp.float32)
    zero = jnp.zeros((Cin_p,), jnp.float32)

    # conv1 (3x3, stride) with identity input transform; BN1 stat partials fused.
    y1, s1, q1 = conv2d_bn_stats(xc, _pad_filter(params["w1"], Cin_p, Cout_p),
                                 ident, zero, 1.0, stride=stride, padding=1,
                                 compute_dtype=compute_dtype)
    M1 = y1.shape[0] * y1.shape[1] * y1.shape[2]
    sc1, sh1 = _bn_scale_shift(jnp.sum(s1, axis=(0, 1)), jnp.sum(q1, axis=(0, 1)), M1,
                               _pad_channels(params["g1"], Cout_p),
                               _pad_channels(params["be1"], Cout_p))

    # conv2 (3x3, stride 1) with BN1 + PReLU fused into its input path; the 1x1
    # projection shortcut (when present) rides along in the same pallas_call.
    w2p = _pad_filter(params["w2"], Cout_p, Cout_p)
    if conv_shortcut:
        xs = xc[:, ::stride, ::stride, :]          # 1x1 stride-s conv == conv on strided input
        wsp = _pad_filter(params["ws"], Cin_p, Cout_p)[0, 0]
        y2, s2, q2, ysc, ss, qs = conv2d_bn_stats(
            y1, w2p, sc1, sh1, params["alpha"], stride=1, padding=1,
            shortcut=(xs, wsp), compute_dtype=compute_dtype)
    else:
        y2, s2, q2 = conv2d_bn_stats(y1, w2p, sc1, sh1, params["alpha"],
                                     stride=1, padding=1, compute_dtype=compute_dtype)
    M2 = y2.shape[0] * y2.shape[1] * y2.shape[2]
    sc2, sh2 = _bn_scale_shift(jnp.sum(s2, axis=(0, 1)), jnp.sum(q2, axis=(0, 1)), M2,
                               _pad_channels(params["g2"], Cout_p),
                               _pad_channels(params["be2"], Cout_p))

    if conv_shortcut:
        scs, shs = _bn_scale_shift(jnp.sum(ss, axis=(0, 1)), jnp.sum(qs, axis=(0, 1)), M2,
                                   _pad_channels(params["gs"], Cout_p),
                                   _pad_channels(params["bes"], Cout_p))
        s_in = ysc
    else:
        # Identity shortcut (stride == 1, Cin == Cout): add the padded input directly.
        scs = jnp.ones((Cout_p,), jnp.float32)
        shs = jnp.zeros((Cout_p,), jnp.float32)
        s_in = xc

    out = bn_add_relu(y2, sc2, sh2, s_in, scs, shs, x.dtype)       # (N, Ho, Wo, Cout_p) f32
    return jnp.transpose(out[..., :Cout], (0, 3, 1, 2))            # drop pad lanes, NHWC->NCHW


# ---------------------------------------------------------------------------
# Pure-JAX reference (PyTorch semantics, including the conv biases).
# ---------------------------------------------------------------------------
def ref_forward(params, x_nchw, *, stride, conv_shortcut):
    x = jnp.transpose(x_nchw, (0, 2, 3, 1))

    def conv(x, w, b, s, pad):
        y = jax.lax.conv_general_dilated(
            x, w, window_strides=(s, s), padding=[(pad, pad), (pad, pad)],
            dimension_numbers=("NHWC", "HWIO", "NHWC"),
            precision=jax.lax.Precision.HIGHEST)
        return y + b

    def bn(y, g, b):
        m = jnp.mean(y, axis=(0, 1, 2), keepdims=True)
        v = jnp.mean((y - m) ** 2, axis=(0, 1, 2), keepdims=True)
        return (y - m) / jnp.sqrt(v + EPS) * g + b

    y1 = conv(x, params["w1"], params["b1"], stride, 1)
    z1 = bn(y1, params["g1"], params["be1"])
    a1 = jnp.where(z1 >= 0, z1, params["alpha"] * z1)
    y2 = conv(a1, params["w2"], params["b2"], 1, 1)
    z2 = bn(y2, params["g2"], params["be2"])
    if conv_shortcut:
        ys = conv(x, params["ws"], params["bs"], stride, 0)
        zs = bn(ys, params["gs"], params["bes"])
    else:
        zs = x
    return jnp.transpose(jnp.maximum(z2 + zs, 0.0), (0, 3, 1, 2))


if __name__ == "__main__":
    k0, k1, k2, k3 = jax.random.split(jax.random.PRNGKey(0), 4)

    # Case A: projection shortcut (Cin != Cout), stride 1, f32 compute.
    N, Cin, H, W, Cout, stride = 2, 4, 16, 16, 8, 1
    conv_shortcut = (stride != 1 or Cin != Cout)
    x = jax.random.normal(k0, (N, Cin, H, W), jnp.float32)          # PyTorch NCHW input
    params = init_residual_block(k1, Cin, Cout, stride)
    fwd = jax.jit(functools.partial(residual_block_forward, stride=stride,
                                    conv_shortcut=conv_shortcut))
    out = jax.block_until_ready(fwd(params, x))
    ref = ref_forward(params, x, stride=stride, conv_shortcut=conv_shortcut)
    assert out.shape == (N, Cout, H // stride, W // stride)
    assert jnp.allclose(out, ref, atol=1e-3, rtol=1e-3), "case A mismatch vs reference"

    # Case B: identity shortcut (Cin == Cout, stride 1), f32 compute.
    Cb = 8
    xb = jax.random.normal(k2, (N, Cb, H, W), jnp.float32)
    params_b = init_residual_block(k3, Cb, Cb, 1)
    fwd_b = jax.jit(functools.partial(residual_block_forward, stride=1,
                                      conv_shortcut=False))
    out_b = jax.block_until_ready(fwd_b(params_b, xb))
    ref_b = ref_forward(params_b, xb, stride=1, conv_shortcut=False)
    assert out_b.shape == (N, Cb, H, W)
    assert jnp.allclose(out_b, ref_b, atol=1e-3, rtol=1e-3), "case B mismatch vs reference"

    # Case C: bf16 MXU operands + bf16 conv intermediates (loose tolerance vs f32 ref).
    fwd_bf16 = jax.jit(functools.partial(residual_block_forward, stride=stride,
                                         conv_shortcut=conv_shortcut,
                                         compute_dtype=jnp.bfloat16))
    out_bf16 = jax.block_until_ready(fwd_bf16(params, x))
    assert jnp.allclose(out_bf16, ref, atol=2e-1, rtol=1e-1), "case C (bf16) mismatch"

    print("KERNEL_OK")
</pallas_src>

<mosaic_0001>
module attributes {stable_mosaic.version = 11 : i64} {
  func.func @_bn_add_relu_kernel(%arg0: i32, %arg1: memref<1x16x16x128xf32, #tpu.memory_space<vmem>>, %arg2: memref<1x1x128xf32, #tpu.memory_space<vmem>>, %arg3: memref<1x1x128xf32, #tpu.memory_space<vmem>>, %arg4: memref<1x16x16x128xf32, #tpu.memory_space<vmem>>, %arg5: memref<1x1x128xf32, #tpu.memory_space<vmem>>, %arg6: memref<1x1x128xf32, #tpu.memory_space<vmem>>, %arg7: memref<1x16x16x128xf32, #tpu.memory_space<vmem>>) attributes {dimension_semantics = [#tpu.dimension_semantics<parallel>], iteration_bounds = array<i64: 2>, scalar_prefetch = 0 : i64, scratch_operands = 0 : i64, tpu.core_type = #tpu.core_type<tc>, window_params = [{transform_indices = @transform_0, window_bounds = array<i64: 1, 16, 16, 128>}, {pipeline_mode = #tpu.pipeline_mode<synchronous>, transform_indices = @transform_1, window_bounds = array<i64: 1, 1, 128>}, {pipeline_mode = #tpu.pipeline_mode<synchronous>, transform_indices = @transform_2, window_bounds = array<i64: 1, 1, 128>}, {transform_indices = @transform_3, window_bounds = array<i64: 1, 16, 16, 128>}, {pipeline_mode = #tpu.pipeline_mode<synchronous>, transform_indices = @transform_4, window_bounds = array<i64: 1, 1, 128>}, {pipeline_mode = #tpu.pipeline_mode<synchronous>, transform_indices = @transform_5, window_bounds = array<i64: 1, 1, 128>}, {transform_indices = @transform_6, window_bounds = array<i64: 1, 16, 16, 128>}]} {
    %c0 = arith.constant 0 : index
    %c0_0 = arith.constant 0 : index
    %c0_1 = arith.constant 0 : index
    %c0_2 = arith.constant 0 : index
    %0 = vector.load %arg1[%c0, %c0_0, %c0_1, %c0_2] : memref<1x16x16x128xf32, #tpu.memory_space<vmem>>, vector<1x16x16x128xf32>
    %1 = vector.shape_cast %0 : vector<1x16x16x128xf32> to vector<16x16x128xf32>
    %c0_3 = arith.constant 0 : index
    %c0_4 = arith.constant 0 : index
    %c0_5 = arith.constant 0 : index
    %2 = vector.load %arg2[%c0_3, %c0_4, %c0_5] : memref<1x1x128xf32, #tpu.memory_space<vmem>>, vector<1x1x128xf32>
    %3 = vector.shape_cast %2 : vector<1x1x128xf32> to vector<1x128xf32>
    %4 = vector.shape_cast %3 : vector<1x128xf32> to vector<1x1x128xf32>
    %5 = vector.broadcast %4 : vector<1x1x128xf32> to vector<16x16x128xf32>
    %6 = arith.mulf %1, %5 : vector<16x16x128xf32>
    %c0_6 = arith.constant 0 : index
    %c0_7 = arith.constant 0 : index
    %c0_8 = arith.constant 0 : index
    %7 = vector.load %arg3[%c0_6, %c0_7, %c0_8] : memref<1x1x128xf32, #tpu.memory_space<vmem>>, vector<1x1x128xf32>
    %8 = vector.shape_cast %7 : vector<1x1x128xf32> to vector<1x128xf32>
    %9 = vector.shape_cast %8 : vector<1x128xf32> to vector<1x1x128xf32>
    %10 = vector.broadcast %9 : vector<1x1x128xf32> to vector<16x16x128xf32>
    %11 = arith.addf %6, %10 : vector<16x16x128xf32>
    %c0_9 = arith.constant 0 : index
    %c0_10 = arith.constant 0 : index
    %c0_11 = arith.constant 0 : index
    %c0_12 = arith.constant 0 : index
    %12 = vector.load %arg4[%c0_9, %c0_10, %c0_11, %c0_12] : memref<1x16x16x128xf32, #tpu.memory_space<vmem>>, vector<1x16x16x128xf32>
    %13 = vector.shape_cast %12 : vector<1x16x16x128xf32> to vector<16x16x128xf32>
    %c0_13 = arith.constant 0 : index
    %c0_14 = arith.constant 0 : index
    %c0_15 = arith.constant 0 : index
    %14 = vector.load %arg5[%c0_13, %c0_14, %c0_15] : memref<1x1x128xf32, #tpu.memory_space<vmem>>, vector<1x1x128xf32>
    %15 = vector.shape_cast %14 : vector<1x1x128xf32> to vector<1x128xf32>
    %16 = vector.shape_cast %15 : vector<1x128xf32> to vector<1x1x128xf32>
    %17 = vector.broadcast %16 : vector<1x1x128xf32> to vector<16x16x128xf32>
    %18 = arith.mulf %13, %17 : vector<16x16x128xf32>
    %c0_16 = arith.constant 0 : index
    %c0_17 = arith.constant 0 : index
    %c0_18 = arith.constant 0 : index
    %19 = vector.load %arg6[%c0_16, %c0_17, %c0_18] : memref<1x1x128xf32, #tpu.memory_space<vmem>>, vector<1x1x128xf32>
    %20 = vector.shape_cast %19 : vector<1x1x128xf32> to vector<1x128xf32>
    %21 = vector.shape_cast %20 : vector<1x128xf32> to vector<1x1x128xf32>
    %22 = vector.broadcast %21 : vector<1x1x128xf32> to vector<16x16x128xf32>
    %23 = arith.addf %18, %22 : vector<16x16x128xf32>
    %24 = arith.addf %11, %23 : vector<16x16x128xf32>
    %cst = arith.constant 0.000000e+00 : f32
    %25 = vector.broadcast %cst : f32 to vector<16x16x128xf32>
    %26 = arith.maximumf %24, %25 : vector<16x16x128xf32>
    %27 = vector.shape_cast %26 : vector<16x16x128xf32> to vector<1x16x16x128xf32>
    %c0_19 = arith.constant 0 : index
    %c0_20 = arith.constant 0 : index
    %c0_21 = arith.constant 0 : index
    %c0_22 = arith.constant 0 : index
    %28 = vector.load %arg7[%c0_19, %c0_20, %c0_21, %c0_22] : memref<1x16x16x128xf32, #tpu.memory_space<vmem>>, vector<1x16x16x128xf32>
    tpu.vector_store %arg7[%c0_19, %c0_20, %c0_21, %c0_22], %27 {strides = array<i32>} : memref<1x16x16x128xf32, #tpu.memory_space<vmem>>, vector<1x16x16x128xf32>,
    return
  }
  func.func @transform_0(%arg0: i32) -> (i32, i32, i32, i32) {
    %c0_i32 = arith.constant 0 : i32
    %c0_i32_0 = arith.constant 0 : i32
    %c0_i32_1 = arith.constant 0 : i32
    %c0_i32_2 = arith.constant 0 : i32
    return %arg0, %c0_i32, %c0_i32_0, %c0_i32_1 : i32, i32, i32, i32
  }
  func.func @transform_1(%arg0: i32) -> (i32, i32, i32) {
    %c0_i32 = arith.constant 0 : i32
    %c0_i32_0 = arith.constant 0 : i32
    %c0_i32_1 = arith.constant 0 : i32
    %c0_i32_2 = arith.constant 0 : i32
    return %c0_i32, %c0_i32_0, %c0_i32_1 : i32, i32, i32
  }
  func.func @transform_2(%arg0: i32) -> (i32, i32, i32) {
    %c0_i32 = arith.constant 0 : i32
    %c0_i32_0 = arith.constant 0 : i32
    %c0_i32_1 = arith.constant 0 : i32
    %c0_i32_2 = arith.constant 0 : i32
    return %c0_i32, %c0_i32_0, %c0_i32_1 : i32, i32, i32
  }
  func.func @transform_3(%arg0: i32) -> (i32, i32, i32, i32) {
    %c0_i32 = arith.constant 0 : i32
    %c0_i32_0 = arith.constant 0 : i32
    %c0_i32_1 = arith.constant 0 : i32
    %c0_i32_2 = arith.constant 0 : i32
    return %arg0, %c0_i32, %c0_i32_0, %c0_i32_1 : i32, i32, i32, i32
  }
  func.func @transform_4(%arg0: i32) -> (i32, i32, i32) {
    %c0_i32 = arith.constant 0 : i32
    %c0_i32_0 = arith.constant 0 : i32
    %c0_i32_1 = arith.constant 0 : i32
    %c0_i32_2 = arith.constant 0 : i32
    return %c0_i32, %c0_i32_0, %c0_i32_1 : i32, i32, i32
  }
  func.func @transform_5(%arg0: i32) -> (i32, i32, i32) {
    %c0_i32 = arith.constant 0 : i32
    %c0_i32_0 = arith.constant 0 : i32
    %c0_i32_1 = arith.constant 0 : i32
    %c0_i32_2 = arith.constant 0 : i32
    return %c0_i32, %c0_i32_0, %c0_i32_1 : i32, i32, i32
  }
  func.func @transform_6(%arg0: i32) -> (i32, i32, i32, i32) {
    %c0_i32 = arith.constant 0 : i32
    %c0_i32_0 = arith.constant 0 : i32
    %c0_i32_1 = arith.constant 0 : i32
    %c0_i32_2 = arith.constant 0 : i32
    return %arg0, %c0_i32, %c0_i32_0, %c0_i32_1 : i32, i32, i32, i32
  }
}

module attributes {stable_mosaic.version = 11 : i64} {
  func.func @_conv_bn_stats_kernel(%arg0: i32, %arg1: memref<1x16x16x128xf32, #tpu.memory_space<vmem>>, %arg2: memref<9x128x128xf32, #tpu.memory_space<vmem>>, %arg3: memref<1x1x128xf32, #tpu.memory_space<vmem>>, %arg4: memref<1x1x128xf32, #tpu.memory_space<vmem>>, %arg5: memref<1x1xf32, #tpu.memory_space<smem>>, %arg6: memref<1x16x16x128xf32, #tpu.memory_space<vmem>>, %arg7: memref<1x1x128xf32, #tpu.memory_space<vmem>>, %arg8: memref<1x1x128xf32, #tpu.memory_space<vmem>>, %arg9: memref<18x18x128xf32, #tpu.memory_space<vmem>>) attributes {dimension_semantics = [#tpu.dimension_semantics<parallel>], iteration_bounds = array<i64: 2>, scalar_prefetch = 0 : i64, scratch_operands = 1 : i64, tpu.core_type = #tpu.core_type<tc>, window_params = [{transform_indices = @transform_0, window_bounds = array<i64: 1, 16, 16, 128>}, {pipeline_mode = #tpu.pipeline_mode<synchronous>, transform_indices = @transform_1, window_bounds = array<i64: 9, 128, 128>}, {pipeline_mode = #tpu.pipeline_mode<synchronous>, transform_indices = @transform_2, window_bounds = array<i64: 1, 1, 128>}, {pipeline_mode = #tpu.pipeline_mode<synchronous>, transform_indices = @transform_3, window_bounds = array<i64: 1, 1, 128>}, {transform_indices = @transform_4, window_bounds = array<i64: 1, 1>}, {transform_indices = @transform_5, window_bounds = array<i64: 1, 16, 16, 128>}, {transform_indices = @transform_6, window_bounds = array<i64: 1, 1, 128>}, {transform_indices = @transform_7, window_bounds = array<i64: 1, 1, 128>}]} {
    %c0 = arith.constant 0 : index
    %c0_0 = arith.constant 0 : index
    %0 = memref.load %arg5[%c0, %c0_0] : memref<1x1xf32, #tpu.memory_space<smem>>
    %c0_1 = arith.constant 0 : index
    %c0_2 = arith.constant 0 : index
    %c0_3 = arith.constant 0 : index
    %c0_4 = arith.constant 0 : index
    %1 = vector.load %arg1[%c0_1, %c0_2, %c0_3, %c0_4] : memref<1x16x16x128xf32, #tpu.memory_space<vmem>>, vector<1x16x16x128xf32>
    %2 = vector.shape_cast %1 : vector<1x16x16x128xf32> to vector<16x16x128xf32>
    %c0_5 = arith.constant 0 : index
    %c0_6 = arith.constant 0 : index
    %c0_7 = arith.constant 0 : index
    %3 = vector.load %arg3[%c0_5, %c0_6, %c0_7] : memref<1x1x128xf32, #tpu.memory_space<vmem>>, vector<1x1x128xf32>
    %4 = vector.shape_cast %3 : vector<1x1x128xf32> to vector<1x128xf32>
    %5 = vector.shape_cast %4 : vector<1x128xf32> to vector<1x1x128xf32>
    %6 = vector.broadcast %5 : vector<1x1x128xf32> to vector<16x16x128xf32>
    %7 = arith.mulf %2, %6 : vector<16x16x128xf32>
    %c0_8 = arith.constant 0 : index
    %c0_9 = arith.constant 0 : index
    %c0_10 = arith.constant 0 : index
    %8 = vector.load %arg4[%c0_8, %c0_9, %c0_10] : memref<1x1x128xf32, #tpu.memory_space<vmem>>, vector<1x1x128xf32>
    %9 = vector.shape_cast %8 : vector<1x1x128xf32> to vector<1x128xf32>
    %10 = vector.shape_cast %9 : vector<1x128xf32> to vector<1x1x128xf32>
    %11 = vector.broadcast %10 : vector<1x1x128xf32> to vector<16x16x128xf32>
    %12 = arith.addf %7, %11 : vector<16x16x128xf32>
    %cst = arith.constant 0.000000e+00 : f32
    %13 = vector.broadcast %cst : f32 to vector<16x16x128xf32>
    %14 = arith.cmpf oge, %12, %13 : vector<16x16x128xf32>
    %15 = vector.broadcast %0 : f32 to vector<16x16x128xf32>
    %16 = arith.mulf %15, %12 : vector<16x16x128xf32>
    %17 = arith.select %14, %12, %16 : vector<16x16x128xi1>, vector<16x16x128xf32>
    %cst_11 = arith.constant 0.000000e+00 : f32
    %18 = vector.broadcast %cst_11 : f32 to vector<18x18x128xf32>
    %c0_12 = arith.constant 0 : index
    %c0_13 = arith.constant 0 : index
    %c0_14 = arith.constant 0 : index
    %19 = vector.load %arg9[%c0_12, %c0_13, %c0_14] : memref<18x18x128xf32, #tpu.memory_space<vmem>>, vector<18x18x128xf32>
    tpu.vector_store %arg9[%c0_12, %c0_13, %c0_14], %18 {strides = array<i32>} : memref<18x18x128xf32, #tpu.memory_space<vmem>>, vector<18x18x128xf32>,
    %c1 = arith.constant 1 : index
    %c1_15 = arith.constant 1 : index
    %c0_16 = arith.constant 0 : index
    %20 = vector.load %arg9[%c1, %c1_15, %c0_16] : memref<18x18x128xf32, #tpu.memory_space<vmem>>, vector<16x16x128xf32>
    tpu.vector_store %arg9[%c1, %c1_15, %c0_16], %17 {strides = array<i32>} : memref<18x18x128xf32, #tpu.memory_space<vmem>>, vector<16x16x128xf32>,
    %cst_17 = arith.constant 0.000000e+00 : f32
    %21 = vector.broadcast %cst_17 : f32 to vector<256x128xf32>
    %c0_18 = arith.constant 0 : index
    %c0_19 = arith.constant 0 : index
    %c0_20 = arith.constant 0 : index
    %22 = vector.load %arg9[%c0_18, %c0_19, %c0_20] : memref<18x18x128xf32, #tpu.memory_space<vmem>>, vector<16x16x128xf32>
    %23 = vector.shape_cast %22 : vector<16x16x128xf32> to vector<256x128xf32>
    %c0_21 = arith.constant 0 : index
    %c0_22 = arith.constant 0 : index
    %c0_23 = arith.constant 0 : index
    %24 = vector.load %arg2[%c0_21, %c0_22, %c0_23] : memref<9x128x128xf32, #tpu.memory_space<vmem>>, vector<1x128x128xf32>
    %25 = vector.shape_cast %24 : vector<1x128x128xf32> to vector<128x128xf32>
    %cst_24 = arith.constant dense<0.000000e+00> : vector<256x128xf32>
    %26 = tpu.matmul %23, %25, %cst_24 {dimension_numbers = #tpu.dot_dimension_numbers<[1], [0], [0], [1], [0, 0, 1, 1], [], []>} : vector<256x128xf32>, vector<128x128xf32>, vector<256x128xf32> -> vector<256x128xf32>
    %27 = arith.addf %21, %26 : vector<256x128xf32>
    %c0_25 = arith.constant 0 : index
    %c1_26 = arith.constant 1 : index
    %c0_27 = arith.constant 0 : index
    %28 = vector.load %arg9[%c0_25, %c1_26, %c0_27] : memref<18x18x128xf32, #tpu.memory_space<vmem>>, vector<16x16x128xf32>
    %29 = vector.shape_cast %28 : vector<16x16x128xf32> to vector<256x128xf32>
    %c1_28 = arith.constant 1 : index
    %c0_29 = arith.constant 0 : index
    %c0_30 = arith.constant 0 : index
    %30 = vector.load %arg2[%c1_28, %c0_29, %c0_30] : memref<9x128x128xf32, #tpu.memory_space<vmem>>, vector<1x128x128xf32>
    %31 = vector.shape_cast %30 : vector<1x128x128xf32> to vector<128x128xf32>
    %cst_31 = arith.constant dense<0.000000e+00> : vector<256x128xf32>
    %32 = tpu.matmul %29, %31, %cst_31 {dimension_numbers = #tpu.dot_dimension_numbers<[1], [0], [0], [1], [0, 0, 1, 1], [], []>} : vector<256x128xf32>, vector<128x128xf32>, vector<256x128xf32> -> vector<256x128xf32>
    %33 = arith.addf %27, %32 : vector<256x128xf32>
    %c0_32 = arith.constant 0 : index
    %c2 = arith.constant 2 : index
    %c0_33 = arith.constant 0 : index
    %34 = vector.load %arg9[%c0_32, %c2, %c0_33] : memref<18x18x128xf32, #tpu.memory_space<vmem>>, vector<16x16x128xf32>
    %35 = vector.shape_cast %34 : vector<16x16x128xf32> to vector<256x128xf32>
    %c2_34 = arith.constant 2 : index
    %c0_35 = arith.constant 0 : index
    %c0_36 = arith.constant 0 : index
    %36 = vector.load %arg2[%c2_34, %c0_35, %c0_36] : memref<9x128x128xf32, #tpu.memory_space<vmem>>, vector<1x128x128xf32>
    %37 = vector.shape_cast %36 : vector<1x128x128xf32> to vector<128x128xf32>
    %cst_37 = arith.constant dense<0.000000e+00> : vector<256x128xf32>
    %38 = tpu.matmul %35, %37, %cst_37 {dimension_numbers = #tpu.dot_dimension_numbers<[1], [0], [0], [1], [0, 0, 1, 1], [], []>} : vector<256x128xf32>, vector<128x128xf32>, vector<256x128xf32> -> vector<256x128xf32>
    %39 = arith.addf %33, %38 : vector<256x128xf32>
    %c1_38 = arith.constant 1 : index
    %c0_39 = arith.constant 0 : index
    %c0_40 = arith.constant 0 : index
    %40 = vector.load %arg9[%c1_38, %c0_39, %c0_40] : memref<18x18x128xf32, #tpu.memory_space<vmem>>, vector<16x16x128xf32>
    %41 = vector.shape_cast %40 : vector<16x16x128xf32> to vector<256x128xf32>
    %c3 = arith.constant 3 : index
    %c0_41 = arith.constant 0 : index
    %c0_42 = arith.constant 0 : index
    %42 = vector.load %arg2[%c3, %c0_41, %c0_42] : memref<9x128x128xf32, #tpu.memory_space<vmem>>, vector<1x128x128xf32>
    %43 = vector.shape_cast %42 : vector<1x128x128xf32> to vector<128x128xf32>
    %cst_43 = arith.constant dense<0.000000e+00> : vector<256x128xf32>
    %44 = tpu.matmul %41, %43, %cst_43 {dimension_numbers = #tpu.dot_dimension_numbers<[1], [0], [0], [1], [0, 0, 1, 1], [], []>} : vector<256x128xf32>, vector<128x128xf32>, vector<256x128xf32> -> vector<256x128xf32>
    %45 = arith.addf %39, %44 : vector<256x128xf32>
    %c1_44 = arith.constant 1 : index
    %c1_45 = arith.constant 1 : index
    %c0_46 = arith.constant 0 : index
    %46 = vector.load %arg9[%c1_44, %c1_45, %c0_46] : memref<18x18x128xf32, #tpu.memory_space<vmem>>, vector<16x16x128xf32>
    %47 = vector.shape_cast %46 : vector<16x16x128xf32> to vector<256x128xf32>
    %c4 = arith.constant 4 : index
    %c0_47 = arith.constant 0 : index
    %c0_48 = arith.constant 0 : index
    %48 = vector.load %arg2[%c4, %c0_47, %c0_48] : memref<9x128x128xf32, #tpu.memory_space<vmem>>, vector<1x128x128xf32>
    %49 = vector.shape_cast %48 : vector<1x128x128xf32> to vector<128x128xf32>
    %cst_49 = arith.constant dense<0.000000e+00> : vector<256x128xf32>
    %50 = tpu.matmul %47, %49, %cst_49 {dimension_numbers = #tpu.dot_dimension_numbers<[1], [0], [0], [1], [0, 0, 1, 1], [], []>} : vector<256x128xf32>, vector<128x128xf32>, vector<256x128xf32> -> vector<256x128xf32>
    %51 = arith.addf %45, %50 : vector<256x128xf32>
    %c1_50 = arith.constant 1 : index
    %c2_51 = arith.constant 2 : index
    %c0_52 = arith.constant 0 : index
    %52 = vector.load %arg9[%c1_50, %c2_51, %c0_52] : memref<18x18x128xf32, #tpu.memory_space<vmem>>, vector<16x16x128xf32>
    %53 = vector.shape_cast %52 : vector<16x16x128xf32> to vector<256x128xf32>
    %c5 = arith.constant 5 : index
    %c0_53 = arith.constant 0 : index
    %c0_54 = arith.constant 0 : index
    %54 = vector.load %arg2[%c5, %c0_53, %c0_54] : memref<9x128x128xf32, #tpu.memory_space<vmem>>, vector<1x128x128xf32>
    %55 = vector.shape_cast %54 : vector<1x128x128xf32> to vector<128x128xf32>
    %cst_55 = arith.constant dense<0.000000e+00> : vector<256x128xf32>
    %56 = tpu.matmul %53, %55, %cst_55 {dimension_numbers = #tpu.dot_dimension_numbers<[1], [0], [0], [1], [0, 0, 1, 1], [], []>} : vector<256x128xf32>, vector<128x128xf32>, vector<256x128xf32> -> vector<256x128xf32>
    %57 = arith.addf %51, %56 : vector<256x128xf32>
    %c2_56 = arith.constant 2 : index
    %c0_57 = arith.constant 0 : index
    %c0_58 = arith.constant 0 : index
    %58 = vector.load %arg9[%c2_56, %c0_57, %c0_58] : memref<18x18x128xf32, #tpu.memory_space<vmem>>, vector<16x16x128xf32>
    %59 = vector.shape_cast %58 : vector<16x16x128xf32> to vector<256x128xf32>
    %c6 = arith.constant 6 : index
    %c0_59 = arith.constant 0 : index
    %c0_60 = arith.constant 0 : index
    %60 = vector.load %arg2[%c6, %c0_59, %c0_60] : memref<9x128x128xf32, #tpu.memory_space<vmem>>, vector<1x128x128xf32>
    %61 = vector.shape_cast %60 : vector<1x128x128xf32> to vector<128x128xf32>
    %cst_61 = arith.constant dense<0.000000e+00> : vector<256x128xf32>
    %62 = tpu.matmul %59, %61, %cst_61 {dimension_numbers = #tpu.dot_dimension_numbers<[1], [0], [0], [1], [0, 0, 1, 1], [], []>} : vector<256x128xf32>, vector<128x128xf32>, vector<256x128xf32> -> vector<256x128xf32>
    %63 = arith.addf %57, %62 : vector<256x128xf32>
    %c2_62 = arith.constant 2 : index
    %c1_63 = arith.constant 1 : index
    %c0_64 = arith.constant 0 : index
    %64 = vector.load %arg9[%c2_62, %c1_63, %c0_64] : memref<18x18x128xf32, #tpu.memory_space<vmem>>, vector<16x16x128xf32>
    %65 = vector.shape_cast %64 : vector<16x16x128xf32> to vector<256x128xf32>
    %c7 = arith.constant 7 : index
    %c0_65 = arith.constant 0 : index
    %c0_66 = arith.constant 0 : index
    %66 = vector.load %arg2[%c7, %c0_65, %c0_66] : memref<9x128x128xf32, #tpu.memory_space<vmem>>, vector<1x128x128xf32>
    %67 = vector.shape_cast %66 : vector<1x128x128xf32> to vector<128x128xf32>
    %cst_67 = arith.constant dense<0.000000e+00> : vector<256x128xf32>
    %68 = tpu.matmul %65, %67, %cst_67 {dimension_numbers = #tpu.dot_dimension_numbers<[1], [0], [0], [1], [0, 0, 1, 1], [], []>} : vector<256x128xf32>, vector<128x128xf32>, vector<256x128xf32> -> vector<256x128xf32>
    %69 = arith.addf %63, %68 : vector<256x128xf32>
    %c2_68 = arith.constant 2 : index
    %c2_69 = arith.constant 2 : index
    %c0_70 = arith.constant 0 : index
    %70 = vector.load %arg9[%c2_68, %c2_69, %c0_70] : memref<18x18x128xf32, #tpu.memory_space<vmem>>, vector<16x16x128xf32>
    %71 = vector.shape_cast %70 : vector<16x16x128xf32> to vector<256x128xf32>
    %c8 = arith.constant 8 : index
    %c0_71 = arith.constant 0 : index
    %c0_72 = arith.constant 0 : index
    %72 = vector.load %arg2[%c8, %c0_71, %c0_72] : memref<9x128x128xf32, #tpu.memory_space<vmem>>, vector<1x128x128xf32>
    %73 = vector.shape_cast %72 : vector<1x128x128xf32> to vector<128x128xf32>
    %cst_73 = arith.constant dense<0.000000e+00> : vector<256x128xf32>
    %74 = tpu.matmul %71, %73, %cst_73 {dimension_numbers = #tpu.dot_dimension_numbers<[1], [0], [0], [1], [0, 0, 1, 1], [], []>} : vector<256x128xf32>, vector<128x128xf32>, vector<256x128xf32> -> vector<256x128xf32>
    %75 = arith.addf %69, %74 : vector<256x128xf32>
    %76 = vector.shape_cast %75 : vector<256x128xf32> to vector<1x16x16x128xf32>
    %c0_74 = arith.constant 0 : index
    %c0_75 = arith.constant 0 : index
    %c0_76 = arith.constant 0 : index
    %c0_77 = arith.constant 0 : index
    %77 = vector.load %arg6[%c0_74, %c0_75, %c0_76, %c0_77] : memref<1x16x16x128xf32, #tpu.memory_space<vmem>>, vector<1x16x16x128xf32>
    tpu.vector_store %arg6[%c0_74, %c0_75, %c0_76, %c0_77], %76 {strides = array<i32>} : memref<1x16x16x128xf32, #tpu.memory_space<vmem>>, vector<1x16x16x128xf32>,
    %cst_78 = arith.constant dense<0.000000e+00> : vector<128xf32>
    %78 = vector.multi_reduction <add>, %75, %cst_78 [0] : vector<256x128xf32> to vector<128xf32>
    %79 = vector.shape_cast %78 : vector<128xf32> to vector<1x1x128xf32>
    %c0_79 = arith.constant 0 : index
    %c0_80 = arith.constant 0 : index
    %c0_81 = arith.constant 0 : index
    %80 = vector.load %arg7[%c0_79, %c0_80, %c0_81] : memref<1x1x128xf32, #tpu.memory_space<vmem>>, vector<1x1x128xf32>
    tpu.vector_store %arg7[%c0_79, %c0_80, %c0_81], %79 {strides = array<i32>} : memref<1x1x128xf32, #tpu.memory_space<vmem>>, vector<1x1x128xf32>,
    %81 = arith.mulf %75, %75 : vector<256x128xf32>
    %cst_82 = arith.constant dense<0.000000e+00> : vector<128xf32>
    %82 = vector.multi_reduction <add>, %81, %cst_82 [0] : vector<256x128xf32> to vector<128xf32>
    %83 = vector.shape_cast %82 : vector<128xf32> to vector<1x1x128xf32>
    %c0_83 = arith.constant 0 : index
    %c0_84 = arith.constant 0 : index
    %c0_85 = arith.constant 0 : index
    %84 = vector.load %arg8[%c0_83, %c0_84, %c0_85] : memref<1x1x128xf32, #tpu.memory_space<vmem>>, vector<1x1x128xf32>
    tpu.vector_store %arg8[%c0_83, %c0_84, %c0_85], %83 {strides = array<i32>} : memref<1x1x128xf32, #tpu.memory_space<vmem>>, vector<1x1x128xf32>,
    return
  }
  func.func @transform_0(%arg0: i32) -> (i32, i32, i32, i32) {
    %c0_i32 = arith.constant 0 : i32
    %c0_i32_0 = arith.constant 0 : i32
    %c0_i32_1 = arith.constant 0 : i32
    %c0_i32_2 = arith.constant 0 : i32
    return %arg0, %c0_i32, %c0_i32_0, %c0_i32_1 : i32, i32, i32, i32
  }
  func.func @transform_1(%arg0: i32) -> (i32, i32, i32) {
    %c0_i32 = arith.constant 0 : i32
    %c0_i32_0 = arith.constant 0 : i32
    %c0_i32_1 = arith.constant 0 : i32
    %c0_i32_2 = arith.constant 0 : i32
    return %c0_i32, %c0_i32_0, %c0_i32_1 : i32, i32, i32
  }
  func.func @transform_2(%arg0: i32) -> (i32, i32, i32) {
    %c0_i32 = arith.constant 0 : i32
    %c0_i32_0 = arith.constant 0 : i32
    %c0_i32_1 = arith.constant 0 : i32
    %c0_i32_2 = arith.constant 0 : i32
    return %c0_i32, %c0_i32_0, %c0_i32_1 : i32, i32, i32
  }
  func.func @transform_3(%arg0: i32) -> (i32, i32, i32) {
    %c0_i32 = arith.constant 0 : i32
    %c0_i32_0 = arith.constant 0 : i32
    %c0_i32_1 = arith.constant 0 : i32
    %c0_i32_2 = arith.constant 0 : i32
    return %c0_i32, %c0_i32_0, %c0_i32_1 : i32, i32, i32
  }
  func.func @transform_4(%arg0: i32) -> (i32, i32) {
    %c0_i32 = arith.constant 0 : i32
    %c0_i32_0 = arith.constant 0 : i32
    %c0_i32_1 = arith.constant 0 : i32
    return %c0_i32, %c0_i32_0 : i32, i32
  }
  func.func @transform_5(%arg0: i32) -> (i32, i32, i32, i32) {
    %c0_i32 = arith.constant 0 : i32
    %c0_i32_0 = arith.constant 0 : i32
    %c0_i32_1 = arith.constant 0 : i32
    %c0_i32_2 = arith.constant 0 : i32
    return %arg0, %c0_i32, %c0_i32_0, %c0_i32_1 : i32, i32, i32, i32
  }
  func.func @transform_6(%arg0: i32) -> (i32, i32, i32) {
    %c0_i32 = arith.constant 0 : i32
    %c0_i32_0 = arith.constant 0 : i32
    %c0_i32_1 = arith.constant 0 : i32
    return %arg0, %c0_i32, %c0_i32_0 : i32, i32, i32
  }
  func.func @transform_7(%arg0: i32) -> (i32, i32, i32) {
    %c0_i32 = arith.constant 0 : i32
    %c0_i32_0 = arith.constant 0 : i32
    %c0_i32_1 = arith.constant 0 : i32
    return %arg0, %c0_i32, %c0_i32_0 : i32, i32, i32
  }
}

module attributes {stable_mosaic.version = 11 : i64} {
  func.func @_conv_bn_stats_kernel(%arg0: i32, %arg1: memref<1x16x16x128xf32, #tpu.memory_space<vmem>>, %arg2: memref<9x128x128xf32, #tpu.memory_space<vmem>>, %arg3: memref<1x1x128xf32, #tpu.memory_space<vmem>>, %arg4: memref<1x1x128xf32, #tpu.memory_space<vmem>>, %arg5: memref<1x1xf32, #tpu.memory_space<smem>>, %arg6: memref<1x16x16x128xf32, #tpu.memory_space<vmem>>, %arg7: memref<128x128xf32, #tpu.memory_space<vmem>>, %arg8: memref<1x16x16x128xf32, #tpu.memory_space<vmem>>, %arg9: memref<1x1x128xf32, #tpu.memory_space<vmem>>, %arg10: memref<1x1x128xf32, #tpu.memory_space<vmem>>, %arg11: memref<1x16x16x128xf32, #tpu.memory_space<vmem>>, %arg12: memref<1x1x128xf32, #tpu.memory_space<vmem>>, %arg13: memref<1x1x128xf32, #tpu.memory_space<vmem>>, %arg14: memref<18x18x128xf32, #tpu.memory_space<vmem>>) attributes {dimension_semantics = [#tpu.dimension_semantics<parallel>], iteration_bounds = array<i64: 2>, scalar_prefetch = 0 : i64, scratch_operands = 1 : i64, tpu.core_type = #tpu.core_type<tc>, window_params = [{transform_indices = @transform_0, window_bounds = array<i64: 1, 16, 16, 128>}, {pipeline_mode = #tpu.pipeline_mode<synchronous>, transform_indices = @transform_1, window_bounds = array<i64: 9, 128, 128>}, {pipeline_mode = #tpu.pipeline_mode<synchronous>, transform_indices = @transform_2, window_bounds = array<i64: 1, 1, 128>}, {pipeline_mode = #tpu.pipeline_mode<synchronous>, transform_indices = @transform_3, window_bounds = array<i64: 1, 1, 128>}, {transform_indices = @transform_4, window_bounds = array<i64: 1, 1>}, {transform_indices = @transform_5, window_bounds = array<i64: 1, 16, 16, 128>}, {pipeline_mode = #tpu.pipeline_mode<synchronous>, transform_indices = @transform_6, window_bounds = array<i64: 128, 128>}, {transform_indices = @transform_7, window_bounds = array<i64: 1, 16, 16, 128>}, {transform_indices = @transform_8, window_bounds = array<i64: 1, 1, 128>}, {transform_indices = @transform_9, window_bounds = array<i64: 1, 1, 128>}, {transform_indices = @transform_10, window_bounds = array<i64: 1, 16, 16, 128>}, {transform_indices = @transform_11, window_bounds = array<i64: 1, 1, 128>}, {transform_indices = @transform_12, window_bounds = array<i64: 1, 1, 128>}]} {
    %c0 = arith.constant 0 : index
    %c0_0 = arith.constant 0 : index
    %0 = memref.load %arg5[%c0, %c0_0] : memref<1x1xf32, #tpu.memory_space<smem>>
    %c0_1 = arith.constant 0 : index
    %c0_2 = arith.constant 0 : index
    %c0_3 = arith.constant 0 : index
    %c0_4 = arith.constant 0 : index
    %1 = vector.load %arg1[%c0_1, %c0_2, %c0_3, %c0_4] : memref<1x16x16x128xf32, #tpu.memory_space<vmem>>, vector<1x16x16x128xf32>
    %2 = vector.shape_cast %1 : vector<1x16x16x128xf32> to vector<16x16x128xf32>
    %c0_5 = arith.constant 0 : index
    %c0_6 = arith.constant 0 : index
    %c0_7 = arith.constant 0 : index
    %3 = vector.load %arg3[%c0_5, %c0_6, %c0_7] : memref<1x1x128xf32, #tpu.memory_space<vmem>>, vector<1x1x128xf32>
    %4 = vector.shape_cast %3 : vector<1x1x128xf32> to vector<1x128xf32>
    %5 = vector.shape_cast %4 : vector<1x128xf32> to vector<1x1x128xf32>
    %6 = vector.broadcast %5 : vector<1x1x128xf32> to vector<16x16x128xf32>
    %7 = arith.mulf %2, %6 : vector<16x16x128xf32>
    %c0_8 = arith.constant 0 : index
    %c0_9 = arith.constant 0 : index
    %c0_10 = arith.constant 0 : index
    %8 = vector.load %arg4[%c0_8, %c0_9, %c0_10] : memref<1x1x128xf32, #tpu.memory_space<vmem>>, vector<1x1x128xf32>
    %9 = vector.shape_cast %8 : vector<1x1x128xf32> to vector<1x128xf32>
    %10 = vector.shape_cast %9 : vector<1x128xf32> to vector<1x1x128xf32>
    %11 = vector.broadcast %10 : vector<1x1x128xf32> to vector<16x16x128xf32>
    %12 = arith.addf %7, %11 : vector<16x16x128xf32>
    %cst = arith.constant 0.000000e+00 : f32
    %13 = vector.broadcast %cst : f32 to vector<16x16x128xf32>
    %14 = arith.cmpf oge, %12, %13 : vector<16x16x128xf32>
    %15 = vector.broadcast %0 : f32 to vector<16x16x128xf32>
    %16 = arith.mulf %15, %12 : vector<16x16x128xf32>
    %17 = arith.select %14, %12, %16 : vector<16x16x128xi1>, vector<16x16x128xf32>
    %cst_11 = arith.constant 0.000000e+00 : f32
    %18 = vector.broadcast %cst_11 : f32 to vector<18x18x128xf32>
    %c0_12 = arith.constant 0 : index
    %c0_13 = arith.constant 0 : index
    %c0_14 = arith.constant 0 : index
    %19 = vector.load %arg14[%c0_12, %c0_13, %c0_14] : memref<18x18x128xf32, #tpu.memory_space<vmem>>, vector<18x18x128xf32>
    tpu.vector_store %arg14[%c0_12, %c0_13, %c0_14], %18 {strides = array<i32>} : memref<18x18x128xf32, #tpu.memory_space<vmem>>, vector<18x18x128xf32>,
    %c1 = arith.constant 1 : index
    %c1_15 = arith.constant 1 : index
    %c0_16 = arith.constant 0 : index
    %20 = vector.load %arg14[%c1, %c1_15, %c0_16] : memref<18x18x128xf32, #tpu.memory_space<vmem>>, vector<16x16x128xf32>
    tpu.vector_store %arg14[%c1, %c1_15, %c0_16], %17 {strides = array<i32>} : memref<18x18x128xf32, #tpu.memory_space<vmem>>, vector<16x16x128xf32>,
    %cst_17 = arith.constant 0.000000e+00 : f32
    %21 = vector.broadcast %cst_17 : f32 to vector<256x128xf32>
    %c0_18 = arith.constant 0 : index
    %c0_19 = arith.constant 0 : index
    %c0_20 = arith.constant 0 : index
    %22 = vector.load %arg14[%c0_18, %c0_19, %c0_20] : memref<18x18x128xf32, #tpu.memory_space<vmem>>, vector<16x16x128xf32>
    %23 = vector.shape_cast %22 : vector<16x16x128xf32> to vector<256x128xf32>
    %c0_21 = arith.constant 0 : index
    %c0_22 = arith.constant 0 : index
    %c0_23 = arith.constant 0 : index
    %24 = vector.load %arg2[%c0_21, %c0_22, %c0_23] : memref<9x128x128xf32, #tpu.memory_space<vmem>>, vector<1x128x128xf32>
    %25 = vector.shape_cast %24 : vector<1x128x128xf32> to vector<128x128xf32>
    %cst_24 = arith.constant dense<0.000000e+00> : vector<256x128xf32>
    %26 = tpu.matmul %23, %25, %cst_24 {dimension_numbers = #tpu.dot_dimension_numbers<[1], [0], [0], [1], [0, 0, 1, 1], [], []>} : vector<256x128xf32>, vector<128x128xf32>, vector<256x128xf32> -> vector<256x128xf32>
    %27 = arith.addf %21, %26 : vector<256x128xf32>
    %c0_25 = arith.constant 0 : index
    %c1_26 = arith.constant 1 : index
    %c0_27 = arith.constant 0 : index
    %28 = vector.load %arg14[%c0_25, %c1_26, %c0_27] : memref<18x18x128xf32, #tpu.memory_space<vmem>>, vector<16x16x128xf32>
    %29 = vector.shape_cast %28 : vector<16x16x128xf32> to vector<256x128xf32>
    %c1_28 = arith.constant 1 : index
    %c0_29 = arith.constant 0 : index
    %c0_30 = arith.constant 0 : index
    %30 = vector.load %arg2[%c1_28, %c0_29, %c0_30] : memref<9x128x128xf32, #tpu.memory_space<vmem>>, vector<1x128x128xf32>
    %31 = vector.shape_cast %30 : vector<1x128x128xf32> to vector<128x128xf32>
    %cst_31 = arith.constant dense<0.000000e+00> : vector<256x128xf32>
    %32 = tpu.matmul %29, %31, %cst_31 {dimension_numbers = #tpu.dot_dimension_numbers<[1], [0], [0], [1], [0, 0, 1, 1], [], []>} : vector<256x128xf32>, vector<128x128xf32>, vector<256x128xf32> -> vector<256x128xf32>
    %33 = arith.addf %27, %32 : vector<256x128xf32>
    %c0_32 = arith.constant 0 : index
    %c2 = arith.constant 2 : index
    %c0_33 = arith.constant 0 : index
    %34 = vector.load %arg14[%c0_32, %c2, %c0_33] : memref<18x18x128xf32, #tpu.memory_space<vmem>>, vector<16x16x128xf32>
    %35 = vector.shape_cast %34 : vector<16x16x128xf32> to vector<256x128xf32>
    %c2_34 = arith.constant 2 : index
    %c0_35 = arith.constant 0 : index
    %c0_36 = arith.constant 0 : index
    %36 = vector.load %arg2[%c2_34, %c0_35, %c0_36] : memref<9x128x128xf32, #tpu.memory_space<vmem>>, vector<1x128x128xf32>
    %37 = vector.shape_cast %36 : vector<1x128x128xf32> to vector<128x128xf32>
    %cst_37 = arith.constant dense<0.000000e+00> : vector<256x128xf32>
    %38 = tpu.matmul %35, %37, %cst_37 {dimension_numbers = #tpu.dot_dimension_numbers<[1], [0], [0], [1], [0, 0, 1, 1], [], []>} : vector<256x128xf32>, vector<128x128xf32>, vector<256x128xf32> -> vector<256x128xf32>
    %39 = arith.addf %33, %38 : vector<256x128xf32>
    %c1_38 = arith.constant 1 : index
    %c0_39 = arith.constant 0 : index
    %c0_40 = arith.constant 0 : index
    %40 = vector.load %arg14[%c1_38, %c0_39, %c0_40] : memref<18x18x128xf32, #tpu.memory_space<vmem>>, vector<16x16x128xf32>
    %41 = vector.shape_cast %40 : vector<16x16x128xf32> to vector<256x128xf32>
    %c3 = arith.constant 3 : index
    %c0_41 = arith.constant 0 : index
    %c0_42 = arith.constant 0 : index
    %42 = vector.load %arg2[%c3, %c0_41, %c0_42] : memref<9x128x128xf32, #tpu.memory_space<vmem>>, vector<1x128x128xf32>
    %43 = vector.shape_cast %42 : vector<1x128x128xf32> to vector<128x128xf32>
    %cst_43 = arith.constant dense<0.000000e+00> : vector<256x128xf32>
    %44 = tpu.matmul %41, %43, %cst_43 {dimension_numbers = #tpu.dot_dimension_numbers<[1], [0], [0], [1], [0, 0, 1, 1], [], []>} : vector<256x128xf32>, vector<128x128xf32>, vector<256x128xf32> -> vector<256x128xf32>
    %45 = arith.addf %39, %44 : vector<256x128xf32>
    %c1_44 = arith.constant 1 : index
    %c1_45 = arith.constant 1 : index
    %c0_46 = arith.constant 0 : index
    %46 = vector.load %arg14[%c1_44, %c1_45, %c0_46] : memref<18x18x128xf32, #tpu.memory_space<vmem>>, vector<16x16x128xf32>
    %47 = vector.shape_cast %46 : vector<16x16x128xf32> to vector<256x128xf32>
    %c4 = arith.constant 4 : index
    %c0_47 = arith.constant 0 : index
    %c0_48 = arith.constant 0 : index
    %48 = vector.load %arg2[%c4, %c0_47, %c0_48] : memref<9x128x128xf32, #tpu.memory_space<vmem>>, vector<1x128x128xf32>
    %49 = vector.shape_cast %48 : vector<1x128x128xf32> to vector<128x128xf32>
    %cst_49 = arith.constant dense<0.000000e+00> : vector<256x128xf32>
    %50 = tpu.matmul %47, %49, %cst_49 {dimension_numbers = #tpu.dot_dimension_numbers<[1], [0], [0], [1], [0, 0, 1, 1], [], []>} : vector<256x128xf32>, vector<128x128xf32>, vector<256x128xf32> -> vector<256x128xf32>
    %51 = arith.addf %45, %50 : vector<256x128xf32>
    %c1_50 = arith.constant 1 : index
    %c2_51 = arith.constant 2 : index
    %c0_52 = arith.constant 0 : index
    %52 = vector.load %arg14[%c1_50, %c2_51, %c0_52] : memref<18x18x128xf32, #tpu.memory_space<vmem>>, vector<16x16x128xf32>
    %53 = vector.shape_cast %52 : vector<16x16x128xf32> to vector<256x128xf32>
    %c5 = arith.constant 5 : index
    %c0_53 = arith.constant 0 : index
    %c0_54 = arith.constant 0 : index
    %54 = vector.load %arg2[%c5, %c0_53, %c0_54] : memref<9x128x128xf32, #tpu.memory_space<vmem>>, vector<1x128x128xf32>
    %55 = vector.shape_cast %54 : vector<1x128x128xf32> to vector<128x128xf32>
    %cst_55 = arith.constant dense<0.000000e+00> : vector<256x128xf32>
    %56 = tpu.matmul %53, %55, %cst_55 {dimension_numbers = #tpu.dot_dimension_numbers<[1], [0], [0], [1], [0, 0, 1, 1], [], []>} : vector<256x128xf32>, vector<128x128xf32>, vector<256x128xf32> -> vector<256x128xf32>
    %57 = arith.addf %51, %56 : vector<256x128xf32>
    %c2_56 = arith.constant 2 : index
    %c0_57 = arith.constant 0 : index
    %c0_58 = arith.constant 0 : index
    %58 = vector.load %arg14[%c2_56, %c0_57, %c0_58] : memref<18x18x128xf32, #tpu.memory_space<vmem>>, vector<16x16x128xf32>
    %59 = vector.shape_cast %58 : vector<16x16x128xf32> to vector<256x128xf32>
    %c6 = arith.constant 6 : index
    %c0_59 = arith.constant 0 : index
    %c0_60 = arith.constant 0 : index
    %60 = vector.load %arg2[%c6, %c0_59, %c0_60] : memref<9x128x128xf32, #tpu.memory_space<vmem>>, vector<1x128x128xf32>
    %61 = vector.shape_cast %60 : vector<1x128x128xf32> to vector<128x128xf32>
    %cst_61 = arith.constant dense<0.000000e+00> : vector<256x128xf32>
    %62 = tpu.matmul %59, %61, %cst_61 {dimension_numbers = #tpu.dot_dimension_numbers<[1], [0], [0], [1], [0, 0, 1, 1], [], []>} : vector<256x128xf32>, vector<128x128xf32>, vector<256x128xf32> -> vector<256x128xf32>
    %63 = arith.addf %57, %62 : vector<256x128xf32>
    %c2_62 = arith.constant 2 : index
    %c1_63 = arith.constant 1 : index
    %c0_64 = arith.constant 0 : index
    %64 = vector.load %arg14[%c2_62, %c1_63, %c0_64] : memref<18x18x128xf32, #tpu.memory_space<vmem>>, vector<16x16x128xf32>
    %65 = vector.shape_cast %64 : vector<16x16x128xf32> to vector<256x128xf32>
    %c7 = arith.constant 7 : index
    %c0_65 = arith.constant 0 : index
    %c0_66 = arith.constant 0 : index
    %66 = vector.load %arg2[%c7, %c0_65, %c0_66] : memref<9x128x128xf32, #tpu.memory_space<vmem>>, vector<1x128x128xf32>
    %67 = vector.shape_cast %66 : vector<1x128x128xf32> to vector<128x128xf32>
    %cst_67 = arith.constant dense<0.000000e+00> : vector<256x128xf32>
    %68 = tpu.matmul %65, %67, %cst_67 {dimension_numbers = #tpu.dot_dimension_numbers<[1], [0], [0], [1], [0, 0, 1, 1], [], []>} : vector<256x128xf32>, vector<128x128xf32>, vector<256x128xf32> -> vector<256x128xf32>
    %69 = arith.addf %63, %68 : vector<256x128xf32>
    %c2_68 = arith.constant 2 : index
    %c2_69 = arith.constant 2 : index
    %c0_70 = arith.constant 0 : index
    %70 = vector.load %arg14[%c2_68, %c2_69, %c0_70] : memref<18x18x128xf32, #tpu.memory_space<vmem>>, vector<16x16x128xf32>
    %71 = vector.shape_cast %70 : vector<16x16x128xf32> to vector<256x128xf32>
    %c8 = arith.constant 8 : index
    %c0_71 = arith.constant 0 : index
    %c0_72 = arith.constant 0 : index
    %72 = vector.load %arg2[%c8, %c0_71, %c0_72] : memref<9x128x128xf32, #tpu.memory_space<vmem>>, vector<1x128x128xf32>
    %73 = vector.shape_cast %72 : vector<1x128x128xf32> to vector<128x128xf32>
    %cst_73 = arith.constant dense<0.000000e+00> : vector<256x128xf32>
    %74 = tpu.matmul %71, %73, %cst_73 {dimension_numbers = #tpu.dot_dimension_numbers<[1], [0], [0], [1], [0, 0, 1, 1], [], []>} : vector<256x128xf32>, vector<128x128xf32>, vector<256x128xf32> -> vector<256x128xf32>
    %75 = arith.addf %69, %74 : vector<256x128xf32>
    %76 = vector.shape_cast %75 : vector<256x128xf32> to vector<1x16x16x128xf32>
    %c0_74 = arith.constant 0 : index
    %c0_75 = arith.constant 0 : index
    %c0_76 = arith.constant 0 : index
    %c0_77 = arith.constant 0 : index
    %77 = vector.load %arg8[%c0_74, %c0_75, %c0_76, %c0_77] : memref<1x16x16x128xf32, #tpu.memory_space<vmem>>, vector<1x16x16x128xf32>
    tpu.vector_store %arg8[%c0_74, %c0_75, %c0_76, %c0_77], %76 {strides = array<i32>} : memref<1x16x16x128xf32, #tpu.memory_space<vmem>>, vector<1x16x16x128xf32>,
    %cst_78 = arith.constant dense<0.000000e+00> : vector<128xf32>
    %78 = vector.multi_reduction <add>, %75, %cst_78 [0] : vector<256x128xf32> to vector<128xf32>
    %79 = vector.shape_cast %78 : vector<128xf32> to vector<1x1x128xf32>
    %c0_79 = arith.constant 0 : index
    %c0_80 = arith.constant 0 : index
    %c0_81 = arith.constant 0 : index
    %80 = vector.load %arg9[%c0_79, %c0_80, %c0_81] : memref<1x1x128xf32, #tpu.memory_space<vmem>>, vector<1x1x128xf32>
    tpu.vector_store %arg9[%c0_79, %c0_80, %c0_81], %79 {strides = array<i32>} : memref<1x1x128xf32, #tpu.memory_space<vmem>>, vector<1x1x128xf32>,
    %81 = arith.mulf %75, %75 : vector<256x128xf32>
    %cst_82 = arith.constant dense<0.000000e+00> : vector<128xf32>
    %82 = vector.multi_reduction <add>, %81, %cst_82 [0] : vector<256x128xf32> to vector<128xf32>
    %83 = vector.shape_cast %82 : vector<128xf32> to vector<1x1x128xf32>
    %c0_83 = arith.constant 0 : index
    %c0_84 = arith.constant 0 : index
    %c0_85 = arith.constant 0 : index
    %84 = vector.load %arg10[%c0_83, %c0_84, %c0_85] : memref<1x1x128xf32, #tpu.memory_space<vmem>>, vector<1x1x128xf32>
    tpu.vector_store %arg10[%c0_83, %c0_84, %c0_85], %83 {strides = array<i32>} : memref<1x1x128xf32, #tpu.memory_space<vmem>>, vector<1x1x128xf32>,
    %c0_86 = arith.constant 0 : index
    %c0_87 = arith.constant 0 : index
    %c0_88 = arith.constant 0 : index
    %c0_89 = arith.constant 0 : index
    %85 = vector.load %arg6[%c0_86, %c0_87, %c0_88, %c0_89] : memref<1x16x16x128xf32, #tpu.memory_space<vmem>>, vector<1x16x16x128xf32>
    %86 = vector.shape_cast %85 : vector<1x16x16x128xf32> to vector<16x16x128xf32>
    %87 = vector.shape_cast %86 : vector<16x16x128xf32> to vector<256x128xf32>
    %c0_90 = arith.constant 0 : index
    %c0_91 = arith.constant 0 : index
    %88 = vector.load %arg7[%c0_90, %c0_91] : memref<128x128xf32, #tpu.memory_space<vmem>>, vector<128x128xf32>
    %cst_92 = arith.constant dense<0.000000e+00> : vector<256x128xf32>
    %89 = tpu.matmul %87, %88, %cst_92 {dimension_numbers = #tpu.dot_dimension_numbers<[1], [0], [0], [1], [0, 0, 1, 1], [], []>} : vector<256x128xf32>, vector<128x128xf32>, vector<256x128xf32> -> vector<256x128xf32>
    %90 = vector.shape_cast %89 : vector<256x128xf32> to vector<1x16x16x128xf32>
    %c0_93 = arith.constant 0 : index
    %c0_94 = arith.constant 0 : index
    %c0_95 = arith.constant 0 : index
    %c0_96 = arith.constant 0 : index
    %91 = vector.load %arg11[%c0_93, %c0_94, %c0_95, %c0_96] : memref<1x16x16x128xf32, #tpu.memory_space<vmem>>, vector<1x16x16x128xf32>
    tpu.vector_store %arg11[%c0_93, %c0_94, %c0_95, %c0_96], %90 {strides = array<i32>} : memref<1x16x16x128xf32, #tpu.memory_space<vmem>>, vector<1x16x16x128xf32>,
    %cst_97 = arith.constant dense<0.000000e+00> : vector<128xf32>
    %92 = vector.multi_reduction <add>, %89, %cst_97 [0] : vector<256x128xf32> to vector<128xf32>
    %93 = vector.shape_cast %92 : vector<128xf32> to vector<1x1x128xf32>
    %c0_98 = arith.constant 0 : index
    %c0_99 = arith.constant 0 : index
    %c0_100 = arith.constant 0 : index
    %94 = vector.load %arg12[%c0_98, %c0_99, %c0_100] : memref<1x1x128xf32, #tpu.memory_space<vmem>>, vector<1x1x128xf32>
    tpu.vector_store %arg12[%c0_98, %c0_99, %c0_100], %93 {strides = array<i32>} : memref<1x1x128xf32, #tpu.memory_space<vmem>>, vector<1x1x128xf32>,
    %95 = arith.mulf %89, %89 : vector<256x128xf32>
    %cst_101 = arith.constant dense<0.000000e+00> : vector<128xf32>
    %96 = vector.multi_reduction <add>, %95, %cst_101 [0] : vector<256x128xf32> to vector<128xf32>
    %97 = vector.shape_cast %96 : vector<128xf32> to vector<1x1x128xf32>
    %c0_102 = arith.constant 0 : index
    %c0_103 = arith.constant 0 : index
    %c0_104 = arith.constant 0 : index
    %98 = vector.load %arg13[%c0_102, %c0_103, %c0_104] : memref<1x1x128xf32, #tpu.memory_space<vmem>>, vector<1x1x128xf32>
    tpu.vector_store %arg13[%c0_102, %c0_103, %c0_104], %97 {strides = array<i32>} : memref<1x1x128xf32, #tpu.memory_space<vmem>>, vector<1x1x128xf32>,
    return
  }
  func.func @transform_0(%arg0: i32) -> (i32, i32, i32, i32) {
    %c0_i32 = arith.constant 0 : i32
    %c0_i32_0 = arith.constant 0 : i32
    %c0_i32_1 = arith.constant 0 : i32
    %c0_i32_2 = arith.constant 0 : i32
    return %arg0, %c0_i32, %c0_i32_0, %c0_i32_1 : i32, i32, i32, i32
  }
  func.func @transform_1(%arg0: i32) -> (i32, i32, i32) {
    %c0_i32 = arith.constant 0 : i32
    %c0_i32_0 = arith.constant 0 : i32
    %c0_i32_1 = arith.constant 0 : i32
    %c0_i32_2 = arith.constant 0 : i32
    return %c0_i32, %c0_i32_0, %c0_i32_1 : i32, i32, i32
  }
  func.func @transform_2(%arg0: i32) -> (i32, i32, i32) {
    %c0_i32 = arith.constant 0 : i32
    %c0_i32_0 = arith.constant 0 : i32
    %c0_i32_1 = arith.constant 0 : i32
    %c0_i32_2 = arith.constant 0 : i32
    return %c0_i32, %c0_i32_0, %c0_i32_1 : i32, i32, i32
  }
  func.func @transform_3(%arg0: i32) -> (i32, i32, i32) {
    %c0_i32 = arith.constant 0 : i32
    %c0_i32_0 = arith.constant 0 : i32
    %c0_i32_1 = arith.constant 0 : i32
    %c0_i32_2 = arith.constant 0 : i32
    return %c0_i32, %c0_i32_0, %c0_i32_1 : i32, i32, i32
  }
  func.func @transform_4(%arg0: i32) -> (i32, i32) {
    %c0_i32 = arith.constant 0 : i32
    %c0_i32_0 = arith.constant 0 : i32
    %c0_i32_1 = arith.constant 0 : i32
    return %c0_i32, %c0_i32_0 : i32, i32
  }
  func.func @transform_5(%arg0: i32) -> (i32, i32, i32, i32) {
    %c0_i32 = arith.constant 0 : i32
    %c0_i32_0 = arith.constant 0 : i32
    %c0_i32_1 = arith.constant 0 : i32
    %c0_i32_2 = arith.constant 0 : i32
    return %arg0, %c0_i32, %c0_i32_0, %c0_i32_1 : i32, i32, i32, i32
  }
  func.func @transform_6(%arg0: i32) -> (i32, i32) {
    %c0_i32 = arith.constant 0 : i32
    %c0_i32_0 = arith.constant 0 : i32
    %c0_i32_1 = arith.constant 0 : i32
    return %c0_i32, %c0_i32_0 : i32, i32
  }
  func.func @transform_7(%arg0: i32) -> (i32, i32, i32, i32) {
    %c0_i32 = arith.constant 0 : i32
    %c0_i32_0 = arith.constant 0 : i32
    %c0_i32_1 = arith.constant 0 : i32
    %c0_i32_2 = arith.constant 0 : i32
    return %arg0, %c0_i32, %c0_i32_0, %c0_i32_1 : i32, i32, i32, i32
  }
  func.func @transform_8(%arg0: i32) -> (i32, i32, i32) {
    %c0_i32 = arith.constant 0 : i32
    %c0_i32_0 = arith.constant 0 : i32
    %c0_i32_1 = arith.constant 0 : i32
    return %arg0, %c0_i32, %c0_i32_0 : i32, i32, i32
  }
  func.func @transform_9(%arg0: i32) -> (i32, i32, i32) {
    %c0_i32 = arith.constant 0 : i32
    %c0_i32_0 = arith.constant 0 : i32
    %c0_i32_1 = arith.constant 0 : i32
    return %arg0, %c0_i32, %c0_i32_0 : i32, i32, i32
  }
  func.func @transform_10(%arg0: i32) -> (i32, i32, i32, i32) {
    %c0_i32 = arith.constant 0 : i32
    %c0_i32_0 = arith.constant 0 : i32
    %c0_i32_1 = arith.constant 0 : i32
    %c0_i32_2 = arith.constant 0 : i32
    return %arg0, %c0_i32, %c0_i32_0, %c0_i32_1 : i32, i32, i32, i32
  }
  func.func @transform_11(%arg0: i32) -> (i32, i32, i32) {
    %c0_i32 = arith.constant 0 : i32
    %c0_i32_0 = arith.constant 0 : i32
    %c0_i32_1 = arith.constant 0 : i32
    return %arg0, %c0_i32, %c0_i32_0 : i32, i32, i32
  }
  func.func @transform_12(%arg0: i32) -> (i32, i32, i32) {
    %c0_i32 = arith.constant 0 : i32
    %c0_i32_0 = arith.constant 0 : i32
    %c0_i32_1 = arith.constant 0 : i32
    return %arg0, %c0_i32, %c0_i32_0 : i32, i32, i32
  }
}

</mosaic_0001>

<bundles_post_ra>
// kernel: residual_block_forward.5
= control target key start
LH: loop header
LB: loop body
LE: loop exit
PB: predicated region body
PF: predicated region fallthrough
CT: control target
= control target key end

     0   :  { %s726_s21 = smov 0   ;;  %s1001_s0 = inlined_call_operand.vmem [shape: f32[2,16,16,128], index: 0, kind: input, shape index: {}]   ;;  %s1002_s1 = inlined_call_operand.vmem [shape: f32[1,1,128], index: 1, kind: input, shape index: {}]   ;;  %s1003_s2 = inlined_call_operand.vmem [shape: f32[1,1,128], index: 2, kind: input, shape index: {}]   ;;  %s1004_s3 = inlined_call_operand.vmem [shape: f32[2,16,16,128], index: 3, kind: input, shape index: {}]   ;;  %s1005_s4 = inlined_call_operand.vmem [shape: f32[1,1,128], index: 4, kind: input, shape index: {}]   ;;  %s1006_s5 = inlined_call_operand.vmem [shape: f32[1,1,128], index: 5, kind: input, shape index: {}]   ;;  %s1007_s6 = inlined_call_operand.vmem [shape: f32[2,16,16,128], index: 6, kind: output, shape index: {}]  }
   0x1 LB: > { %s655_s22 = sadd.s32 4294967295, %s689_s21   ;;  %p659_p0 = scmp.ge.s32.totalorder %s689_s21, 1  ;;  %s689_s21 = sphi %s726_s21, %s16_s21  }
   0x2   : > { %p222_p1 = scmp.lt.s32.totalorder %s689_s21, 3 }
   0x4   : > { %p223_p2 = pnand %p659_p0, %p222_p1 }
   0x5   : > { %p257_p3 = scmp.lt.s32.totalorder (!%p223_p2), %s655_s22, 1  ;;  %v739_v0 = vld [vmem:[%s1002_s1] ss:$0 sm:$0xff] (!%p223_p2) }
   0x6   : > { %226 = sbr.rel (%p223_p2) target bundleno = 71 (0x47), region = 44  ;;  %v744_v1 = vld [vmem:[%s1005_s4] ss:$0 sm:$0xff] (!%p223_p2) }
   0x7   : > { %v761_v2 = vld [vmem:[%s1003_s2] ss:$0 sm:$0xff] (!%p223_p2) }
   0x8   : > { %v766_v3 = vld [vmem:[%s1006_s5] ss:$0 sm:$0xff] (!%p223_p2) }
   0xd   : > { %s1009_s22 = smov (!%p257_p3, %s655_s22), 1 }
   0xe   : > { %s734_s23 = sshll.u32 %s1009_s22, 8 }
   0xf   : > { %s750_s30 = scalar_lea.vmem %s1001_s0, %s734_s23  ;;  %s756_s9 = scalar_lea.vmem %s1004_s3, %s734_s23 }
  0x10   : > { %v272_v4 = vld [vmem:[%s750_s30] sm:$0xff]  ;;  %v273_v6 = vld [vmem:[%s750_s30 + $0x8] sm:$0xff]  ;;  %v274_v11 = vld [vmem:[%s750_s30 + $0x10] sm:$0xff]  ;;  %s801_s16 = scalar_lea.vmem %s1007_s6, %s734_s23 }
  0x11   : > { %v382_v5 = vld [vmem:[%s756_s9] sm:$0xff]  ;;  %v311_v7 = vmul.f32 %v739_v0, %v272_v4  ;;  %v312_v9 = vmul.f32 %v739_v0, %v273_v6  ;;  %v383_v10 = vld [vmem:[%s756_s9 + $0x8] sm:$0xff]  ;;  %v384_v12 = vld [vmem:[%s756_s9 + $0x10] sm:$0xff]  ;;  %v313_v14 = vmul.f32 %v739_v0, %v274_v11 }
  0x12   : > { %v421_v8 = vmul.f32 %v744_v1, %v382_v5  ;;  %v422_v13 = vmul.f32 %v744_v1, %v383_v10  ;;  %v423_v15 = vmul.f32 %v744_v1, %v384_v12  ;;  %v275_v16 = vld [vmem:[%s750_s30 + $0x18] sm:$0xff]  ;;  %v276_v18 = vld [vmem:[%s750_s30 + $0x20] sm:$0xff]  ;;  %v277_v24 = vld [vmem:[%s750_s30 + $0x28] sm:$0xff] }
  0x13   : > { %v385_v17 = vld [vmem:[%s756_s9 + $0x18] sm:$0xff]  ;;  %v350_v19 = vadd.f32 %v761_v2, %v311_v7  ;;  %v351_v21 = vadd.f32 %v761_v2, %v312_v9  ;;  %v314_v22 = vmul.f32 %v739_v0, %v275_v16  ;;  %v386_v23 = vld [vmem:[%s756_s9 + $0x20] sm:$0xff]  ;;  %v352_v26 = vadd.f32 %v761_v2, %v313_v14  ;;  %v387_v29 = vld [vmem:[%s756_s9 + $0x28] sm:$0xff] }
  0x14   : > { %v460_v20 = vadd.f32 %v766_v3, %v421_v8  ;;  %v461_v25 = vadd.f32 %v766_v3, %v422_v13  ;;  %v462_v27 = vadd.f32 %v766_v3, %v423_v15  ;;  %v424_v28 = vmul.f32 %v744_v1, %v385_v17  ;;  %v278_v38 = vld [vmem:[%s750_s30 + $0x30] sm:$0xff]  ;;  %v279_v44 = vld [vmem:[%s750_s30 + $0x38] sm:$0xff]  ;;  %v280_v46 = vld [vmem:[%s750_s30 + $0x40] sm:$0xff] }
  0x15   : > { %v353_v31 = vadd.f32 %v761_v2, %v314_v22  ;;  %v315_v32 = vmul.f32 %v739_v0, %v276_v18  ;;  %v425_v33 = vmul.f32 %v744_v1, %v386_v23  ;;  %v316_v37 = vmul.f32 %v739_v0, %v277_v24  ;;  %v388_v39 = vld [vmem:[%s756_s9 + $0x30] sm:$0xff]  ;;  %v389_v45 = vld [vmem:[%s756_s9 + $0x38] sm:$0xff]  ;;  %v390_v55 = vld [vmem:[%s756_s9 + $0x40] sm:$0xff] }
  0x16   : > { %v492_v30 = vadd.f32 %v460_v20, %v350_v19  ;;  %v493_v34 = vadd.f32 %v461_v25, %v351_v21  ;;  %v494_v35 = vadd.f32 %v462_v27, %v352_v26  ;;  %v463_v36 = vadd.f32 %v766_v3, %v424_v28  ;;  %v281_v60 = vld [vmem:[%s750_s30 + $0x48] sm:$0xff]  ;;  %v282_v6 = vld [vmem:[%s750_s30 + $0x50] sm:$0xff]  ;;  %v283_v12 = vld [vmem:[%s750_s30 + $0x58] sm:$0xff] }
  0x17   : > { %v354_v41 = vadd.f32 %v761_v2, %v315_v32  ;;  %v464_v42 = vadd.f32 %v766_v3, %v425_v33  ;;  %v426_v43 = vmul.f32 %v744_v1, %v387_v29  ;;  %v355_v50 = vadd.f32 %v761_v2, %v316_v37  ;;  %v391_v61 = vld [vmem:[%s756_s9 + $0x48] sm:$0xff]  ;;  %v392_v7 = vld [vmem:[%s756_s9 + $0x50] sm:$0xff]  ;;  %v393_v21 = vld [vmem:[%s756_s9 + $0x58] sm:$0xff] }
  0x18   : > { %v524_v40 = vmax.f32 %v492_v30, 0.0  ;;  %v525_v47 = vmax.f32 %v493_v34, 0.0  ;;  %v526_v48 = vmax.f32 %v494_v35, 0.0  ;;  %v495_v49 = vadd.f32 %v463_v36, %v353_v31  ;;  %v284_v22 = vld [vmem:[%s750_s30 + $0x60] sm:$0xff]  ;;  %v285_v28 = vld [vmem:[%s750_s30 + $0x68] sm:$0xff] }
  0x19   : > { %v496_v51 = vadd.f32 %v464_v42, %v354_v41  ;;  %v465_v52 = vadd.f32 %v766_v3, %v426_v43  ;;  %v317_v53 = vmul.f32 %v739_v0, %v278_v38  ;;  %v427_v54 = vmul.f32 %v744_v1, %v388_v39  ;;  %v394_v27 = vld [vmem:[%s756_s9 + $0x60] sm:$0xff]  ;;  %v395_v33 = vld [vmem:[%s756_s9 + $0x68] sm:$0xff]  ;;  %v286_v38 = vld [vmem:[%s750_s30 + $0x70] sm:$0xff] }
  0x1a   : > { %556 = vst [vmem:[%s801_s16] sm:$0xff] %v524_v40  ;;  %557 = vst [vmem:[%s801_s16 + $0x8] sm:$0xff] %v525_v47  ;;  %v527_v56 = vmax.f32 %v495_v49, 0.0  ;;  %v318_v57 = vmul.f32 %v739_v0, %v279_v44  ;;  %v428_v58 = vmul.f32 %v744_v1, %v389_v45  ;;  %v319_v59 = vmul.f32 %v739_v0, %v280_v46  ;;  %v396_v43 = vld [vmem:[%s756_s9 + $0x70] sm:$0xff]  ;;  %v287_v44 = vld [vmem:[%s750_s30 + $0x78] sm:$0xff] }
  0x1b   : > { %558 = vst [vmem:[%s801_s16 + $0x10] sm:$0xff] %v526_v48  ;;  %v528_v62 = vmax.f32 %v496_v51, 0.0  ;;  %v497_v63 = vadd.f32 %v465_v52, %v355_v50  ;;  %v356_v4 = vadd.f32 %v761_v2, %v317_v53  ;;  %v466_v5 = vadd.f32 %v766_v3, %v427_v54  ;;  %v397_v49 = vld [vmem:[%s756_s9 + $0x78] sm:$0xff]  ;;  %v288_v50 = vld [vmem:[%s750_s30 + $0x80] sm:$0xff] }
  0x1c   : > { %559 = vst [vmem:[%s801_s16 + $0x18] sm:$0xff] %v527_v56  ;;  %v357_v8 = vadd.f32 %v761_v2, %v318_v57  ;;  %v467_v9 = vadd.f32 %v766_v3, %v428_v58  ;;  %v358_v10 = vadd.f32 %v761_v2, %v319_v59  ;;  %v429_v11 = vmul.f32 %v744_v1, %v390_v55  ;;  %v398_v59 = vld [vmem:[%s756_s9 + $0x80] sm:$0xff] }
  0x1d   : > { %560 = vst [vmem:[%s801_s16 + $0x20] sm:$0xff] %v528_v62  ;;  %v529_v13 = vmax.f32 %v497_v63, 0.0  ;;  %v498_v14 = vadd.f32 %v466_v5, %v356_v4  ;;  %v320_v15 = vmul.f32 %v739_v0, %v281_v60  ;;  %v430_v16 = vmul.f32 %v744_v1, %v391_v61  ;;  %v289_v4 = vld [vmem:[%s750_s30 + $0x88] sm:$0xff] }
  0x1e   : > { %v499_v17 = vadd.f32 %v467_v9, %v357_v8  ;;  %v468_v18 = vadd.f32 %v766_v3, %v429_v11  ;;  %v321_v19 = vmul.f32 %v739_v0, %v282_v6  ;;  %v431_v20 = vmul.f32 %v744_v1, %v392_v7  ;;  %v399_v5 = vld [vmem:[%s756_s9 + $0x88] sm:$0xff]  ;;  %v400_v11 = vld [vmem:[%s756_s9 + $0x90] sm:$0xff] }
  0x1f   : > { %561 = vst [vmem:[%s801_s16 + $0x28] sm:$0xff] %v529_v13  ;;  %v530_v23 = vmax.f32 %v498_v14, 0.0  ;;  %v359_v24 = vadd.f32 %v761_v2, %v320_v15  ;;  %v469_v25 = vadd.f32 %v766_v3, %v430_v16  ;;  %v322_v26 = vmul.f32 %v739_v0, %v283_v12  ;;  %v291_v16 = vld [vmem:[%s750_s30 + $0x98] sm:$0xff] }
  0x20   : > { %v531_v29 = vmax.f32 %v499_v17, 0.0  ;;  %v500_v30 = vadd.f32 %v468_v18, %v358_v10  ;;  %v360_v31 = vadd.f32 %v761_v2, %v321_v19  ;;  %v470_v32 = vadd.f32 %v766_v3, %v431_v20  ;;  %v290_v10 = vld [vmem:[%s750_s30 + $0x90] sm:$0xff] }
  0x21   : > { %562 = vst [vmem:[%s801_s16 + $0x30] sm:$0xff] %v530_v23  ;;  %v501_v34 = vadd.f32 %v469_v25, %v359_v24  ;;  %v361_v35 = vadd.f32 %v761_v2, %v322_v26  ;;  %v432_v36 = vmul.f32 %v744_v1, %v393_v21  ;;  %v323_v37 = vmul.f32 %v739_v0, %v284_v22  ;;  %v401_v25 = vld [vmem:[%s756_s9 + $0x98] sm:$0xff]  ;;  %v292_v26 = vld [vmem:[%s750_s30 + $0xa0] sm:$0xff] }
  0x22   : > { %563 = vst [vmem:[%s801_s16 + $0x38] sm:$0xff] %v531_v29  ;;  %v532_v39 = vmax.f32 %v500_v30, 0.0  ;;  %v502_v40 = vadd.f32 %v470_v32, %v360_v31  ;;  %v433_v41 = vmul.f32 %v744_v1, %v394_v27  ;;  %v324_v42 = vmul.f32 %v739_v0, %v285_v28  ;;  %v402_v31 = vld [vmem:[%s756_s9 + $0xa0] sm:$0xff]  ;;  %v293_v32 = vld [vmem:[%s750_s30 + $0xa8] sm:$0xff] }
  0x23   : > { %v533_v45 = vmax.f32 %v501_v34, 0.0  ;;  %v471_v46 = vadd.f32 %v766_v3, %v432_v36  ;;  %v362_v47 = vadd.f32 %v761_v2, %v323_v37  ;;  %v434_v48 = vmul.f32 %v744_v1, %v395_v33  ;;  %v403_v37 = vld [vmem:[%s756_s9 + $0xa8] sm:$0xff] }
  0x24   : > { %564 = vst [vmem:[%s801_s16 + $0x40] sm:$0xff] %v532_v39  ;;  %v534_v51 = vmax.f32 %v502_v40, 0.0  ;;  %v472_v52 = vadd.f32 %v766_v3, %v433_v41  ;;  %v363_v53 = vadd.f32 %v761_v2, %v324_v42  ;;  %v325_v54 = vmul.f32 %v739_v0, %v286_v38  ;;  %v294_v42 = vld [vmem:[%s750_s30 + $0xb0] sm:$0xff] }
  0x25   : > { %565 = vst [vmem:[%s801_s16 + $0x48] sm:$0xff] %v533_v45  ;;  %v503_v55 = vadd.f32 %v471_v46, %v361_v35  ;;  %v473_v56 = vadd.f32 %v766_v3, %v434_v48  ;;  %v435_v57 = vmul.f32 %v744_v1, %v396_v43  ;;  %v326_v58 = vmul.f32 %v739_v0, %v287_v44  ;;  %v295_v48 = vld [vmem:[%s750_s30 + $0xb8] sm:$0xff] }
  0x26   : > { %566 = vst [vmem:[%s801_s16 + $0x50] sm:$0xff] %v534_v51  ;;  %v504_v60 = vadd.f32 %v472_v52, %v362_v47  ;;  %v364_v61 = vadd.f32 %v761_v2, %v325_v54  ;;  %v436_v62 = vmul.f32 %v744_v1, %v397_v49  ;;  %v327_v63 = vmul.f32 %v739_v0, %v288_v50  ;;  %v404_v47 = vld [vmem:[%s756_s9 + $0xb0] sm:$0xff]  ;;  %v296_v54 = vld [vmem:[%s750_s30 + $0xc0] sm:$0xff] }
  0x27   : > { %v535_v6 = vmax.f32 %v503_v55, 0.0  ;;  %v505_v7 = vadd.f32 %v473_v56, %v363_v53  ;;  %v474_v8 = vadd.f32 %v766_v3, %v435_v57  ;;  %v365_v9 = vadd.f32 %v761_v2, %v326_v58  ;;  %v405_v53 = vld [vmem:[%s756_s9 + $0xb8] sm:$0xff] }
  0x28   : > { %v536_v12 = vmax.f32 %v504_v60, 0.0  ;;  %v475_v13 = vadd.f32 %v766_v3, %v436_v62  ;;  %v366_v14 = vadd.f32 %v761_v2, %v327_v63  ;;  %v437_v15 = vmul.f32 %v744_v1, %v398_v59  ;;  %v406_v63 = vld [vmem:[%s756_s9 + $0xc0] sm:$0xff] }
  0x29   : > { %567 = vst [vmem:[%s801_s16 + $0x58] sm:$0xff] %v535_v6  ;;  %v537_v17 = vmax.f32 %v505_v7, 0.0  ;;  %v506_v18 = vadd.f32 %v474_v8, %v364_v61  ;;  %v328_v19 = vmul.f32 %v739_v0, %v289_v4  ;;  %v438_v20 = vmul.f32 %v744_v1, %v399_v5  ;;  %v297_v8 = vld [vmem:[%s750_s30 + $0xc8] sm:$0xff] }
  0x2a   : > { %568 = vst [vmem:[%s801_s16 + $0x60] sm:$0xff] %v536_v12  ;;  %v507_v21 = vadd.f32 %v475_v13, %v365_v9  ;;  %v476_v22 = vadd.f32 %v766_v3, %v437_v15  ;;  %v329_v23 = vmul.f32 %v739_v0, %v290_v10  ;;  %v439_v24 = vmul.f32 %v744_v1, %v400_v11  ;;  %v407_v9 = vld [vmem:[%s756_s9 + $0xc8] sm:$0xff]  ;;  %v408_v15 = vld [vmem:[%s756_s9 + $0xd0] sm:$0xff] }
  0x2b   : > { %569 = vst [vmem:[%s801_s16 + $0x68] sm:$0xff] %v537_v17  ;;  %v538_v27 = vmax.f32 %v506_v18, 0.0  ;;  %v367_v28 = vadd.f32 %v761_v2, %v328_v19  ;;  %v477_v29 = vadd.f32 %v766_v3, %v438_v20  ;;  %v330_v30 = vmul.f32 %v739_v0, %v291_v16  ;;  %v299_v20 = vld [vmem:[%s750_s30 + $0xd8] sm:$0xff] }
  0x2c   : > { %v539_v33 = vmax.f32 %v507_v21, 0.0  ;;  %v508_v34 = vadd.f32 %v476_v22, %v366_v14  ;;  %v368_v35 = vadd.f32 %v761_v2, %v329_v23  ;;  %v478_v36 = vadd.f32 %v766_v3, %v439_v24  ;;  %v298_v14 = vld [vmem:[%s750_s30 + $0xd0] sm:$0xff] }
  0x2d   : > { %570 = vst [vmem:[%s801_s16 + $0x70] sm:$0xff] %v538_v27  ;;  %v509_v38 = vadd.f32 %v477_v29, %v367_v28  ;;  %v369_v39 = vadd.f32 %v761_v2, %v330_v30  ;;  %v440_v40 = vmul.f32 %v744_v1, %v401_v25  ;;  %v331_v41 = vmul.f32 %v739_v0, %v292_v26  ;;  %v409_v29 = vld [vmem:[%s756_s9 + $0xd8] sm:$0xff]  ;;  %v300_v30 = vld [vmem:[%s750_s30 + $0xe0] sm:$0xff] }
  0x2e   : > { %571 = vst [vmem:[%s801_s16 + $0x78] sm:$0xff] %v539_v33  ;;  %v540_v43 = vmax.f32 %v508_v34, 0.0  ;;  %v510_v44 = vadd.f32 %v478_v36, %v368_v35  ;;  %v441_v45 = vmul.f32 %v744_v1, %v402_v31  ;;  %v332_v46 = vmul.f32 %v739_v0, %v293_v32  ;;  %v410_v35 = vld [vmem:[%s756_s9 + $0xe0] sm:$0xff]  ;;  %v301_v36 = vld [vmem:[%s750_s30 + $0xe8] sm:$0xff] }
  0x2f   : > { %v541_v49 = vmax.f32 %v509_v38, 0.0  ;;  %v479_v50 = vadd.f32 %v766_v3, %v440_v40  ;;  %v370_v51 = vadd.f32 %v761_v2, %v331_v41  ;;  %v442_v52 = vmul.f32 %v744_v1, %v403_v37  ;;  %v411_v41 = vld [vmem:[%s756_s9 + $0xe8] sm:$0xff] }
  0x30   : > { %572 = vst [vmem:[%s801_s16 + $0x80] sm:$0xff] %v540_v43  ;;  %v542_v55 = vmax.f32 %v510_v44, 0.0  ;;  %v480_v56 = vadd.f32 %v766_v3, %v441_v45  ;;  %v371_v57 = vadd.f32 %v761_v2, %v332_v46  ;;  %v333_v58 = vmul.f32 %v739_v0, %v294_v42  ;;  %v302_v46 = vld [vmem:[%s750_s30 + $0xf0] sm:$0xff] }
  0x31   : > { %573 = vst [vmem:[%s801_s16 + $0x88] sm:$0xff] %v541_v49  ;;  %v511_v59 = vadd.f32 %v479_v50, %v369_v39  ;;  %v481_v60 = vadd.f32 %v766_v3, %v442_v52  ;;  %v443_v61 = vmul.f32 %v744_v1, %v404_v47  ;;  %v334_v62 = vmul.f32 %v739_v0, %v295_v48  ;;  %v303_v52 = vld [vmem:[%s750_s30 + $0xf8] sm:$0xff] }
  0x32   : > { %574 = vst [vmem:[%s801_s16 + $0x90] sm:$0xff] %v542_v55  ;;  %v512_v4 = vadd.f32 %v480_v56, %v370_v51  ;;  %v372_v5 = vadd.f32 %v761_v2, %v333_v58  ;;  %v444_v6 = vmul.f32 %v744_v1, %v405_v53  ;;  %v335_v7 = vmul.f32 %v739_v0, %v296_v54  ;;  %v412_v51 = vld [vmem:[%s756_s9 + $0xf0] sm:$0xff] }
  0x33   : > { %v543_v10 = vmax.f32 %v511_v59, 0.0  ;;  %v513_v11 = vadd.f32 %v481_v60, %v371_v57  ;;  %v482_v12 = vadd.f32 %v766_v3, %v443_v61  ;;  %v373_v13 = vadd.f32 %v761_v2, %v334_v62  ;;  %v413_v57 = vld [vmem:[%s756_s9 + $0xf8] sm:$0xff] }
  0x34   : > { %v544_v16 = vmax.f32 %v512_v4, 0.0  ;;  %v483_v17 = vadd.f32 %v766_v3, %v444_v6  ;;  %v374_v18 = vadd.f32 %v761_v2, %v335_v7  ;;  %v445_v19 = vmul.f32 %v744_v1, %v406_v63 }
  0x35   : > { %575 = vst [vmem:[%s801_s16 + $0x98] sm:$0xff] %v543_v10  ;;  %v545_v21 = vmax.f32 %v513_v11, 0.0  ;;  %v514_v22 = vadd.f32 %v482_v12, %v372_v5  ;;  %v336_v23 = vmul.f32 %v739_v0, %v297_v8  ;;  %v446_v24 = vmul.f32 %v744_v1, %v407_v9 }
  0x36   : > { %576 = vst [vmem:[%s801_s16 + $0xa0] sm:$0xff] %v544_v16  ;;  %v515_v25 = vadd.f32 %v483_v17, %v373_v13  ;;  %v484_v26 = vadd.f32 %v766_v3, %v445_v19  ;;  %v337_v27 = vmul.f32 %v739_v0, %v298_v14  ;;  %v447_v28 = vmul.f32 %v744_v1, %v408_v15 }
  0x37   : > { %577 = vst [vmem:[%s801_s16 + $0xa8] sm:$0xff] %v545_v21  ;;  %v546_v31 = vmax.f32 %v514_v22, 0.0  ;;  %v375_v32 = vadd.f32 %v761_v2, %v336_v23  ;;  %v485_v33 = vadd.f32 %v766_v3, %v446_v24  ;;  %v338_v34 = vmul.f32 %v739_v0, %v299_v20 }
  0x38   : > { %v547_v37 = vmax.f32 %v515_v25, 0.0  ;;  %v516_v38 = vadd.f32 %v484_v26, %v374_v18  ;;  %v376_v39 = vadd.f32 %v761_v2, %v337_v27  ;;  %v486_v40 = vadd.f32 %v766_v3, %v447_v28 }
  0x39   : > { %578 = vst [vmem:[%s801_s16 + $0xb0] sm:$0xff] %v546_v31  ;;  %v517_v42 = vadd.f32 %v485_v33, %v375_v32  ;;  %v377_v43 = vadd.f32 %v761_v2, %v338_v34  ;;  %v448_v44 = vmul.f32 %v744_v1, %v409_v29  ;;  %v339_v45 = vmul.f32 %v739_v0, %v300_v30 }
  0x3a   : > { %579 = vst [vmem:[%s801_s16 + $0xb8] sm:$0xff] %v547_v37  ;;  %v548_v47 = vmax.f32 %v516_v38, 0.0  ;;  %v518_v48 = vadd.f32 %v486_v40, %v376_v39  ;;  %v449_v49 = vmul.f32 %v744_v1, %v410_v35  ;;  %v340_v50 = vmul.f32 %v739_v0, %v301_v36 }
  0x3b   : > { %v549_v53 = vmax.f32 %v517_v42, 0.0  ;;  %v487_v54 = vadd.f32 %v766_v3, %v448_v44  ;;  %v378_v55 = vadd.f32 %v761_v2, %v339_v45  ;;  %v450_v56 = vmul.f32 %v744_v1, %v411_v41 }
  0x3c   : > { %580 = vst [vmem:[%s801_s16 + $0xc0] sm:$0xff] %v548_v47  ;;  %v550_v58 = vmax.f32 %v518_v48, 0.0  ;;  %v488_v59 = vadd.f32 %v766_v3, %v449_v49  ;;  %v379_v60 = vadd.f32 %v761_v2, %v340_v50  ;;  %v341_v61 = vmul.f32 %v739_v0, %v302_v46 }
  0x3d   : > { %581 = vst [vmem:[%s801_s16 + $0xc8] sm:$0xff] %v549_v53  ;;  %v519_v62 = vadd.f32 %v487_v54, %v377_v43  ;;  %v489_v63 = vadd.f32 %v766_v3, %v450_v56  ;;  %v451_v4 = vmul.f32 %v744_v1, %v412_v51  ;;  %v342_v5 = vmul.f32 %v739_v0, %v303_v52 }
  0x3e   : > { %582 = vst [vmem:[%s801_s16 + $0xd0] sm:$0xff] %v550_v58  ;;  %v520_v6 = vadd.f32 %v488_v59, %v378_v55  ;;  %v380_v7 = vadd.f32 %v761_v2, %v341_v61  ;;  %v452_v8 = vmul.f32 %v744_v1, %v413_v57 }
  0x3f   : > { %v551_v9 = vmax.f32 %v519_v62, 0.0  ;;  %v521_v10 = vadd.f32 %v489_v63, %v379_v60  ;;  %v490_v11 = vadd.f32 %v766_v3, %v451_v4  ;;  %v381_v12 = vadd.f32 %v761_v2, %v342_v5 }
  0x40   : > { %v552_v13 = vmax.f32 %v520_v6, 0.0  ;;  %v491_v14 = vadd.f32 %v766_v3, %v452_v8 }
  0x41   : > { %583 = vst [vmem:[%s801_s16 + $0xd8] sm:$0xff] %v551_v9  ;;  %v553_v0 = vmax.f32 %v521_v10, 0.0  ;;  %v522_v15 = vadd.f32 %v490_v11, %v380_v7 }
  0x42   : > { %584 = vst [vmem:[%s801_s16 + $0xe0] sm:$0xff] %v552_v13  ;;  %v523_v16 = vadd.f32 %v491_v14, %v381_v12 }
  0x43   : > { %585 = vst [vmem:[%s801_s16 + $0xe8] sm:$0xff] %v553_v0  ;;  %v554_v17 = vmax.f32 %v522_v15, 0.0 }
  0x44   : > { %v555_v18 = vmax.f32 %v523_v16, 0.0 }
  0x45   : > { %586 = vst [vmem:[%s801_s16 + $0xf0] sm:$0xff] %v554_v17 }
  0x46   : > { %587 = vst [vmem:[%s801_s16 + $0xf8] sm:$0xff] %v555_v18 }
  0x47 PF: > { %s16_s21 = sadd.s32 1, %s689_s21  }
  0x48   : > { %p13_p4 = scmp.ge.s32.totalorder %s16_s21, 4  }
  0x4a   :  { %15 = sbr.rel (!%p13_p4) target bundleno = 1 (0x1), region = 77 }

// kernel: residual_block_forward.3
= control target key start
LH: loop header
LB: loop body
LE: loop exit
PB: predicated region body
PF: predicated region fallthrough
CT: control target
= control target key end

     0   :  { %s5444_s26 = smov 0   ;;  %s6717_s0 = inlined_call_operand.vmem [shape: f32[2,16,16,128], index: 0, kind: input, shape index: {}]   ;;  %s6718_s1 = inlined_call_operand.vmem [shape: f32[9,128,128], index: 1, kind: input, shape index: {}]   ;;  %s6719_s2 = inlined_call_operand.vmem [shape: f32[1,1,128], index: 2, kind: input, shape index: {}]   ;;  %s6720_s3 = inlined_call_operand.vmem [shape: f32[1,1,128], index: 3, kind: input, shape index: {}]   ;;  %s6721_s4 = inlined_call_operand.<no memory space> [shape: f32[1,1], index: 4, kind: input, shape index: {}]   ;;  %s6722_s5 = inlined_call_operand.vmem [shape: f32[2,16,16,128], index: 5, kind: output, shape index: {0}]   ;;  %s6723_s6 = inlined_call_operand.vmem [shape: f32[2,1,128], index: 6, kind: output, shape index: {1}]   ;;  %s6724_s7 = inlined_call_operand.vmem [shape: f32[2,1,128], index: 7, kind: output, shape index: {2}]  }
   0x1   :  { %13 = sst [smem:[#allocation3]] %s6721_s4 }
   0x2 LB: > { %s3527_s27 = sadd.s32 4294967295, %s5398_s26   ;;  %p3531_p0 = scmp.ge.s32.totalorder %s5398_s26, 1  ;;  %s5398_s26 = sphi %s5444_s26, %s19_s26  }
   0x3   : > { %p243_p1 = scmp.lt.s32.totalorder %s5398_s26, 3 }
   0x5   : > { %p244_p2 = pnand %p3531_p0, %p243_p1 }
   0x7   : > { %247 = sbr.rel (%p244_p2) target bundleno = 574 (0x23e), region = 40 }
   0xe   : > { %v3538_v0 = vld [vmem:[%s6718_s1 + $0x80] sm:$0xff]  ;;  %v3539_v1 = vld [vmem:[%s6718_s1 + $0x88] sm:$0xff]  ;;  %p5463_p3 = scmp.lt.s32.totalorder %s3527_s27, 1  ;;  %v3540_v5 = vld [vmem:[%s6718_s1 + $0x90] sm:$0xff]  ;;  %v5400_v7 = vmov 0.0   ;;  %s5511_s8 = sld [smem:[#allocation3]] }
   0xf   : > { %v3586_v2 = vld [vmem:[%s6718_s1 + $0x200] sm:$0xff]  ;;  %v5467_v3 = vpack.c.bf16 %v3539_v1, %v3538_v0  ;;  %v3587_v4 = vld [vmem:[%s6718_s1 + $0x208] sm:$0xff]  ;;  %v3541_v6 = vld [vmem:[%s6718_s1 + $0x98] sm:$0xff]  ;;  %505 = vst [vmem:[#allocation2] sm:$0xff] %v5400_v7 }
  0x10   : > { %506 = vst [vmem:[#allocation2 + $0x8] sm:$0xff] %v5400_v7  ;;  %507 = vst [vmem:[#allocation2 + $0x10] sm:$0x3] %v5400_v7  ;;  %v5478_v8 = vpack.c.bf16 %v3587_v4, %v3586_v2  ;;  %v4826_v9 = vpack.c.bf16 %v3541_v6, %v3540_v5  ;;  %v3588_v10 = vld [vmem:[%s6718_s1 + $0x210] sm:$0xff]  ;;  %v3589_v11 = vld [vmem:[%s6718_s1 + $0x218] sm:$0xff]  ;;  %s6789_s27 = smov (!%p5463_p3, %s3527_s27), 1 }
  0x11   : > { %508 = vst [vmem:[#allocation2 + $0x18] sm:$0xff] %v5400_v7  ;;  %509 = vst [vmem:[#allocation2 + $0x20] sm:$0xff] %v5400_v7  ;;  %v3542_v12 = vld [vmem:[%s6718_s1 + $0xa0] sm:$0xff]  ;;  %4823 = vmatprep.subr.bf16.mxu1 %v5467_v3  ;;  %v5496_v13 = vpack.c.bf16 %v3589_v11, %v3588_v10  ;;  %v3543_v14 = vld [vmem:[%s6718_s1 + $0xa8] sm:$0xff]  ;;  %s3668_s30 = sshll.u32 %s6789_s27, 8  ;;  %s293_s16 = scalar_lea.vmem %s6723_s6, %s6789_s27 }
  0x12   : > { %510 = vst [vmem:[#allocation2 + $0x28] sm:$0x3] %v5400_v7  ;;  %511 = vst [vmem:[#allocation2 + $0x30] sm:$0xff] %v5400_v7  ;;  %v3590_v15 = vld [vmem:[%s6718_s1 + $0x220] sm:$0xff]  ;;  %v3591_v16 = vld [vmem:[%s6718_s1 + $0x228] sm:$0xff]  ;;  %4951 = vmatprep.subr.bf16.mxu0 %v5478_v8  ;;  %4825 = vmatpush3.bf16.msra.mxu1 %v5467_v3  ;;  %v4830_v17 = vpack.c.bf16 %v3543_v14, %v3542_v12  ;;  %s5533_s19 = scalar_lea.vmem %s6717_s0, %s3668_s30  ;;  %s6667_s14 = scalar_lea.vmem %s6722_s5, %s3668_s30 }
  0x13   : > { %512 = vst [vmem:[#allocation2 + $0x38] sm:$0xff] %v5400_v7  ;;  %513 = vst [vmem:[#allocation2 + $0x40] sm:$0x3] %v5400_v7  ;;  %4953 = vmatpush3.bf16.msra.mxu0 %v5478_v8  ;;  %4827 = vmatprep.subr.bf16.mxu1 %v4826_v9  ;;  %v5514_v18 = vpack.c.bf16 %v3591_v16, %v3590_v15  ;;  %v3544_v19 = vld [vmem:[%s6718_s1 + $0xb0] sm:$0xff]  ;;  %v3545_v20 = vld [vmem:[%s6718_s1 + $0xb8] sm:$0xff]  ;;  %s296_s20 = scalar_lea.vmem %s6724_s7, %s6789_s27 }
  0x14   : > { %514 = vst [vmem:[#allocation2 + $0x48] sm:$0xff] %v5400_v7  ;;  %515 = vst [vmem:[#allocation2 + $0x50] sm:$0xff] %v5400_v7  ;;  %4955 = vmatprep.subr.bf16.mxu0 %v5496_v13  ;;  %v3592_v21 = vld [vmem:[%s6718_s1 + $0x230] sm:$0xff]  ;;  %v3593_v22 = vld [vmem:[%s6718_s1 + $0x238] sm:$0xff]  ;;  %v4834_v23 = vpack.c.bf16 %v3545_v20, %v3544_v19  ;;  %v5583_v41 = vstv %s5511_s8 }
  0x15   : > { %516 = vst [vmem:[#allocation2 + $0x58] sm:$0x3] %v5400_v7  ;;  %517 = vst [vmem:[#allocation2 + $0x60] sm:$0xff] %v5400_v7  ;;  %v3546_v24 = vld [vmem:[%s6718_s1 + $0xc0] sm:$0xff]  ;;  %v3547_v25 = vld [vmem:[%s6718_s1 + $0xc8] sm:$0xff]  ;;  %v5546_v27 = vpack.c.bf16 %v3593_v22, %v3592_v21 }
  0x16   : > { %518 = vst [vmem:[#allocation2 + $0x68] sm:$0xff] %v5400_v7  ;;  %519 = vst [vmem:[#allocation2 + $0x70] sm:$0x3] %v5400_v7  ;;  %4829 = vmatpush3.bf16.msra.mxu1 %v4826_v9  ;;  %v3594_v26 = vld [vmem:[%s6718_s1 + $0x240] sm:$0xff]  ;;  %v3595_v28 = vld [vmem:[%s6718_s1 + $0x248] sm:$0xff]  ;;  %v4838_v38 = vpack.c.bf16 %v3547_v25, %v3546_v24 }
  0x17   : > { %520 = vst [vmem:[#allocation2 + $0x78] sm:$0xff] %v5400_v7  ;;  %521 = vst [vmem:[#allocation2 + $0x80] sm:$0xff] %v5400_v7  ;;  %4957 = vmatpush3.bf16.msra.mxu0 %v5496_v13  ;;  %4831 = vmatprep.subr.bf16.mxu1 %v4830_v17  ;;  %v3548_v29 = vld [vmem:[%s6718_s1 + $0xd0] sm:$0xff]  ;;  %v640_v30 = vld [vmem:[#allocation2 + $0x1] sm:$0xff]  ;;  %v5587_v43 = vpack.c.bf16 %v3595_v28, %v3594_v26 }
  0x18   : > { %522 = vst [vmem:[#allocation2 + $0x88] sm:$0x3] %v5400_v7  ;;  %523 = vst [vmem:[#allocation2 + $0x90] sm:$0xff] %v5400_v7  ;;  %4959 = vmatprep.subr.bf16.mxu0 %v5514_v18  ;;  %4134 = vmatprep.mubr.f32.mxu1 %v640_v30  ;;  %v298_v31 = vld [vmem:[%s5533_s19] sm:$0xff]  ;;  %v3549_v34 = vld [vmem:[%s6718_s1 + $0xd8] sm:$0xff] }
  0x19   : > { %524 = vst [vmem:[#allocation2 + $0x98] sm:$0xff] %v5400_v7  ;;  %525 = vst [vmem:[#allocation2 + $0xa0] sm:$0x3] %v5400_v7  ;;  %v5558_v32 = vld [vmem:[%s6719_s2] ss:$0 sm:$0xff]  ;;  %v3596_v35 = vld [vmem:[%s6718_s1 + $0x250] sm:$0xff]  ;;  %v5593_v48 = vpack.c.bf16 %v3549_v34, %v3548_v29 }
  0x1a   : > { %526 = vst [vmem:[#allocation2 + $0xa8] sm:$0xff] %v5400_v7  ;;  %527 = vst [vmem:[#allocation2 + $0xb0] sm:$0xff] %v5400_v7  ;;  %v5563_v33 = vld [vmem:[%s6720_s3] ss:$0 sm:$0xff]  ;;  %4833 = vmatpush3.bf16.msra.mxu1 %v4830_v17  ;;  %v3597_v36 = vld [vmem:[%s6718_s1 + $0x258] sm:$0xff]  ;;  %v337_v37 = vmul.f32 %v5558_v32, %v298_v31 }
  0x1b   : > { %528 = vst [vmem:[#allocation2 + $0xb8] sm:$0x3] %v5400_v7  ;;  %529 = vst [vmem:[#allocation2 + $0xc0] sm:$0xff] %v5400_v7  ;;  %4961 = vmatpush3.bf16.msra.mxu0 %v5514_v18  ;;  %4835 = vmatprep.subr.bf16.mxu1 %v4834_v23  ;;  %v3550_v39 = vld [vmem:[%s6718_s1 + $0xe0] sm:$0xff]  ;;  %v3551_v40 = vld [vmem:[%s6718_s1 + $0xe8] sm:$0xff]  ;;  %v5595_v49 = vpack.c.bf16 %v3597_v36, %v3596_v35 }
  0x1c   : > { %530 = vst [vmem:[#allocation2 + $0xc8] sm:$0xff] %v5400_v7  ;;  %531 = vst [vmem:[#allocation2 + $0xd0] sm:$0x3] %v5400_v7  ;;  %v299_v42 = vld [vmem:[%s5533_s19 + $0x8] sm:$0xff]  ;;  %4963 = vmatprep.subr.bf16.mxu0 %v5546_v27  ;;  %v376_v44 = vadd.f32 %v5563_v33, %v337_v37  ;;  %v300_v46 = vld [vmem:[%s5533_s19 + $0x10] sm:$0xff]  ;;  %v5606_v55 = vpack.c.bf16 %v3551_v40, %v3550_v39 }
  0x1d   : > { %532 = vst [vmem:[#allocation2 + $0xd8] sm:$0xff] %v5400_v7  ;;  %533 = vst [vmem:[#allocation2 + $0xe0] sm:$0xff] %v5400_v7  ;;  %v338_v45 = vmul.f32 %v5558_v32, %v299_v42  ;;  %v301_v47 = vld [vmem:[%s5533_s19 + $0x18] sm:$0xff]  ;;  %v3598_v50 = vld [vmem:[%s6718_s1 + $0x260] sm:$0xff]  ;;  %v339_v52 = vmul.f32 %v5558_v32, %v300_v46 }
  0x1e   : > { %534 = vst [vmem:[#allocation2 + $0xe8] sm:$0x3] %v5400_v7  ;;  %535 = vst [vmem:[#allocation2 + $0xf0] sm:$0xff] %v5400_v7  ;;  %v3599_v51 = vld [vmem:[%s6718_s1 + $0x268] sm:$0xff]  ;;  %v340_v53 = vmul.f32 %v5558_v32, %v301_v47  ;;  %v302_v54 = vld [vmem:[%s5533_s19 + $0x20] sm:$0xff]  ;;  %4837 = vmatpush3.bf16.msra.mxu1 %v4834_v23  ;;  %vm408_vm0 = vcmp.ge.f32.partialorder %v376_v44, 0.0  ;;  %v441_v56 = vmul.f32 %v5583_v41, %v376_v44 }
  0x1f   : > { %536 = vst [vmem:[#allocation2 + $0xf8] sm:$0xff] %v5400_v7  ;;  %537 = vst [vmem:[#allocation2 + $0x100] sm:$0x3] %v5400_v7  ;;  %v377_v57 = vadd.f32 %v5563_v33, %v338_v45  ;;  %4965 = vmatpush3.bf16.msra.mxu0 %v5546_v27  ;;  %4839 = vmatprep.subr.bf16.mxu1 %v4838_v38  ;;  %v3552_v58 = vld [vmem:[%s6718_s1 + $0xf0] sm:$0xff]  ;;  %v3553_v59 = vld [vmem:[%s6718_s1 + $0xf8] sm:$0xff]  ;;  %v378_v60 = vadd.f32 %v5563_v33, %v339_v52 }
  0x20   : > { %538 = vst [vmem:[#allocation2 + $0x108] sm:$0xff] %v5400_v7  ;;  %539 = vst [vmem:[#allocation2 + $0x110] sm:$0xff] %v5400_v7  ;;  %v379_v61 = vadd.f32 %v5563_v33, %v340_v53  ;;  %v341_v62 = vmul.f32 %v5558_v32, %v302_v54  ;;  %v303_v63 = vld [vmem:[%s5533_s19 + $0x28] sm:$0xff]  ;;  %4967 = vmatprep.subr.bf16.mxu0 %v5587_v43  ;;  %v5622_v0 = vpack.c.bf16 %v3599_v51, %v3598_v50  ;;  %v304_v3 = vld [vmem:[%s5533_s19 + $0x30] sm:$0xff] }
  0x21   : > { %540 = vst [vmem:[#allocation2 + $0x118] sm:$0x3] %v5400_v7  ;;  %541 = vst [vmem:[#allocation2 + $0x120] sm:$0xff] %v5400_v7  ;;  %v5624_v1 = vsel %vm408_vm0, %v376_v44, %v441_v56  ;;  %vm409_vm1 = vcmp.ge.f32.partialorder %v377_v57, 0.0  ;;  %v442_v2 = vmul.f32 %v5583_v41, %v377_v57  ;;  %v3600_v4 = vld [vmem:[%s6718_s1 + $0x270] sm:$0xff]  ;;  %v3601_v5 = vld [vmem:[%s6718_s1 + $0x278] sm:$0xff]  ;;  %v443_v6 = vmul.f32 %v5583_v41, %v378_v60 }
  0x22   : > { %542 = vst [vmem:[#allocation2 + $0x128] sm:$0xff] %v5400_v7  ;;  %543 = vst [vmem:[#allocation2 + $0x130] sm:$0x3] %v5400_v7  ;;  %4454 = vmatprep.mubr.f32.mxu0 %v5624_v1  ;;  %vm410_vm2 = vcmp.ge.f32.partialorder %v378_v60, 0.0  ;;  %vm411_vm3 = vcmp.ge.f32.partialorder %v379_v61, 0.0  ;;  %v305_v9 = vld [vmem:[%s5533_s19 + $0x38] sm:$0xff]  ;;  %4841 = vmatpush3.bf16.msra.mxu1 %v4838_v38  ;;  %v5639_v10 = vpack.c.bf16 %v3553_v59, %v3552_v58 }
  0x23   : > { %544 = vst [vmem:[#allocation2 + $0x138] sm:$0xff] %v5400_v7  ;;  %545 = vst [vmem:[#allocation2 + $0x140] sm:$0xff] %v5400_v7  ;;  %v624_v11 = vld [vmem:[%s6718_s1] sm:$0xff]  ;;  %v625_v12 = vld [vmem:[%s6718_s1 + $0x8] sm:$0xff]  ;;  %v5648_v14 = vsel %vm409_vm1, %v377_v57, %v442_v2  ;;  %v380_v15 = vadd.f32 %v5563_v33, %v341_v62  ;;  %v342_v16 = vmul.f32 %v5558_v32, %v303_v63  ;;  %4969 = vmatpush3.bf16.msra.mxu0 %v5587_v43 }
  0x24   : > { %546 = vst [vmem:[#allocation2 + $0x148] sm:$0x3] %v5400_v7  ;;  %547 = vst [vmem:[#allocation2 + $0x150] sm:$0xff] %v5400_v7  ;;  %v306_v17 = vld [vmem:[%s5533_s19 + $0x40] sm:$0xff]  ;;  %4843 = vmatprep.subr.bf16.mxu1 %v5593_v48  ;;  %v5657_v19 = vsel %vm410_vm2, %v378_v60, %v443_v6  ;;  %v343_v21 = vmul.f32 %v5558_v32, %v304_v3  ;;  %4971 = vmatprep.subr.bf16.mxu0 %v5595_v49  ;;  %v307_v25 = vld [vmem:[%s5533_s19 + $0x48] sm:$0xff] }
  0x25   : > { %548 = vst [vmem:[#allocation2 + $0x158] sm:$0xff] %v5400_v7  ;;  %549 = vst [vmem:[#allocation2 + $0x160] sm:$0x3] %v5400_v7  ;;  %vm412_vm4 = vcmp.ge.f32.partialorder %v380_v15, 0.0  ;;  %v445_v22 = vmul.f32 %v5583_v41, %v380_v15  ;;  %v381_v23 = vadd.f32 %v5563_v33, %v342_v16  ;;  %v344_v24 = vmul.f32 %v5558_v32, %v305_v9  ;;  %v3602_v29 = vld [vmem:[%s6718_s1 + $0x280] sm:$0xff]  ;;  %v3603_v30 = vld [vmem:[%s6718_s1 + $0x288] sm:$0xff] }
  0x26   : > { %550 = vst [vmem:[#allocation2 + $0x168] sm:$0xff] %v5400_v7  ;;  %551 = vst [vmem:[#allocation2 + $0x170] sm:$0xff] %v5400_v7  ;;  %v5669_v26 = vpack.c.bf16 %v3601_v5, %v3600_v4  ;;  %v5671_v28 = vpack.c.bf16 %v625_v12, %v624_v11  ;;  %v382_v31 = vadd.f32 %v5563_v33, %v343_v21  ;;  %4845 = vmatpush3.bf16.msra.mxu1 %v5593_v48  ;;  %v3604_v35 = vld [vmem:[%s6718_s1 + $0x290] sm:$0xff]  ;;  %v3605_v39 = vld [vmem:[%s6718_s1 + $0x298] sm:$0xff] }
  0x27   : > { %552 = vst [vmem:[#allocation2 + $0x178] sm:$0x3] %v5400_v7  ;;  %553 = vst [vmem:[#allocation2 + $0x180] sm:$0xff] %v5400_v7  ;;  %v345_v34 = vmul.f32 %v5558_v32, %v306_v17  ;;  %v5685_v36 = vsel %vm412_vm4, %v380_v15, %v445_v22  ;;  %vm413_vm5 = vcmp.ge.f32.partialorder %v381_v23, 0.0  ;;  %v446_v37 = vmul.f32 %v5583_v41, %v381_v23  ;;  %v308_v45 = vld [vmem:[%s5533_s19 + $0x50] sm:$0xff]  ;;  %v309_v46 = vld [vmem:[%s5533_s19 + $0x58] sm:$0xff] }
  0x28   : > { %554 = vst [vmem:[#allocation2 + $0x188] sm:$0xff] %v5400_v7  ;;  %555 = vst [vmem:[#allocation2 + $0x190] sm:$0x3] %v5400_v7  ;;  %v383_v38 = vadd.f32 %v5563_v33, %v344_v24  ;;  %4973 = vmatpush3.bf16.msra.mxu0 %v5595_v49  ;;  %4847 = vmatprep.subr.bf16.mxu1 %v5606_v55  ;;  %vm414_vm6 = vcmp.ge.f32.partialorder %v382_v31, 0.0  ;;  %v447_v40 = vmul.f32 %v5583_v41, %v382_v31  ;;  %v310_v51 = vld [vmem:[%s5533_s19 + $0x60] sm:$0xff]  ;;  %v626_v52 = vld [vmem:[%s6718_s1 + $0x10] sm:$0xff] }
  0x29   : > { %556 = vst [vmem:[#allocation2 + $0x198] sm:$0xff] %v5400_v7  ;;  %557 = vst [vmem:[#allocation2 + $0x1a0] sm:$0xff] %v5400_v7  ;;  %v384_v42 = vadd.f32 %v5563_v33, %v345_v34  ;;  %v346_v44 = vmul.f32 %v5558_v32, %v307_v25  ;;  %4975 = vmatprep.subr.bf16.mxu0 %v5622_v0  ;;  %v5701_v47 = vpack.c.bf16 %v3603_v30, %v3602_v29  ;;  %v627_v53 = vld [vmem:[%s6718_s1 + $0x18] sm:$0xff]  ;;  %v311_v58 = vld [vmem:[%s5533_s19 + $0x68] sm:$0xff] }
  0x2a   : > { %558 = vst [vmem:[#allocation2 + $0x1a8] sm:$0x3] %v5400_v7  ;;  %6750 = vst [vmem:[#allocation4_spill] sm:$0xff] %v5546_v27  ;;  %v444_v7 = vmul.f32 %v5583_v41, %v379_v61  ;;  %v5703_v48 = vsel %vm413_vm5, %v381_v23, %v446_v37  ;;  %vm415_vm7 = vcmp.ge.f32.partialorder %v383_v38, 0.0  ;;  %v448_v50 = vmul.f32 %v5583_v41, %v383_v38  ;;  %v3606_v60 = vld [vmem:[%s6718_s1 + $0x2a0] sm:$0xff]  ;;  %v3608_v15 = vld [vmem:[%s6718_s1 + $0x2b0] sm:$0xff] }
  0x2b   : > { %6751 = vst [vmem:[#allocation5_spill] sm:$0xff] %v5587_v43  ;;  %6752 = vst [vmem:[#allocation6_spill] sm:$0xff] %v5595_v49  ;;  %v5714_v54 = vsel %vm414_vm6, %v382_v31, %v447_v40  ;;  %vm416_vm8 = vcmp.ge.f32.partialorder %v384_v42, 0.0  ;;  %v449_v56 = vmul.f32 %v5583_v41, %v384_v42  ;;  %v385_v57 = vadd.f32 %v5563_v33, %v346_v44  ;;  %v3609_v16 = vld [vmem:[%s6718_s1 + $0x2b8] sm:$0xff]  ;;  %v641_v24 = vld [vmem:[#allocation2 + $0x9] sm:$0xff] }
  0x2c   : > { %6753 = vst [vmem:[#allocation7_spill] sm:$0xff] %v5622_v0  ;;  %560 = vst [vmem:[#allocation2 + $0x19] sm:$0xff] %v5624_v1  ;;  %v5659_v20 = vsel %vm411_vm3, %v379_v61, %v444_v7  ;;  %4849 = vmatpush3.bf16.msra.mxu1 %v5606_v55  ;;  %v5720_v59 = vpack.c.bf16 %v3605_v39, %v3604_v35  ;;  %v3607_v61 = vld [vmem:[%s6718_s1 + $0x2a8] sm:$0xff]  ;;  %v5730_v62 = vsel %vm415_vm7, %v383_v38, %v448_v50  ;;  %v312_v55 = vld [vmem:[%s5533_s19 + $0x70] sm:$0xff] }
  0x2d   : > { %561 = vst [vmem:[#allocation2 + $0x21] sm:$0xff] %v5648_v14  ;;  %562 = vst [vmem:[#allocation2 + $0x31] sm:$0xff] %v5657_v19  ;;  %v347_v63 = vmul.f32 %v5558_v32, %v308_v45  ;;  %v348_v2 = vmul.f32 %v5558_v32, %v309_v46  ;;  %4977 = vmatpush3.bf16.msra.mxu0 %v5622_v0  ;;  %4851 = vmatprep.subr.bf16.mxu1 %v5639_v10  ;;  %vm417_vm9 = vcmp.ge.f32.partialorder %v385_v57, 0.0  ;;  %v313_v23 = vld [vmem:[%s5533_s19 + $0x78] sm:$0xff]  ;;  %v628_v30 = vld [vmem:[%s6718_s1 + $0x20] sm:$0xff] }
  0x2e   : > { %563 = vst [vmem:[#allocation2 + $0x39] sm:$0xff] %v5659_v20  ;;  %6754 = vst [vmem:[#allocation8_spill] sm:$0xff] %v5669_v26  ;;  %v5739_v3 = vsel %vm416_vm8, %v384_v42, %v449_v56  ;;  %v450_v4 = vmul.f32 %v5583_v41, %v385_v57  ;;  %v349_v5 = vmul.f32 %v5558_v32, %v310_v51  ;;  %4979 = vmatprep.subr.bf16.mxu0 %v5669_v26  ;;  %v3610_v38 = vld [vmem:[%s6718_s1 + $0x2c0] sm:$0xff]  ;;  %v3611_v39 = vld [vmem:[%s6718_s1 + $0x2c8] sm:$0xff] }
  0x2f   : > { %564 = vst [vmem:[#allocation2 + $0x49] sm:$0xff] %v5685_v36  ;;  %565 = vst [vmem:[#allocation2 + $0x51] sm:$0xff] %v5703_v48  ;;  %v5744_v6 = vpack.c.bf16 %v627_v53, %v626_v52  ;;  %v386_v7 = vadd.f32 %v5563_v33, %v347_v63  ;;  %v387_v9 = vadd.f32 %v5563_v33, %v348_v2  ;;  %v314_v45 = vld [vmem:[%s5533_s19 + $0x80] sm:$0xff]  ;;  %v315_v51 = vld [vmem:[%s5533_s19 + $0x88] sm:$0xff] }
  0x30   : > { %566 = vst [vmem:[#allocation2 + $0x61] sm:$0xff] %v5714_v54  ;;  %567 = vst [vmem:[#allocation2 + $0x69] sm:$0xff] %v5730_v62  ;;  %v350_v11 = vmul.f32 %v5558_v32, %v311_v58  ;;  %v5750_v12 = vpack.c.bf16 %v3607_v61, %v3606_v60  ;;  %v5758_v17 = vsel %vm417_vm9, %v385_v57, %v450_v4  ;;  %4853 = vmatpush3.bf16.msra.mxu1 %v5639_v10  ;;  %v629_v10 = vld [vmem:[%s6718_s1 + $0x28] sm:$0xff]  ;;  %v316_v57 = vld [vmem:[%s5533_s19 + $0x90] sm:$0xff] }
  0x31   : > { %568 = vst [vmem:[#allocation2 + $0x79] sm:$0xff] %v5739_v3  ;;  %v388_v21 = vadd.f32 %v5563_v33, %v349_v5  ;;  %v351_v22 = vmul.f32 %v5558_v32, %v312_v55  ;;  %569 = vst [vmem:[#allocation2 + $0x81] sm:$0xff] %v5758_v17  ;;  %vm418_vm10 = vcmp.ge.f32.partialorder %v386_v7, 0.0  ;;  %v451_v25 = vmul.f32 %v5583_v41, %v386_v7  ;;  %v317_v58 = vld [vmem:[%s5533_s19 + $0x98] sm:$0xff]  ;;  %v630_v4 = vld [vmem:[%s6718_s1 + $0x30] sm:$0xff] }
  0x32   : > { %vm419_vm11 = vcmp.ge.f32.partialorder %v387_v9, 0.0  ;;  %v452_v29 = vmul.f32 %v5583_v41, %v387_v9  ;;  %4981 = vmatpush3.bf16.msra.mxu0 %v5669_v26  ;;  %4855 = vmatprep.subr.bf16.mxu1 %v5671_v28  ;;  %v389_v34 = vadd.f32 %v5563_v33, %v350_v11  ;;  %v5779_v37 = vpack.c.bf16 %v3609_v16, %v3608_v15  ;;  %v3613_v61 = vld [vmem:[%s6718_s1 + $0x2d8] sm:$0xff]  ;;  %v318_v15 = vld [vmem:[%s5533_s19 + $0xa0] sm:$0xff]  ;;  %v3571_v26 = vld [vmem:[%s6718_s1 + $0x188] sm:$0xff] }
  0x33   : > { %vm420_vm12 = vcmp.ge.f32.partialorder %v388_v21, 0.0  ;;  %v453_v31 = vmul.f32 %v5583_v41, %v388_v21  ;;  %v390_v35 = vadd.f32 %v5563_v33, %v351_v22  ;;  %4983 = vmatprep.subr.bf16.mxu0 %v5701_v47  ;;  %v5788_v40 = vsel %vm418_vm10, %v386_v7, %v451_v25  ;;  %4135 = vmatmul.mubr.f32.vlgmr.msra.gmra.mrb[0].mxu1 %v641_v24  ;;  %v631_v5 = vld [vmem:[%s6718_s1 + $0x38] sm:$0xff]  ;;  %v3643_v43 = vld [vmem:[%s6718_s1 + $0x3c8] sm:$0xff] }
  0x34   : > { %v5790_v42 = vsel %vm419_vm11, %v387_v9, %v452_v29  ;;  %v352_v44 = vmul.f32 %v5558_v32, %v313_v23  ;;  %570 = vst [vmem:[#allocation2 + $0x91] sm:$0xff] %v5788_v40  ;;  %vm421_vm13 = vcmp.ge.f32.partialorder %v389_v34, 0.0  ;;  %v454_v50 = vmul.f32 %v5583_v41, %v389_v34  ;;  %4857 = vmatpush3.bf16.msra.mxu1 %v5671_v28  ;;  %v3612_v28 = vld [vmem:[%s6718_s1 + $0x2d0] sm:$0xff]  ;;  %v319_v29 = vld [vmem:[%s5533_s19 + $0xa8] sm:$0xff]  ;;  %v3641_v49 = vld [vmem:[%s6718_s1 + $0x3b8] sm:$0xff] }
  0x35   : > { %571 = vst [vmem:[#allocation2 + $0x99] sm:$0xff] %v5790_v42  ;;  %v5796_v46 = vsel %vm420_vm12, %v388_v21, %v453_v31  ;;  %vm422_vm14 = vcmp.ge.f32.partialorder %v390_v35, 0.0  ;;  %4455 = vmatmul.mubr.f32.vlgmr.msra.gmra.mrb[0].mxu0 %v5648_v14  ;;  %v5802_v52 = vpack.c.bf16 %v629_v10, %v628_v30  ;;  %v455_v53 = vmul.f32 %v5583_v41, %v390_v35  ;;  %v320_v30 = vld [vmem:[%s5533_s19 + $0xb0] sm:$0xff] }
  0x36   : > { %572 = vst [vmem:[#allocation2 + $0xa9] sm:$0xff] %v5796_v46  ;;  %v391_v56 = vadd.f32 %v5563_v33, %v352_v44  ;;  %4985 = vmatpush3.bf16.msra.mxu0 %v5701_v47  ;;  %4137 = vmatprep.mubr.f32.mxu1 %v5624_v1  ;;  %v5811_v60 = vpack.c.bf16 %v3611_v39, %v3610_v38  ;;  %v634_v44 = vld [vmem:[%s6718_s1 + $0x50] sm:$0xff] }
  0x37   : > { %v5820_v63 = vsel %vm421_vm13, %v389_v34, %v454_v50  ;;  %v353_v2 = vmul.f32 %v5558_v32, %v314_v45  ;;  %4457 = vmatprep.mubr.f32.mxu0 %v5657_v19  ;;  %4987 = vmatprep.subr.bf16.mxu0 %v5720_v59  ;;  %v5827_v1 = vsel %vm422_vm14, %v390_v35, %v455_v53  ;;  %v321_v34 = vld [vmem:[%s5533_s19 + $0xb8] sm:$0xff] }
  0x38   : > { %573 = vst [vmem:[#allocation2 + $0xb1] sm:$0xff] %v5820_v63  ;;  %vm423_vm15 = vcmp.ge.f32.partialorder %v391_v56, 0.0  ;;  %v456_v47 = vmul.f32 %v5583_v41, %v391_v56  ;;  %v354_v55 = vmul.f32 %v5558_v32, %v315_v51  ;;  %4138 = vmatmul.mubr.f32.gmra.mrb[2].mxu1 %v5648_v14  ;;  %4859 = vmatprep.subr.bf16.mxu1 %v5744_v6  ;;  %574 = vst [vmem:[#allocation2 + $0xc1] sm:$0xff] %v5827_v1  ;;  %v635_v45 = vld [vmem:[%s6718_s1 + $0x58] sm:$0xff] }
  0x39   : > { %v392_v7 = vadd.f32 %v5563_v33, %v353_v2  ;;  %v355_v9 = vmul.f32 %v5558_v32, %v316_v57  ;;  %v356_v11 = vmul.f32 %v5558_v32, %v317_v58  ;;  %4458 = vmatmul.mubr.f32.gmra.mrb[2].mxu0 %v5659_v20  ;;  %4140 = vmatprep.mubr.f32.mxu1 %v5657_v19 }
  0x3a   : > { %v5846_v14 = vpack.c.bf16 %v3613_v61, %v3612_v28  ;;  %v5848_v16 = vsel %vm423_vm15, %v391_v56, %v456_v47  ;;  %v393_v21 = vadd.f32 %v5563_v33, %v354_v55  ;;  %4989 = vmatpush3.bf16.msra.mxu0 %v5720_v59  ;;  %4460 = vmatprep.mubr.f32.mxu0 %v5685_v36  ;;  %v322_v28 = vld [vmem:[%s5533_s19 + $0xc0] sm:$0xff]  ;;  %v323_v61 = vld [vmem:[%s5533_s19 + $0xc8] sm:$0xff]  ;;  %v324_v55 = vld [vmem:[%s5533_s19 + $0xd0] sm:$0xff] }
  0x3b   : > { %575 = vst [vmem:[#allocation2 + $0xc9] sm:$0xff] %v5848_v16  ;;  %vm424_vm0 = vcmp.ge.f32.partialorder %v392_v7, 0.0  ;;  %v457_v22 = vmul.f32 %v5583_v41, %v392_v7  ;;  %v394_v23 = vadd.f32 %v5563_v33, %v355_v9  ;;  %v395_v19 = vadd.f32 %v5563_v33, %v356_v11  ;;  %4991 = vmatprep.subr.bf16.mxu0 %v5750_v12 }
  0x3c   : > { %4861 = vmatpush3.bf16.msra.mxu1 %v5744_v6  ;;  %v4866_v24 = vpack.c.bf16 %v631_v5, %v630_v4  ;;  %vm425_vm1 = vcmp.ge.f32.partialorder %v393_v21, 0.0  ;;  %v458_v59 = vmul.f32 %v5583_v41, %v393_v21  ;;  %v357_v25 = vmul.f32 %v5558_v32, %v318_v15  ;;  %v632_v6 = vld [vmem:[%s6718_s1 + $0x40] sm:$0xff]  ;;  %v325_v15 = vld [vmem:[%s5533_s19 + $0xd8] sm:$0xff] }
  0x3d   : > { %4141 = vmatmul.mubr.f32.gmra.mrb[4].mxu1 %v5659_v20  ;;  %4863 = vmatprep.subr.bf16.mxu1 %v5802_v52  ;;  %v5865_v10 = vsel %vm424_vm0, %v392_v7, %v457_v22  ;;  %vm426_vm2 = vcmp.ge.f32.partialorder %v394_v23, 0.0  ;;  %v459_v31 = vmul.f32 %v5583_v41, %v394_v23  ;;  %vm427_vm3 = vcmp.ge.f32.partialorder %v395_v19, 0.0  ;;  %v633_v20 = vld [vmem:[%s6718_s1 + $0x48] sm:$0xff]  ;;  %v3614_v5 = vld [vmem:[%s6718_s1 + $0x2e0] sm:$0xff] }
  0x3e   : > { %4461 = vmatmul.mubr.f32.gmra.mrb[4].mxu0 %v5703_v48  ;;  %4143 = vmatprep.mubr.f32.mxu1 %v5685_v36  ;;  %576 = vst [vmem:[#allocation2 + $0xd9] sm:$0xff] %v5865_v10  ;;  %v5879_v35 = vsel %vm425_vm1, %v393_v21, %v458_v59  ;;  %v460_v38 = vmul.f32 %v5583_v41, %v395_v19 }
  0x3f   : > { %v396_v39 = vadd.f32 %v5563_v33, %v357_v25  ;;  %4993 = vmatpush3.bf16.msra.mxu0 %v5750_v12  ;;  %4463 = vmatprep.mubr.f32.mxu0 %v5714_v54  ;;  %577 = vst [vmem:[#allocation2 + $0xe1] sm:$0xff] %v5879_v35  ;;  %v5886_v36 = vsel %vm426_vm2, %v394_v23, %v459_v31  ;;  %v326_v31 = vld [vmem:[%s5533_s19 + $0xe0] sm:$0xff] }
  0x40   : > { %v358_v50 = vmul.f32 %v5558_v32, %v319_v29  ;;  %v359_v12 = vmul.f32 %v5558_v32, %v320_v30  ;;  %4995 = vmatprep.subr.bf16.mxu0 %v5779_v37  ;;  %4865 = vmatpush3.bf16.msra.mxu1 %v5802_v52  ;;  %578 = vst [vmem:[#allocation2 + $0xf1] sm:$0xff] %v5886_v36  ;;  %v6296_v0 = vld [vmem:[#allocation2 + $0xc0] sm:$0xff] }
  0x41   : > { %v5900_v51 = vsel %vm427_vm3, %v395_v19, %v460_v38  ;;  %vm428_vm4 = vcmp.ge.f32.partialorder %v396_v39, 0.0  ;;  %v461_v53 = vmul.f32 %v5583_v41, %v396_v39  ;;  %v360_v56 = vmul.f32 %v5558_v32, %v321_v34  ;;  %4144 = vmatmul.mubr.f32.gmra.mrb[6].mxu1 %v5703_v48  ;;  %4867 = vmatprep.subr.bf16.mxu1 %v4866_v24  ;;  %v3617_v38 = vld [vmem:[%s6718_s1 + $0x2f8] sm:$0xff] }
  0x42   : > { %v4870_v57 = vpack.c.bf16 %v633_v20, %v632_v6  ;;  %579 = vst [vmem:[#allocation2 + $0xf9] sm:$0xff] %v5900_v51  ;;  %v397_v58 = vadd.f32 %v5563_v33, %v358_v50  ;;  %v398_v52 = vadd.f32 %v5563_v33, %v359_v12  ;;  %4464 = vmatmul.mubr.f32.gmra.mrb[6].mxu0 %v5730_v62  ;;  %v3616_v20 = vld [vmem:[%s6718_s1 + $0x2f0] sm:$0xff]  ;;  %6767 = vst [vmem:[#allocation21_spill] sm:$0xff] %v6296_v0 }
  0x43   : > { %4146 = vmatprep.mubr.f32.mxu1 %v5714_v54  ;;  %v5912_v2 = vpack.c.bf16 %v635_v45, %v634_v44  ;;  %v5914_v47 = vsel %vm428_vm4, %v396_v39, %v461_v53  ;;  %v399_v48 = vadd.f32 %v5563_v33, %v360_v56  ;;  %4997 = vmatpush3.bf16.msra.mxu0 %v5779_v37  ;;  %v3615_v37 = vld [vmem:[%s6718_s1 + $0x2e8] sm:$0xff]  ;;  %v638_v12 = vld [vmem:[%s6718_s1 + $0x70] sm:$0xff]  ;;  %v639_v53 = vld [vmem:[%s6718_s1 + $0x78] sm:$0xff] }
  0x44   : > { %4466 = vmatprep.mubr.f32.mxu0 %v5739_v3  ;;  %580 = vst [vmem:[#allocation2 + $0x109] sm:$0xff] %v5914_v47  ;;  %vm429_vm5 = vcmp.ge.f32.partialorder %v397_v58, 0.0  ;;  %v462_v4 = vmul.f32 %v5583_v41, %v397_v58  ;;  %vm430_vm6 = vcmp.ge.f32.partialorder %v398_v52, 0.0  ;;  %v463_v54 = vmul.f32 %v5583_v41, %v398_v52  ;;  %4999 = vmatprep.subr.bf16.mxu0 %v5811_v60 }
  0x45   : > { %4869 = vmatpush3.bf16.msra.mxu1 %v4866_v24  ;;  %vm431_vm7 = vcmp.ge.f32.partialorder %v399_v48, 0.0  ;;  %v464_v7 = vmul.f32 %v5583_v41, %v399_v48  ;;  %v361_v9 = vmul.f32 %v5558_v32, %v322_v28  ;;  %v362_v11 = vmul.f32 %v5558_v32, %v323_v61  ;;  %v637_v24 = vld [vmem:[%s6718_s1 + $0x68] sm:$0xff]  ;;  %v3618_v28 = vld [vmem:[%s6718_s1 + $0x300] sm:$0xff] }
  0x46   : > { %4147 = vmatmul.mubr.f32.gmra.mrb[8].mxu1 %v5730_v62  ;;  %4871 = vmatprep.subr.bf16.mxu1 %v4870_v57  ;;  %v5935_v21 = vsel %vm429_vm5, %v397_v58, %v462_v4  ;;  %v5937_v22 = vsel %vm430_vm6, %v398_v52, %v463_v54  ;;  %v363_v23 = vmul.f32 %v5558_v32, %v324_v55  ;;  %v636_v62 = vld [vmem:[%s6718_s1 + $0x60] sm:$0xff]  ;;  %v3619_v61 = vld [vmem:[%s6718_s1 + $0x308] sm:$0xff]  ;;  %v328_v4 = vld [vmem:[%s5533_s19 + $0xf0] sm:$0xff] }
  0x47   : > { %4467 = vmatmul.mubr.f32.gmra.mrb[8].mxu0 %v5758_v17  ;;  %4149 = vmatprep.mubr.f32.mxu1 %v5739_v3  ;;  %581 = vst [vmem:[#allocation2 + $0x111] sm:$0xff] %v5935_v21  ;;  %582 = vst [vmem:[#allocation2 + $0x121] sm:$0xff] %v5937_v22  ;;  %v5944_v19 = vsel %vm431_vm7, %v399_v48, %v464_v7  ;;  %v400_v59 = vadd.f32 %v5563_v33, %v361_v9  ;;  %v3554_v54 = vld [vmem:[%s6718_s1 + $0x100] sm:$0xff] }
  0x48   : > { %v401_v25 = vadd.f32 %v5563_v33, %v362_v11  ;;  %5001 = vmatpush3.bf16.msra.mxu0 %v5811_v60  ;;  %4469 = vmatprep.mubr.f32.mxu0 %v5788_v40  ;;  %v5006_v3 = vpack.c.bf16 %v3615_v37, %v3614_v5  ;;  %583 = vst [vmem:[#allocation2 + $0x129] sm:$0xff] %v5944_v19  ;;  %v327_v60 = vld [vmem:[%s5533_s19 + $0xe8] sm:$0xff]  ;;  %v329_v37 = vld [vmem:[%s5533_s19 + $0xf8] sm:$0xff] }
  0x49   : > { %v402_v29 = vadd.f32 %v5563_v33, %v363_v23  ;;  %v364_v30 = vmul.f32 %v5558_v32, %v325_v15  ;;  %5003 = vmatprep.subr.bf16.mxu0 %v5846_v14  ;;  %4873 = vmatpush3.bf16.msra.mxu1 %v4870_v57  ;;  %vm432_vm8 = vcmp.ge.f32.partialorder %v400_v59, 0.0  ;;  %v465_v34 = vmul.f32 %v5583_v41, %v400_v59  ;;  %v3555_v5 = vld [vmem:[%s6718_s1 + $0x108] sm:$0xff]  ;;  %v6022_v7 = vld [vmem:[#allocation2 + $0x1a] sm:$0xff]  ;;  %v3620_v23 = vld [vmem:[%s6718_s1 + $0x310] sm:$0xff] }
  0x4a   : > { %vm433_vm9 = vcmp.ge.f32.partialorder %v401_v25, 0.0  ;;  %v466_v6 = vmul.f32 %v5583_v41, %v401_v25  ;;  %4150 = vmatmul.mubr.f32.gmra.mrb[10].mxu1 %v5758_v17  ;;  %4875 = vmatprep.subr.bf16.mxu1 %v5912_v2  ;;  %v4878_v39 = vpack.c.bf16 %v637_v24, %v636_v62  ;;  %v365_v56 = vmul.f32 %v5558_v32, %v326_v31  ;;  %v3621_v62 = vld [vmem:[%s6718_s1 + $0x318] sm:$0xff] }
  0x4b   : > { %vm434_vm10 = vcmp.ge.f32.partialorder %v402_v29, 0.0  ;;  %v467_v44 = vmul.f32 %v5583_v41, %v402_v29  ;;  %v403_v45 = vadd.f32 %v5563_v33, %v364_v30  ;;  %4470 = vmatmul.mubr.f32.gmra.mrb[10].mxu0 %v5790_v42  ;;  %4152 = vmatprep.mubr.f32.mxu1 %v5788_v40  ;;  %v5976_v17 = vsel %vm432_vm8, %v400_v59, %v465_v34  ;;  %v6048_v30 = vld [vmem:[#allocation2 + $0x32] sm:$0xff]  ;;  %v3623_v34 = vld [vmem:[%s6718_s1 + $0x328] sm:$0xff] }
  0x4c   : > { %v5978_v50 = vsel %vm433_vm9, %v401_v25, %v466_v6  ;;  %5005 = vmatpush3.bf16.msra.mxu0 %v5846_v14  ;;  %4472 = vmatprep.mubr.f32.mxu0 %v5796_v46  ;;  %584 = vst [vmem:[#allocation2 + $0x139] sm:$0xff] %v5976_v17  ;;  %v366_v58 = vmul.f32 %v5558_v32, %v327_v60 }
  0x4d   : > { %585 = vst [vmem:[#allocation2 + $0x141] sm:$0xff] %v5978_v50  ;;  %v5991_v40 = vsel %vm434_vm10, %v402_v29, %v467_v44  ;;  %vm435_vm11 = vcmp.ge.f32.partialorder %v403_v45, 0.0  ;;  %v468_v57 = vmul.f32 %v5583_v41, %v403_v45  ;;  %5007 = vmatprep.subr.bf16.mxu0 %v5006_v3  ;;  %v5010_v52 = vpack.c.bf16 %v3617_v38, %v3616_v20  ;;  %v6070_v20 = vld [vmem:[#allocation2 + $0x4a] sm:$0xff]  ;;  %v6085_v44 = vld [vmem:[#allocation2 + $0x62] sm:$0xff] }
  0x4e   : > { %4877 = vmatpush3.bf16.msra.mxu1 %v5912_v2  ;;  %586 = vst [vmem:[#allocation2 + $0x151] sm:$0xff] %v5991_v40  ;;  %v404_v14 = vadd.f32 %v5563_v33, %v365_v56  ;;  %v4882_v55 = vpack.c.bf16 %v639_v53, %v638_v12  ;;  %v405_v2 = vadd.f32 %v5563_v33, %v366_v58  ;;  %v3627_v12 = vld [vmem:[%s6718_s1 + $0x348] sm:$0xff]  ;;  %v6099_v53 = vld [vmem:[#allocation2 + $0x7a] sm:$0xff]  ;;  %v3628_v56 = vld [vmem:[%s6718_s1 + $0x350] sm:$0xff] }
  0x4f   : > { %4153 = vmatmul.mubr.f32.gmra.mrb[12].mxu1 %v5790_v42  ;;  %4879 = vmatprep.subr.bf16.mxu1 %v4878_v39  ;;  %v6005_v48 = vsel %vm435_vm11, %v403_v45, %v468_v57  ;;  %v5014_v9 = vpack.c.bf16 %v3619_v61, %v3618_v28  ;;  %v367_v15 = vmul.f32 %v5558_v32, %v328_v4  ;;  %v3626_v45 = vld [vmem:[%s6718_s1 + $0x340] sm:$0xff]  ;;  %v3629_v57 = vld [vmem:[%s6718_s1 + $0x358] sm:$0xff]  ;;  %v6127_v28 = vld [vmem:[#allocation2 + $0xaa] sm:$0xff] }
  0x50   : > { %4473 = vmatmul.mubr.f32.gmra.mrb[12].mxu0 %v5820_v63  ;;  %4155 = vmatprep.mubr.f32.mxu1 %v5796_v46  ;;  %587 = vst [vmem:[#allocation2 + $0x159] sm:$0xff] %v6005_v48  ;;  %vm436_vm12 = vcmp.ge.f32.partialorder %v404_v14, 0.0  ;;  %v469_v42 = vmul.f32 %v5583_v41, %v404_v14  ;;  %vm437_vm13 = vcmp.ge.f32.partialorder %v405_v2, 0.0  ;;  %v470_v46 = vmul.f32 %v5583_v41, %v405_v2  ;;  %v6113_v58 = vld [vmem:[#allocation2 + $0x92] sm:$0xff]  ;;  %v3634_v4 = vld [vmem:[%s6718_s1 + $0x380] sm:$0xff] }
  0x51   : > { %5009 = vmatpush3.bf16.msra.mxu0 %v5006_v3  ;;  %4475 = vmatprep.mubr.f32.mxu0 %v5827_v1  ;;  %v6037_v59 = vpack.c.bf16 %v3555_v5, %v3554_v54  ;;  %v368_v25 = vmul.f32 %v5558_v32, %v329_v37  ;;  %v6045_v3 = vld [vmem:[#allocation2 + $0x22] sm:$0xff]  ;;  %v5018_v31 = vpack.c.bf16 %v3621_v62, %v3620_v23  ;;  %v3632_v61 = vld [vmem:[%s6718_s1 + $0x370] sm:$0xff]  ;;  %v6155_v54 = vld [vmem:[#allocation2 + $0xda] sm:$0xff] }
  0x52   : > { %5011 = vmatprep.subr.bf16.mxu0 %v5010_v52  ;;  %4881 = vmatpush3.bf16.msra.mxu1 %v4878_v39  ;;  %v6024_v11 = vsel %vm436_vm12, %v404_v14, %v469_v42  ;;  %v6035_v24 = vsel %vm437_vm13, %v405_v2, %v470_v46  ;;  %v6083_v39 = vld [vmem:[#allocation2 + $0x52] sm:$0xff]  ;;  %v3631_v14 = vld [vmem:[%s6718_s1 + $0x368] sm:$0xff]  ;;  %v6167_v46 = vld [vmem:[#allocation2] sm:$0xff] }
  0x53   : > { %6755 = vst [vmem:[#allocation9_spill] sm:$0xff] %v6024_v11  ;;  %4156 = vmatmul.mubr.f32.gmra.mrb[14].mxu1 %v5820_v63  ;;  %4883 = vmatprep.subr.bf16.mxu1 %v4882_v55  ;;  %588 = vst [vmem:[#allocation2 + $0x169] sm:$0xff] %v6024_v11  ;;  %v406_v63 = vadd.f32 %v5563_v33, %v367_v15  ;;  %v407_v29 = vadd.f32 %v5563_v33, %v368_v25  ;;  %v6141_v2 = vld [vmem:[#allocation2 + $0xc2] sm:$0xff]  ;;  %v3556_v5 = vld [vmem:[%s6718_s1 + $0x110] sm:$0xff] }
  0x54   : > { %6756 = vst [vmem:[#allocation10_spill] sm:$0xff] %v6035_v24  ;;  %4476 = vmatmul.mubr.f32.gmra.mrb[14].mxu0 %v5848_v16  ;;  %4158 = vmatprep.mubr.f32.mxu1 %v5827_v1  ;;  %589 = vst [vmem:[#allocation2 + $0x171] sm:$0xff] %v6035_v24  ;;  %v3622_v1 = vld [vmem:[%s6718_s1 + $0x320] sm:$0xff]  ;;  %v3635_v42 = vld [vmem:[%s6718_s1 + $0x388] sm:$0xff] }
  0x55   : > { %5013 = vmatpush3.bf16.msra.mxu0 %v5010_v52  ;;  %4534 = vmatprep.mubr.f32.mxu0 %v6022_v7  ;;  %vm438_vm14 = vcmp.ge.f32.partialorder %v406_v63, 0.0  ;;  %v471_v32 = vmul.f32 %v5583_v41, %v406_v63  ;;  %vm439_vm15 = vcmp.ge.f32.partialorder %v407_v29, 0.0  ;;  %v472_v33 = vmul.f32 %v5583_v41, %v407_v29  ;;  %v3624_v41 = vld [vmem:[%s6718_s1 + $0x330] sm:$0xff]  ;;  %v3630_v52 = vld [vmem:[%s6718_s1 + $0x360] sm:$0xff]  ;;  %v3557_v37 = vld [vmem:[%s6718_s1 + $0x118] sm:$0xff] }
  0x56   : > { %5015 = vmatprep.subr.bf16.mxu0 %v5014_v9  ;;  %4885 = vmatpush3.bf16.msra.mxu1 %v4882_v55  ;;  %v5022_v38 = vpack.c.bf16 %v3623_v34, %v3622_v1  ;;  %v3633_v55 = vld [vmem:[%s6718_s1 + $0x378] sm:$0xff]  ;;  %v4890_v62 = vpack.c.bf16 %v3557_v37, %v3556_v5  ;;  %v3558_v25 = vld [vmem:[%s6718_s1 + $0x120] sm:$0xff]  ;;  %v6195_v1 = vld [vmem:[#allocation2 + $0x10a] sm:$0xff] }
  0x57   : > { %4159 = vmatmul.mubr.f32.gmra.mrb[16].mxu1 %v5848_v16  ;;  %4887 = vmatprep.subr.bf16.mxu1 %v6037_v59  ;;  %v6062_v6 = vsel %vm438_vm14, %v406_v63, %v471_v32  ;;  %v6065_v16 = vld [vmem:[#allocation2 + $0x3a] sm:$0xff]  ;;  %v6067_v60 = vsel %vm439_vm15, %v407_v29, %v472_v33  ;;  %v6175_v23 = vld [vmem:[#allocation2 + $0xf2] sm:$0xff]  ;;  %v3559_v63 = vld [vmem:[%s6718_s1 + $0x128] sm:$0xff] }
  0x58   : > { %4535 = vmatmul.mubr.f32.vlgmr.msra.gmra.mrb[0].mxu0 %v6045_v3  ;;  %4161 = vmatprep.mubr.f32.mxu1 %v5865_v10  ;;  %6757 = vst [vmem:[#allocation11_spill] sm:$0xff] %v6062_v6  ;;  %6758 = vst [vmem:[#allocation12_spill] sm:$0xff] %v6067_v60  ;;  %v3625_v10 = vld [vmem:[%s6718_s1 + $0x338] sm:$0xff]  ;;  %v6187_v29 = vld [vmem:[#allocation2 + $0x20] sm:$0xff]  ;;  %v4894_v34 = vpack.c.bf16 %v3559_v63, %v3558_v25 }
  0x59   : > { %5017 = vmatpush3.bf16.msra.mxu0 %v5014_v9  ;;  %4537 = vmatprep.mubr.f32.mxu0 %v6048_v30  ;;  %590 = vst [vmem:[#allocation2 + $0x181] sm:$0xff] %v6062_v6  ;;  %591 = vst [vmem:[#allocation2 + $0x189] sm:$0xff] %v6067_v60  ;;  %v6171_v9 = vld [vmem:[#allocation2 + $0xe2] sm:$0xff]  ;;  %v6173_v15 = vld [vmem:[#allocation2 + $0x18] sm:$0xff] }
  0x5a   : > { %5019 = vmatprep.subr.bf16.mxu0 %v5018_v31  ;;  %v6193_v32 = vld [vmem:[#allocation2 + $0x30] sm:$0xff]  ;;  %v3561_v33 = vld [vmem:[%s6718_s1 + $0x138] sm:$0xff]  ;;  %v3566_v37 = vld [vmem:[%s6718_s1 + $0x160] sm:$0xff] }
  0x5b   : > { %4162 = vmatmul.mubr.f32.gmra.mrb[18].mxu1 %v5879_v35  ;;  %v5026_v35 = vpack.c.bf16 %v3625_v10, %v3624_v41  ;;  %v6209_v41 = vld [vmem:[#allocation2 + $0x112] sm:$0xff]  ;;  %v6211_v10 = vld [vmem:[#allocation2 + $0x48] sm:$0xff]  ;;  %v6260_v25 = vld [vmem:[#allocation2 + $0x80] sm:$0xff] }
  0x5c   : > { %4538 = vmatmul.mubr.f32.gmra.mrb[2].mxu0 %v6065_v16  ;;  %4164 = vmatprep.mubr.f32.mxu1 %v5886_v36  ;;  %v6097_v36 = vld [vmem:[#allocation2 + $0x6a] sm:$0xff]  ;;  %6762 = vst [vmem:[#allocation16_spill] sm:$0xff] %v6260_v25  ;;  %v6263_v63 = vld [vmem:[#allocation2 + $0x15a] sm:$0xff] }
  0x5d   : > { %4540 = vmatprep.mubr.f32.mxu0 %v6070_v20  ;;  %5021 = vmatpush3.bf16.msra.mxu0 %v5018_v31  ;;  %v6191_v31 = vld [vmem:[#allocation2 + $0xfa] sm:$0xff]  ;;  %v6294_v60 = vld [vmem:[#allocation2 + $0xb0] sm:$0xff] }
  0x5e   : > { %5023 = vmatprep.subr.bf16.mxu0 %v5022_v38  ;;  %6766 = vst [vmem:[#allocation20_spill] sm:$0xff] %v6294_v60  ;;  %v3637_v6 = vld [vmem:[%s6718_s1 + $0x398] sm:$0xff]  ;;  %v6352_v27 = vld [vmem:[#allocation2 + $0x110] sm:$0xff] }
  0x5f   : > { %4165 = vmatmul.mubr.f32.gmra.mrb[20].mxu1 %v5900_v51  ;;  %v5030_v51 = vpack.c.bf16 %v3627_v12, %v3626_v45  ;;  %v3562_v12 = vld [vmem:[%s6718_s1 + $0x140] sm:$0xff] }
  0x60   : > { %4541 = vmatmul.mubr.f32.gmra.mrb[4].mxu0 %v6083_v39  ;;  %4167 = vmatprep.mubr.f32.mxu1 %v5914_v47  ;;  %v6111_v47 = vld [vmem:[#allocation2 + $0x82] sm:$0xff] }
  0x61   : > { %4543 = vmatprep.mubr.f32.mxu0 %v6085_v44  ;;  %5025 = vmatpush3.bf16.msra.mxu0 %v5022_v38  ;;  %v6206_v38 = vld [vmem:[#allocation2 + $0x38] sm:$0xff] }
  0x62   : > { %5027 = vmatprep.subr.bf16.mxu0 %v5026_v35 }
  0x63   : > { %4168 = vmatmul.mubr.f32.gmra.mrb[22].mxu1 %v5935_v21  ;;  %v5034_v21 = vpack.c.bf16 %v3629_v57, %v3628_v56  ;;  %v6224_v56 = vld [vmem:[#allocation2 + $0x50] sm:$0xff] }
  0x64   : > { %4544 = vmatmul.mubr.f32.gmra.mrb[6].mxu0 %v6097_v36  ;;  %4170 = vmatprep.mubr.f32.mxu1 %v5937_v22  ;;  %v6125_v22 = vld [vmem:[#allocation2 + $0x9a] sm:$0xff]  ;;  %v6227_v57 = vld [vmem:[#allocation2 + $0x12a] sm:$0xff] }
  0x65   : > { %4546 = vmatprep.mubr.f32.mxu0 %v6099_v53  ;;  %5029 = vmatpush3.bf16.msra.mxu0 %v5026_v35  ;;  %v6213_v35 = vld [vmem:[#allocation2 + $0x122] sm:$0xff] }
  0x66   : > { %5031 = vmatprep.subr.bf16.mxu0 %v5030_v51 }
  0x67   : > { %4171 = vmatmul.mubr.f32.gmra.mrb[24].mxu1 %v5944_v19  ;;  %v5038_v19 = vpack.c.bf16 %v3631_v14, %v3630_v52  ;;  %v6231_v52 = vld [vmem:[#allocation2 + $0x13a] sm:$0xff] }
  0x68   : > { %4547 = vmatmul.mubr.f32.gmra.mrb[8].mxu0 %v6111_v47  ;;  %4173 = vmatprep.mubr.f32.mxu1 %v5976_v17  ;;  %v6139_v17 = vld [vmem:[#allocation2 + $0xb2] sm:$0xff] }
  0x69   : > { %4549 = vmatprep.mubr.f32.mxu0 %v6113_v58  ;;  %5033 = vmatpush3.bf16.msra.mxu0 %v5030_v51  ;;  %v3563_v51 = vld [vmem:[%s6718_s1 + $0x148] sm:$0xff] }
  0x6a   : > { %5035 = vmatprep.subr.bf16.mxu0 %v5034_v21  ;;  %v4902_v14 = vpack.c.bf16 %v3563_v51, %v3562_v12  ;;  %v3569_v12 = vld [vmem:[%s6718_s1 + $0x178] sm:$0xff] }
  0x6b   : > { %4174 = vmatmul.mubr.f32.gmra.mrb[26].mxu1 %v5978_v50  ;;  %v5042_v50 = vpack.c.bf16 %v3633_v55, %v3632_v61  ;;  %v3565_v61 = vld [vmem:[%s6718_s1 + $0x158] sm:$0xff]  ;;  %v6242_v55 = vld [vmem:[#allocation2 + $0x68] sm:$0xff] }
  0x6c   : > { %4550 = vmatmul.mubr.f32.gmra.mrb[10].mxu0 %v6125_v22  ;;  %4176 = vmatprep.mubr.f32.mxu1 %v5991_v40  ;;  %v6153_v40 = vld [vmem:[#allocation2 + $0xca] sm:$0xff]  ;;  %6760 = vst [vmem:[#allocation14_spill] sm:$0xff] %v6242_v55  ;;  %v6278_v51 = vld [vmem:[#allocation2 + $0x98] sm:$0xff] }
  0x6d   : > { %4552 = vmatprep.mubr.f32.mxu0 %v6127_v28  ;;  %5037 = vmatpush3.bf16.msra.mxu0 %v5034_v21  ;;  %v6229_v21 = vld [vmem:[#allocation2 + $0x60] sm:$0xff]  ;;  %6764 = vst [vmem:[#allocation18_spill] sm:$0xff] %v6278_v51 }
  0x6e   : > { %5039 = vmatprep.subr.bf16.mxu0 %v5038_v19  ;;  %6759 = vst [vmem:[#allocation13_spill] sm:$0xff] %v6229_v21 }
  0x6f   : > { %4177 = vmatmul.mubr.f32.gmra.mrb[28].mxu1 %v6005_v48  ;;  %v6157_v48 = vpack.c.bf16 %v3635_v42, %v3634_v4  ;;  %v6247_v4 = vld [vmem:[#allocation2 + $0x78] sm:$0xff] }
  0x70   : > { %4553 = vmatmul.mubr.f32.gmra.mrb[12].mxu0 %v6139_v17  ;;  %4179 = vmatprep.mubr.f32.mxu1 %v6024_v11  ;;  %6761 = vst [vmem:[#allocation15_spill] sm:$0xff] %v6247_v4  ;;  %v6249_v42 = vld [vmem:[#allocation2 + $0x152] sm:$0xff]  ;;  %v3642_v11 = vld [vmem:[%s6718_s1 + $0x3c0] sm:$0xff] }
  0x71   : > { %4555 = vmatprep.mubr.f32.mxu0 %v6141_v2  ;;  %5041 = vmatpush3.bf16.msra.mxu0 %v5038_v19  ;;  %v3564_v19 = vld [vmem:[%s6718_s1 + $0x150] sm:$0xff] }
  0x72   : > { %5043 = vmatprep.subr.bf16.mxu0 %v5042_v50  ;;  %v4906_v5 = vpack.c.bf16 %v3565_v61, %v3564_v19  ;;  %v6283_v19 = vld [vmem:[#allocation2 + $0xa8] sm:$0xff] }
  0x73   : > { %4180 = vmatmul.mubr.f32.gmra.mrb[30].mxu1 %v6035_v24  ;;  %6765 = vst [vmem:[#allocation19_spill] sm:$0xff] %v6283_v19  ;;  %v2087_v61 = vld [vmem:[#allocation2 + $0x182] sm:$0xff] }
  0x74   : > { %4556 = vmatmul.mubr.f32.gmra.mrb[14].mxu0 %v6153_v40  ;;  %4214 = vmatprep.mubr.f32.mxu1 %v6167_v46  ;;  %v6323_v24 = vld [vmem:[#allocation2 + $0xe0] sm:$0xff] }
  0x75   : > { %4558 = vmatprep.mubr.f32.mxu0 %v6155_v54  ;;  %5045 = vmatpush3.bf16.msra.mxu0 %v5042_v50  ;;  %v6245_v50 = vld [vmem:[#allocation2 + $0x142] sm:$0xff] }
  0x76   : > { %5047 = vmatprep.subr.bf16.mxu0 %v6157_v48 }
  0x77   : > { %4215 = vmatmul.mubr.f32.vlgmr.msra.gmra.mrb[0].mxu1 %v6167_v46 }
  0x78   : > { %4559 = vmatmul.mubr.f32.gmra.mrb[16].mxu0 %v6171_v9  ;;  %4889 = vmatpush3.bf16.msra.mxu1 %v6037_v59  ;;  %v3560_v59 = vld [vmem:[%s6718_s1 + $0x130] sm:$0xff] }
  0x79   : > { %4217 = vmatprep.mubr.f32.mxu1 %v6173_v15  ;;  %4561 = vmatprep.mubr.f32.mxu0 %v6175_v23  ;;  %v4898_v45 = vpack.c.bf16 %v3561_v33, %v3560_v59  ;;  %v6267_v59 = vld [vmem:[#allocation2 + $0x16a] sm:$0xff] }
  0x7a   : > { %4891 = vmatprep.subr.bf16.mxu1 %v4890_v62 }
  0x7b   : > { %4218 = vmatmul.mubr.f32.gmra.mrb[2].mxu1 %v6187_v29 }
  0x7c   : > { %4562 = vmatmul.mubr.f32.gmra.mrb[18].mxu0 %v6191_v31  ;;  %4220 = vmatprep.mubr.f32.mxu1 %v6193_v32 }
  0x7d   : > { %4564 = vmatprep.mubr.f32.mxu0 %v6195_v1  ;;  %4893 = vmatpush3.bf16.msra.mxu1 %v4890_v62  ;;  %v3567_v62 = vld [vmem:[%s6718_s1 + $0x168] sm:$0xff] }
  0x7e   : > { %4895 = vmatprep.subr.bf16.mxu1 %v4894_v34  ;;  %v4910_v33 = vpack.c.bf16 %v3567_v62, %v3566_v37  ;;  %v3570_v62 = vld [vmem:[%s6718_s1 + $0x180] sm:$0xff] }
  0x7f   : > { %4221 = vmatmul.mubr.f32.gmra.mrb[4].mxu1 %v6206_v38 }
  0x80   : > { %4565 = vmatmul.mubr.f32.gmra.mrb[20].mxu0 %v6209_v41  ;;  %4223 = vmatprep.mubr.f32.mxu1 %v6211_v10 }
  0x81   : > { %4567 = vmatprep.mubr.f32.mxu0 %v6213_v35  ;;  %4897 = vmatpush3.bf16.msra.mxu1 %v4894_v34  ;;  %v6265_v34 = vld [vmem:[#allocation2 + $0x90] sm:$0xff] }
  0x82   : > { %4899 = vmatprep.subr.bf16.mxu1 %v4898_v45  ;;  %6763 = vst [vmem:[#allocation17_spill] sm:$0xff] %v6265_v34 }
  0x83   : > { %4224 = vmatmul.mubr.f32.gmra.mrb[6].mxu1 %v6224_v56 }
  0x84   : > { %4568 = vmatmul.mubr.f32.gmra.mrb[22].mxu0 %v6227_v57  ;;  %4226 = vmatprep.mubr.f32.mxu1 %v6229_v21 }
  0x85   : > { %4570 = vmatprep.mubr.f32.mxu0 %v6231_v52  ;;  %4901 = vmatpush3.bf16.msra.mxu1 %v4898_v45  ;;  %v3568_v45 = vld [vmem:[%s6718_s1 + $0x170] sm:$0xff] }
  0x86   : > { %4903 = vmatprep.subr.bf16.mxu1 %v4902_v14  ;;  %v4914_v37 = vpack.c.bf16 %v3569_v12, %v3568_v45  ;;  %v6298_v45 = vpack.c.bf16 %v3571_v26, %v3570_v62  ;;  %v3636_v12 = vld [vmem:[%s6718_s1 + $0x390] sm:$0xff]  ;;  %v3638_v62 = vld [vmem:[%s6718_s1 + $0x3a0] sm:$0xff] }
  0x87   : > { %4227 = vmatmul.mubr.f32.gmra.mrb[8].mxu1 %v6242_v55  ;;  %v5050_v26 = vpack.c.bf16 %v3637_v6, %v3636_v12  ;;  %v6327_v6 = vld [vmem:[#allocation2 + $0xf0] sm:$0xff] }
  0x88   : > { %4571 = vmatmul.mubr.f32.gmra.mrb[24].mxu0 %v6245_v50  ;;  %4229 = vmatprep.mubr.f32.mxu1 %v6247_v4  ;;  %v3640_v12 = vld [vmem:[%s6718_s1 + $0x3b0] sm:$0xff] }
  0x89   : > { %4573 = vmatprep.mubr.f32.mxu0 %v6249_v42  ;;  %4905 = vmatpush3.bf16.msra.mxu1 %v4902_v14  ;;  %v6281_v14 = vld [vmem:[#allocation2 + $0x172] sm:$0xff] }
  0x8a   : > { %4907 = vmatprep.subr.bf16.mxu1 %v4906_v5 }
  0x8b   : > { %4230 = vmatmul.mubr.f32.gmra.mrb[10].mxu1 %v6260_v25 }
  0x8c   : > { %4574 = vmatmul.mubr.f32.gmra.mrb[26].mxu0 %v6263_v63  ;;  %4232 = vmatprep.mubr.f32.mxu1 %v6265_v34 }
  0x8d   : > { %4576 = vmatprep.mubr.f32.mxu0 %v6267_v59  ;;  %4909 = vmatpush3.bf16.msra.mxu1 %v4906_v5  ;;  %v2088_v5 = vld [vmem:[#allocation2 + $0x18a] sm:$0xff] }
  0x8e   : > { %4911 = vmatprep.subr.bf16.mxu1 %v4910_v33 }
  0x8f   : > { %4233 = vmatmul.mubr.f32.gmra.mrb[12].mxu1 %v6278_v51 }
  0x90   : > { %4577 = vmatmul.mubr.f32.gmra.mrb[28].mxu0 %v6281_v14  ;;  %4235 = vmatprep.mubr.f32.mxu1 %v6283_v19 }
  0x91   : > { %4579 = vmatprep.mubr.f32.mxu0 %v2087_v61  ;;  %4913 = vmatpush3.bf16.msra.mxu1 %v4910_v33  ;;  %v6308_v61 = vld [vmem:[#allocation2 + $0xc8] sm:$0xff]  ;;  %v6311_v33 = vld [vmem:[#allocation2 + $0xd8] sm:$0xff] }
  0x92   : > { %4915 = vmatprep.subr.bf16.mxu1 %v4914_v37  ;;  %6768 = vst [vmem:[#allocation22_spill] sm:$0xff] %v6308_v61 }
  0x93   : > { %4236 = vmatmul.mubr.f32.gmra.mrb[14].mxu1 %v6294_v60 }
  0x94   : > { %4580 = vmatmul.mubr.f32.gmra.mrb[30].mxu0 %v2088_v5  ;;  %4238 = vmatprep.mubr.f32.mxu1 %v6296_v0  ;;  %v3639_v5 = vld [vmem:[%s6718_s1 + $0x3a8] sm:$0xff] }
  0x95   : > { %4614 = vmatprep.mubr.f32.mxu0 %v6193_v32  ;;  %4917 = vmatpush3.bf16.msra.mxu1 %v4914_v37  ;;  %v5054_v37 = vpack.c.bf16 %v3639_v5, %v3638_v62  ;;  %v6341_v62 = vld [vmem:[#allocation2 + $0x108] sm:$0xff]  ;;  %v5058_v5 = vpack.c.bf16 %v3641_v49, %v3640_v12  ;;  %v5062_v49 = vpack.c.bf16 %v3643_v43, %v3642_v11  ;;  %v3644_v12 = vld [vmem:[%s6718_s1 + $0x3d0] sm:$0xff]  ;;  %v3646_v11 = vld [vmem:[%s6718_s1 + $0x3e0] sm:$0xff] }
  0x96   : > { %4919 = vmatprep.subr.bf16.mxu1 %v6298_v45 }
  0x97   : > { %4239 = vmatmul.mubr.f32.gmra.mrb[16].mxu1 %v6308_v61 }
  0x98   : > { %4615 = vmatmul.mubr.f32.vlgmr.msra.gmra.mrb[0].mxu0 %v6206_v38  ;;  %4241 = vmatprep.mubr.f32.mxu1 %v6311_v33 }
  0x99   : > { %5049 = vmatpush3.bf16.msra.mxu0 %v6157_v48  ;;  %4617 = vmatprep.mubr.f32.mxu0 %v6211_v10  ;;  %v6338_v48 = vld [vmem:[#allocation2 + $0xf8] sm:$0xff] }
  0x9a   : > { %5051 = vmatprep.subr.bf16.mxu0 %v5050_v26 }
  0x9b   : > { %4242 = vmatmul.mubr.f32.gmra.mrb[18].mxu1 %v6323_v24 }
  0x9c   : > { %4618 = vmatmul.mubr.f32.gmra.mrb[2].mxu0 %v6224_v56  ;;  %4244 = vmatprep.mubr.f32.mxu1 %v6327_v6 }
  0x9d   : > { %4620 = vmatprep.mubr.f32.mxu0 %v6229_v21  ;;  %5053 = vmatpush3.bf16.msra.mxu0 %v5050_v26  ;;  %v6355_v26 = vld [vmem:[#allocation2 + $0x120] sm:$0xff]  ;;  %v1140_v21 = vld [vmem:[#allocation2 + $0xa] sm:$0xff] }
  0x9e   : > { %5055 = vmatprep.subr.bf16.mxu0 %v5054_v37 }
  0x9f   : > { %4245 = vmatmul.mubr.f32.gmra.mrb[20].mxu1 %v6338_v48 }
  0xa0   : > { %4621 = vmatmul.mubr.f32.gmra.mrb[4].mxu0 %v6242_v55  ;;  %4247 = vmatprep.mubr.f32.mxu1 %v6341_v62  ;;  %v3645_v55 = vld [vmem:[%s6718_s1 + $0x3d8] sm:$0xff] }
  0xa1   : > { %4623 = vmatprep.mubr.f32.mxu0 %v6247_v4  ;;  %5057 = vmatpush3.bf16.msra.mxu0 %v5054_v37  ;;  %v6366_v4 = vld [vmem:[#allocation2 + $0x128] sm:$0xff]  ;;  %v6369_v37 = vld [vmem:[#allocation2 + $0x138] sm:$0xff]  ;;  %v5066_v43 = vpack.c.bf16 %v3645_v55, %v3644_v12  ;;  %v3648_v12 = vld [vmem:[%s6718_s1 + $0x3f0] sm:$0xff] }
  0xa2   : > { %5059 = vmatprep.subr.bf16.mxu0 %v5058_v5 }
  0xa3   : > { %4248 = vmatmul.mubr.f32.gmra.mrb[22].mxu1 %v6352_v27 }
  0xa4   : > { %4624 = vmatmul.mubr.f32.gmra.mrb[6].mxu0 %v6260_v25  ;;  %4250 = vmatprep.mubr.f32.mxu1 %v6355_v26  ;;  %v3647_v25 = vld [vmem:[%s6718_s1 + $0x3e8] sm:$0xff] }
  0xa5   : > { %4626 = vmatprep.mubr.f32.mxu0 %v6265_v34  ;;  %5061 = vmatpush3.bf16.msra.mxu0 %v5058_v5  ;;  %v6380_v34 = vld [vmem:[#allocation2 + $0x140] sm:$0xff]  ;;  %v6383_v5 = vld [vmem:[#allocation2 + $0x150] sm:$0xff]  ;;  %v5070_v55 = vpack.c.bf16 %v3647_v25, %v3646_v11 }
  0xa6   : > { %5063 = vmatprep.subr.bf16.mxu0 %v5062_v49  ;;  %v3650_v11 = vld [vmem:[%s6718_s1 + $0x400] sm:$0xff] }
  0xa7   : > { %4251 = vmatmul.mubr.f32.gmra.mrb[24].mxu1 %v6366_v4 }
  0xa8   : > { %4627 = vmatmul.mubr.f32.gmra.mrb[8].mxu0 %v6278_v51  ;;  %4253 = vmatprep.mubr.f32.mxu1 %v6369_v37  ;;  %v3649_v51 = vld [vmem:[%s6718_s1 + $0x3f8] sm:$0xff] }
  0xa9   : > { %4629 = vmatprep.mubr.f32.mxu0 %v6283_v19  ;;  %5065 = vmatpush3.bf16.msra.mxu0 %v5062_v49  ;;  %v6394_v19 = vld [vmem:[#allocation2 + $0x158] sm:$0xff]  ;;  %v6397_v49 = vld [vmem:[#allocation2 + $0x168] sm:$0xff]  ;;  %v5074_v25 = vpack.c.bf16 %v3649_v51, %v3648_v12  ;;  %v3572_v12 = vld [vmem:[%s6718_s1 + $0x190] sm:$0xff] }
  0xaa   : > { %5067 = vmatprep.subr.bf16.mxu0 %v5066_v43 }
  0xab   : > { %4254 = vmatmul.mubr.f32.gmra.mrb[26].mxu1 %v6380_v34 }
  0xac   : > { %4630 = vmatmul.mubr.f32.gmra.mrb[10].mxu0 %v6294_v60  ;;  %4256 = vmatprep.mubr.f32.mxu1 %v6383_v5  ;;  %v3651_v60 = vld [vmem:[%s6718_s1 + $0x408] sm:$0xff] }
  0xad   : > { %4632 = vmatprep.mubr.f32.mxu0 %v6296_v0  ;;  %5069 = vmatpush3.bf16.msra.mxu0 %v5066_v43  ;;  %v6408_v0 = vld [vmem:[#allocation2 + $0x170] sm:$0xff]  ;;  %v1139_v43 = vld [vmem:[#allocation2 + $0x2] sm:$0xff]  ;;  %v6411_v51 = vpack.c.bf16 %v3651_v60, %v3650_v11 }
  0xae   : > { %5071 = vmatprep.subr.bf16.mxu0 %v5070_v55  ;;  %v3574_v60 = vld [vmem:[%s6718_s1 + $0x1a0] sm:$0xff]  ;;  %v3575_v11 = vld [vmem:[%s6718_s1 + $0x1a8] sm:$0xff] }
  0xaf   : > { %4257 = vmatmul.mubr.f32.gmra.mrb[28].mxu1 %v6394_v19 }
  0xb0   : > { %4633 = vmatmul.mubr.f32.gmra.mrb[12].mxu0 %v6308_v61  ;;  %4259 = vmatprep.mubr.f32.mxu1 %v6397_v49  ;;  %v3573_v61 = vld [vmem:[%s6718_s1 + $0x198] sm:$0xff] }
  0xb1   : > { %4635 = vmatprep.mubr.f32.mxu0 %v6311_v33  ;;  %5073 = vmatpush3.bf16.msra.mxu0 %v5070_v55  ;;  %v4922_v55 = vpack.c.bf16 %v3573_v61, %v3572_v12  ;;  %v4926_v61 = vpack.c.bf16 %v3575_v11, %v3574_v60  ;;  %v3583_v12 = vld [vmem:[%s6718_s1 + $0x1e8] sm:$0xff]  ;;  %v3585_v60 = vld [vmem:[%s6718_s1 + $0x1f8] sm:$0xff] }
  0xb2   : > { %5075 = vmatprep.subr.bf16.mxu0 %v5074_v25 }
  0xb3   : > { %4260 = vmatmul.mubr.f32.gmra.mrb[30].mxu1 %v6408_v0 }
  0xb4   : > { %4636 = vmatmul.mubr.f32.gmra.mrb[14].mxu0 %v6323_v24  ;;  %4294 = vmatprep.mubr.f32.mxu1 %v1139_v43  ;;  %v3581_v43 = vld [vmem:[%s6718_s1 + $0x1d8] sm:$0xff] }
  0xb5   : > { %4638 = vmatprep.mubr.f32.mxu0 %v6327_v6  ;;  %5077 = vmatpush3.bf16.msra.mxu0 %v5074_v25  ;;  %v3577_v25 = vld [vmem:[%s6718_s1 + $0x1b8] sm:$0xff] }
  0xb6   : > { %5079 = vmatprep.subr.bf16.mxu0 %v6411_v51 }
  0xb7   : > { %4295 = vmatmul.mubr.f32.vlgmr.msra.gmra.mrb[0].mxu1 %v1140_v21  ;;  %v3576_v21 = vld [vmem:[%s6718_s1 + $0x1b0] sm:$0xff] }
  0xb8   : > { %4639 = vmatmul.mubr.f32.gmra.mrb[16].mxu0 %v6338_v48  ;;  %4921 = vmatpush3.bf16.msra.mxu1 %v6298_v45  ;;  %v3579_v45 = vld [vmem:[%s6718_s1 + $0x1c8] sm:$0xff] }
  0xb9   : > { %4297 = vmatprep.mubr.f32.mxu1 %v6022_v7  ;;  %4641 = vmatprep.mubr.f32.mxu0 %v6341_v62  ;;  %v4930_v7 = vpack.c.bf16 %v3577_v25, %v3576_v21  ;;  %v3655_v25 = vld [vmem:[%s6718_s1 + $0x428] sm:$0xff] }
  0xba   : > { %4923 = vmatprep.subr.bf16.mxu1 %v4922_v55 }
  0xbb   : > { %4298 = vmatmul.mubr.f32.gmra.mrb[2].mxu1 %v6045_v3  ;;  %v3578_v3 = vld [vmem:[%s6718_s1 + $0x1c0] sm:$0xff] }
  0xbc   : > { %4642 = vmatmul.mubr.f32.gmra.mrb[18].mxu0 %v6352_v27  ;;  %4300 = vmatprep.mubr.f32.mxu1 %v6048_v30  ;;  %v4934_v30 = vpack.c.bf16 %v3579_v45, %v3578_v3  ;;  %v3657_v3 = vld [vmem:[%s6718_s1 + $0x438] sm:$0xff] }
  0xbd   : > { %4644 = vmatprep.mubr.f32.mxu0 %v6355_v26  ;;  %4925 = vmatpush3.bf16.msra.mxu1 %v4922_v55 }
  0xbe   : > { %4927 = vmatprep.subr.bf16.mxu1 %v4926_v61 }
  0xbf   : > { %4301 = vmatmul.mubr.f32.gmra.mrb[4].mxu1 %v6065_v16  ;;  %v3580_v16 = vld [vmem:[%s6718_s1 + $0x1d0] sm:$0xff] }
  0xc0   : > { %4645 = vmatmul.mubr.f32.gmra.mrb[20].mxu0 %v6366_v4  ;;  %4303 = vmatprep.mubr.f32.mxu1 %v6070_v20  ;;  %v4938_v20 = vpack.c.bf16 %v3581_v43, %v3580_v16  ;;  %v2678_v16 = vld [vmem:[#allocation2 + $0x91] sm:$0xff] }
  0xc1   : > { %4647 = vmatprep.mubr.f32.mxu0 %v6369_v37  ;;  %4929 = vmatpush3.bf16.msra.mxu1 %v4926_v61  ;;  %v3653_v61 = vld [vmem:[%s6718_s1 + $0x418] sm:$0xff] }
  0xc2   : > { %4931 = vmatprep.subr.bf16.mxu1 %v4930_v7 }
  0xc3   : > { %4304 = vmatmul.mubr.f32.gmra.mrb[6].mxu1 %v6083_v39  ;;  %v3582_v39 = vld [vmem:[%s6718_s1 + $0x1e0] sm:$0xff] }
  0xc4   : > { %4648 = vmatmul.mubr.f32.gmra.mrb[22].mxu0 %v6380_v34  ;;  %4306 = vmatprep.mubr.f32.mxu1 %v6085_v44  ;;  %v6473_v44 = vld [vmem:[#allocation2 + $0x180] sm:$0xff]  ;;  %v4942_v55 = vpack.c.bf16 %v3583_v12, %v3582_v39  ;;  %v2680_v39 = vld [vmem:[#allocation2 + $0xa9] sm:$0xff] }
  0xc5   : > { %4650 = vmatprep.mubr.f32.mxu0 %v6383_v5  ;;  %4933 = vmatpush3.bf16.msra.mxu1 %v4930_v7 }
  0xc6   : > { %4935 = vmatprep.subr.bf16.mxu1 %v4934_v30 }
  0xc7   : > { %4307 = vmatmul.mubr.f32.gmra.mrb[8].mxu1 %v6097_v36  ;;  %v3584_v36 = vld [vmem:[%s6718_s1 + $0x1f0] sm:$0xff] }
  0xc8   : > { %4651 = vmatmul.mubr.f32.gmra.mrb[24].mxu0 %v6394_v19  ;;  %4309 = vmatprep.mubr.f32.mxu1 %v6099_v53  ;;  %v6485_v53 = vld [vmem:[#allocation2 + $0x188] sm:$0xff]  ;;  %v4946_v11 = vpack.c.bf16 %v3585_v60, %v3584_v36 }
  0xc9   : > { %4653 = vmatprep.mubr.f32.mxu0 %v6397_v49  ;;  %4937 = vmatpush3.bf16.msra.mxu1 %v4934_v30  ;;  %v3659_v30 = vld [vmem:[%s6718_s1 + $0x448] sm:$0xff] }
  0xca   : > { %4939 = vmatprep.subr.bf16.mxu1 %v4938_v20  ;;  %v2682_v36 = vld [vmem:[#allocation2 + $0xc1] sm:$0xff] }
  0xcb   : > { %4310 = vmatmul.mubr.f32.gmra.mrb[10].mxu1 %v6111_v47  ;;  %v2670_v47 = vld [vmem:[#allocation2 + $0x31] sm:$0xff] }
  0xcc   : > { %4654 = vmatmul.mubr.f32.gmra.mrb[26].mxu0 %v6408_v0  ;;  %4312 = vmatprep.mubr.f32.mxu1 %v6113_v58  ;;  %v3652_v58 = vld [vmem:[%s6718_s1 + $0x410] sm:$0xff] }
  0xcd   : > { %4656 = vmatprep.mubr.f32.mxu0 %v6473_v44  ;;  %4941 = vmatpush3.bf16.msra.mxu1 %v4938_v20  ;;  %v5082_v21 = vpack.c.bf16 %v3653_v61, %v3652_v58  ;;  %v3661_v20 = vld [vmem:[%s6718_s1 + $0x458] sm:$0xff] }
  0xce   : > { %4943 = vmatprep.subr.bf16.mxu1 %v4942_v55  ;;  %v6557_v61 = vld [vmem:[#allocation2 + $0xf1] sm:$0xff] }
  0xcf   : > { %4313 = vmatmul.mubr.f32.gmra.mrb[12].mxu1 %v6125_v22  ;;  %v2671_v22 = vld [vmem:[#allocation2 + $0x39] sm:$0xff] }
  0xd0   : > { %4657 = vmatmul.mubr.f32.gmra.mrb[28].mxu0 %v6485_v53  ;;  %4315 = vmatprep.mubr.f32.mxu1 %v6127_v28  ;;  %v2672_v28 = vld [vmem:[#allocation2 + $0x49] sm:$0xff] }
  0xd1   : > { %4659 = vmatprep.mubr.f32.mxu0 %v6167_v46  ;;  %4945 = vmatpush3.bf16.msra.mxu1 %v4942_v55  ;;  %v3663_v55 = vld [vmem:[%s6718_s1 + $0x468] sm:$0xff] }
  0xd2   : > { %4947 = vmatprep.subr.bf16.mxu1 %v4946_v11 }
  0xd3   : > { %4316 = vmatmul.mubr.f32.gmra.mrb[14].mxu1 %v6139_v17  ;;  %v3654_v17 = vld [vmem:[%s6718_s1 + $0x420] sm:$0xff] }
  0xd4   : > { %4660 = vmatmul.mubr.f32.gmra.mrb[30].mxu0 %v6167_v46  ;;  %4318 = vmatprep.mubr.f32.mxu1 %v6141_v2  ;;  %v2673_v2 = vld [vmem:[#allocation2 + $0x51] sm:$0xff]  ;;  %v2674_v46 = vld [vmem:[#allocation2 + $0x61] sm:$0xff]  ;;  %v5086_v7 = vpack.c.bf16 %v3655_v25, %v3654_v17 }
  0xd5   : > { %4694 = vmatprep.mubr.f32.mxu0 %v2670_v47  ;;  %4949 = vmatpush3.bf16.msra.mxu1 %v4946_v11  ;;  %v3665_v11 = vld [vmem:[%s6718_s1 + $0x478] sm:$0xff]  ;;  %v6777_v25 = vld [vmem:[#allocation6_spill] sm:$0xff] }
  0xd6   : > { %5110 = vmatprep.subr.bf16.mxu1 %v5478_v8  ;;  %v6550_v47 = vld [vmem:[#allocation2 + $0xd9] sm:$0xff] }
  0xd7   : > { %4319 = vmatmul.mubr.f32.gmra.mrb[16].mxu1 %v6153_v40  ;;  %v3656_v40 = vld [vmem:[%s6718_s1 + $0x430] sm:$0xff]  ;;  %v6776_v17 = vld [vmem:[#allocation9_spill] sm:$0xff] }
  0xd8   : > { %4695 = vmatmul.mubr.f32.vlgmr.msra.gmra.mrb[0].mxu0 %v2671_v22  ;;  %4321 = vmatprep.mubr.f32.mxu1 %v6155_v54  ;;  %v2675_v54 = vld [vmem:[#allocation2 + $0x69] sm:$0xff]  ;;  %v5090_v45 = vpack.c.bf16 %v3657_v3, %v3656_v40  ;;  %v2700_v3 = vld [vmem:[#allocation2 + $0x199] sm:$0xff] }
  0xd9   : > { %5081 = vmatpush3.bf16.msra.mxu0 %v6411_v51  ;;  %4697 = vmatprep.mubr.f32.mxu0 %v2672_v28  ;;  %v2676_v51 = vld [vmem:[#allocation2 + $0x79] sm:$0xff]  ;;  %v6772_v22 = vld [vmem:[#allocation15_spill] sm:$0xff] }
  0xda   : > { %5083 = vmatprep.subr.bf16.mxu0 %v5082_v21  ;;  %v6773_v28 = vld [vmem:[#allocation5_spill] sm:$0xff]  ;;  %v6781_v40 = vld [vmem:[#allocation11_spill] sm:$0xff] }
  0xdb   : > { %4322 = vmatmul.mubr.f32.gmra.mrb[18].mxu1 %v6171_v9  ;;  %v3658_v9 = vld [vmem:[%s6718_s1 + $0x440] sm:$0xff] }
  0xdc   : > { %4698 = vmatmul.mubr.f32.gmra.mrb[2].mxu0 %v2673_v2  ;;  %4324 = vmatprep.mubr.f32.mxu1 %v6175_v23  ;;  %v2677_v23 = vld [vmem:[#allocation2 + $0x81] sm:$0xff]  ;;  %v5094_v43 = vpack.c.bf16 %v3659_v30, %v3658_v9  ;;  %v6785_v9 = vld [vmem:[#allocation21_spill] sm:$0xff] }
  0xdd   : > { %4700 = vmatprep.mubr.f32.mxu0 %v2674_v46  ;;  %5085 = vmatpush3.bf16.msra.mxu0 %v5082_v21  ;;  %v6774_v21 = vld [vmem:[#allocation16_spill] sm:$0xff]  ;;  %v6778_v2 = vld [vmem:[#allocation18_spill] sm:$0xff] }
  0xde   : > { %5087 = vmatprep.subr.bf16.mxu0 %v5086_v7  ;;  %v6779_v46 = vld [vmem:[#allocation10_spill] sm:$0xff] }
  0xdf   : > { %4325 = vmatmul.mubr.f32.gmra.mrb[20].mxu1 %v6191_v31  ;;  %v3660_v31 = vld [vmem:[%s6718_s1 + $0x450] sm:$0xff]  ;;  %v2701_v30 = vld [vmem:[#allocation2 + $0x1a1] sm:$0xff] }
  0xe0   : > { %4701 = vmatmul.mubr.f32.gmra.mrb[4].mxu0 %v2675_v54  ;;  %4327 = vmatprep.mubr.f32.mxu1 %v6195_v1  ;;  %v2679_v1 = vld [vmem:[#allocation2 + $0x99] sm:$0xff]  ;;  %v5098_v12 = vpack.c.bf16 %v3661_v20, %v3660_v31  ;;  %v6782_v54 = vld [vmem:[#allocation7_spill] sm:$0xff] }
  0xe1   : > { %4703 = vmatprep.mubr.f32.mxu0 %v2676_v51  ;;  %5089 = vmatpush3.bf16.msra.mxu0 %v5086_v7  ;;  %v6780_v7 = vld [vmem:[#allocation19_spill] sm:$0xff]  ;;  %v6783_v51 = vld [vmem:[#allocation20_spill] sm:$0xff]  ;;  %v2977_v31 = vld [vmem:[#allocation2 + $0x3a] sm:$0xff] }
  0xe2   : > { %5091 = vmatprep.subr.bf16.mxu0 %v5090_v45  ;;  %v2978_v20 = vld [vmem:[#allocation2 + $0x4a] sm:$0xff] }
  0xe3   : > { %4328 = vmatmul.mubr.f32.gmra.mrb[22].mxu1 %v6209_v41  ;;  %v3662_v41 = vld [vmem:[%s6718_s1 + $0x460] sm:$0xff] }
  0xe4   : > { %4704 = vmatmul.mubr.f32.gmra.mrb[6].mxu0 %v2677_v23  ;;  %4330 = vmatprep.mubr.f32.mxu1 %v6213_v35  ;;  %v2681_v35 = vld [vmem:[#allocation2 + $0xb1] sm:$0xff]  ;;  %v5102_v60 = vpack.c.bf16 %v3663_v55, %v3662_v41  ;;  %v2999_v55 = vld [vmem:[#allocation2 + $0x142] sm:$0xff] }
  0xe5   : > { %4706 = vmatprep.mubr.f32.mxu0 %v2678_v16  ;;  %5093 = vmatpush3.bf16.msra.mxu0 %v5090_v45  ;;  %v6784_v45 = vld [vmem:[#allocation12_spill] sm:$0xff] }
  0xe6   : > { %5095 = vmatprep.subr.bf16.mxu0 %v5094_v43  ;;  %v2976_v23 = vld [vmem:[#allocation2 + $0x32] sm:$0xff] }
  0xe7   : > { %4331 = vmatmul.mubr.f32.gmra.mrb[24].mxu1 %v6227_v57  ;;  %v3664_v57 = vld [vmem:[%s6718_s1 + $0x470] sm:$0xff] }
  0xe8   : > { %4707 = vmatmul.mubr.f32.gmra.mrb[8].mxu0 %v2679_v1  ;;  %4333 = vmatprep.mubr.f32.mxu1 %v6231_v52  ;;  %v2683_v52 = vld [vmem:[#allocation2 + $0xc9] sm:$0xff]  ;;  %v5106_v58 = vpack.c.bf16 %v3665_v11, %v3664_v57  ;;  %v2979_v1 = vld [vmem:[#allocation2 + $0x52] sm:$0xff] }
  0xe9   : > { %4709 = vmatprep.mubr.f32.mxu0 %v2680_v39  ;;  %5097 = vmatpush3.bf16.msra.mxu0 %v5094_v43  ;;  %v6786_v16 = vld [vmem:[#allocation8_spill] sm:$0xff]  ;;  %v6787_v43 = vld [vmem:[#allocation22_spill] sm:$0xff] }
  0xea   : > { %5099 = vmatprep.subr.bf16.mxu0 %v5098_v12  ;;  %v2980_v39 = vld [vmem:[#allocation2 + $0x62] sm:$0xff]  ;;  %v2984_v41 = vld [vmem:[#allocation2 + $0x92] sm:$0xff] }
  0xeb   : > { %4334 = vmatmul.mubr.f32.gmra.mrb[26].mxu1 %v6245_v50  ;;  %v6555_v50 = vld [vmem:[#allocation2 + $0xe1] sm:$0xff]  ;;  %v3003_v57 = vld [vmem:[#allocation2 + $0x172] sm:$0xff]  ;;  %v1779_v11 = vld [vmem:[#allocation2 + $0x169] sm:$0xff] }
  0xec   : > { %4710 = vmatmul.mubr.f32.gmra.mrb[10].mxu0 %v2681_v35  ;;  %4336 = vmatprep.mubr.f32.mxu1 %v6249_v42  ;;  %v6563_v42 = vld [vmem:[#allocation2 + $0xf9] sm:$0xff] }
  0xed   : > { %4712 = vmatprep.mubr.f32.mxu0 %v2682_v36  ;;  %5101 = vmatpush3.bf16.msra.mxu0 %v5098_v12  ;;  %v2982_v12 = vld [vmem:[#allocation2 + $0x7a] sm:$0xff]  ;;  %v3000_v35 = vld [vmem:[#allocation2 + $0x152] sm:$0xff] }
  0xee   : > { %5103 = vmatprep.subr.bf16.mxu0 %v5102_v60  ;;  %v3001_v36 = vld [vmem:[#allocation2 + $0x15a] sm:$0xff] }
  0xef   : > { %4337 = vmatmul.mubr.f32.gmra.mrb[28].mxu1 %v6263_v63  ;;  %v6565_v63 = vld [vmem:[#allocation2 + $0x109] sm:$0xff] }
  0xf0   : > { %4713 = vmatmul.mubr.f32.gmra.mrb[12].mxu0 %v2683_v52  ;;  %4339 = vmatprep.mubr.f32.mxu1 %v6267_v59  ;;  %v6572_v59 = vld [vmem:[#allocation2 + $0x111] sm:$0xff]  ;;  %v3004_v52 = vld [vmem:[#allocation2 + $0x182] sm:$0xff] }
  0xf1   : > { %4715 = vmatprep.mubr.f32.mxu0 %v6550_v47  ;;  %5105 = vmatpush3.bf16.msra.mxu0 %v5102_v60  ;;  %v3002_v60 = vld [vmem:[#allocation2 + $0x16a] sm:$0xff] }
  0xf2   : > { %5107 = vmatprep.subr.bf16.mxu0 %v5106_v58 }
  0xf3   : > { %4340 = vmatmul.mubr.f32.gmra.mrb[30].mxu1 %v6281_v14  ;;  %v6770_v14 = vld [vmem:[#allocation4_spill] sm:$0xff] }
  0xf4   : > { %4716 = vmatmul.mubr.f32.gmra.mrb[14].mxu0 %v6555_v50  ;;  %4374 = vmatprep.mubr.f32.mxu1 %v6173_v15  ;;  %v6574_v15 = vld [vmem:[#allocation2 + $0x121] sm:$0xff] }
  0xf5   : > { %4718 = vmatprep.mubr.f32.mxu0 %v6557_v61  ;;  %5109 = vmatpush3.bf16.msra.mxu0 %v5106_v58  ;;  %v3005_v58 = vld [vmem:[#allocation2 + $0x18a] sm:$0xff] }
  0xf7   : > { %4375 = vmatmul.mubr.f32.vlgmr.msra.gmra.mrb[0].mxu1 %v6187_v29  ;;  %v6581_v29 = vld [vmem:[#allocation2 + $0x129] sm:$0xff] }
  0xf8   : > { %4719 = vmatmul.mubr.f32.gmra.mrb[16].mxu0 %v6563_v42  ;;  %5118 = vmatpush3.bf16.msra.mxu1 %v5478_v8  ;;  %v6584_v8 = vld [vmem:[#allocation2 + $0x139] sm:$0xff] }
  0xf9   : > { %4377 = vmatprep.mubr.f32.mxu1 %v6193_v32  ;;  %4721 = vmatprep.mubr.f32.mxu0 %v6565_v63  ;;  %v6769_v32 = vld [vmem:[#allocation13_spill] sm:$0xff] }
  0xfa   : > { %5111 = vmatprep.subr.bf16.mxu1 %v5496_v13 }
  0xfb   : > { %4378 = vmatmul.mubr.f32.gmra.mrb[2].mxu1 %v6206_v38  ;;  %v6591_v38 = vld [vmem:[#allocation2 + $0x141] sm:$0xff] }
  0xfc   : > { %4722 = vmatmul.mubr.f32.gmra.mrb[18].mxu0 %v6572_v59  ;;  %4380 = vmatprep.mubr.f32.mxu1 %v6211_v10  ;;  %v6594_v10 = vld [vmem:[#allocation2 + $0x151] sm:$0xff] }
  0xfd   : > { %4724 = vmatprep.mubr.f32.mxu0 %v6574_v15  ;;  %5119 = vmatpush3.bf16.msra.mxu1 %v5496_v13  ;;  %v6771_v13 = vld [vmem:[#allocation14_spill] sm:$0xff] }
  0xfe   : > { %5112 = vmatprep.subr.bf16.mxu1 %v5514_v18 }
  0xff   : > { %4381 = vmatmul.mubr.f32.gmra.mrb[4].mxu1 %v6224_v56  ;;  %v6601_v56 = vld [vmem:[#allocation2 + $0x159] sm:$0xff] }
 0x100   : > { %4725 = vmatmul.mubr.f32.gmra.mrb[20].mxu0 %v6581_v29  ;;  %4383 = vmatprep.mubr.f32.mxu1 %v6769_v32 }
 0x101   : > { %4727 = vmatprep.mubr.f32.mxu0 %v6584_v8  ;;  %5120 = vmatpush3.bf16.msra.mxu1 %v5514_v18  ;;  %v6775_v18 = vld [vmem:[#allocation17_spill] sm:$0xff] }
 0x102   : > { %5113 = vmatprep.subr.bf16.mxu1 %v6770_v14 }
 0x103   : > { %4384 = vmatmul.mubr.f32.gmra.mrb[6].mxu1 %v6771_v13 }
 0x104   : > { %4728 = vmatmul.mubr.f32.gmra.mrb[22].mxu0 %v6591_v38  ;;  %4386 = vmatprep.mubr.f32.mxu1 %v6772_v22 }
 0x105   : > { %4730 = vmatprep.mubr.f32.mxu0 %v6594_v10  ;;  %5121 = vmatpush3.bf16.msra.mxu1 %v6770_v14 }
 0x106   : > { %5114 = vmatprep.subr.bf16.mxu1 %v6773_v28 }
 0x107   : > { %4387 = vmatmul.mubr.f32.gmra.mrb[8].mxu1 %v6774_v21 }
 0x108   : > { %4731 = vmatmul.mubr.f32.gmra.mrb[24].mxu0 %v6601_v56  ;;  %4389 = vmatprep.mubr.f32.mxu1 %v6775_v18 }
 0x109   : > { %4733 = vmatprep.mubr.f32.mxu0 %v6776_v17  ;;  %5122 = vmatpush3.bf16.msra.mxu1 %v6773_v28 }
 0x10a   : > { %5115 = vmatprep.subr.bf16.mxu1 %v6777_v25 }
 0x10b   : > { %4390 = vmatmul.mubr.f32.gmra.mrb[10].mxu1 %v6778_v2 }
 0x10c   : > { %4734 = vmatmul.mubr.f32.gmra.mrb[26].mxu0 %v6779_v46  ;;  %4392 = vmatprep.mubr.f32.mxu1 %v6780_v7 }
 0x10d   : > { %4736 = vmatprep.mubr.f32.mxu0 %v6781_v40  ;;  %5123 = vmatpush3.bf16.msra.mxu1 %v6777_v25 }
 0x10e   : > { %5116 = vmatprep.subr.bf16.mxu1 %v6782_v54 }
 0x10f   : > { %4393 = vmatmul.mubr.f32.gmra.mrb[12].mxu1 %v6783_v51 }
 0x110   : > { %4737 = vmatmul.mubr.f32.gmra.mrb[28].mxu0 %v6784_v45  ;;  %4395 = vmatprep.mubr.f32.mxu1 %v6785_v9 }
 0x111   : > { %4739 = vmatprep.mubr.f32.mxu0 %v2700_v3  ;;  %5124 = vmatpush3.bf16.msra.mxu1 %v6782_v54 }
 0x112   : > { %5117 = vmatprep.subr.bf16.mxu1 %v6786_v16 }
 0x113   : > { %4396 = vmatmul.mubr.f32.gmra.mrb[14].mxu1 %v6787_v43 }
 0x114   : > { %4740 = vmatmul.mubr.f32.gmra.mrb[30].mxu0 %v2701_v30  ;;  %4398 = vmatprep.mubr.f32.mxu1 %v6311_v33  ;;  %v2981_v33 = vld [vmem:[#allocation2 + $0x6a] sm:$0xff] }
 0x115   : > { %4774 = vmatprep.mubr.f32.mxu0 %v2976_v23  ;;  %5125 = vmatpush3.bf16.msra.mxu1 %v6786_v16 }
 0x117   : > { %4399 = vmatmul.mubr.f32.gmra.mrb[16].mxu1 %v6323_v24  ;;  %v2983_v24 = vld [vmem:[#allocation2 + $0x82] sm:$0xff] }
 0x118   : > { %4775 = vmatmul.mubr.f32.vlgmr.msra.gmra.mrb[0].mxu0 %v2977_v31  ;;  %4401 = vmatprep.mubr.f32.mxu1 %v6327_v6  ;;  %v2985_v6 = vld [vmem:[#allocation2 + $0x9a] sm:$0xff] }
 0x119   : > { %4777 = vmatprep.mubr.f32.mxu0 %v2978_v20 }
 0x11b   : > { %4402 = vmatmul.mubr.f32.gmra.mrb[18].mxu1 %v6338_v48  ;;  %v2986_v48 = vld [vmem:[#allocation2 + $0xaa] sm:$0xff] }
 0x11c   : > { %4778 = vmatmul.mubr.f32.gmra.mrb[2].mxu0 %v2979_v1  ;;  %4404 = vmatprep.mubr.f32.mxu1 %v6341_v62  ;;  %v2988_v62 = vld [vmem:[#allocation2 + $0xc2] sm:$0xff] }
 0x11d   : > { %4780 = vmatprep.mubr.f32.mxu0 %v2980_v39 }
 0x11f   : > { %4405 = vmatmul.mubr.f32.gmra.mrb[20].mxu1 %v6352_v27  ;;  %v2987_v27 = vld [vmem:[#allocation2 + $0xb2] sm:$0xff] }
 0x120   : > { %4781 = vmatmul.mubr.f32.gmra.mrb[4].mxu0 %v2981_v33  ;;  %4407 = vmatprep.mubr.f32.mxu1 %v6355_v26  ;;  %v2990_v26 = vld [vmem:[#allocation2 + $0xda] sm:$0xff] }
 0x121   : > { %4783 = vmatprep.mubr.f32.mxu0 %v2982_v12 }
 0x123   : > { %4408 = vmatmul.mubr.f32.gmra.mrb[22].mxu1 %v6366_v4  ;;  %v2989_v4 = vld [vmem:[#allocation2 + $0xca] sm:$0xff] }
 0x124   : > { %4784 = vmatmul.mubr.f32.gmra.mrb[6].mxu0 %v2983_v24  ;;  %4410 = vmatprep.mubr.f32.mxu1 %v6369_v37  ;;  %v2992_v37 = vld [vmem:[#allocation2 + $0xf2] sm:$0xff] }
 0x125   : > { %4786 = vmatprep.mubr.f32.mxu0 %v2984_v41 }
 0x127   : > { %4411 = vmatmul.mubr.f32.gmra.mrb[24].mxu1 %v6380_v34  ;;  %v2991_v34 = vld [vmem:[#allocation2 + $0xe2] sm:$0xff] }
 0x128   : > { %4787 = vmatmul.mubr.f32.gmra.mrb[8].mxu0 %v2985_v6  ;;  %4413 = vmatprep.mubr.f32.mxu1 %v6383_v5  ;;  %v2994_v5 = vld [vmem:[#allocation2 + $0x10a] sm:$0xff] }
 0x129   : > { %4789 = vmatprep.mubr.f32.mxu0 %v2986_v48 }
 0x12b   : > { %4414 = vmatmul.mubr.f32.gmra.mrb[26].mxu1 %v6394_v19  ;;  %v2993_v19 = vld [vmem:[#allocation2 + $0xfa] sm:$0xff] }
 0x12c   : > { %4790 = vmatmul.mubr.f32.gmra.mrb[10].mxu0 %v2987_v27  ;;  %4416 = vmatprep.mubr.f32.mxu1 %v6397_v49  ;;  %v2996_v49 = vld [vmem:[#allocation2 + $0x122] sm:$0xff] }
 0x12d   : > { %4792 = vmatprep.mubr.f32.mxu0 %v2988_v62 }
 0x12f   : > { %4417 = vmatmul.mubr.f32.gmra.mrb[28].mxu1 %v6408_v0  ;;  %v2995_v0 = vld [vmem:[#allocation2 + $0x112] sm:$0xff] }
 0x130   : > { %4793 = vmatmul.mubr.f32.gmra.mrb[12].mxu0 %v2989_v4  ;;  %4419 = vmatprep.mubr.f32.mxu1 %v6473_v44  ;;  %v2997_v44 = vld [vmem:[#allocation2 + $0x12a] sm:$0xff] }
 0x131   : > { %4795 = vmatprep.mubr.f32.mxu0 %v2990_v26 }
 0x133   : > { %4420 = vmatmul.mubr.f32.gmra.mrb[30].mxu1 %v6485_v53  ;;  %v2998_v53 = vld [vmem:[#allocation2 + $0x13a] sm:$0xff] }
 0x134   : > { %4796 = vmatmul.mubr.f32.gmra.mrb[14].mxu0 %v2991_v34  ;;  %4478 = vmatprep.mubr.f32.mxu1 %v6550_v47  ;;  %v1780_v47 = vld [vmem:[#allocation2 + $0x171] sm:$0xff] }
 0x135   : > { %4798 = vmatprep.mubr.f32.mxu0 %v2992_v37 }
 0x137   : > { %4479 = vmatmul.mubr.f32.vlgmr.msra.gmra.mrb[16].mxu1 %v6555_v50  ;;  %v1781_v50 = vld [vmem:[#allocation2 + $0x181] sm:$0xff] }
 0x138   : > { %4799 = vmatmul.mubr.f32.gmra.mrb[16].mxu0 %v2993_v19  ;;  %4481 = vmatprep.mubr.f32.mxu1 %v6557_v61  ;;  %v3006_v61 = vld [vmem:[#allocation2 + $0x19a] sm:$0xff] }
 0x139   : > { %4801 = vmatprep.mubr.f32.mxu0 %v2994_v5 }
 0x13b   : > { %4482 = vmatmul.mubr.f32.gmra.mrb[18].mxu1 %v6563_v42  ;;  %v1782_v42 = vld [vmem:[#allocation2 + $0x189] sm:$0xff] }
 0x13c   : > { %4802 = vmatmul.mubr.f32.gmra.mrb[18].mxu0 %v2995_v0  ;;  %4484 = vmatprep.mubr.f32.mxu1 %v6565_v63  ;;  %v3007_v63 = vld [vmem:[#allocation2 + $0x1a2] sm:$0xff] }
 0x13d   : > { %4804 = vmatprep.mubr.f32.mxu0 %v2996_v49 }
 0x13f   : > { %4485 = vmatmul.mubr.f32.gmra.mrb[20].mxu1 %v6572_v59 }
 0x140   : > { %4805 = vmatmul.mubr.f32.gmra.mrb[20].mxu0 %v2997_v44  ;;  %4487 = vmatprep.mubr.f32.mxu1 %v6574_v15 }
 0x141   : > { %4807 = vmatprep.mubr.f32.mxu0 %v2998_v53 }
 0x143   : > { %4488 = vmatmul.mubr.f32.gmra.mrb[22].mxu1 %v6581_v29 }
 0x144   : > { %4808 = vmatmul.mubr.f32.gmra.mrb[22].mxu0 %v2999_v55  ;;  %4490 = vmatprep.mubr.f32.mxu1 %v6584_v8 }
 0x145   : > { %4810 = vmatprep.mubr.f32.mxu0 %v3000_v35 }
 0x147   : > { %4491 = vmatmul.mubr.f32.gmra.mrb[24].mxu1 %v6591_v38 }
 0x148   : > { %4811 = vmatmul.mubr.f32.gmra.mrb[24].mxu0 %v3001_v36  ;;  %4493 = vmatprep.mubr.f32.mxu1 %v6594_v10 }
 0x149   : > { %4813 = vmatprep.mubr.f32.mxu0 %v3002_v60 }
 0x14b   : > { %4494 = vmatmul.mubr.f32.gmra.mrb[26].mxu1 %v6601_v56 }
 0x14c   : > { %4814 = vmatmul.mubr.f32.gmra.mrb[26].mxu0 %v3003_v57  ;;  %4496 = vmatprep.mubr.f32.mxu1 %v1779_v11 }
 0x14d   : > { %4816 = vmatprep.mubr.f32.mxu0 %v3004_v52 }
 0x14f   : > { %4497 = vmatmul.mubr.f32.gmra.mrb[28].mxu1 %v1780_v47 }
 0x150   : > { %4817 = vmatmul.mubr.f32.gmra.mrb[28].mxu0 %v3005_v58  ;;  %4499 = vmatprep.mubr.f32.mxu1 %v1781_v50 }
 0x151   : > { %4819 = vmatprep.mubr.f32.mxu0 %v3006_v61 }
 0x153   : > { %4500 = vmatmul.mubr.f32.gmra.mrb[30].mxu1 %v1782_v42 }
 0x154   : > { %4820 = vmatmul.mubr.f32.gmra.mrb[30].mxu0 %v3007_v63 }
 0x1ca   : > { %v4376_v59 = vpop.f32.mrb[0].mxu1 }
 0x1cb   : > { %v1560_v15 = vpop.f32.mrb[1].mxu1 }
 0x1ce   : > { %v4379_v29 = vpop.f32.mrb[2].mxu1 }
 0x1cf   : > { %v1570_v8 = vpop.f32.mrb[3].mxu1 }
 0x1d2   : > { %v4382_v32 = vpop.f32.mrb[4].mxu1 }
 0x1d3   : > { %v1580_v38 = vpop.f32.mrb[5].mxu1 }
 0x1d6   : > { %v4385_v10 = vpop.f32.mrb[6].mxu1 }
 0x1d7   : > { %v1590_v14 = vpop.f32.mrb[7].mxu1 }
 0x1da   : > { %v4388_v13 = vpop.f32.mrb[8].mxu1 }
 0x1db   : > { %v1600_v22 = vpop.f32.mrb[9].mxu1 }
 0x1de   : > { %v4391_v56 = vpop.f32.mrb[10].mxu1 }
 0x1df   : > { %v6652_v28 = vpop.f32.mrb[11].mxu1 }
 0x1e2   : > { %v6654_v21 = vpop.f32.mrb[12].mxu1 }
 0x1e3   : > { %v6656_v18 = vpop.f32.mrb[13].mxu1 }
 0x1e6   : > { %v6658_v17 = vpop.f32.mrb[14].mxu1 }
 0x1e7   : > { %v6660_v25 = vpop.f32.mrb[15].mxu1 }
 0x1eb   : > { %v4776_v2 = vpop.f32.mrb[0].mxu0 }
 0x1ec   : > { %v5126_v46 = vadd.f32 %v4776_v2, %v4376_v59  ;;  %v3091_v7 = vpop.f32.mrb[1].mxu0 }
 0x1ed   : > { %v5127_v40 = vadd.f32 %v3091_v7, %v1560_v15 }
 0x1ee   : > { %3283 = vst [vmem:[%s6667_s14 + $0x8] sm:$0xff] %v5126_v46  ;;  %v3353_v3 = vmul.f32 %v5126_v46, %v5126_v46 }
 0x1ef   : > { %3282 = vst [vmem:[%s6667_s14] sm:$0xff] %v5127_v40  ;;  %v3314_v54 = vadd.f32 %v5127_v40, %v5126_v46  ;;  %v3352_v51 = vmul.f32 %v5127_v40, %v5127_v40  ;;  %v4779_v45 = vpop.f32.mrb[2].mxu0 }
 0x1f0   : > { %v5128_v9 = vadd.f32 %v4779_v45, %v4379_v29  ;;  %v3101_v30 = vpop.f32.mrb[3].mxu0 }
 0x1f1   : > { %v3384_v23 = vadd.f32 %v3353_v3, %v3352_v51  ;;  %v5129_v16 = vadd.f32 %v3101_v30, %v1570_v8 }
 0x1f2   : > { %3285 = vst [vmem:[%s6667_s14 + $0x18] sm:$0xff] %v5128_v9  ;;  %v3355_v33 = vmul.f32 %v5128_v9, %v5128_v9 }
 0x1f3   : > { %3284 = vst [vmem:[%s6667_s14 + $0x10] sm:$0xff] %v5129_v16  ;;  %v3315_v43 = vadd.f32 %v5129_v16, %v3314_v54  ;;  %v3354_v31 = vmul.f32 %v5129_v16, %v5129_v16  ;;  %v4782_v20 = vpop.f32.mrb[4].mxu0 }
 0x1f4   : > { %v5130_v1 = vadd.f32 %v4782_v20, %v4382_v32  ;;  %v3111_v39 = vpop.f32.mrb[5].mxu0 }
 0x1f5   : > { %v3385_v12 = vadd.f32 %v3384_v23, %v3354_v31  ;;  %v5131_v24 = vadd.f32 %v3111_v39, %v1580_v38  ;;  %v3316_v41 = vadd.f32 %v5128_v9, %v3315_v43 }
 0x1f6   : > { %3287 = vst [vmem:[%s6667_s14 + $0x28] sm:$0xff] %v5130_v1  ;;  %v3357_v34 = vmul.f32 %v5130_v1, %v5130_v1 }
 0x1f7   : > { %3286 = vst [vmem:[%s6667_s14 + $0x20] sm:$0xff] %v5131_v24  ;;  %v3317_v6 = vadd.f32 %v5131_v24, %v3316_v41  ;;  %v3356_v48 = vmul.f32 %v5131_v24, %v5131_v24  ;;  %v3386_v27 = vadd.f32 %v3385_v12, %v3355_v33  ;;  %v4785_v62 = vpop.f32.mrb[6].mxu0 }
 0x1f8   : > { %v5132_v4 = vadd.f32 %v4785_v62, %v4385_v10  ;;  %v3121_v26 = vpop.f32.mrb[7].mxu0 }
 0x1f9   : > { %v3387_v37 = vadd.f32 %v3386_v27, %v3356_v48  ;;  %v5133_v19 = vadd.f32 %v3121_v26, %v1590_v14  ;;  %v3318_v5 = vadd.f32 %v5130_v1, %v3317_v6 }
 0x1fa   : > { %3289 = vst [vmem:[%s6667_s14 + $0x38] sm:$0xff] %v5132_v4  ;;  %v3359_v36 = vmul.f32 %v5132_v4, %v5132_v4 }
 0x1fb   : > { %3288 = vst [vmem:[%s6667_s14 + $0x30] sm:$0xff] %v5133_v19  ;;  %v3319_v0 = vadd.f32 %v5133_v19, %v3318_v5  ;;  %v3358_v49 = vmul.f32 %v5133_v19, %v5133_v19  ;;  %v3388_v44 = vadd.f32 %v3387_v37, %v3357_v34  ;;  %v4788_v53 = vpop.f32.mrb[8].mxu0 }
 0x1fc   : > { %v5134_v55 = vadd.f32 %v4788_v53, %v4388_v13  ;;  %v3131_v35 = vpop.f32.mrb[9].mxu0 }
 0x1fd   : > { %v3389_v60 = vadd.f32 %v3388_v44, %v3358_v49  ;;  %v5135_v57 = vadd.f32 %v3131_v35, %v1600_v22  ;;  %v3320_v11 = vadd.f32 %v5132_v4, %v3319_v0 }
 0x1fe   : > { %3291 = vst [vmem:[%s6667_s14 + $0x48] sm:$0xff] %v5134_v55  ;;  %v3361_v63 = vmul.f32 %v5134_v55, %v5134_v55 }
 0x1ff   : > { %3290 = vst [vmem:[%s6667_s14 + $0x40] sm:$0xff] %v5135_v57  ;;  %v3321_v52 = vadd.f32 %v5135_v57, %v3320_v11  ;;  %v3360_v47 = vmul.f32 %v5135_v57, %v5135_v57  ;;  %v3390_v58 = vadd.f32 %v3389_v60, %v3359_v36  ;;  %v4791_v50 = vpop.f32.mrb[10].mxu0 }
 0x200   : > { %v5136_v61 = vadd.f32 %v4791_v50, %v4391_v56  ;;  %v3141_v42 = vpop.f32.mrb[11].mxu0 }
 0x201   : > { %v3391_v59 = vadd.f32 %v3390_v58, %v3360_v47  ;;  %v5137_v15 = vadd.f32 %v3141_v42, %v6652_v28  ;;  %v3322_v29 = vadd.f32 %v5134_v55, %v3321_v52 }
 0x202   : > { %3293 = vst [vmem:[%s6667_s14 + $0x58] sm:$0xff] %v5136_v61  ;;  %v3363_v22 = vmul.f32 %v5136_v61, %v5136_v61 }
 0x203   : > { %3292 = vst [vmem:[%s6667_s14 + $0x50] sm:$0xff] %v5137_v15  ;;  %v3323_v8 = vadd.f32 %v5137_v15, %v3322_v29  ;;  %v3362_v32 = vmul.f32 %v5137_v15, %v5137_v15  ;;  %v3392_v38 = vadd.f32 %v3391_v59, %v3361_v63  ;;  %v4794_v10 = vpop.f32.mrb[12].mxu0 }
 0x204   : > { %v5138_v14 = vadd.f32 %v4794_v10, %v6654_v21  ;;  %v3151_v13 = vpop.f32.mrb[13].mxu0 }
 0x205   : > { %v3393_v56 = vadd.f32 %v3392_v38, %v3362_v32  ;;  %v5139_v2 = vadd.f32 %v3151_v13, %v6656_v18  ;;  %v3324_v46 = vadd.f32 %v5136_v61, %v3323_v8 }
 0x206   : > { %3295 = vst [vmem:[%s6667_s14 + $0x68] sm:$0xff] %v5138_v14  ;;  %v3365_v45 = vmul.f32 %v5138_v14, %v5138_v14 }
 0x207   : > { %3294 = vst [vmem:[%s6667_s14 + $0x60] sm:$0xff] %v5139_v2  ;;  %v3325_v28 = vadd.f32 %v5139_v2, %v3324_v46  ;;  %v3364_v7 = vmul.f32 %v5139_v2, %v5139_v2  ;;  %v3394_v40 = vadd.f32 %v3393_v56, %v3363_v22  ;;  %v4797_v3 = vpop.f32.mrb[14].mxu0 }
 0x208   : > { %v5140_v54 = vadd.f32 %v4797_v3, %v6658_v17  ;;  %v3161_v51 = vpop.f32.mrb[15].mxu0 }
 0x209   : > { %v3395_v9 = vadd.f32 %v3394_v40, %v3364_v7  ;;  %v5141_v21 = vadd.f32 %v3161_v51, %v6660_v25  ;;  %v3326_v30 = vadd.f32 %v5138_v14, %v3325_v28 }
 0x20a   : > { %3297 = vst [vmem:[%s6667_s14 + $0x78] sm:$0xff] %v5140_v54  ;;  %v4480_v18 = vpop.f32.mrb[16].mxu1  ;;  %v3367_v33 = vmul.f32 %v5140_v54, %v5140_v54 }
 0x20b   : > { %3296 = vst [vmem:[%s6667_s14 + $0x70] sm:$0xff] %v5141_v21  ;;  %v3327_v23 = vadd.f32 %v5141_v21, %v3326_v30  ;;  %v3366_v16 = vmul.f32 %v5141_v21, %v5141_v21  ;;  %v3396_v43 = vadd.f32 %v3395_v9, %v3365_v45  ;;  %v4800_v31 = vpop.f32.mrb[16].mxu0  ;;  %v1946_v20 = vpop.f32.mrb[17].mxu1 }
 0x20c   : > { %v5142_v1 = vadd.f32 %v4800_v31, %v4480_v18  ;;  %v3171_v39 = vpop.f32.mrb[17].mxu0 }
 0x20d   : > { %v3397_v17 = vadd.f32 %v3396_v43, %v3366_v16  ;;  %v5143_v12 = vadd.f32 %v3171_v39, %v1946_v20  ;;  %v3328_v24 = vadd.f32 %v5140_v54, %v3327_v23 }
 0x20e   : > { %3299 = vst [vmem:[%s6667_s14 + $0x88] sm:$0xff] %v5142_v1  ;;  %v4483_v25 = vpop.f32.mrb[18].mxu1  ;;  %v3369_v34 = vmul.f32 %v5142_v1, %v5142_v1 }
 0x20f   : > { %3298 = vst [vmem:[%s6667_s14 + $0x80] sm:$0xff] %v5143_v12  ;;  %v3329_v41 = vadd.f32 %v5143_v12, %v3328_v24  ;;  %v3368_v6 = vmul.f32 %v5143_v12, %v5143_v12  ;;  %v3398_v48 = vadd.f32 %v3397_v17, %v3367_v33  ;;  %v4803_v27 = vpop.f32.mrb[18].mxu0  ;;  %v1956_v62 = vpop.f32.mrb[19].mxu1 }
 0x210   : > { %v5144_v4 = vadd.f32 %v4803_v27, %v4483_v25  ;;  %v3181_v26 = vpop.f32.mrb[19].mxu0 }
 0x211   : > { %v3399_v37 = vadd.f32 %v3398_v48, %v3368_v6  ;;  %v5145_v19 = vadd.f32 %v3181_v26, %v1956_v62  ;;  %v3330_v5 = vadd.f32 %v5142_v1, %v3329_v41 }
 0x212   : > { %3301 = vst [vmem:[%s6667_s14 + $0x98] sm:$0xff] %v5144_v4  ;;  %v4486_v0 = vpop.f32.mrb[20].mxu1  ;;  %v3371_v57 = vmul.f32 %v5144_v4, %v5144_v4 }
 0x213   : > { %3300 = vst [vmem:[%s6667_s14 + $0x90] sm:$0xff] %v5145_v19  ;;  %v3331_v49 = vadd.f32 %v5145_v19, %v3330_v5  ;;  %v3370_v44 = vmul.f32 %v5145_v19, %v5145_v19  ;;  %v3400_v53 = vadd.f32 %v3399_v37, %v3369_v34  ;;  %v4806_v55 = vpop.f32.mrb[20].mxu0  ;;  %v1966_v35 = vpop.f32.mrb[21].mxu1 }
 0x214   : > { %v5146_v36 = vadd.f32 %v4806_v55, %v4486_v0  ;;  %v3191_v60 = vpop.f32.mrb[21].mxu0 }
 0x215   : > { %v3401_v11 = vadd.f32 %v3400_v53, %v3370_v44  ;;  %v5147_v52 = vadd.f32 %v3191_v60, %v1966_v35  ;;  %v3332_v47 = vadd.f32 %v5144_v4, %v3331_v49 }
 0x216   : > { %3303 = vst [vmem:[%s6667_s14 + $0xa8] sm:$0xff] %v5146_v36  ;;  %v4489_v58 = vpop.f32.mrb[22].mxu1  ;;  %v3373_v8 = vmul.f32 %v5146_v36, %v5146_v36 }
 0x217   : > { %3302 = vst [vmem:[%s6667_s14 + $0xa0] sm:$0xff] %v5147_v52  ;;  %v3333_v50 = vadd.f32 %v5147_v52, %v3332_v47  ;;  %v3372_v61 = vmul.f32 %v5147_v52, %v5147_v52  ;;  %v3402_v42 = vadd.f32 %v3401_v11, %v3371_v57  ;;  %v4809_v63 = vpop.f32.mrb[22].mxu0  ;;  %v1976_v59 = vpop.f32.mrb[23].mxu1 }
 0x218   : > { %v5148_v15 = vadd.f32 %v4809_v63, %v4489_v58  ;;  %v3201_v29 = vpop.f32.mrb[23].mxu0 }
 0x219   : > { %v3403_v32 = vadd.f32 %v3402_v42, %v3372_v61  ;;  %v5149_v38 = vadd.f32 %v3201_v29, %v1976_v59  ;;  %v3334_v10 = vadd.f32 %v5146_v36, %v3333_v50 }
 0x21a   : > { %3305 = vst [vmem:[%s6667_s14 + $0xb8] sm:$0xff] %v5148_v15  ;;  %v4492_v14 = vpop.f32.mrb[24].mxu1  ;;  %v3375_v40 = vmul.f32 %v5148_v15, %v5148_v15 }
 0x21b   : > { %3304 = vst [vmem:[%s6667_s14 + $0xb0] sm:$0xff] %v5149_v38  ;;  %v3335_v13 = vadd.f32 %v5149_v38, %v3334_v10  ;;  %v3374_v22 = vmul.f32 %v5149_v38, %v5149_v38  ;;  %v3404_v56 = vadd.f32 %v3403_v32, %v3373_v8  ;;  %v4812_v2 = vpop.f32.mrb[24].mxu0  ;;  %v1986_v46 = vpop.f32.mrb[25].mxu1 }
 0x21c   : > { %v5150_v28 = vadd.f32 %v4812_v2, %v4492_v14  ;;  %v3211_v7 = vpop.f32.mrb[25].mxu0 }
 0x21d   : > { %v3405_v3 = vadd.f32 %v3404_v56, %v3374_v22  ;;  %v5151_v54 = vadd.f32 %v3211_v7, %v1986_v46  ;;  %v3336_v51 = vadd.f32 %v5148_v15, %v3335_v13 }
 0x21e   : > { %3307 = vst [vmem:[%s6667_s14 + $0xc8] sm:$0xff] %v5150_v28  ;;  %v4495_v45 = vpop.f32.mrb[26].mxu1  ;;  %v3377_v31 = vmul.f32 %v5150_v28, %v5150_v28 }
 0x21f   : > { %3306 = vst [vmem:[%s6667_s14 + $0xc0] sm:$0xff] %v5151_v54  ;;  %v3337_v9 = vadd.f32 %v5151_v54, %v3336_v51  ;;  %v3376_v21 = vmul.f32 %v5151_v54, %v5151_v54  ;;  %v3406_v30 = vadd.f32 %v3405_v3, %v3375_v40  ;;  %v4815_v18 = vpop.f32.mrb[26].mxu0  ;;  %v1996_v23 = vpop.f32.mrb[27].mxu1 }
 0x220   : > { %v5152_v16 = vadd.f32 %v4815_v18, %v4495_v45  ;;  %v3221_v43 = vpop.f32.mrb[27].mxu0 }
 0x221   : > { %v3407_v20 = vadd.f32 %v3406_v30, %v3376_v21  ;;  %v5153_v1 = vadd.f32 %v3221_v43, %v1996_v23  ;;  %v3338_v39 = vadd.f32 %v5150_v28, %v3337_v9 }
 0x222   : > { %3309 = vst [vmem:[%s6667_s14 + $0xd8] sm:$0xff] %v5152_v16  ;;  %v4498_v33 = vpop.f32.mrb[28].mxu1  ;;  %v3379_v27 = vmul.f32 %v5152_v16, %v5152_v16 }
 0x223   : > { %3308 = vst [vmem:[%s6667_s14 + $0xd0] sm:$0xff] %v5153_v1  ;;  %v3339_v17 = vadd.f32 %v5153_v1, %v3338_v39  ;;  %v3378_v12 = vmul.f32 %v5153_v1, %v5153_v1  ;;  %v3408_v24 = vadd.f32 %v3407_v20, %v3377_v31  ;;  %v4818_v25 = vpop.f32.mrb[28].mxu0  ;;  %v2006_v41 = vpop.f32.mrb[29].mxu1 }
 0x224   : > { %v5154_v6 = vadd.f32 %v4818_v25, %v4498_v33  ;;  %v3231_v48 = vpop.f32.mrb[29].mxu0 }
 0x225   : > { %v3409_v62 = vadd.f32 %v3408_v24, %v3378_v12  ;;  %v5155_v4 = vadd.f32 %v3231_v48, %v2006_v41  ;;  %v3340_v26 = vadd.f32 %v5152_v16, %v3339_v17 }
 0x226   : > { %3311 = vst [vmem:[%s6667_s14 + $0xe8] sm:$0xff] %v5154_v6  ;;  %v4501_v34 = vpop.f32.mrb[30].mxu1  ;;  %v3381_v55 = vmul.f32 %v5154_v6, %v5154_v6 }
 0x227   : > { %3310 = vst [vmem:[%s6667_s14 + $0xe0] sm:$0xff] %v5155_v4  ;;  %v3341_v37 = vadd.f32 %v5155_v4, %v3340_v26  ;;  %v3380_v19 = vmul.f32 %v5155_v4, %v5155_v4  ;;  %v3410_v5 = vadd.f32 %v3409_v62, %v3379_v27  ;;  %v4821_v0 = vpop.f32.mrb[30].mxu0  ;;  %v2016_v49 = vpop.f32.mrb[31].mxu1 }
 0x228   : > { %v5156_v44 = vadd.f32 %v4821_v0, %v4501_v34  ;;  %v3241_v53 = vpop.f32.mrb[31].mxu0 }
 0x229   : > { %v3411_v35 = vadd.f32 %v3410_v5, %v3380_v19  ;;  %v5157_v36 = vadd.f32 %v3241_v53, %v2016_v49  ;;  %v3342_v60 = vadd.f32 %v5154_v6, %v3341_v37 }
 0x22a   : > { %3313 = vst [vmem:[%s6667_s14 + $0xf8] sm:$0xff] %v5156_v44  ;;  %v3383_v47 = vmul.f32 %v5156_v44, %v5156_v44 }
 0x22b   : > { %3312 = vst [vmem:[%s6667_s14 + $0xf0] sm:$0xff] %v5157_v36  ;;  %v3343_v57 = vadd.f32 %v5157_v36, %v3342_v60  ;;  %v3382_v11 = vmul.f32 %v5157_v36, %v5157_v36  ;;  %v3412_v52 = vadd.f32 %v3411_v35, %v3381_v55 }
 0x22d   : > { %v3344_v58 = vadd.f32 %v5156_v44, %v3343_v57  ;;  %v3413_v50 = vadd.f32 %v3412_v52, %v3382_v11 }
 0x22f   : > { %v3345_v61 = vrot.slane %v3344_v58, 4  ;;  %v3414_v42 = vadd.f32 %v3413_v50, %v3383_v47 }
 0x231   : > { %v3346_v63 = vadd.f32 %v3345_v61, %v3344_v58  ;;  %v3415_v59 = vrot.slane %v3414_v42, 4 }
 0x233   : > { %v3347_v15 = vrot.slane %v3346_v63, 2  ;;  %v3416_v29 = vadd.f32 %v3415_v59, %v3414_v42 }
 0x235   : > { %v3348_v8 = vadd.f32 %v3347_v15, %v3346_v63  ;;  %v3417_v32 = vrot.slane %v3416_v29, 2 }
 0x237   : > { %v3349_v38 = vrot.slane %v3348_v8, 1  ;;  %v3418_v10 = vadd.f32 %v3417_v32, %v3416_v29 }
 0x239   : > { %v3350_v14 = vadd.f32 %v3349_v38, %v3348_v8  ;;  %v3419_v13 = vrot.slane %v3418_v10, 1 }
 0x23b   : > { %3351 = vst [vmem:[%s293_s16] sm:$0x1] %v3350_v14  ;;  %v3420_v22 = vadd.f32 %v3419_v13, %v3418_v10 }
 0x23d   : > { %3421 = vst [vmem:[%s296_s20] sm:$0x1] %v3420_v22 }
 0x23e PF: > { %s19_s26 = sadd.s32 1, %s5398_s26  }
 0x23f   : > { %p16_p4 = scmp.ge.s32.totalorder %s19_s26, 4  }
 0x241   :  { %18 = sbr.rel (!%p16_p4) target bundleno = 2 (0x2), region = 104 }

// kernel: residual_block_forward.4
= control target key start
LH: loop header
LB: loop body
LE: loop exit
PB: predicated region body
PF: predicated region fallthrough
CT: control target
= control target key end

     0   :  { %s6310_s23 = smov 0   ;;  %s7707_s0 = inlined_call_operand.vmem [shape: f32[2,16,16,128], index: 0, kind: input, shape index: {}]   ;;  %s7708_s1 = inlined_call_operand.vmem [shape: f32[9,128,128], index: 1, kind: input, shape index: {}]   ;;  %s7709_s2 = inlined_call_operand.vmem [shape: f32[1,1,128], index: 2, kind: input, shape index: {}]   ;;  %s7710_s3 = inlined_call_operand.vmem [shape: f32[1,1,128], index: 3, kind: input, shape index: {}]   ;;  %s7711_s4 = inlined_call_operand.<no memory space> [shape: f32[1,1], index: 4, kind: input, shape index: {}]   ;;  %s7712_s5 = inlined_call_operand.vmem [shape: f32[2,16,16,128], index: 5, kind: input, shape index: {}]   ;;  %s7713_s6 = inlined_call_operand.vmem [shape: f32[128,128], index: 6, kind: input, shape index: {}]   ;;  %s7714_s7 = inlined_call_operand.vmem [shape: f32[2,16,16,128], index: 7, kind: output, shape index: {0}]   ;;  %s7715_s8 = inlined_call_operand.vmem [shape: f32[2,1,128], index: 8, kind: output, shape index: {1}]   ;;  %s7716_s9 = inlined_call_operand.vmem [shape: f32[2,1,128], index: 9, kind: output, shape index: {2}]   ;;  %s7717_s10 = inlined_call_operand.vmem [shape: f32[2,16,16,128], index: 10, kind: output, shape index: {3}]   ;;  %s7718_s11 = inlined_call_operand.vmem [shape: f32[2,1,128], index: 11, kind: output, shape index: {4}]   ;;  %s7719_s12 = inlined_call_operand.vmem [shape: f32[2,1,128], index: 12, kind: output, shape index: {5}]  }
   0x1   :  { %18 = sst [smem:[#allocation3]] %s7711_s4 }
   0x2 LB: > { %s4218_s24 = sadd.s32 4294967295, %s6239_s23   ;;  %p4222_p0 = scmp.ge.s32.totalorder %s6239_s23, 1  ;;  %s6239_s23 = sphi %s6310_s23, %s24_s23  }
   0x3   : > { %p384_p1 = scmp.lt.s32.totalorder %s6239_s23, 3 }
   0x5   : > { %p385_p2 = pnand %p4222_p0, %p384_p1 }
   0x7   : > { %388 = sbr.rel (%p385_p2) target bundleno = 608 (0x260), region = 48 }
   0xe   : > { %v4233_v0 = vld [vmem:[%s7708_s1 + $0x80] sm:$0xff]  ;;  %v4234_v1 = vld [vmem:[%s7708_s1 + $0x88] sm:$0xff]  ;;  %p6329_p3 = scmp.lt.s32.totalorder %s4218_s24, 1  ;;  %v4235_v5 = vld [vmem:[%s7708_s1 + $0x90] sm:$0xff]  ;;  %v6241_v7 = vmov 0.0   ;;  %s6376_s17 = sld [smem:[#allocation3]] }
   0xf   : > { %v4281_v2 = vld [vmem:[%s7708_s1 + $0x200] sm:$0xff]  ;;  %v6333_v3 = vpack.c.bf16 %v4234_v1, %v4233_v0  ;;  %v4282_v4 = vld [vmem:[%s7708_s1 + $0x208] sm:$0xff]  ;;  %v4236_v6 = vld [vmem:[%s7708_s1 + $0x98] sm:$0xff]  ;;  %688 = vst [vmem:[#allocation2] sm:$0xff] %v6241_v7 }
  0x10   : > { %689 = vst [vmem:[#allocation2 + $0x8] sm:$0xff] %v6241_v7  ;;  %690 = vst [vmem:[#allocation2 + $0x10] sm:$0x3] %v6241_v7  ;;  %v5775_v8 = vpack.c.bf16 %v4282_v4, %v4281_v2  ;;  %v5651_v9 = vpack.c.bf16 %v4236_v6, %v4235_v5  ;;  %v4283_v10 = vld [vmem:[%s7708_s1 + $0x210] sm:$0xff]  ;;  %v4284_v11 = vld [vmem:[%s7708_s1 + $0x218] sm:$0xff]  ;;  %s7751_s24 = smov (!%p6329_p3, %s4218_s24), 1 }
  0x11   : > { %691 = vst [vmem:[#allocation2 + $0x18] sm:$0xff] %v6241_v7  ;;  %692 = vst [vmem:[#allocation2 + $0x20] sm:$0xff] %v6241_v7  ;;  %v4237_v12 = vld [vmem:[%s7708_s1 + $0xa0] sm:$0xff]  ;;  %5648 = vmatprep.subr.bf16.mxu1 %v6333_v3  ;;  %v5779_v13 = vpack.c.bf16 %v4284_v11, %v4283_v10  ;;  %v4238_v14 = vld [vmem:[%s7708_s1 + $0xa8] sm:$0xff]  ;;  %s6374_s16 = sshll.u32 %s7751_s24, 8  ;;  %s476_s14 = scalar_lea.vmem %s7718_s11, %s7751_s24 }
  0x12   : > { %693 = vst [vmem:[#allocation2 + $0x28] sm:$0x3] %v6241_v7  ;;  %694 = vst [vmem:[#allocation2 + $0x30] sm:$0xff] %v6241_v7  ;;  %v4285_v15 = vld [vmem:[%s7708_s1 + $0x220] sm:$0xff]  ;;  %v4286_v16 = vld [vmem:[%s7708_s1 + $0x228] sm:$0xff]  ;;  %5776 = vmatprep.subr.bf16.mxu0 %v5775_v8  ;;  %5650 = vmatpush3.bf16.msra.mxu1 %v6333_v3  ;;  %v5655_v17 = vpack.c.bf16 %v4238_v14, %v4237_v12  ;;  %s6421_s30 = scalar_lea.vmem %s7707_s0, %s6374_s16  ;;  %s7491_s25 = scalar_lea.vmem %s7712_s5, %s6374_s16 }
  0x13   : > { %695 = vst [vmem:[#allocation2 + $0x38] sm:$0xff] %v6241_v7  ;;  %696 = vst [vmem:[#allocation2 + $0x40] sm:$0x3] %v6241_v7  ;;  %5778 = vmatpush3.bf16.msra.mxu0 %v5775_v8  ;;  %5652 = vmatprep.subr.bf16.mxu1 %v5651_v9  ;;  %v4239_v18 = vld [vmem:[%s7708_s1 + $0xb0] sm:$0xff]  ;;  %v5783_v19 = vpack.c.bf16 %v4286_v16, %v4285_v15  ;;  %v4240_v20 = vld [vmem:[%s7708_s1 + $0xb8] sm:$0xff]  ;;  %s7588_s27 = scalar_lea.vmem %s7717_s10, %s6374_s16  ;;  %s479_s19 = scalar_lea.vmem %s7719_s12, %s7751_s24 }
  0x14   : > { %697 = vst [vmem:[#allocation2 + $0x48] sm:$0xff] %v6241_v7  ;;  %698 = vst [vmem:[#allocation2 + $0x50] sm:$0xff] %v6241_v7  ;;  %5780 = vmatprep.subr.bf16.mxu0 %v5779_v13  ;;  %v4287_v21 = vld [vmem:[%s7708_s1 + $0x230] sm:$0xff]  ;;  %v4288_v22 = vld [vmem:[%s7708_s1 + $0x238] sm:$0xff]  ;;  %v5659_v33 = vpack.c.bf16 %v4240_v20, %v4239_v18  ;;  %v6461_v52 = vstv %s6376_s17  ;;  %s465_s22 = scalar_lea.vmem %s7715_s8, %s7751_s24  ;;  %s468_s26 = scalar_lea.vmem %s7716_s9, %s7751_s24 }
  0x15   : > { %699 = vst [vmem:[#allocation2 + $0x58] sm:$0x3] %v6241_v7  ;;  %700 = vst [vmem:[#allocation2 + $0x60] sm:$0xff] %v6241_v7  ;;  %v4241_v23 = vld [vmem:[%s7708_s1 + $0xc0] sm:$0xff]  ;;  %v4242_v24 = vld [vmem:[%s7708_s1 + $0xc8] sm:$0xff]  ;;  %v5787_v38 = vpack.c.bf16 %v4288_v22, %v4287_v21 }
  0x16   : > { %701 = vst [vmem:[#allocation2 + $0x68] sm:$0xff] %v6241_v7  ;;  %702 = vst [vmem:[#allocation2 + $0x70] sm:$0x3] %v6241_v7  ;;  %v4289_v25 = vld [vmem:[%s7708_s1 + $0x240] sm:$0xff]  ;;  %v4290_v26 = vld [vmem:[%s7708_s1 + $0x248] sm:$0xff]  ;;  %5654 = vmatpush3.bf16.msra.mxu1 %v5651_v9  ;;  %v5663_v45 = vpack.c.bf16 %v4242_v24, %v4241_v23 }
  0x17   : > { %703 = vst [vmem:[#allocation2 + $0x78] sm:$0xff] %v6241_v7  ;;  %704 = vst [vmem:[#allocation2 + $0x80] sm:$0xff] %v6241_v7  ;;  %v4243_v27 = vld [vmem:[%s7708_s1 + $0xd0] sm:$0xff]  ;;  %v4244_v28 = vld [vmem:[%s7708_s1 + $0xd8] sm:$0xff]  ;;  %5782 = vmatpush3.bf16.msra.mxu0 %v5779_v13  ;;  %5656 = vmatprep.subr.bf16.mxu1 %v5655_v17  ;;  %v5791_v46 = vpack.c.bf16 %v4290_v26, %v4289_v25 }
  0x18   : > { %705 = vst [vmem:[#allocation2 + $0x88] sm:$0x3] %v6241_v7  ;;  %706 = vst [vmem:[#allocation2 + $0x90] sm:$0xff] %v6241_v7  ;;  %v4291_v29 = vld [vmem:[%s7708_s1 + $0x250] sm:$0xff]  ;;  %v4292_v30 = vld [vmem:[%s7708_s1 + $0x258] sm:$0xff]  ;;  %5784 = vmatprep.subr.bf16.mxu0 %v5783_v19  ;;  %v6452_v47 = vpack.c.bf16 %v4244_v28, %v4243_v27 }
  0x19   : > { %707 = vst [vmem:[#allocation2 + $0x98] sm:$0xff] %v6241_v7  ;;  %708 = vst [vmem:[#allocation2 + $0xa0] sm:$0x3] %v6241_v7  ;;  %v4245_v31 = vld [vmem:[%s7708_s1 + $0xe0] sm:$0xff]  ;;  %v4246_v32 = vld [vmem:[%s7708_s1 + $0xe8] sm:$0xff]  ;;  %v6456_v50 = vpack.c.bf16 %v4292_v30, %v4291_v29 }
  0x1a   : > { %709 = vst [vmem:[#allocation2 + $0xa8] sm:$0xff] %v6241_v7  ;;  %710 = vst [vmem:[#allocation2 + $0xb0] sm:$0xff] %v6241_v7  ;;  %v4293_v34 = vld [vmem:[%s7708_s1 + $0x260] sm:$0xff]  ;;  %v4294_v35 = vld [vmem:[%s7708_s1 + $0x268] sm:$0xff]  ;;  %5658 = vmatpush3.bf16.msra.mxu1 %v5655_v17  ;;  %v6458_v51 = vpack.c.bf16 %v4246_v32, %v4245_v31 }
  0x1b   : > { %711 = vst [vmem:[#allocation2 + $0xb8] sm:$0x3] %v6241_v7  ;;  %712 = vst [vmem:[#allocation2 + $0xc0] sm:$0xff] %v6241_v7  ;;  %v4247_v36 = vld [vmem:[%s7708_s1 + $0xf0] sm:$0xff]  ;;  %v4248_v37 = vld [vmem:[%s7708_s1 + $0xf8] sm:$0xff]  ;;  %5786 = vmatpush3.bf16.msra.mxu0 %v5783_v19  ;;  %5660 = vmatprep.subr.bf16.mxu1 %v5659_v33  ;;  %v6470_v56 = vpack.c.bf16 %v4294_v35, %v4293_v34 }
  0x1c   : > { %713 = vst [vmem:[#allocation2 + $0xc8] sm:$0xff] %v6241_v7  ;;  %714 = vst [vmem:[#allocation2 + $0xd0] sm:$0x3] %v6241_v7  ;;  %v4295_v39 = vld [vmem:[%s7708_s1 + $0x270] sm:$0xff]  ;;  %v4296_v40 = vld [vmem:[%s7708_s1 + $0x278] sm:$0xff]  ;;  %5788 = vmatprep.subr.bf16.mxu0 %v5787_v38  ;;  %v6472_v57 = vpack.c.bf16 %v4248_v37, %v4247_v36 }
  0x1d   : > { %715 = vst [vmem:[#allocation2 + $0xd8] sm:$0xff] %v6241_v7  ;;  %716 = vst [vmem:[#allocation2 + $0xe0] sm:$0xff] %v6241_v7  ;;  %v823_v41 = vld [vmem:[#allocation2 + $0x1] sm:$0xff]  ;;  %v6445_v43 = vld [vmem:[%s7709_s2] ss:$0 sm:$0xff]  ;;  %v6474_v58 = vpack.c.bf16 %v4296_v40, %v4295_v39 }
  0x1e   : > { %717 = vst [vmem:[#allocation2 + $0xe8] sm:$0x3] %v6241_v7  ;;  %718 = vst [vmem:[#allocation2 + $0xf0] sm:$0xff] %v6241_v7  ;;  %4879 = vmatprep.mubr.f32.mxu1 %v823_v41  ;;  %v481_v42 = vld [vmem:[%s6421_s30] sm:$0xff]  ;;  %v482_v49 = vld [vmem:[%s6421_s30 + $0x8] sm:$0xff]  ;;  %5662 = vmatpush3.bf16.msra.mxu1 %v5659_v33 }
  0x1f   : > { %719 = vst [vmem:[#allocation2 + $0xf8] sm:$0xff] %v6241_v7  ;;  %720 = vst [vmem:[#allocation2 + $0x100] sm:$0x3] %v6241_v7  ;;  %v6450_v44 = vld [vmem:[%s7710_s3] ss:$0 sm:$0xff]  ;;  %v520_v48 = vmul.f32 %v6445_v43, %v481_v42  ;;  %v521_v53 = vmul.f32 %v6445_v43, %v482_v49  ;;  %v4298_v55 = vld [vmem:[%s7708_s1 + $0x288] sm:$0xff]  ;;  %5790 = vmatpush3.bf16.msra.mxu0 %v5787_v38  ;;  %5664 = vmatprep.subr.bf16.mxu1 %v5663_v45 }
  0x20   : > { %721 = vst [vmem:[#allocation2 + $0x108] sm:$0xff] %v6241_v7  ;;  %722 = vst [vmem:[#allocation2 + $0x110] sm:$0xff] %v6241_v7  ;;  %v4297_v54 = vld [vmem:[%s7708_s1 + $0x280] sm:$0xff]  ;;  %v483_v60 = vld [vmem:[%s6421_s30 + $0x10] sm:$0xff]  ;;  %5792 = vmatprep.subr.bf16.mxu0 %v5791_v46 }
  0x21   : > { %723 = vst [vmem:[#allocation2 + $0x118] sm:$0x3] %v6241_v7  ;;  %724 = vst [vmem:[#allocation2 + $0x120] sm:$0xff] %v6241_v7  ;;  %v559_v59 = vadd.f32 %v6450_v44, %v520_v48  ;;  %v484_v61 = vld [vmem:[%s6421_s30 + $0x18] sm:$0xff]  ;;  %v485_v62 = vld [vmem:[%s6421_s30 + $0x20] sm:$0xff]  ;;  %v560_v63 = vadd.f32 %v6450_v44, %v521_v53  ;;  %v522_v2 = vmul.f32 %v6445_v43, %v483_v60 }
  0x22   : > { %725 = vst [vmem:[#allocation2 + $0x128] sm:$0xff] %v6241_v7  ;;  %726 = vst [vmem:[#allocation2 + $0x130] sm:$0x3] %v6241_v7  ;;  %v807_v0 = vld [vmem:[%s7708_s1] sm:$0xff]  ;;  %v808_v1 = vld [vmem:[%s7708_s1 + $0x8] sm:$0xff]  ;;  %v523_v3 = vmul.f32 %v6445_v43, %v484_v61  ;;  %v524_v4 = vmul.f32 %v6445_v43, %v485_v62  ;;  %5666 = vmatpush3.bf16.msra.mxu1 %v5663_v45 }
  0x23   : > { %727 = vst [vmem:[#allocation2 + $0x138] sm:$0xff] %v6241_v7  ;;  %728 = vst [vmem:[#allocation2 + $0x140] sm:$0xff] %v6241_v7  ;;  %v486_v5 = vld [vmem:[%s6421_s30 + $0x28] sm:$0xff]  ;;  %vm591_vm0 = vcmp.ge.f32.partialorder %v559_v59, 0.0  ;;  %v624_v6 = vmul.f32 %v6461_v52, %v559_v59  ;;  %vm592_vm1 = vcmp.ge.f32.partialorder %v560_v63, 0.0  ;;  %v625_v9 = vmul.f32 %v6461_v52, %v560_v63  ;;  %v487_v16 = vld [vmem:[%s6421_s30 + $0x30] sm:$0xff]  ;;  %5794 = vmatpush3.bf16.msra.mxu0 %v5791_v46 }
  0x24   : > { %729 = vst [vmem:[#allocation2 + $0x148] sm:$0x3] %v6241_v7  ;;  %730 = vst [vmem:[#allocation2 + $0x150] sm:$0xff] %v6241_v7  ;;  %v525_v8 = vmul.f32 %v6445_v43, %v486_v5  ;;  %v561_v10 = vadd.f32 %v6450_v44, %v522_v2  ;;  %v562_v11 = vadd.f32 %v6450_v44, %v523_v3  ;;  %v488_v19 = vld [vmem:[%s6421_s30 + $0x38] sm:$0xff]  ;;  %v489_v20 = vld [vmem:[%s6421_s30 + $0x40] sm:$0xff]  ;;  %5668 = vmatprep.subr.bf16.mxu1 %v6452_v47 }
  0x25   : > { %731 = vst [vmem:[#allocation2 + $0x158] sm:$0xff] %v6241_v7  ;;  %732 = vst [vmem:[#allocation2 + $0x160] sm:$0x3] %v6241_v7  ;;  %v6498_v12 = vsel %vm591_vm0, %v559_v59, %v624_v6  ;;  %v6500_v13 = vpack.c.bf16 %v808_v1, %v807_v0  ;;  %v563_v14 = vadd.f32 %v6450_v44, %v524_v4  ;;  %v4299_v23 = vld [vmem:[%s7708_s1 + $0x290] sm:$0xff]  ;;  %v4300_v24 = vld [vmem:[%s7708_s1 + $0x298] sm:$0xff]  ;;  %5796 = vmatprep.subr.bf16.mxu0 %v6456_v50 }
  0x26   : > { %733 = vst [vmem:[#allocation2 + $0x168] sm:$0xff] %v6241_v7  ;;  %734 = vst [vmem:[#allocation2 + $0x170] sm:$0xff] %v6241_v7  ;;  %v564_v15 = vadd.f32 %v6450_v44, %v525_v8  ;;  %5199 = vmatprep.mubr.f32.mxu0 %v6498_v12  ;;  %v6507_v17 = vsel %vm592_vm1, %v560_v63, %v625_v9  ;;  %vm593_vm2 = vcmp.ge.f32.partialorder %v561_v10, 0.0  ;;  %vm594_vm3 = vcmp.ge.f32.partialorder %v562_v11, 0.0  ;;  %v490_v25 = vld [vmem:[%s6421_s30 + $0x48] sm:$0xff]  ;;  %v809_v28 = vld [vmem:[%s7708_s1 + $0x10] sm:$0xff] }
  0x27   : > { %735 = vst [vmem:[#allocation2 + $0x178] sm:$0x3] %v6241_v7  ;;  %736 = vst [vmem:[#allocation2 + $0x180] sm:$0xff] %v6241_v7  ;;  %v626_v18 = vmul.f32 %v6461_v52, %v561_v10  ;;  %v627_v21 = vmul.f32 %v6461_v52, %v562_v11  ;;  %vm595_vm4 = vcmp.ge.f32.partialorder %v563_v14, 0.0  ;;  %v628_v22 = vmul.f32 %v6461_v52, %v563_v14  ;;  %v810_v29 = vld [vmem:[%s7708_s1 + $0x18] sm:$0xff]  ;;  %v491_v31 = vld [vmem:[%s6421_s30 + $0x50] sm:$0xff] }
  0x28   : > { %737 = vst [vmem:[#allocation2 + $0x188] sm:$0xff] %v6241_v7  ;;  %738 = vst [vmem:[#allocation2 + $0x190] sm:$0x3] %v6241_v7  ;;  %vm596_vm5 = vcmp.ge.f32.partialorder %v564_v15, 0.0  ;;  %v629_v27 = vmul.f32 %v6461_v52, %v564_v15  ;;  %v526_v30 = vmul.f32 %v6445_v43, %v487_v16  ;;  %v527_v34 = vmul.f32 %v6445_v43, %v488_v19  ;;  %v492_v36 = vld [vmem:[%s6421_s30 + $0x58] sm:$0xff]  ;;  %v493_v53 = vld [vmem:[%s6421_s30 + $0x60] sm:$0xff] }
  0x29   : > { %739 = vst [vmem:[#allocation2 + $0x198] sm:$0xff] %v6241_v7  ;;  %740 = vst [vmem:[#allocation2 + $0x1a0] sm:$0xff] %v6241_v7  ;;  %v6524_v26 = vsel %vm593_vm2, %v561_v10, %v626_v18  ;;  %v6538_v32 = vsel %vm594_vm3, %v562_v11, %v627_v21  ;;  %v6541_v33 = vsel %vm595_vm4, %v563_v14, %v628_v22  ;;  %5670 = vmatpush3.bf16.msra.mxu1 %v6452_v47  ;;  %v4301_v61 = vld [vmem:[%s7708_s1 + $0x2a0] sm:$0xff]  ;;  %v4302_v62 = vld [vmem:[%s7708_s1 + $0x2a8] sm:$0xff] }
  0x2a   : > { %741 = vst [vmem:[#allocation2 + $0x1a8] sm:$0x3] %v6241_v7  ;;  %v6492_v7 = vpack.c.bf16 %v4298_v55, %v4297_v54  ;;  %743 = vst [vmem:[#allocation2 + $0x19] sm:$0xff] %v6498_v12  ;;  %v528_v35 = vmul.f32 %v6445_v43, %v489_v20  ;;  %v6549_v37 = vsel %vm596_vm5, %v564_v15, %v629_v27  ;;  %5798 = vmatpush3.bf16.msra.mxu0 %v6456_v50  ;;  %v494_v50 = vld [vmem:[%s6421_s30 + $0x68] sm:$0xff]  ;;  %v811_v2 = vld [vmem:[%s7708_s1 + $0x20] sm:$0xff] }
  0x2b   : > { %744 = vst [vmem:[#allocation2 + $0x21] sm:$0xff] %v6507_v17  ;;  %745 = vst [vmem:[#allocation2 + $0x31] sm:$0xff] %v6524_v26  ;;  %v6551_v38 = vpack.c.bf16 %v4300_v24, %v4299_v23  ;;  %v565_v39 = vadd.f32 %v6450_v44, %v526_v30  ;;  %v529_v40 = vmul.f32 %v6445_v43, %v490_v25  ;;  %5672 = vmatprep.subr.bf16.mxu1 %v6458_v51  ;;  %v812_v3 = vld [vmem:[%s7708_s1 + $0x28] sm:$0xff]  ;;  %v496_v10 = vld [vmem:[%s6421_s30 + $0x78] sm:$0xff] }
  0x2c   : > { %746 = vst [vmem:[#allocation2 + $0x39] sm:$0xff] %v6538_v32  ;;  %747 = vst [vmem:[#allocation2 + $0x49] sm:$0xff] %v6541_v33  ;;  %v6557_v41 = vpack.c.bf16 %v810_v29, %v809_v28  ;;  %v566_v42 = vadd.f32 %v6450_v44, %v527_v34  ;;  %v567_v45 = vadd.f32 %v6450_v44, %v528_v35  ;;  %5800 = vmatprep.subr.bf16.mxu0 %v6470_v56  ;;  %v497_v15 = vld [vmem:[%s6421_s30 + $0x80] sm:$0xff]  ;;  %v4303_v20 = vld [vmem:[%s7708_s1 + $0x2b0] sm:$0xff] }
  0x2d   : > { %748 = vst [vmem:[#allocation2 + $0x51] sm:$0xff] %v6549_v37  ;;  %v530_v46 = vmul.f32 %v6445_v43, %v491_v31  ;;  %vm597_vm6 = vcmp.ge.f32.partialorder %v565_v39, 0.0  ;;  %v630_v48 = vmul.f32 %v6461_v52, %v565_v39  ;;  %v568_v47 = vadd.f32 %v6450_v44, %v529_v40  ;;  %5674 = vmatpush3.bf16.msra.mxu1 %v6458_v51  ;;  %v495_v51 = vld [vmem:[%s6421_s30 + $0x70] sm:$0xff]  ;;  %v4304_v21 = vld [vmem:[%s7708_s1 + $0x2b8] sm:$0xff]  ;;  %v498_v23 = vld [vmem:[%s6421_s30 + $0x88] sm:$0xff] }
  0x2e   : > { %v531_v49 = vmul.f32 %v6445_v43, %v492_v36  ;;  %vm598_vm7 = vcmp.ge.f32.partialorder %v566_v42, 0.0  ;;  %v631_v54 = vmul.f32 %v6461_v52, %v566_v42  ;;  %vm599_vm8 = vcmp.ge.f32.partialorder %v567_v45, 0.0  ;;  %5802 = vmatpush3.bf16.msra.mxu0 %v6470_v56  ;;  %5676 = vmatprep.subr.bf16.mxu1 %v6472_v57  ;;  %v824_v24 = vld [vmem:[#allocation2 + $0x9] sm:$0xff]  ;;  %v814_v30 = vld [vmem:[%s7708_s1 + $0x38] sm:$0xff] }
  0x2f   : > { %v632_v55 = vmul.f32 %v6461_v52, %v567_v45  ;;  %v6572_v59 = vsel %vm597_vm6, %v565_v39, %v630_v48  ;;  %vm600_vm9 = vcmp.ge.f32.partialorder %v568_v47, 0.0  ;;  %v633_v60 = vmul.f32 %v6461_v52, %v568_v47  ;;  %5804 = vmatprep.subr.bf16.mxu0 %v6474_v58  ;;  %v813_v29 = vld [vmem:[%s7708_s1 + $0x30] sm:$0xff]  ;;  %v500_v48 = vld [vmem:[%s6421_s30 + $0x98] sm:$0xff] }
  0x30   : > { %v569_v63 = vadd.f32 %v6450_v44, %v530_v46  ;;  %749 = vst [vmem:[#allocation2 + $0x61] sm:$0xff] %v6572_v59  ;;  %v6584_v0 = vsel %vm598_vm7, %v566_v42, %v631_v54  ;;  %v570_v4 = vadd.f32 %v6450_v44, %v531_v49  ;;  %v532_v5 = vmul.f32 %v6445_v43, %v493_v53  ;;  %v499_v40 = vld [vmem:[%s6421_s30 + $0x90] sm:$0xff]  ;;  %v501_v54 = vld [vmem:[%s6421_s30 + $0xa0] sm:$0xff] }
  0x31   : > { %v6586_v1 = vsel %vm599_vm8, %v567_v45, %v632_v55  ;;  %750 = vst [vmem:[#allocation2 + $0x69] sm:$0xff] %v6584_v0  ;;  %v6602_v6 = vsel %vm600_vm9, %v568_v47, %v633_v60  ;;  %v533_v9 = vmul.f32 %v6445_v43, %v494_v50  ;;  %v6609_v56 = vpack.c.bf16 %v4302_v62, %v4301_v61  ;;  %v502_v60 = vld [vmem:[%s6421_s30 + $0xa8] sm:$0xff] }
  0x32   : > { %751 = vst [vmem:[#allocation2 + $0x79] sm:$0xff] %v6586_v1  ;;  %vm601_vm10 = vcmp.ge.f32.partialorder %v569_v63, 0.0  ;;  %v634_v8 = vmul.f32 %v6461_v52, %v569_v63  ;;  %752 = vst [vmem:[#allocation2 + $0x81] sm:$0xff] %v6602_v6  ;;  %vm602_vm11 = vcmp.ge.f32.partialorder %v570_v4, 0.0  ;;  %v635_v11 = vmul.f32 %v6461_v52, %v570_v4  ;;  %5678 = vmatpush3.bf16.msra.mxu1 %v6472_v57  ;;  %v4306_v62 = vld [vmem:[%s7708_s1 + $0x2c8] sm:$0xff] }
  0x33   : > { %v571_v14 = vadd.f32 %v6450_v44, %v532_v5  ;;  %v6614_v16 = vpack.c.bf16 %v812_v3, %v811_v2  ;;  %v572_v19 = vadd.f32 %v6450_v44, %v533_v9  ;;  %v534_v22 = vmul.f32 %v6445_v43, %v495_v51  ;;  %5806 = vmatpush3.bf16.msra.mxu0 %v6474_v58  ;;  %v815_v3 = vld [vmem:[%s7708_s1 + $0x40] sm:$0xff] }
  0x34   : > { %v6616_v18 = vsel %vm601_vm10, %v569_v63, %v634_v8  ;;  %v6629_v25 = vsel %vm602_vm11, %v570_v4, %v635_v11  ;;  %v535_v28 = vmul.f32 %v6445_v43, %v496_v10  ;;  %5680 = vmatprep.subr.bf16.mxu1 %v6500_v13  ;;  %v536_v58 = vmul.f32 %v6445_v43, %v497_v15  ;;  %v816_v4 = vld [vmem:[%s7708_s1 + $0x48] sm:$0xff]  ;;  %v503_v10 = vld [vmem:[%s6421_s30 + $0xb0] sm:$0xff]  ;;  %v504_v15 = vld [vmem:[%s6421_s30 + $0xb8] sm:$0xff] }
  0x35   : > { %753 = vst [vmem:[#allocation2 + $0x91] sm:$0xff] %v6616_v18  ;;  %vm603_vm12 = vcmp.ge.f32.partialorder %v571_v14, 0.0  ;;  %v636_v27 = vmul.f32 %v6461_v52, %v571_v14  ;;  %754 = vst [vmem:[#allocation2 + $0x99] sm:$0xff] %v6629_v25  ;;  %vm604_vm13 = vcmp.ge.f32.partialorder %v572_v19, 0.0  ;;  %v637_v57 = vmul.f32 %v6461_v52, %v572_v19  ;;  %5808 = vmatprep.subr.bf16.mxu0 %v6492_v7 }
  0x36   : > { %v573_v31 = vadd.f32 %v6450_v44, %v534_v22  ;;  %v6648_v35 = vpack.c.bf16 %v4304_v21, %v4303_v20  ;;  %v574_v36 = vadd.f32 %v6450_v44, %v535_v28  ;;  %v537_v39 = vmul.f32 %v6445_v43, %v498_v23  ;;  %4880 = vmatmul.mubr.f32.vlgmr.msra.gmra.mrb[0].mxu1 %v824_v24  ;;  %v505_v21 = vld [vmem:[%s6421_s30 + $0xc0] sm:$0xff]  ;;  %v506_v24 = vld [vmem:[%s6421_s30 + $0xc8] sm:$0xff]  ;;  %v4307_v28 = vld [vmem:[%s7708_s1 + $0x2d0] sm:$0xff] }
  0x37   : > { %v6646_v34 = vsel %vm603_vm12, %v571_v14, %v636_v27  ;;  %v6654_v42 = vsel %vm604_vm13, %v572_v19, %v637_v57  ;;  %v575_v46 = vadd.f32 %v6450_v44, %v536_v58  ;;  %5200 = vmatmul.mubr.f32.vlgmr.msra.gmra.mrb[0].mxu0 %v6507_v17  ;;  %4882 = vmatprep.mubr.f32.mxu1 %v6498_v12  ;;  %v4308_v57 = vld [vmem:[%s7708_s1 + $0x2d8] sm:$0xff] }
  0x38   : > { %755 = vst [vmem:[#allocation2 + $0xa9] sm:$0xff] %v6646_v34  ;;  %vm605_vm14 = vcmp.ge.f32.partialorder %v573_v31, 0.0  ;;  %v638_v45 = vmul.f32 %v6461_v52, %v573_v31  ;;  %756 = vst [vmem:[#allocation2 + $0xb1] sm:$0xff] %v6654_v42  ;;  %v6662_v47 = vpack.c.bf16 %v814_v30, %v813_v29  ;;  %vm606_vm15 = vcmp.ge.f32.partialorder %v574_v36, 0.0  ;;  %5810 = vmatpush3.bf16.msra.mxu0 %v6492_v7  ;;  %v817_v30 = vld [vmem:[%s7708_s1 + $0x50] sm:$0xff] }
  0x39   : > { %v639_v49 = vmul.f32 %v6461_v52, %v574_v36  ;;  %v576_v53 = vadd.f32 %v6450_v44, %v537_v39  ;;  %5682 = vmatpush3.bf16.msra.mxu1 %v6500_v13  ;;  %vm607_vm0 = vcmp.ge.f32.partialorder %v575_v46, 0.0  ;;  %v640_v50 = vmul.f32 %v6461_v52, %v575_v46  ;;  %5202 = vmatprep.mubr.f32.mxu0 %v6524_v26  ;;  %v4305_v13 = vld [vmem:[%s7708_s1 + $0x2c0] sm:$0xff] }
  0x3a   : > { %v6669_v55 = vsel %vm605_vm14, %v573_v31, %v638_v45  ;;  %v538_v12 = vmul.f32 %v6445_v43, %v499_v40  ;;  %5812 = vmatprep.subr.bf16.mxu0 %v6551_v38  ;;  %v539_v63 = vmul.f32 %v6445_v43, %v500_v48  ;;  %4883 = vmatmul.mubr.f32.gmra.mrb[2].mxu1 %v6507_v17  ;;  %v818_v31 = vld [vmem:[%s7708_s1 + $0x58] sm:$0xff]  ;;  %v507_v45 = vld [vmem:[%s6421_s30 + $0xd0] sm:$0xff] }
  0x3b   : > { %757 = vst [vmem:[#allocation2 + $0xc1] sm:$0xff] %v6669_v55  ;;  %v6677_v61 = vsel %vm606_vm15, %v574_v36, %v639_v49  ;;  %vm608_vm1 = vcmp.ge.f32.partialorder %v576_v53, 0.0  ;;  %v641_v7 = vmul.f32 %v6461_v52, %v576_v53  ;;  %5684 = vmatprep.subr.bf16.mxu1 %v6557_v41  ;;  %v6691_v2 = vsel %vm607_vm0, %v575_v46, %v640_v50  ;;  %v508_v49 = vld [vmem:[%s6421_s30 + $0xd8] sm:$0xff]  ;;  %v509_v50 = vld [vmem:[%s6421_s30 + $0xe0] sm:$0xff] }
  0x3c   : > { %758 = vst [vmem:[#allocation2 + $0xc9] sm:$0xff] %v6677_v61  ;;  %v577_v5 = vadd.f32 %v6450_v44, %v538_v12  ;;  %v540_v17 = vmul.f32 %v6445_v43, %v501_v54  ;;  %5203 = vmatmul.mubr.f32.gmra.mrb[2].mxu0 %v6538_v32  ;;  %4885 = vmatprep.mubr.f32.mxu1 %v6524_v26  ;;  %759 = vst [vmem:[#allocation2 + $0xd9] sm:$0xff] %v6691_v2 }
  0x3d   : > { %v6705_v51 = vsel %vm608_vm1, %v576_v53, %v641_v7  ;;  %v578_v8 = vadd.f32 %v6450_v44, %v539_v63  ;;  %v541_v9 = vmul.f32 %v6445_v43, %v502_v60  ;;  %5205 = vmatprep.mubr.f32.mxu0 %v6541_v33  ;;  %5814 = vmatpush3.bf16.msra.mxu0 %v6551_v38  ;;  %v4310_v63 = vld [vmem:[%s7708_s1 + $0x2e8] sm:$0xff] }
  0x3e   : > { %760 = vst [vmem:[#allocation2 + $0xe1] sm:$0xff] %v6705_v51  ;;  %v6713_v11 = vpack.c.bf16 %v4306_v62, %v4305_v13  ;;  %vm609_vm2 = vcmp.ge.f32.partialorder %v577_v5, 0.0  ;;  %v642_v26 = vmul.f32 %v6461_v52, %v577_v5  ;;  %v579_v14 = vadd.f32 %v6450_v44, %v540_v17  ;;  %5686 = vmatpush3.bf16.msra.mxu1 %v6557_v41 }
  0x3f   : > { %5816 = vmatprep.subr.bf16.mxu0 %v6609_v56  ;;  %v6720_v19 = vpack.c.bf16 %v816_v4, %v815_v3  ;;  %vm610_vm3 = vcmp.ge.f32.partialorder %v578_v8, 0.0  ;;  %v643_v38 = vmul.f32 %v6461_v52, %v578_v8  ;;  %v580_v20 = vadd.f32 %v6450_v44, %v541_v9  ;;  %4886 = vmatmul.mubr.f32.gmra.mrb[4].mxu1 %v6538_v32  ;;  %v819_v4 = vld [vmem:[%s7708_s1 + $0x60] sm:$0xff] }
  0x40   : > { %5688 = vmatprep.subr.bf16.mxu1 %v6614_v16  ;;  %v6727_v22 = vsel %vm609_vm2, %v577_v5, %v642_v26  ;;  %vm611_vm4 = vcmp.ge.f32.partialorder %v579_v14, 0.0  ;;  %v644_v23 = vmul.f32 %v6461_v52, %v579_v14  ;;  %v542_v41 = vmul.f32 %v6445_v43, %v503_v10  ;;  %5206 = vmatmul.mubr.f32.gmra.mrb[4].mxu0 %v6549_v37  ;;  %v820_v5 = vld [vmem:[%s7708_s1 + $0x68] sm:$0xff]  ;;  %v511_v26 = vld [vmem:[%s6421_s30 + $0xf0] sm:$0xff] }
  0x41   : > { %4888 = vmatprep.mubr.f32.mxu1 %v6541_v33  ;;  %761 = vst [vmem:[#allocation2 + $0xf1] sm:$0xff] %v6727_v22  ;;  %v6735_v27 = vsel %vm610_vm3, %v578_v8, %v643_v38  ;;  %vm612_vm5 = vcmp.ge.f32.partialorder %v580_v20, 0.0  ;;  %v645_v32 = vmul.f32 %v6461_v52, %v580_v20  ;;  %v543_v29 = vmul.f32 %v6445_v43, %v504_v15  ;;  %v512_v38 = vld [vmem:[%s6421_s30 + $0xf8] sm:$0xff] }
  0x42   : > { %5208 = vmatprep.mubr.f32.mxu0 %v6572_v59  ;;  %5818 = vmatpush3.bf16.msra.mxu0 %v6609_v56  ;;  %762 = vst [vmem:[#allocation2 + $0xf9] sm:$0xff] %v6735_v27  ;;  %v6749_v33 = vsel %vm611_vm4, %v579_v14, %v644_v23  ;;  %v581_v58 = vadd.f32 %v6450_v44, %v542_v41 }
  0x43   : > { %v544_v36 = vmul.f32 %v6445_v43, %v505_v21  ;;  %5690 = vmatpush3.bf16.msra.mxu1 %v6614_v16  ;;  %5820 = vmatprep.subr.bf16.mxu0 %v6648_v35  ;;  %763 = vst [vmem:[#allocation2 + $0x109] sm:$0xff] %v6749_v33  ;;  %v6763_v56 = vsel %vm612_vm5, %v580_v20, %v645_v32 }
  0x44   : > { %v582_v39 = vadd.f32 %v6450_v44, %v543_v29  ;;  %v545_v40 = vmul.f32 %v6445_v43, %v506_v24  ;;  %4889 = vmatmul.mubr.f32.gmra.mrb[6].mxu1 %v6549_v37  ;;  %5692 = vmatprep.subr.bf16.mxu1 %v6662_v47  ;;  %764 = vst [vmem:[#allocation2 + $0x111] sm:$0xff] %v6763_v56  ;;  %vm613_vm6 = vcmp.ge.f32.partialorder %v581_v58, 0.0  ;;  %v4312_v24 = vld [vmem:[%s7708_s1 + $0x2f8] sm:$0xff] }
  0x45   : > { %v6771_v16 = vpack.c.bf16 %v4308_v57, %v4307_v28  ;;  %v646_v46 = vmul.f32 %v6461_v52, %v581_v58  ;;  %v583_v48 = vadd.f32 %v6450_v44, %v544_v36  ;;  %5209 = vmatmul.mubr.f32.gmra.mrb[6].mxu0 %v6584_v0  ;;  %4891 = vmatprep.mubr.f32.mxu1 %v6572_v59  ;;  %v510_v59 = vld [vmem:[%s6421_s30 + $0xe8] sm:$0xff]  ;;  %v821_v57 = vld [vmem:[%s7708_s1 + $0x70] sm:$0xff]  ;;  %v822_v29 = vld [vmem:[%s7708_s1 + $0x78] sm:$0xff]  ;;  %s7594_s30 = scalar_lea.vmem %s7714_s7, %s6374_s16 }
  0x46   : > { %v6778_v53 = vpack.c.bf16 %v818_v31, %v817_v30  ;;  %vm614_vm7 = vcmp.ge.f32.partialorder %v582_v39, 0.0  ;;  %v647_v37 = vmul.f32 %v6461_v52, %v582_v39  ;;  %v584_v54 = vadd.f32 %v6450_v44, %v545_v40  ;;  %5211 = vmatprep.mubr.f32.mxu0 %v6586_v1  ;;  %5822 = vmatpush3.bf16.msra.mxu0 %v6648_v35  ;;  %v4309_v35 = vld [vmem:[%s7708_s1 + $0x2e0] sm:$0xff] }
  0x47   : > { %v6785_v12 = vsel %vm613_vm6, %v581_v58, %v646_v46  ;;  %vm615_vm8 = vcmp.ge.f32.partialorder %v583_v48, 0.0  ;;  %v648_v60 = vmul.f32 %v6461_v52, %v583_v48  ;;  %v546_v7 = vmul.f32 %v6445_v43, %v507_v45  ;;  %5694 = vmatpush3.bf16.msra.mxu1 %v6662_v47  ;;  %5824 = vmatprep.subr.bf16.mxu0 %v6713_v11  ;;  %v4313_v45 = vld [vmem:[%s7708_s1 + $0x300] sm:$0xff]  ;;  %v4250_v46 = vld [vmem:[%s7708_s1 + $0x108] sm:$0xff] }
  0x48   : > { %765 = vst [vmem:[#allocation2 + $0x121] sm:$0xff] %v6785_v12  ;;  %v6793_v13 = vsel %vm614_vm7, %v582_v39, %v647_v37  ;;  %vm616_vm9 = vcmp.ge.f32.partialorder %v584_v54, 0.0  ;;  %v649_v62 = vmul.f32 %v6461_v52, %v584_v54  ;;  %v547_v47 = vmul.f32 %v6445_v43, %v508_v49  ;;  %4892 = vmatmul.mubr.f32.gmra.mrb[8].mxu1 %v6584_v0 }
  0x49   : > { %5696 = vmatprep.subr.bf16.mxu1 %v6720_v19  ;;  %766 = vst [vmem:[#allocation2 + $0x129] sm:$0xff] %v6793_v13  ;;  %v6807_v3 = vsel %vm615_vm8, %v583_v48, %v648_v60  ;;  %v585_v17 = vadd.f32 %v6450_v44, %v546_v7  ;;  %v548_v0 = vmul.f32 %v6445_v43, %v509_v50  ;;  %v4318_v50 = vld [vmem:[%s7708_s1 + $0x328] sm:$0xff]  ;;  %v4253_v60 = vld [vmem:[%s7708_s1 + $0x120] sm:$0xff] }
  0x4a   : > { %5212 = vmatmul.mubr.f32.gmra.mrb[8].mxu0 %v6602_v6  ;;  %4894 = vmatprep.mubr.f32.mxu1 %v6586_v1  ;;  %767 = vst [vmem:[#allocation2 + $0x139] sm:$0xff] %v6807_v3  ;;  %v6821_v8 = vsel %vm616_vm9, %v584_v54, %v649_v62  ;;  %v586_v9 = vadd.f32 %v6450_v44, %v547_v47  ;;  %v4317_v54 = vld [vmem:[%s7708_s1 + $0x320] sm:$0xff]  ;;  %v4254_v7 = vld [vmem:[%s7708_s1 + $0x128] sm:$0xff]  ;;  %v4319_v47 = vld [vmem:[%s7708_s1 + $0x330] sm:$0xff] }
  0x4b   : > { %v549_v10 = vmul.f32 %v6445_v43, %v510_v59  ;;  %5214 = vmatprep.mubr.f32.mxu0 %v6616_v18  ;;  %5826 = vmatpush3.bf16.msra.mxu0 %v6713_v11  ;;  %768 = vst [vmem:[#allocation2 + $0x141] sm:$0xff] %v6821_v8  ;;  %v5831_v14 = vpack.c.bf16 %v4310_v63, %v4309_v35  ;;  %vm617_vm10 = vcmp.ge.f32.partialorder %v585_v17, 0.0  ;;  %v6965_v59 = vld [vmem:[#allocation2 + $0x3a] sm:$0xff]  ;;  %v6970_v62 = vld [vmem:[#allocation2 + $0x4a] sm:$0xff] }
  0x4c   : > { %v650_v1 = vmul.f32 %v6461_v52, %v585_v17  ;;  %v587_v15 = vadd.f32 %v6450_v44, %v548_v0  ;;  %5698 = vmatpush3.bf16.msra.mxu1 %v6720_v19  ;;  %5828 = vmatprep.subr.bf16.mxu0 %v6771_v16  ;;  %v5703_v20 = vpack.c.bf16 %v820_v5, %v819_v4  ;;  %vm618_vm11 = vcmp.ge.f32.partialorder %v586_v9, 0.0  ;;  %v4311_v19 = vld [vmem:[%s7708_s1 + $0x2f0] sm:$0xff]  ;;  %v6981_v4 = vld [vmem:[#allocation2 + $0x38] sm:$0xff] }
  0x4d   : > { %v651_v21 = vmul.f32 %v6461_v52, %v586_v9  ;;  %v588_v23 = vadd.f32 %v6450_v44, %v549_v10  ;;  %4895 = vmatmul.mubr.f32.gmra.mrb[10].mxu1 %v6602_v6  ;;  %5700 = vmatprep.subr.bf16.mxu1 %v6778_v53  ;;  %v550_v32 = vmul.f32 %v6445_v43, %v511_v26  ;;  %v4255_v5 = vld [vmem:[%s7708_s1 + $0x130] sm:$0xff] }
  0x4e   : > { %v6838_v11 = vsel %vm617_vm10, %v585_v17, %v650_v1  ;;  %vm619_vm12 = vcmp.ge.f32.partialorder %v587_v15, 0.0  ;;  %v652_v41 = vmul.f32 %v6461_v52, %v587_v15  ;;  %5215 = vmatmul.mubr.f32.gmra.mrb[10].mxu0 %v6629_v25  ;;  %4897 = vmatprep.mubr.f32.mxu1 %v6616_v18  ;;  %v551_v30 = vmul.f32 %v6445_v43, %v512_v38  ;;  %v4256_v17 = vld [vmem:[%s7708_s1 + $0x138] sm:$0xff]  ;;  %v4322_v1 = vld [vmem:[%s7708_s1 + $0x348] sm:$0xff]  ;;  %v4257_v38 = vld [vmem:[%s7708_s1 + $0x140] sm:$0xff] }
  0x4f   : > { %769 = vst [vmem:[#allocation2 + $0x151] sm:$0xff] %v6838_v11  ;;  %v6851_v6 = vsel %vm618_vm11, %v586_v9, %v651_v21  ;;  %vm620_vm13 = vcmp.ge.f32.partialorder %v588_v23, 0.0  ;;  %v653_v28 = vmul.f32 %v6461_v52, %v588_v23  ;;  %5217 = vmatprep.mubr.f32.mxu0 %v6646_v34  ;;  %5830 = vmatpush3.bf16.msra.mxu0 %v6771_v16  ;;  %v4314_v16 = vld [vmem:[%s7708_s1 + $0x308] sm:$0xff]  ;;  %v6990_v0 = vld [vmem:[#allocation2 + $0x52] sm:$0xff] }
  0x50   : > { %770 = vst [vmem:[#allocation2 + $0x159] sm:$0xff] %v6851_v6  ;;  %v6865_v18 = vsel %vm619_vm12, %v587_v15, %v652_v41  ;;  %v589_v31 = vadd.f32 %v6450_v44, %v550_v32  ;;  %5702 = vmatpush3.bf16.msra.mxu1 %v6778_v53  ;;  %5832 = vmatprep.subr.bf16.mxu0 %v5831_v14  ;;  %v6947_v53 = vld [vmem:[#allocation2 + $0x32] sm:$0xff]  ;;  %v6994_v9 = vld [vmem:[#allocation2 + $0x62] sm:$0xff]  ;;  %v7014_v21 = vld [vmem:[#allocation2 + $0x6a] sm:$0xff] }
  0x51   : > { %771 = vst [vmem:[#allocation2 + $0x169] sm:$0xff] %v6865_v18  ;;  %v6870_v58 = vsel %vm620_vm13, %v588_v23, %v653_v28  ;;  %v5835_v36 = vpack.c.bf16 %v4312_v24, %v4311_v19  ;;  %v590_v43 = vadd.f32 %v6450_v44, %v551_v30  ;;  %4898 = vmatmul.mubr.f32.gmra.mrb[12].mxu1 %v6629_v25  ;;  %v4249_v25 = vld [vmem:[%s7708_s1 + $0x100] sm:$0xff]  ;;  %v7005_v15 = vld [vmem:[#allocation2 + $0x50] sm:$0xff]  ;;  %v4324_v32 = vld [vmem:[%s7708_s1 + $0x358] sm:$0xff] }
  0x52   : > { %5704 = vmatprep.subr.bf16.mxu1 %v5703_v20  ;;  %772 = vst [vmem:[#allocation2 + $0x171] sm:$0xff] %v6870_v58  ;;  %v5707_v39 = vpack.c.bf16 %v822_v29, %v821_v57  ;;  %vm621_vm14 = vcmp.ge.f32.partialorder %v589_v31, 0.0  ;;  %v654_v40 = vmul.f32 %v6461_v52, %v589_v31  ;;  %5218 = vmatmul.mubr.f32.gmra.mrb[12].mxu0 %v6654_v42  ;;  %v7016_v23 = vld [vmem:[#allocation2 + $0x60] sm:$0xff]  ;;  %v4323_v24 = vld [vmem:[%s7708_s1 + $0x350] sm:$0xff]  ;;  %v4260_v57 = vld [vmem:[%s7708_s1 + $0x158] sm:$0xff] }
  0x53   : > { %4900 = vmatprep.mubr.f32.mxu1 %v6646_v34  ;;  %vm622_vm15 = vcmp.ge.f32.partialorder %v590_v43, 0.0  ;;  %v655_v44 = vmul.f32 %v6461_v52, %v590_v43  ;;  %5220 = vmatprep.mubr.f32.mxu0 %v6669_v55  ;;  %v5839_v34 = vpack.c.bf16 %v4314_v16, %v4313_v45  ;;  %v5711_v52 = vpack.c.bf16 %v4250_v46, %v4249_v25  ;;  %v4259_v28 = vld [vmem:[%s7708_s1 + $0x150] sm:$0xff]  ;;  %v7038_v29 = vld [vmem:[#allocation2 + $0x82] sm:$0xff]  ;;  %v7040_v30 = vld [vmem:[#allocation2 + $0x78] sm:$0xff] }
  0x54   : > { %5834 = vmatpush3.bf16.msra.mxu0 %v5831_v14  ;;  %v686_v48 = vsel %vm621_vm14, %v589_v31, %v654_v40  ;;  %5706 = vmatpush3.bf16.msra.mxu1 %v5703_v20  ;;  %v5847_v35 = vpack.c.bf16 %v4318_v50, %v4317_v54  ;;  %v5719_v63 = vpack.c.bf16 %v4254_v7, %v4253_v60  ;;  %v4321_v14 = vld [vmem:[%s7708_s1 + $0x340] sm:$0xff]  ;;  %v4258_v20 = vld [vmem:[%s7708_s1 + $0x148] sm:$0xff]  ;;  %v7101_v7 = vld [vmem:[#allocation2 + $0xb0] sm:$0xff] }
  0x55   : > { %5836 = vmatprep.subr.bf16.mxu0 %v5835_v36  ;;  %773 = vst [vmem:[#allocation2 + $0x181] sm:$0xff] %v686_v48  ;;  %v687_v49 = vsel %vm622_vm15, %v590_v43, %v655_v44  ;;  %4901 = vmatmul.mubr.f32.gmra.mrb[14].mxu1 %v6654_v42  ;;  %v6923_v42 = vld [vmem:[#allocation2 + $0x1a] sm:$0xff]  ;;  %v5723_v26 = vpack.c.bf16 %v4256_v17, %v4255_v5  ;;  %v4326_v43 = vld [vmem:[%s7708_s1 + $0x368] sm:$0xff]  ;;  %v7064_v44 = vld [vmem:[#allocation2 + $0x90] sm:$0xff] }
  0x56   : > { %5708 = vmatprep.subr.bf16.mxu1 %v5707_v39  ;;  %774 = vst [vmem:[#allocation2 + $0x189] sm:$0xff] %v687_v49  ;;  %5221 = vmatmul.mubr.f32.gmra.mrb[14].mxu0 %v6677_v61  ;;  %v5855_v41 = vpack.c.bf16 %v4322_v1, %v4321_v14  ;;  %v5727_v19 = vpack.c.bf16 %v4258_v20, %v4257_v38  ;;  %v4261_v40 = vld [vmem:[%s7708_s1 + $0x160] sm:$0xff]  ;;  %v4262_v45 = vld [vmem:[%s7708_s1 + $0x168] sm:$0xff]  ;;  %v7128_v1 = vld [vmem:[#allocation2 + $0xd8] sm:$0xff] }
  0x57   : > { %4903 = vmatprep.mubr.f32.mxu1 %v6669_v55  ;;  %5223 = vmatprep.mubr.f32.mxu0 %v6691_v2  ;;  %v4315_v55 = vld [vmem:[%s7708_s1 + $0x310] sm:$0xff]  ;;  %v5859_v31 = vpack.c.bf16 %v4324_v32, %v4323_v24  ;;  %v7062_v16 = vld [vmem:[#allocation2 + $0x9a] sm:$0xff]  ;;  %v4330_v60 = vld [vmem:[%s7708_s1 + $0x388] sm:$0xff] }
  0x58   : > { %5838 = vmatpush3.bf16.msra.mxu0 %v5835_v36  ;;  %5710 = vmatpush3.bf16.msra.mxu1 %v5707_v39  ;;  %v4325_v36 = vld [vmem:[%s7708_s1 + $0x360] sm:$0xff]  ;;  %v7066_v25 = vld [vmem:[#allocation2 + $0xaa] sm:$0xff]  ;;  %v7130_v38 = vld [vmem:[#allocation2 + $0xf2] sm:$0xff] }
  0x59   : > { %5840 = vmatprep.subr.bf16.mxu0 %v5839_v34  ;;  %4904 = vmatmul.mubr.f32.gmra.mrb[16].mxu1 %v6677_v61  ;;  %v4316_v61 = vld [vmem:[%s7708_s1 + $0x318] sm:$0xff]  ;;  %v7053_v39 = vld [vmem:[#allocation2 + $0x80] sm:$0xff]  ;;  %v5863_v46 = vpack.c.bf16 %v4326_v43, %v4325_v36  ;;  %v7144_v24 = vld [vmem:[#allocation2 + $0x10a] sm:$0xff] }
  0x5a   : > { %5712 = vmatprep.subr.bf16.mxu1 %v5711_v52  ;;  %5224 = vmatmul.mubr.f32.gmra.mrb[16].mxu0 %v6705_v51  ;;  %v4329_v50 = vld [vmem:[%s7708_s1 + $0x380] sm:$0xff]  ;;  %v7149_v32 = vld [vmem:[#allocation2 + $0xf8] sm:$0xff]  ;;  %v7164_v36 = vld [vmem:[#allocation2 + $0x12a] sm:$0xff] }
  0x5b   : > { %4906 = vmatprep.mubr.f32.mxu1 %v6691_v2  ;;  %5226 = vmatprep.mubr.f32.mxu0 %v6727_v22  ;;  %v6932_v2 = vld [vmem:[#allocation2] sm:$0xff]  ;;  %v7116_v17 = vpack.c.bf16 %v4330_v60, %v4329_v50  ;;  %v7200_v50 = vld [vmem:[#allocation2 + $0x172] sm:$0xff]  ;;  %v7202_v60 = vld [vmem:[#allocation2 + $0x168] sm:$0xff] }
  0x5c   : > { %7732 = vst [vmem:[#allocation4_spill] sm:$0xff] %v6932_v2  ;;  %v7114_v5 = vld [vmem:[#allocation2 + $0xda] sm:$0xff]  ;;  %v7126_v14 = vld [vmem:[#allocation2 + $0xe2] sm:$0xff]  ;;  %7739 = vst [vmem:[#allocation11_spill] sm:$0xff] %v7200_v50 }
  0x5d   : > { %4907 = vmatmul.mubr.f32.gmra.mrb[18].mxu1 %v6705_v51  ;;  %v4251_v51 = vld [vmem:[%s7708_s1 + $0x110] sm:$0xff]  ;;  %v7137_v20 = vld [vmem:[#allocation2 + $0xe0] sm:$0xff] }
  0x5e   : > { %5227 = vmatmul.mubr.f32.gmra.mrb[18].mxu0 %v6735_v27  ;;  %4909 = vmatprep.mubr.f32.mxu1 %v6727_v22  ;;  %v4252_v22 = vld [vmem:[%s7708_s1 + $0x118] sm:$0xff]  ;;  %v7166_v43 = vld [vmem:[#allocation2 + $0x120] sm:$0xff] }
  0x5f   : > { %5229 = vmatprep.mubr.f32.mxu0 %v6749_v33  ;;  %v5715_v37 = vpack.c.bf16 %v4252_v22, %v4251_v51  ;;  %v7086_v51 = vld [vmem:[#allocation2 + $0xb2] sm:$0xff]  ;;  %v7088_v22 = vld [vmem:[#allocation2 + $0xa8] sm:$0xff] }
  0x61   : > { %4910 = vmatmul.mubr.f32.gmra.mrb[20].mxu1 %v6735_v27  ;;  %v6942_v27 = vld [vmem:[#allocation2 + $0x22] sm:$0xff] }
  0x62   : > { %5230 = vmatmul.mubr.f32.gmra.mrb[20].mxu0 %v6763_v56  ;;  %4912 = vmatprep.mubr.f32.mxu1 %v6749_v33  ;;  %v6944_v33 = vld [vmem:[#allocation2 + $0x18] sm:$0xff] }
  0x63   : > { %5232 = vmatprep.mubr.f32.mxu0 %v6785_v12  ;;  %7733 = vst [vmem:[#allocation5_spill] sm:$0xff] %v6944_v33 }
  0x65   : > { %4913 = vmatmul.mubr.f32.gmra.mrb[22].mxu1 %v6763_v56  ;;  %v5843_v56 = vpack.c.bf16 %v4316_v61, %v4315_v55  ;;  %v4263_v55 = vld [vmem:[%s7708_s1 + $0x170] sm:$0xff]  ;;  %v4264_v61 = vld [vmem:[%s7708_s1 + $0x178] sm:$0xff] }
  0x66   : > { %5233 = vmatmul.mubr.f32.gmra.mrb[22].mxu0 %v6793_v13  ;;  %4915 = vmatprep.mubr.f32.mxu1 %v6785_v12  ;;  %v6957_v12 = vld [vmem:[#allocation2 + $0x20] sm:$0xff]  ;;  %v5739_v54 = vpack.c.bf16 %v4264_v61, %v4263_v55  ;;  %v7190_v61 = vld [vmem:[#allocation2 + $0x150] sm:$0xff] }
  0x67   : > { %5235 = vmatprep.mubr.f32.mxu0 %v6807_v3  ;;  %7734 = vst [vmem:[#allocation6_spill] sm:$0xff] %v6957_v12  ;;  %v7188_v55 = vld [vmem:[#allocation2 + $0x15a] sm:$0xff] }
  0x68   : > { %7737 = vst [vmem:[#allocation9_spill] sm:$0xff] %v7188_v55 }
  0x69   : > { %4916 = vmatmul.mubr.f32.gmra.mrb[24].mxu1 %v6793_v13  ;;  %v6967_v13 = vld [vmem:[#allocation2 + $0x30] sm:$0xff] }
  0x6a   : > { %5236 = vmatmul.mubr.f32.gmra.mrb[24].mxu0 %v6821_v8  ;;  %4918 = vmatprep.mubr.f32.mxu1 %v6807_v3  ;;  %v4320_v3 = vld [vmem:[%s7708_s1 + $0x338] sm:$0xff] }
  0x6b   : > { %5238 = vmatprep.mubr.f32.mxu0 %v6838_v11  ;;  %v5851_v10 = vpack.c.bf16 %v4320_v3, %v4319_v47  ;;  %v7110_v47 = vld [vmem:[#allocation2 + $0xca] sm:$0xff]  ;;  %v7112_v3 = vld [vmem:[#allocation2 + $0xc0] sm:$0xff] }
  0x6d   : > { %4919 = vmatmul.mubr.f32.gmra.mrb[26].mxu1 %v6821_v8  ;;  %v6992_v8 = vld [vmem:[#allocation2 + $0x48] sm:$0xff] }
  0x6e   : > { %5239 = vmatmul.mubr.f32.gmra.mrb[26].mxu0 %v6851_v6  ;;  %4921 = vmatprep.mubr.f32.mxu1 %v6838_v11  ;;  %v7018_v11 = vld [vmem:[#allocation2 + $0x7a] sm:$0xff] }
  0x6f   : > { %5241 = vmatprep.mubr.f32.mxu0 %v6865_v18 }
  0x71   : > { %4922 = vmatmul.mubr.f32.gmra.mrb[28].mxu1 %v6851_v6  ;;  %v7029_v6 = vld [vmem:[#allocation2 + $0x68] sm:$0xff] }
  0x72   : > { %5242 = vmatmul.mubr.f32.gmra.mrb[28].mxu0 %v6870_v58  ;;  %4924 = vmatprep.mubr.f32.mxu1 %v6865_v18  ;;  %v7042_v18 = vld [vmem:[#allocation2 + $0x92] sm:$0xff] }
  0x73   : > { %5244 = vmatprep.mubr.f32.mxu0 %v686_v48  ;;  %v5735_v48 = vpack.c.bf16 %v4262_v45, %v4261_v40  ;;  %v7168_v40 = vld [vmem:[#allocation2 + $0x13a] sm:$0xff]  ;;  %v7173_v45 = vld [vmem:[#allocation2 + $0x128] sm:$0xff] }
  0x75   : > { %4925 = vmatmul.mubr.f32.gmra.mrb[30].mxu1 %v6870_v58  ;;  %v5731_v58 = vpack.c.bf16 %v4260_v57, %v4259_v28  ;;  %v7152_v28 = vld [vmem:[#allocation2 + $0x112] sm:$0xff]  ;;  %v7154_v57 = vld [vmem:[#allocation2 + $0x108] sm:$0xff] }
  0x76   : > { %5245 = vmatmul.mubr.f32.gmra.mrb[30].mxu0 %v687_v49  ;;  %4959 = vmatprep.mubr.f32.mxu1 %v6932_v2  ;;  %v4327_v49 = vld [vmem:[%s7708_s1 + $0x370] sm:$0xff] }
  0x77   : > { %5279 = vmatprep.mubr.f32.mxu0 %v6923_v42 }
  0x79   : > { %4960 = vmatmul.mubr.f32.vlgmr.msra.gmra.mrb[0].mxu1 %v6932_v2  ;;  %v4331_v2 = vld [vmem:[%s7708_s1 + $0x390] sm:$0xff] }
  0x7a   : > { %5280 = vmatmul.mubr.f32.vlgmr.msra.gmra.mrb[0].mxu0 %v6942_v27  ;;  %4962 = vmatprep.mubr.f32.mxu1 %v6944_v33  ;;  %v1322_v33 = vld [vmem:[#allocation2 + $0x2] sm:$0xff] }
  0x7b   : > { %5842 = vmatpush3.bf16.msra.mxu0 %v5839_v34  ;;  %5714 = vmatpush3.bf16.msra.mxu1 %v5711_v52  ;;  %v4328_v34 = vld [vmem:[%s7708_s1 + $0x378] sm:$0xff] }
  0x7c   : > { %5282 = vmatprep.mubr.f32.mxu0 %v6947_v53  ;;  %5844 = vmatprep.subr.bf16.mxu0 %v5843_v56  ;;  %v7077_v52 = vld [vmem:[#allocation2 + $0x98] sm:$0xff] }
  0x7d   : > { %4963 = vmatmul.mubr.f32.gmra.mrb[2].mxu1 %v6957_v12  ;;  %5716 = vmatprep.subr.bf16.mxu1 %v5715_v37  ;;  %v2271_v12 = vld [vmem:[#allocation2 + $0x18a] sm:$0xff] }
  0x7e   : > { %5283 = vmatmul.mubr.f32.gmra.mrb[2].mxu0 %v6965_v59  ;;  %4965 = vmatprep.mubr.f32.mxu1 %v6967_v13 }
  0x7f   : > { %5285 = vmatprep.mubr.f32.mxu0 %v6970_v62  ;;  %5846 = vmatpush3.bf16.msra.mxu0 %v5843_v56  ;;  %v7090_v56 = vld [vmem:[#allocation2 + $0xc2] sm:$0xff] }
  0x80   : > { %5718 = vmatpush3.bf16.msra.mxu1 %v5715_v37  ;;  %5848 = vmatprep.subr.bf16.mxu0 %v5847_v35  ;;  %v5867_v37 = vpack.c.bf16 %v4328_v34, %v4327_v49  ;;  %v7180_v49 = vld [vmem:[#allocation2 + $0x152] sm:$0xff]  ;;  %v7185_v34 = vld [vmem:[#allocation2 + $0x140] sm:$0xff] }
  0x81   : > { %4966 = vmatmul.mubr.f32.gmra.mrb[4].mxu1 %v6981_v4  ;;  %5720 = vmatprep.subr.bf16.mxu1 %v5719_v63  ;;  %7736 = vst [vmem:[#allocation8_spill] sm:$0xff] %v7180_v49 }
  0x82   : > { %5286 = vmatmul.mubr.f32.gmra.mrb[4].mxu0 %v6990_v0  ;;  %4968 = vmatprep.mubr.f32.mxu1 %v6992_v8 }
  0x83   : > { %5288 = vmatprep.mubr.f32.mxu0 %v6994_v9  ;;  %5850 = vmatpush3.bf16.msra.mxu0 %v5847_v35  ;;  %v4265_v35 = vld [vmem:[%s7708_s1 + $0x180] sm:$0xff] }
  0x84   : > { %5722 = vmatpush3.bf16.msra.mxu1 %v5719_v63  ;;  %5852 = vmatprep.subr.bf16.mxu0 %v5851_v10  ;;  %v4266_v63 = vld [vmem:[%s7708_s1 + $0x188] sm:$0xff] }
  0x85   : > { %4969 = vmatmul.mubr.f32.gmra.mrb[6].mxu1 %v7005_v15  ;;  %5724 = vmatprep.subr.bf16.mxu1 %v5723_v26 }
  0x86   : > { %5289 = vmatmul.mubr.f32.gmra.mrb[6].mxu0 %v7014_v21  ;;  %4971 = vmatprep.mubr.f32.mxu1 %v7016_v23 }
  0x87   : > { %5291 = vmatprep.mubr.f32.mxu0 %v7018_v11  ;;  %5854 = vmatpush3.bf16.msra.mxu0 %v5851_v10  ;;  %v7119_v10 = vpack.c.bf16 %v4266_v63, %v4265_v35  ;;  %v2270_v35 = vld [vmem:[#allocation2 + $0x182] sm:$0xff]  ;;  %v7207_v63 = vld [vmem:[#allocation2 + $0x170] sm:$0xff] }
  0x88   : > { %5726 = vmatpush3.bf16.msra.mxu1 %v5723_v26  ;;  %5856 = vmatprep.subr.bf16.mxu0 %v5855_v41  ;;  %v7123_v26 = vld [vmem:[#allocation2 + $0xc8] sm:$0xff]  ;;  %7740 = vst [vmem:[#allocation12_spill] sm:$0xff] %v7207_v63 }
  0x89   : > { %4972 = vmatmul.mubr.f32.gmra.mrb[8].mxu1 %v7029_v6  ;;  %5728 = vmatprep.subr.bf16.mxu1 %v5727_v19 }
  0x8a   : > { %5292 = vmatmul.mubr.f32.gmra.mrb[8].mxu0 %v7038_v29  ;;  %4974 = vmatprep.mubr.f32.mxu1 %v7040_v30 }
  0x8b   : > { %5294 = vmatprep.mubr.f32.mxu0 %v7042_v18  ;;  %5858 = vmatpush3.bf16.msra.mxu0 %v5855_v41  ;;  %v7140_v41 = vld [vmem:[#allocation2 + $0xfa] sm:$0xff] }
  0x8c   : > { %5730 = vmatpush3.bf16.msra.mxu1 %v5727_v19  ;;  %5860 = vmatprep.subr.bf16.mxu0 %v5859_v31  ;;  %v7142_v19 = vld [vmem:[#allocation2 + $0xf0] sm:$0xff] }
  0x8d   : > { %4975 = vmatmul.mubr.f32.gmra.mrb[10].mxu1 %v7053_v39  ;;  %5732 = vmatprep.subr.bf16.mxu1 %v5731_v58 }
  0x8e   : > { %5295 = vmatmul.mubr.f32.gmra.mrb[10].mxu0 %v7062_v16  ;;  %4977 = vmatprep.mubr.f32.mxu1 %v7064_v44 }
  0x8f   : > { %5297 = vmatprep.mubr.f32.mxu0 %v7066_v25  ;;  %5862 = vmatpush3.bf16.msra.mxu0 %v5859_v31  ;;  %v7156_v31 = vld [vmem:[#allocation2 + $0x122] sm:$0xff] }
  0x90   : > { %5734 = vmatpush3.bf16.msra.mxu1 %v5731_v58  ;;  %5864 = vmatprep.subr.bf16.mxu0 %v5863_v46  ;;  %v7161_v58 = vld [vmem:[#allocation2 + $0x110] sm:$0xff] }
  0x91   : > { %4978 = vmatmul.mubr.f32.gmra.mrb[12].mxu1 %v7077_v52  ;;  %5736 = vmatprep.subr.bf16.mxu1 %v5735_v48 }
  0x92   : > { %5298 = vmatmul.mubr.f32.gmra.mrb[12].mxu0 %v7086_v51  ;;  %4980 = vmatprep.mubr.f32.mxu1 %v7088_v22 }
  0x93   : > { %5300 = vmatprep.mubr.f32.mxu0 %v7090_v56  ;;  %5866 = vmatpush3.bf16.msra.mxu0 %v5863_v46  ;;  %v7176_v46 = vld [vmem:[#allocation2 + $0x142] sm:$0xff] }
  0x94   : > { %5738 = vmatpush3.bf16.msra.mxu1 %v5735_v48  ;;  %5868 = vmatprep.subr.bf16.mxu0 %v5867_v37  ;;  %7735 = vst [vmem:[#allocation7_spill] sm:$0xff] %v7176_v46  ;;  %v7178_v48 = vld [vmem:[#allocation2 + $0x138] sm:$0xff] }
  0x95   : > { %4981 = vmatmul.mubr.f32.gmra.mrb[14].mxu1 %v7101_v7  ;;  %5740 = vmatprep.subr.bf16.mxu1 %v5739_v54 }
  0x96   : > { %5301 = vmatmul.mubr.f32.gmra.mrb[14].mxu0 %v7110_v47  ;;  %4983 = vmatprep.mubr.f32.mxu1 %v7112_v3 }
  0x97   : > { %5303 = vmatprep.mubr.f32.mxu0 %v7114_v5  ;;  %5870 = vmatpush3.bf16.msra.mxu0 %v5867_v37  ;;  %v7192_v37 = vld [vmem:[#allocation2 + $0x16a] sm:$0xff] }
  0x98   : > { %5742 = vmatpush3.bf16.msra.mxu1 %v5739_v54  ;;  %5872 = vmatprep.subr.bf16.mxu0 %v7116_v17  ;;  %7738 = vst [vmem:[#allocation10_spill] sm:$0xff] %v7192_v37  ;;  %v7197_v54 = vld [vmem:[#allocation2 + $0x158] sm:$0xff] }
  0x99   : > { %4984 = vmatmul.mubr.f32.gmra.mrb[16].mxu1 %v7123_v26  ;;  %5744 = vmatprep.subr.bf16.mxu1 %v7119_v10 }
  0x9a   : > { %5304 = vmatmul.mubr.f32.gmra.mrb[16].mxu0 %v7126_v14  ;;  %4986 = vmatprep.mubr.f32.mxu1 %v7128_v1 }
  0x9b   : > { %5306 = vmatprep.mubr.f32.mxu0 %v7130_v38 }
  0x9d   : > { %4987 = vmatmul.mubr.f32.gmra.mrb[18].mxu1 %v7137_v20 }
  0x9e   : > { %5307 = vmatmul.mubr.f32.gmra.mrb[18].mxu0 %v7140_v41  ;;  %4989 = vmatprep.mubr.f32.mxu1 %v7142_v19 }
  0x9f   : > { %5309 = vmatprep.mubr.f32.mxu0 %v7144_v24 }
  0xa1   : > { %4990 = vmatmul.mubr.f32.gmra.mrb[20].mxu1 %v7149_v32 }
  0xa2   : > { %5310 = vmatmul.mubr.f32.gmra.mrb[20].mxu0 %v7152_v28  ;;  %4992 = vmatprep.mubr.f32.mxu1 %v7154_v57 }
  0xa3   : > { %5312 = vmatprep.mubr.f32.mxu0 %v7156_v31 }
  0xa5   : > { %4993 = vmatmul.mubr.f32.gmra.mrb[22].mxu1 %v7161_v58 }
  0xa6   : > { %5313 = vmatmul.mubr.f32.gmra.mrb[22].mxu0 %v7164_v36  ;;  %4995 = vmatprep.mubr.f32.mxu1 %v7166_v43 }
  0xa7   : > { %5315 = vmatprep.mubr.f32.mxu0 %v7168_v40 }
  0xa9   : > { %4996 = vmatmul.mubr.f32.gmra.mrb[24].mxu1 %v7173_v45 }
  0xaa   : > { %5316 = vmatmul.mubr.f32.gmra.mrb[24].mxu0 %v7176_v46  ;;  %4998 = vmatprep.mubr.f32.mxu1 %v7178_v48  ;;  %v4333_v46 = vld [vmem:[%s7708_s1 + $0x3a0] sm:$0xff] }
  0xab   : > { %5318 = vmatprep.mubr.f32.mxu0 %v7180_v49 }
  0xad   : > { %4999 = vmatmul.mubr.f32.gmra.mrb[26].mxu1 %v7185_v34 }
  0xae   : > { %5319 = vmatmul.mubr.f32.gmra.mrb[26].mxu0 %v7188_v55  ;;  %5001 = vmatprep.mubr.f32.mxu1 %v7190_v61  ;;  %v4267_v55 = vld [vmem:[%s7708_s1 + $0x190] sm:$0xff] }
  0xaf   : > { %5321 = vmatprep.mubr.f32.mxu0 %v7192_v37  ;;  %v4332_v37 = vld [vmem:[%s7708_s1 + $0x398] sm:$0xff] }
  0xb0   : > { %v5875_v49 = vpack.c.bf16 %v4332_v37, %v4331_v2  ;;  %v4270_v2 = vld [vmem:[%s7708_s1 + $0x1a8] sm:$0xff]  ;;  %v4335_v37 = vld [vmem:[%s7708_s1 + $0x3b0] sm:$0xff] }
  0xb1   : > { %5002 = vmatmul.mubr.f32.gmra.mrb[28].mxu1 %v7197_v54 }
  0xb2   : > { %5322 = vmatmul.mubr.f32.gmra.mrb[28].mxu0 %v7200_v50  ;;  %5004 = vmatprep.mubr.f32.mxu1 %v7202_v60  ;;  %v1323_v50 = vld [vmem:[#allocation2 + $0xa] sm:$0xff] }
  0xb3   : > { %5324 = vmatprep.mubr.f32.mxu0 %v2270_v35  ;;  %v4268_v35 = vld [vmem:[%s7708_s1 + $0x198] sm:$0xff] }
  0xb5   : > { %5005 = vmatmul.mubr.f32.gmra.mrb[30].mxu1 %v7207_v63  ;;  %v5747_v63 = vpack.c.bf16 %v4268_v35, %v4267_v55  ;;  %v4338_v35 = vld [vmem:[%s7708_s1 + $0x3c8] sm:$0xff] }
  0xb6   : > { %5325 = vmatmul.mubr.f32.gmra.mrb[30].mxu0 %v2271_v12  ;;  %5039 = vmatprep.mubr.f32.mxu1 %v1322_v33  ;;  %v4334_v33 = vld [vmem:[%s7708_s1 + $0x3a8] sm:$0xff]  ;;  %v4269_v12 = vld [vmem:[%s7708_s1 + $0x1a0] sm:$0xff] }
  0xb7   : > { %5359 = vmatprep.mubr.f32.mxu0 %v6967_v13  ;;  %v5879_v55 = vpack.c.bf16 %v4334_v33, %v4333_v46 }
  0xb9   : > { %5040 = vmatmul.mubr.f32.vlgmr.msra.gmra.mrb[0].mxu1 %v1323_v50  ;;  %v4336_v50 = vld [vmem:[%s7708_s1 + $0x3b8] sm:$0xff] }
  0xba   : > { %5360 = vmatmul.mubr.f32.vlgmr.msra.gmra.mrb[0].mxu0 %v6981_v4  ;;  %5042 = vmatprep.mubr.f32.mxu1 %v6923_v42  ;;  %v5751_v42 = vpack.c.bf16 %v4270_v2, %v4269_v12  ;;  %v4340_v12 = vld [vmem:[%s7708_s1 + $0x3d8] sm:$0xff]  ;;  %v4275_v2 = vld [vmem:[%s7708_s1 + $0x1d0] sm:$0xff] }
  0xbb   : > { %5874 = vmatpush3.bf16.msra.mxu0 %v7116_v17  ;;  %5746 = vmatpush3.bf16.msra.mxu1 %v7119_v10  ;;  %v4271_v17 = vld [vmem:[%s7708_s1 + $0x1b0] sm:$0xff]  ;;  %v5883_v10 = vpack.c.bf16 %v4336_v50, %v4335_v37  ;;  %v4342_v37 = vld [vmem:[%s7708_s1 + $0x3e8] sm:$0xff]  ;;  %v4277_v50 = vld [vmem:[%s7708_s1 + $0x1e0] sm:$0xff] }
  0xbc   : > { %5362 = vmatprep.mubr.f32.mxu0 %v6992_v8  ;;  %5876 = vmatprep.subr.bf16.mxu0 %v5875_v49 }
  0xbd   : > { %5043 = vmatmul.mubr.f32.gmra.mrb[2].mxu1 %v6942_v27  ;;  %5748 = vmatprep.subr.bf16.mxu1 %v5747_v63  ;;  %v4272_v27 = vld [vmem:[%s7708_s1 + $0x1b8] sm:$0xff] }
  0xbe   : > { %5363 = vmatmul.mubr.f32.gmra.mrb[2].mxu0 %v7005_v15  ;;  %5045 = vmatprep.mubr.f32.mxu1 %v6947_v53  ;;  %v5755_v46 = vpack.c.bf16 %v4272_v27, %v4271_v17  ;;  %v4337_v53 = vld [vmem:[%s7708_s1 + $0x3c0] sm:$0xff] }
  0xbf   : > { %5365 = vmatprep.mubr.f32.mxu0 %v7016_v23  ;;  %5878 = vmatpush3.bf16.msra.mxu0 %v5875_v49  ;;  %v4273_v49 = vld [vmem:[%s7708_s1 + $0x1c0] sm:$0xff] }
  0xc0   : > { %5750 = vmatpush3.bf16.msra.mxu1 %v5747_v63  ;;  %5880 = vmatprep.subr.bf16.mxu0 %v5879_v55  ;;  %v5887_v63 = vpack.c.bf16 %v4338_v35, %v4337_v53 }
  0xc1   : > { %5046 = vmatmul.mubr.f32.gmra.mrb[4].mxu1 %v6965_v59  ;;  %5752 = vmatprep.subr.bf16.mxu1 %v5751_v42  ;;  %v4274_v59 = vld [vmem:[%s7708_s1 + $0x1c8] sm:$0xff] }
  0xc2   : > { %5366 = vmatmul.mubr.f32.gmra.mrb[4].mxu0 %v7029_v6  ;;  %5048 = vmatprep.mubr.f32.mxu1 %v6970_v62  ;;  %v5759_v33 = vpack.c.bf16 %v4274_v59, %v4273_v49  ;;  %v4339_v62 = vld [vmem:[%s7708_s1 + $0x3d0] sm:$0xff]  ;;  %v4346_v49 = vld [vmem:[%s7708_s1 + $0x408] sm:$0xff]  ;;  %v3637_v59 = vld [vmem:[%s7713_s6] sm:$0xff] }
  0xc3   : > { %5368 = vmatprep.mubr.f32.mxu0 %v7040_v30  ;;  %5882 = vmatpush3.bf16.msra.mxu0 %v5879_v55  ;;  %v5891_v55 = vpack.c.bf16 %v4340_v12, %v4339_v62  ;;  %v3639_v62 = vld [vmem:[%s7713_s6 + $0x10] sm:$0xff]  ;;  %v3640_v12 = vld [vmem:[%s7713_s6 + $0x18] sm:$0xff] }
  0xc4   : > { %5754 = vmatpush3.bf16.msra.mxu1 %v5751_v42  ;;  %5884 = vmatprep.subr.bf16.mxu0 %v5883_v10 }
  0xc5   : > { %5049 = vmatmul.mubr.f32.gmra.mrb[6].mxu1 %v6990_v0  ;;  %5756 = vmatprep.subr.bf16.mxu1 %v5755_v46  ;;  %v4276_v0 = vld [vmem:[%s7708_s1 + $0x1d8] sm:$0xff] }
  0xc6   : > { %5369 = vmatmul.mubr.f32.gmra.mrb[6].mxu0 %v7053_v39  ;;  %5051 = vmatprep.mubr.f32.mxu1 %v6994_v9  ;;  %v5763_v42 = vpack.c.bf16 %v4276_v0, %v4275_v2  ;;  %v4341_v9 = vld [vmem:[%s7708_s1 + $0x3e0] sm:$0xff]  ;;  %v2855_v0 = vld [vmem:[#allocation2 + $0x49] sm:$0xff] }
  0xc7   : > { %5371 = vmatprep.mubr.f32.mxu0 %v7064_v44  ;;  %5886 = vmatpush3.bf16.msra.mxu0 %v5883_v10  ;;  %v5895_v17 = vpack.c.bf16 %v4342_v37, %v4341_v9  ;;  %v4344_v10 = vld [vmem:[%s7708_s1 + $0x3f8] sm:$0xff]  ;;  %v5939_v9 = vpack.c.bf16 %v3640_v12, %v3639_v62  ;;  %v4349_v37 = vld [vmem:[%s7708_s1 + $0x420] sm:$0xff] }
  0xc8   : > { %5758 = vmatpush3.bf16.msra.mxu1 %v5755_v46  ;;  %5888 = vmatprep.subr.bf16.mxu0 %v5887_v63  ;;  %v4279_v46 = vld [vmem:[%s7708_s1 + $0x1f0] sm:$0xff]  ;;  %v2854_v2 = vld [vmem:[#allocation2 + $0x39] sm:$0xff] }
  0xc9   : > { %5052 = vmatmul.mubr.f32.gmra.mrb[8].mxu1 %v7014_v21  ;;  %5760 = vmatprep.subr.bf16.mxu1 %v5759_v33  ;;  %v4278_v21 = vld [vmem:[%s7708_s1 + $0x1e8] sm:$0xff]  ;;  %v3649_v62 = vld [vmem:[%s7713_s6 + $0x60] sm:$0xff]  ;;  %v2864_v12 = vld [vmem:[#allocation2 + $0xb1] sm:$0xff] }
  0xca   : > { %5372 = vmatmul.mubr.f32.gmra.mrb[8].mxu0 %v7077_v52  ;;  %5054 = vmatprep.mubr.f32.mxu1 %v7018_v11  ;;  %v5767_v27 = vpack.c.bf16 %v4278_v21, %v4277_v50  ;;  %v4343_v11 = vld [vmem:[%s7708_s1 + $0x3f0] sm:$0xff]  ;;  %v4350_v50 = vld [vmem:[%s7708_s1 + $0x428] sm:$0xff]  ;;  %v3641_v21 = vld [vmem:[%s7713_s6 + $0x20] sm:$0xff] }
  0xcb   : > { %5374 = vmatprep.mubr.f32.mxu0 %v7088_v22  ;;  %5890 = vmatpush3.bf16.msra.mxu0 %v5887_v63  ;;  %v5899_v53 = vpack.c.bf16 %v4344_v10, %v4343_v11  ;;  %v2857_v11 = vld [vmem:[#allocation2 + $0x61] sm:$0xff]  ;;  %v5911_v10 = vpack.c.bf16 %v4350_v50, %v4349_v37  ;;  %v2866_v37 = vld [vmem:[#allocation2 + $0xc9] sm:$0xff]  ;;  %v2867_v50 = vld [vmem:[#allocation2 + $0xd9] sm:$0xff] }
  0xcc   : > { %5762 = vmatpush3.bf16.msra.mxu1 %v5759_v33  ;;  %5892 = vmatprep.subr.bf16.mxu0 %v5891_v55 }
  0xcd   : > { %5055 = vmatmul.mubr.f32.gmra.mrb[10].mxu1 %v7038_v29  ;;  %5764 = vmatprep.subr.bf16.mxu1 %v5763_v42  ;;  %v4280_v29 = vld [vmem:[%s7708_s1 + $0x1f8] sm:$0xff] }
  0xce   : > { %5375 = vmatmul.mubr.f32.gmra.mrb[10].mxu0 %v7101_v7  ;;  %5057 = vmatprep.mubr.f32.mxu1 %v7042_v18  ;;  %v5771_v35 = vpack.c.bf16 %v4280_v29, %v4279_v46  ;;  %v4345_v18 = vld [vmem:[%s7708_s1 + $0x400] sm:$0xff]  ;;  %v4352_v29 = vld [vmem:[%s7708_s1 + $0x438] sm:$0xff] }
  0xcf   : > { %5377 = vmatprep.mubr.f32.mxu0 %v7112_v3  ;;  %5894 = vmatpush3.bf16.msra.mxu0 %v5891_v55  ;;  %v5903_v63 = vpack.c.bf16 %v4346_v49, %v4345_v18  ;;  %v2859_v18 = vld [vmem:[#allocation2 + $0x79] sm:$0xff] }
  0xd0   : > { %5766 = vmatpush3.bf16.msra.mxu1 %v5763_v42  ;;  %5896 = vmatprep.subr.bf16.mxu0 %v5895_v17  ;;  %v7749_v42 = vld [vmem:[#allocation6_spill] sm:$0xff] }
  0xd1   : > { %5058 = vmatmul.mubr.f32.gmra.mrb[12].mxu1 %v7062_v16  ;;  %5768 = vmatprep.subr.bf16.mxu1 %v5767_v27  ;;  %v3638_v16 = vld [vmem:[%s7713_s6 + $0x8] sm:$0xff] }
  0xd2   : > { %5378 = vmatmul.mubr.f32.gmra.mrb[12].mxu0 %v7123_v26  ;;  %5060 = vmatprep.mubr.f32.mxu1 %v7066_v25  ;;  %v5935_v33 = vpack.c.bf16 %v3638_v16, %v3637_v59  ;;  %v7360_v25 = vld [vmem:[#allocation2 + $0x180] sm:$0xff]  ;;  %v4354_v16 = vld [vmem:[%s7708_s1 + $0x448] sm:$0xff] }
  0xd3   : > { %5380 = vmatprep.mubr.f32.mxu0 %v7128_v1  ;;  %5898 = vmatpush3.bf16.msra.mxu0 %v5895_v17  ;;  %v3642_v17 = vld [vmem:[%s7713_s6 + $0x28] sm:$0xff] }
  0xd4   : > { %5770 = vmatpush3.bf16.msra.mxu1 %v5767_v27  ;;  %5900 = vmatprep.subr.bf16.mxu0 %v5899_v53  ;;  %v2856_v27 = vld [vmem:[#allocation2 + $0x51] sm:$0xff]  ;;  %v5943_v46 = vpack.c.bf16 %v3642_v17, %v3641_v21 }
  0xd5   : > { %5061 = vmatmul.mubr.f32.gmra.mrb[14].mxu1 %v7086_v51  ;;  %5772 = vmatprep.subr.bf16.mxu1 %v5771_v35  ;;  %v7741_v51 = vld [vmem:[#allocation7_spill] sm:$0xff] }
  0xd6   : > { %5381 = vmatmul.mubr.f32.gmra.mrb[14].mxu0 %v7137_v20  ;;  %5063 = vmatprep.mubr.f32.mxu1 %v7090_v56  ;;  %v7742_v56 = vld [vmem:[#allocation12_spill] sm:$0xff] }
  0xd7   : > { %5383 = vmatprep.mubr.f32.mxu0 %v7142_v19  ;;  %5902 = vmatpush3.bf16.msra.mxu0 %v5899_v53  ;;  %v3643_v53 = vld [vmem:[%s7713_s6 + $0x30] sm:$0xff] }
  0xd8   : > { %5774 = vmatpush3.bf16.msra.mxu1 %v5771_v35  ;;  %5904 = vmatprep.subr.bf16.mxu0 %v5903_v63  ;;  %v2858_v35 = vld [vmem:[#allocation2 + $0x69] sm:$0xff] }
  0xd9   : > { %5064 = vmatmul.mubr.f32.gmra.mrb[16].mxu1 %v7110_v47  ;;  %5936 = vmatprep.subr.bf16.mxu1 %v5935_v33  ;;  %v7743_v47 = vld [vmem:[#allocation8_spill] sm:$0xff] }
  0xda   : > { %5384 = vmatmul.mubr.f32.gmra.mrb[16].mxu0 %v7149_v32  ;;  %5066 = vmatprep.mubr.f32.mxu1 %v7114_v5  ;;  %v7366_v5 = vld [vmem:[#allocation2 + $0x188] sm:$0xff] }
  0xdb   : > { %5386 = vmatprep.mubr.f32.mxu0 %v7154_v57 }
  0xdd   : > { %5067 = vmatmul.mubr.f32.gmra.mrb[18].mxu1 %v7126_v14  ;;  %v7744_v14 = vld [vmem:[#allocation9_spill] sm:$0xff] }
  0xde   : > { %5387 = vmatmul.mubr.f32.gmra.mrb[18].mxu0 %v7161_v58  ;;  %5069 = vmatprep.mubr.f32.mxu1 %v7130_v38  ;;  %v7745_v38 = vld [vmem:[#allocation10_spill] sm:$0xff] }
  0xdf   : > { %5389 = vmatprep.mubr.f32.mxu0 %v7166_v43 }
  0xe1   : > { %5070 = vmatmul.mubr.f32.gmra.mrb[20].mxu1 %v7140_v41  ;;  %v7746_v41 = vld [vmem:[#allocation4_spill] sm:$0xff] }
  0xe2   : > { %5390 = vmatmul.mubr.f32.gmra.mrb[20].mxu0 %v7173_v45  ;;  %5072 = vmatprep.mubr.f32.mxu1 %v7144_v24  ;;  %v2853_v24 = vld [vmem:[#allocation2 + $0x31] sm:$0xff] }
  0xe3   : > { %5392 = vmatprep.mubr.f32.mxu0 %v7178_v48 }
  0xe5   : > { %5073 = vmatmul.mubr.f32.gmra.mrb[22].mxu1 %v7152_v28  ;;  %v7747_v28 = vld [vmem:[#allocation11_spill] sm:$0xff] }
  0xe6   : > { %5393 = vmatmul.mubr.f32.gmra.mrb[22].mxu0 %v7185_v34  ;;  %5075 = vmatprep.mubr.f32.mxu1 %v7156_v31  ;;  %v4347_v31 = vld [vmem:[%s7708_s1 + $0x410] sm:$0xff] }
  0xe7   : > { %5395 = vmatprep.mubr.f32.mxu0 %v7190_v61 }
  0xe9   : > { %5076 = vmatmul.mubr.f32.gmra.mrb[24].mxu1 %v7164_v36  ;;  %v4348_v36 = vld [vmem:[%s7708_s1 + $0x418] sm:$0xff] }
  0xea   : > { %5396 = vmatmul.mubr.f32.gmra.mrb[24].mxu0 %v7197_v54  ;;  %5078 = vmatprep.mubr.f32.mxu1 %v7168_v40  ;;  %v7748_v40 = vld [vmem:[#allocation5_spill] sm:$0xff]  ;;  %v5907_v55 = vpack.c.bf16 %v4348_v36, %v4347_v31 }
  0xeb   : > { %5398 = vmatprep.mubr.f32.mxu0 %v7202_v60 }
  0xed   : > { %5079 = vmatmul.mubr.f32.gmra.mrb[26].mxu1 %v7741_v51  ;;  %v2861_v51 = vld [vmem:[#allocation2 + $0x91] sm:$0xff] }
  0xee   : > { %5399 = vmatmul.mubr.f32.gmra.mrb[26].mxu0 %v7742_v56  ;;  %5081 = vmatprep.mubr.f32.mxu1 %v7743_v47 }
  0xef   : > { %5401 = vmatprep.mubr.f32.mxu0 %v7360_v25 }
  0xf1   : > { %5082 = vmatmul.mubr.f32.gmra.mrb[28].mxu1 %v7744_v14 }
  0xf2   : > { %5402 = vmatmul.mubr.f32.gmra.mrb[28].mxu0 %v7366_v5  ;;  %5084 = vmatprep.mubr.f32.mxu1 %v7745_v38  ;;  %v4356_v38 = vld [vmem:[%s7708_s1 + $0x458] sm:$0xff] }
  0xf3   : > { %5404 = vmatprep.mubr.f32.mxu0 %v7746_v41 }
  0xf5   : > { %5085 = vmatmul.mubr.f32.gmra.mrb[30].mxu1 %v7747_v28  ;;  %v2863_v28 = vld [vmem:[#allocation2 + $0xa9] sm:$0xff] }
  0xf6   : > { %5405 = vmatmul.mubr.f32.gmra.mrb[30].mxu0 %v7746_v41  ;;  %5119 = vmatprep.mubr.f32.mxu1 %v7748_v40  ;;  %v3647_v41 = vld [vmem:[%s7713_s6 + $0x50] sm:$0xff]  ;;  %v4358_v40 = vld [vmem:[%s7708_s1 + $0x468] sm:$0xff] }
  0xf7   : > { %5439 = vmatprep.mubr.f32.mxu0 %v2853_v24  ;;  %v2862_v24 = vld [vmem:[#allocation2 + $0x99] sm:$0xff] }
  0xf9   : > { %5120 = vmatmul.mubr.f32.vlgmr.msra.gmra.mrb[0].mxu1 %v7749_v42  ;;  %v4360_v42 = vld [vmem:[%s7708_s1 + $0x478] sm:$0xff] }
  0xfa   : > { %5440 = vmatmul.mubr.f32.vlgmr.msra.gmra.mrb[0].mxu0 %v2854_v2  ;;  %5122 = vmatprep.mubr.f32.mxu1 %v6967_v13  ;;  %v4351_v13 = vld [vmem:[%s7708_s1 + $0x430] sm:$0xff]  ;;  %v2865_v2 = vld [vmem:[#allocation2 + $0xc1] sm:$0xff] }
  0xfb   : > { %5906 = vmatpush3.bf16.msra.mxu0 %v5903_v63  ;;  %5442 = vmatprep.mubr.f32.mxu0 %v2855_v0  ;;  %v5915_v49 = vpack.c.bf16 %v4352_v29, %v4351_v13  ;;  %v3645_v63 = vld [vmem:[%s7713_s6 + $0x40] sm:$0xff]  ;;  %v3607_v13 = vld [vmem:[%s7491_s25 + $0x10] sm:$0xff] }
  0xfc   : > { %5938 = vmatpush3.bf16.msra.mxu1 %v5935_v33  ;;  %5908 = vmatprep.subr.bf16.mxu0 %v5907_v55  ;;  %v2860_v33 = vld [vmem:[#allocation2 + $0x81] sm:$0xff]  ;;  %v3162_v29 = vld [vmem:[#allocation2 + $0x52] sm:$0xff] }
  0xfd   : > { %5123 = vmatmul.mubr.f32.gmra.mrb[2].mxu1 %v6981_v4  ;;  %5940 = vmatprep.subr.bf16.mxu1 %v5939_v9  ;;  %v3644_v4 = vld [vmem:[%s7713_s6 + $0x38] sm:$0xff] }
  0xfe   : > { %5443 = vmatmul.mubr.f32.gmra.mrb[2].mxu0 %v2856_v27  ;;  %5125 = vmatprep.mubr.f32.mxu1 %v6992_v8  ;;  %v5947_v59 = vpack.c.bf16 %v3644_v4, %v3643_v53  ;;  %v4353_v8 = vld [vmem:[%s7708_s1 + $0x440] sm:$0xff]  ;;  %v2869_v27 = vld [vmem:[#allocation2 + $0xf1] sm:$0xff] }
  0xff   : > { %5445 = vmatprep.mubr.f32.mxu0 %v2857_v11  ;;  %5910 = vmatpush3.bf16.msra.mxu0 %v5907_v55  ;;  %v5919_v47 = vpack.c.bf16 %v4354_v16, %v4353_v8  ;;  %v2870_v11 = vld [vmem:[#allocation2 + $0xf9] sm:$0xff]  ;;  %v3163_v4 = vld [vmem:[#allocation2 + $0x62] sm:$0xff] }
 0x100   : > { %5942 = vmatpush3.bf16.msra.mxu1 %v5939_v9  ;;  %5912 = vmatprep.subr.bf16.mxu0 %v5911_v10  ;;  %v3651_v9 = vld [vmem:[%s7713_s6 + $0x70] sm:$0xff]  ;;  %v3609_v53 = vld [vmem:[%s7491_s25 + $0x20] sm:$0xff] }
 0x101   : > { %5126 = vmatmul.mubr.f32.gmra.mrb[4].mxu1 %v7005_v15  ;;  %5944 = vmatprep.subr.bf16.mxu1 %v5943_v46  ;;  %v3646_v15 = vld [vmem:[%s7713_s6 + $0x48] sm:$0xff]  ;;  %v3613_v16 = vld [vmem:[%s7491_s25 + $0x40] sm:$0xff] }
 0x102   : > { %5446 = vmatmul.mubr.f32.gmra.mrb[4].mxu0 %v2858_v35  ;;  %5128 = vmatprep.mubr.f32.mxu1 %v7016_v23  ;;  %v5951_v14 = vpack.c.bf16 %v3646_v15, %v3645_v63  ;;  %v4355_v23 = vld [vmem:[%s7708_s1 + $0x450] sm:$0xff]  ;;  %v3166_v8 = vld [vmem:[#allocation2 + $0x82] sm:$0xff] }
 0x103   : > { %5448 = vmatprep.mubr.f32.mxu0 %v2859_v18  ;;  %5914 = vmatpush3.bf16.msra.mxu0 %v5911_v10  ;;  %v5923_v31 = vpack.c.bf16 %v4356_v38, %v4355_v23  ;;  %v2873_v10 = vld [vmem:[#allocation2 + $0x121] sm:$0xff]  ;;  %v3164_v35 = vld [vmem:[#allocation2 + $0x6a] sm:$0xff]  ;;  %v3167_v63 = vld [vmem:[#allocation2 + $0x92] sm:$0xff] }
 0x104   : > { %5946 = vmatpush3.bf16.msra.mxu1 %v5943_v46  ;;  %5916 = vmatprep.subr.bf16.mxu0 %v5915_v49  ;;  %v2877_v46 = vld [vmem:[#allocation2 + $0x151] sm:$0xff]  ;;  %v3614_v15 = vld [vmem:[%s7491_s25 + $0x48] sm:$0xff]  ;;  %v3617_v38 = vld [vmem:[%s7491_s25 + $0x60] sm:$0xff] }
 0x105   : > { %5129 = vmatmul.mubr.f32.gmra.mrb[6].mxu1 %v7029_v6  ;;  %5948 = vmatprep.subr.bf16.mxu1 %v5947_v59  ;;  %v3648_v6 = vld [vmem:[%s7713_s6 + $0x58] sm:$0xff]  ;;  %v3611_v18 = vld [vmem:[%s7491_s25 + $0x30] sm:$0xff] }
 0x106   : > { %5449 = vmatmul.mubr.f32.gmra.mrb[6].mxu0 %v2860_v33  ;;  %5131 = vmatprep.mubr.f32.mxu1 %v7040_v30  ;;  %v5955_v36 = vpack.c.bf16 %v3648_v6, %v3647_v41  ;;  %v4357_v30 = vld [vmem:[%s7708_s1 + $0x460] sm:$0xff]  ;;  %v3170_v23 = vld [vmem:[#allocation2 + $0xb2] sm:$0xff]  ;;  %v3618_v6 = vld [vmem:[%s7491_s25 + $0x68] sm:$0xff] }
 0x107   : > { %5451 = vmatprep.mubr.f32.mxu0 %v2861_v51  ;;  %5918 = vmatpush3.bf16.msra.mxu0 %v5915_v49  ;;  %v5927_v0 = vpack.c.bf16 %v4358_v40, %v4357_v30  ;;  %v3165_v49 = vld [vmem:[#allocation2 + $0x7a] sm:$0xff]  ;;  %v3615_v51 = vld [vmem:[%s7491_s25 + $0x50] sm:$0xff]  ;;  %v3171_v41 = vld [vmem:[#allocation2 + $0xc2] sm:$0xff] }
 0x108   : > { %5950 = vmatpush3.bf16.msra.mxu1 %v5947_v59  ;;  %5920 = vmatprep.subr.bf16.mxu0 %v5919_v47  ;;  %v3612_v59 = vld [vmem:[%s7491_s25 + $0x38] sm:$0xff]  ;;  %v3174_v30 = vld [vmem:[#allocation2 + $0xe2] sm:$0xff] }
 0x109   : > { %5132 = vmatmul.mubr.f32.gmra.mrb[8].mxu1 %v7053_v39  ;;  %5952 = vmatprep.subr.bf16.mxu1 %v5951_v14  ;;  %v3650_v39 = vld [vmem:[%s7713_s6 + $0x68] sm:$0xff]  ;;  %v3168_v33 = vld [vmem:[#allocation2 + $0x9a] sm:$0xff] }
 0x10a   : > { %5452 = vmatmul.mubr.f32.gmra.mrb[8].mxu0 %v2862_v24  ;;  %5134 = vmatprep.mubr.f32.mxu1 %v7064_v44  ;;  %v5959_v55 = vpack.c.bf16 %v3650_v39, %v3649_v62  ;;  %v4359_v44 = vld [vmem:[%s7708_s1 + $0x470] sm:$0xff]  ;;  %v3621_v40 = vld [vmem:[%s7491_s25 + $0x80] sm:$0xff]  ;;  %v3622_v39 = vld [vmem:[%s7491_s25 + $0x88] sm:$0xff] }
 0x10b   : > { %5454 = vmatprep.mubr.f32.mxu0 %v2863_v28  ;;  %5922 = vmatpush3.bf16.msra.mxu0 %v5919_v47  ;;  %v5931_v21 = vpack.c.bf16 %v4360_v42, %v4359_v44  ;;  %v3169_v47 = vld [vmem:[#allocation2 + $0xaa] sm:$0xff]  ;;  %v3175_v62 = vld [vmem:[#allocation2 + $0xf2] sm:$0xff]  ;;  %v3625_v42 = vld [vmem:[%s7491_s25 + $0xa0] sm:$0xff] }
 0x10c   : > { %5954 = vmatpush3.bf16.msra.mxu1 %v5951_v14  ;;  %5924 = vmatprep.subr.bf16.mxu0 %v5923_v31  ;;  %v3616_v14 = vld [vmem:[%s7491_s25 + $0x58] sm:$0xff]  ;;  %v3172_v24 = vld [vmem:[#allocation2 + $0xca] sm:$0xff] }
 0x10d   : > { %5135 = vmatmul.mubr.f32.gmra.mrb[10].mxu1 %v7077_v52  ;;  %5956 = vmatprep.subr.bf16.mxu1 %v5955_v36  ;;  %v3652_v52 = vld [vmem:[%s7713_s6 + $0x78] sm:$0xff]  ;;  %v3619_v28 = vld [vmem:[%s7491_s25 + $0x70] sm:$0xff] }
 0x10e   : > { %5455 = vmatmul.mubr.f32.gmra.mrb[10].mxu0 %v2864_v12  ;;  %5137 = vmatprep.mubr.f32.mxu1 %v7088_v22  ;;  %v5963_v17 = vpack.c.bf16 %v3652_v52, %v3651_v9  ;;  %v2868_v22 = vld [vmem:[#allocation2 + $0xe1] sm:$0xff]  ;;  %v3178_v44 = vld [vmem:[#allocation2 + $0x112] sm:$0xff] }
 0x10f   : > { %5457 = vmatprep.mubr.f32.mxu0 %v2865_v2  ;;  %5926 = vmatpush3.bf16.msra.mxu0 %v5923_v31  ;;  %v3173_v31 = vld [vmem:[#allocation2 + $0xda] sm:$0xff]  ;;  %v3623_v2 = vld [vmem:[%s7491_s25 + $0x90] sm:$0xff]  ;;  %v3179_v9 = vld [vmem:[#allocation2 + $0x122] sm:$0xff] }
 0x110   : > { %5958 = vmatpush3.bf16.msra.mxu1 %v5955_v36  ;;  %5928 = vmatprep.subr.bf16.mxu0 %v5927_v0  ;;  %v3620_v36 = vld [vmem:[%s7491_s25 + $0x78] sm:$0xff]  ;;  %v3626_v52 = vld [vmem:[%s7491_s25 + $0xa8] sm:$0xff] }
 0x111   : > { %5138 = vmatmul.mubr.f32.gmra.mrb[12].mxu1 %v7101_v7  ;;  %5960 = vmatprep.subr.bf16.mxu1 %v5959_v55  ;;  %v2871_v7 = vld [vmem:[#allocation2 + $0x109] sm:$0xff]  ;;  %v3176_v12 = vld [vmem:[#allocation2 + $0xfa] sm:$0xff] }
 0x112   : > { %5458 = vmatmul.mubr.f32.gmra.mrb[12].mxu0 %v2866_v37  ;;  %5140 = vmatprep.mubr.f32.mxu1 %v7112_v3  ;;  %v2872_v3 = vld [vmem:[#allocation2 + $0x111] sm:$0xff] }
 0x113   : > { %5460 = vmatprep.mubr.f32.mxu0 %v2867_v50  ;;  %5930 = vmatpush3.bf16.msra.mxu0 %v5927_v0  ;;  %v3177_v0 = vld [vmem:[#allocation2 + $0x10a] sm:$0xff] }
 0x114   : > { %5962 = vmatpush3.bf16.msra.mxu1 %v5959_v55  ;;  %5932 = vmatprep.subr.bf16.mxu0 %v5931_v21  ;;  %v3624_v55 = vld [vmem:[%s7491_s25 + $0x98] sm:$0xff]  ;;  %v3180_v37 = vld [vmem:[#allocation2 + $0x12a] sm:$0xff] }
 0x115   : > { %5141 = vmatmul.mubr.f32.gmra.mrb[14].mxu1 %v7123_v26  ;;  %5964 = vmatprep.subr.bf16.mxu1 %v5963_v17  ;;  %v2874_v26 = vld [vmem:[#allocation2 + $0x129] sm:$0xff] }
 0x116   : > { %5461 = vmatmul.mubr.f32.gmra.mrb[14].mxu0 %v2868_v22  ;;  %5143 = vmatprep.mubr.f32.mxu1 %v7128_v1  ;;  %v2875_v1 = vld [vmem:[#allocation2 + $0x139] sm:$0xff]  ;;  %v3627_v50 = vld [vmem:[%s7491_s25 + $0xb0] sm:$0xff]  ;;  %v3182_v22 = vld [vmem:[#allocation2 + $0x142] sm:$0xff] }
 0x117   : > { %5463 = vmatprep.mubr.f32.mxu0 %v2869_v27  ;;  %5934 = vmatpush3.bf16.msra.mxu0 %v5931_v21  ;;  %v3181_v21 = vld [vmem:[#allocation2 + $0x13a] sm:$0xff] }
 0x118   : > { %5966 = vmatpush3.bf16.msra.mxu1 %v5963_v17  ;;  %v3628_v17 = vld [vmem:[%s7491_s25 + $0xb8] sm:$0xff]  ;;  %v3629_v27 = vld [vmem:[%s7491_s25 + $0xc0] sm:$0xff] }
 0x119   : > { %5144 = vmatmul.mubr.f32.gmra.mrb[16].mxu1 %v7137_v20  ;;  %v2876_v20 = vld [vmem:[#allocation2 + $0x141] sm:$0xff] }
 0x11a   : > { %5464 = vmatmul.mubr.f32.gmra.mrb[16].mxu0 %v2870_v11  ;;  %5146 = vmatprep.mubr.f32.mxu1 %v7142_v19  ;;  %v2878_v19 = vld [vmem:[#allocation2 + $0x159] sm:$0xff] }
 0x11b   : > { %5466 = vmatprep.mubr.f32.mxu0 %v2871_v7  ;;  %v3183_v11 = vld [vmem:[#allocation2 + $0x152] sm:$0xff]  ;;  %v3630_v7 = vld [vmem:[%s7491_s25 + $0xc8] sm:$0xff] }
 0x11d   : > { %5147 = vmatmul.mubr.f32.gmra.mrb[18].mxu1 %v7149_v32  ;;  %v2879_v32 = vld [vmem:[#allocation2 + $0x169] sm:$0xff] }
 0x11e   : > { %5467 = vmatmul.mubr.f32.gmra.mrb[18].mxu0 %v2872_v3  ;;  %5149 = vmatprep.mubr.f32.mxu1 %v7154_v57  ;;  %v2880_v57 = vld [vmem:[#allocation2 + $0x171] sm:$0xff]  ;;  %v3184_v3 = vld [vmem:[#allocation2 + $0x15a] sm:$0xff] }
 0x11f   : > { %5469 = vmatprep.mubr.f32.mxu0 %v2873_v10  ;;  %v3631_v10 = vld [vmem:[%s7491_s25 + $0xd0] sm:$0xff] }
 0x121   : > { %5150 = vmatmul.mubr.f32.gmra.mrb[20].mxu1 %v7161_v58  ;;  %v2881_v58 = vld [vmem:[#allocation2 + $0x181] sm:$0xff] }
 0x122   : > { %5470 = vmatmul.mubr.f32.gmra.mrb[20].mxu0 %v2874_v26  ;;  %5152 = vmatprep.mubr.f32.mxu1 %v7166_v43  ;;  %v2882_v43 = vld [vmem:[#allocation2 + $0x189] sm:$0xff] }
 0x123   : > { %5472 = vmatprep.mubr.f32.mxu0 %v2875_v1  ;;  %v3185_v26 = vld [vmem:[#allocation2 + $0x16a] sm:$0xff]  ;;  %v3632_v1 = vld [vmem:[%s7491_s25 + $0xd8] sm:$0xff] }
 0x125   : > { %5153 = vmatmul.mubr.f32.gmra.mrb[22].mxu1 %v7173_v45  ;;  %v2883_v45 = vld [vmem:[#allocation2 + $0x199] sm:$0xff] }
 0x126   : > { %5473 = vmatmul.mubr.f32.gmra.mrb[22].mxu0 %v2876_v20  ;;  %5155 = vmatprep.mubr.f32.mxu1 %v7178_v48  ;;  %v2884_v48 = vld [vmem:[#allocation2 + $0x1a1] sm:$0xff]  ;;  %v3186_v20 = vld [vmem:[#allocation2 + $0x172] sm:$0xff] }
 0x127   : > { %5475 = vmatprep.mubr.f32.mxu0 %v2877_v46  ;;  %v3633_v46 = vld [vmem:[%s7491_s25 + $0xe0] sm:$0xff] }
 0x129   : > { %5156 = vmatmul.mubr.f32.gmra.mrb[24].mxu1 %v7185_v34  ;;  %v3605_v34 = vld [vmem:[%s7491_s25] sm:$0xff] }
 0x12a   : > { %5476 = vmatmul.mubr.f32.gmra.mrb[24].mxu0 %v2878_v19  ;;  %5158 = vmatprep.mubr.f32.mxu1 %v7190_v61  ;;  %v3159_v61 = vld [vmem:[#allocation2 + $0x32] sm:$0xff]  ;;  %v3187_v19 = vld [vmem:[#allocation2 + $0x182] sm:$0xff] }
 0x12b   : > { %5478 = vmatprep.mubr.f32.mxu0 %v2879_v32  ;;  %v3634_v32 = vld [vmem:[%s7491_s25 + $0xe8] sm:$0xff] }
 0x12d   : > { %5159 = vmatmul.mubr.f32.gmra.mrb[26].mxu1 %v7197_v54  ;;  %v3606_v54 = vld [vmem:[%s7491_s25 + $0x8] sm:$0xff] }
 0x12e   : > { %5479 = vmatmul.mubr.f32.gmra.mrb[26].mxu0 %v2880_v57  ;;  %5161 = vmatprep.mubr.f32.mxu1 %v7202_v60  ;;  %v3160_v60 = vld [vmem:[#allocation2 + $0x3a] sm:$0xff]  ;;  %v3188_v57 = vld [vmem:[#allocation2 + $0x18a] sm:$0xff] }
 0x12f   : > { %5481 = vmatprep.mubr.f32.mxu0 %v2881_v58  ;;  %v3635_v58 = vld [vmem:[%s7491_s25 + $0xf0] sm:$0xff] }
 0x131   : > { %5162 = vmatmul.mubr.f32.gmra.mrb[28].mxu1 %v7742_v56  ;;  %v3161_v56 = vld [vmem:[#allocation2 + $0x4a] sm:$0xff] }
 0x132   : > { %5482 = vmatmul.mubr.f32.gmra.mrb[28].mxu0 %v2882_v43  ;;  %5164 = vmatprep.mubr.f32.mxu1 %v7360_v25  ;;  %v3608_v25 = vld [vmem:[%s7491_s25 + $0x18] sm:$0xff] }
 0x133   : > { %5484 = vmatprep.mubr.f32.mxu0 %v2883_v45  ;;  %v3189_v43 = vld [vmem:[#allocation2 + $0x19a] sm:$0xff] }
 0x134   : > { %v3636_v45 = vld [vmem:[%s7491_s25 + $0xf8] sm:$0xff] }
 0x135   : > { %5165 = vmatmul.mubr.f32.gmra.mrb[30].mxu1 %v7366_v5  ;;  %v3610_v5 = vld [vmem:[%s7491_s25 + $0x28] sm:$0xff] }
 0x136   : > { %5485 = vmatmul.mubr.f32.gmra.mrb[30].mxu0 %v2884_v48  ;;  %5599 = vmatprep.mubr.f32.mxu1 %v3605_v34  ;;  %v3190_v48 = vld [vmem:[#allocation2 + $0x1a2] sm:$0xff] }
 0x137   : > { %5519 = vmatprep.mubr.f32.mxu0 %v3159_v61 }
 0x139   : > { %5600 = vmatmul.mubr.f32.vlgmr.msra.gmra.mrb[32].mxu1 %v3606_v54 }
 0x13a   : > { %5520 = vmatmul.mubr.f32.vlgmr.msra.gmra.mrb[0].mxu0 %v3160_v60  ;;  %5602 = vmatprep.mubr.f32.mxu1 %v3607_v13 }
 0x13b   : > { %5522 = vmatprep.mubr.f32.mxu0 %v3161_v56 }
 0x13d   : > { %5603 = vmatmul.mubr.f32.gmra.mrb[34].mxu1 %v3608_v25 }
 0x13e   : > { %5523 = vmatmul.mubr.f32.gmra.mrb[2].mxu0 %v3162_v29  ;;  %5605 = vmatprep.mubr.f32.mxu1 %v3609_v53 }
 0x13f   : > { %5525 = vmatprep.mubr.f32.mxu0 %v3163_v4 }
 0x141   : > { %5606 = vmatmul.mubr.f32.gmra.mrb[36].mxu1 %v3610_v5 }
 0x142   : > { %5526 = vmatmul.mubr.f32.gmra.mrb[4].mxu0 %v3164_v35  ;;  %5608 = vmatprep.mubr.f32.mxu1 %v3611_v18 }
 0x143   : > { %5528 = vmatprep.mubr.f32.mxu0 %v3165_v49 }
 0x145   : > { %5609 = vmatmul.mubr.f32.gmra.mrb[38].mxu1 %v3612_v59 }
 0x146   : > { %5529 = vmatmul.mubr.f32.gmra.mrb[6].mxu0 %v3166_v8  ;;  %5611 = vmatprep.mubr.f32.mxu1 %v3613_v16 }
 0x147   : > { %5531 = vmatprep.mubr.f32.mxu0 %v3167_v63 }
 0x149   : > { %5612 = vmatmul.mubr.f32.gmra.mrb[40].mxu1 %v3614_v15 }
 0x14a   : > { %5532 = vmatmul.mubr.f32.gmra.mrb[8].mxu0 %v3168_v33  ;;  %5614 = vmatprep.mubr.f32.mxu1 %v3615_v51 }
 0x14b   : > { %5534 = vmatprep.mubr.f32.mxu0 %v3169_v47 }
 0x14d   : > { %5615 = vmatmul.mubr.f32.gmra.mrb[42].mxu1 %v3616_v14 }
 0x14e   : > { %5535 = vmatmul.mubr.f32.gmra.mrb[10].mxu0 %v3170_v23  ;;  %5617 = vmatprep.mubr.f32.mxu1 %v3617_v38 }
 0x14f   : > { %5537 = vmatprep.mubr.f32.mxu0 %v3171_v41 }
 0x151   : > { %5618 = vmatmul.mubr.f32.gmra.mrb[44].mxu1 %v3618_v6 }
 0x152   : > { %5538 = vmatmul.mubr.f32.gmra.mrb[12].mxu0 %v3172_v24  ;;  %5620 = vmatprep.mubr.f32.mxu1 %v3619_v28 }
 0x153   : > { %5540 = vmatprep.mubr.f32.mxu0 %v3173_v31 }
 0x155   : > { %5621 = vmatmul.mubr.f32.gmra.mrb[46].mxu1 %v3620_v36 }
 0x156   : > { %5541 = vmatmul.mubr.f32.gmra.mrb[14].mxu0 %v3174_v30  ;;  %5623 = vmatprep.mubr.f32.mxu1 %v3621_v40 }
 0x157   : > { %5543 = vmatprep.mubr.f32.mxu0 %v3175_v62 }
 0x159   : > { %5624 = vmatmul.mubr.f32.gmra.mrb[48].mxu1 %v3622_v39 }
 0x15a   : > { %5544 = vmatmul.mubr.f32.gmra.mrb[16].mxu0 %v3176_v12  ;;  %5626 = vmatprep.mubr.f32.mxu1 %v3623_v2 }
 0x15b   : > { %5546 = vmatprep.mubr.f32.mxu0 %v3177_v0 }
 0x15d   : > { %5627 = vmatmul.mubr.f32.gmra.mrb[50].mxu1 %v3624_v55 }
 0x15e   : > { %5547 = vmatmul.mubr.f32.gmra.mrb[18].mxu0 %v3178_v44  ;;  %5629 = vmatprep.mubr.f32.mxu1 %v3625_v42 }
 0x15f   : > { %5549 = vmatprep.mubr.f32.mxu0 %v3179_v9 }
 0x161   : > { %5630 = vmatmul.mubr.f32.gmra.mrb[52].mxu1 %v3626_v52 }
 0x162   : > { %5550 = vmatmul.mubr.f32.gmra.mrb[20].mxu0 %v3180_v37  ;;  %5632 = vmatprep.mubr.f32.mxu1 %v3627_v50 }
 0x163   : > { %5552 = vmatprep.mubr.f32.mxu0 %v3181_v21 }
 0x165   : > { %5633 = vmatmul.mubr.f32.gmra.mrb[54].mxu1 %v3628_v17 }
 0x166   : > { %5553 = vmatmul.mubr.f32.gmra.mrb[22].mxu0 %v3182_v22  ;;  %5635 = vmatprep.mubr.f32.mxu1 %v3629_v27 }
 0x167   : > { %5555 = vmatprep.mubr.f32.mxu0 %v3183_v11 }
 0x169   : > { %5636 = vmatmul.mubr.f32.gmra.mrb[56].mxu1 %v3630_v7 }
 0x16a   : > { %5556 = vmatmul.mubr.f32.gmra.mrb[24].mxu0 %v3184_v3  ;;  %5638 = vmatprep.mubr.f32.mxu1 %v3631_v10 }
 0x16b   : > { %5558 = vmatprep.mubr.f32.mxu0 %v3185_v26 }
 0x16d   : > { %5639 = vmatmul.mubr.f32.gmra.mrb[58].mxu1 %v3632_v1 }
 0x16e   : > { %5559 = vmatmul.mubr.f32.gmra.mrb[26].mxu0 %v3186_v20  ;;  %5641 = vmatprep.mubr.f32.mxu1 %v3633_v46 }
 0x16f   : > { %5561 = vmatprep.mubr.f32.mxu0 %v3187_v19 }
 0x171   : > { %5642 = vmatmul.mubr.f32.gmra.mrb[60].mxu1 %v3634_v32 }
 0x172   : > { %5562 = vmatmul.mubr.f32.gmra.mrb[28].mxu0 %v3188_v57  ;;  %5644 = vmatprep.mubr.f32.mxu1 %v3635_v58 }
 0x173   : > { %5564 = vmatprep.mubr.f32.mxu0 %v3189_v43 }
 0x175   : > { %5645 = vmatmul.mubr.f32.gmra.mrb[62].mxu1 %v3636_v45 }
 0x176   : > { %5565 = vmatmul.mubr.f32.gmra.mrb[30].mxu0 %v3190_v48 }
 0x1cc   : > { %v5121_v34 = vpop.f32.mrb[0].mxu1 }
 0x1cd   : > { %v1743_v61 = vpop.f32.mrb[1].mxu1 }
 0x1d0   : > { %v5124_v54 = vpop.f32.mrb[2].mxu1 }
 0x1d1   : > { %v1753_v60 = vpop.f32.mrb[3].mxu1 }
 0x1d4   : > { %v7528_v13 = vpop.f32.mrb[4].mxu1 }
 0x1d5   : > { %v7530_v56 = vpop.f32.mrb[5].mxu1 }
 0x1d8   : > { %v7532_v25 = vpop.f32.mrb[6].mxu1 }
 0x1d9   : > { %v7534_v29 = vpop.f32.mrb[7].mxu1 }
 0x1dc   : > { %v7536_v53 = vpop.f32.mrb[8].mxu1 }
 0x1dd   : > { %v7538_v4 = vpop.f32.mrb[9].mxu1 }
 0x1e0   : > { %v7540_v5 = vpop.f32.mrb[10].mxu1 }
 0x1e1   : > { %v7542_v35 = vpop.f32.mrb[11].mxu1 }
 0x1e4   : > { %v7544_v18 = vpop.f32.mrb[12].mxu1 }
 0x1e5   : > { %v7546_v49 = vpop.f32.mrb[13].mxu1 }
 0x1e8   : > { %v7548_v59 = vpop.f32.mrb[14].mxu1 }
 0x1e9   : > { %v7550_v8 = vpop.f32.mrb[15].mxu1 }
 0x1ec   : > { %v7552_v16 = vpop.f32.mrb[16].mxu1 }
 0x1ed   : > { %v7554_v63 = vpop.f32.mrb[17].mxu1 }
 0x1f0   : > { %v7556_v15 = vpop.f32.mrb[18].mxu1 }
 0x1f1   : > { %v7558_v33 = vpop.f32.mrb[19].mxu1 }
 0x1f4   : > { %v7560_v51 = vpop.f32.mrb[20].mxu1 }
 0x1f5   : > { %v7562_v47 = vpop.f32.mrb[21].mxu1 }
 0x1f8   : > { %v7564_v14 = vpop.f32.mrb[22].mxu1 }
 0x1f9   : > { %v7566_v23 = vpop.f32.mrb[23].mxu1 }
 0x1fc   : > { %v7568_v38 = vpop.f32.mrb[24].mxu1 }
 0x1fd   : > { %v7570_v41 = vpop.f32.mrb[25].mxu1 }
 0x200   : > { %v7572_v6 = vpop.f32.mrb[26].mxu1 }
 0x201   : > { %v7574_v24 = vpop.f32.mrb[27].mxu1 }
 0x204   : > { %v7576_v28 = vpop.f32.mrb[28].mxu1 }
 0x205   : > { %v7578_v31 = vpop.f32.mrb[29].mxu1 }
 0x208   : > { %v7580_v36 = vpop.f32.mrb[30].mxu1 }
 0x209   : > { %v7582_v30 = vpop.f32.mrb[31].mxu1 }
 0x20c   : > { %v5601_v40 = vpop.f32.mrb[32].mxu1 }
 0x20d   : > { %v5521_v62 = vpop.f32.mrb[0].mxu0  ;;  %3879 = vst [vmem:[%s7588_s27 + $0x8] sm:$0xff] %v5601_v40  ;;  %v3949_v39 = vmul.f32 %v5601_v40, %v5601_v40  ;;  %v3719_v12 = vpop.f32.mrb[33].mxu1 }
 0x20e   : > { %v5967_v2 = vadd.f32 %v5521_v62, %v5121_v34  ;;  %v3274_v0 = vpop.f32.mrb[1].mxu0  ;;  %3878 = vst [vmem:[%s7588_s27] sm:$0xff] %v3719_v12  ;;  %v3910_v55 = vadd.f32 %v5601_v40, %v3719_v12  ;;  %v3948_v44 = vmul.f32 %v3719_v12, %v3719_v12 }
 0x20f   : > { %v5968_v42 = vadd.f32 %v3274_v0, %v1743_v61 }
 0x210   : > { %3466 = vst [vmem:[%s7594_s30 + $0x8] sm:$0xff] %v5967_v2  ;;  %v3536_v9 = vmul.f32 %v5967_v2, %v5967_v2  ;;  %v3980_v52 = vadd.f32 %v3949_v39, %v3948_v44  ;;  %v5604_v37 = vpop.f32.mrb[34].mxu1 }
 0x211   : > { %3465 = vst [vmem:[%s7594_s30] sm:$0xff] %v5968_v42  ;;  %v3497_v50 = vadd.f32 %v5968_v42, %v5967_v2  ;;  %v3535_v21 = vmul.f32 %v5968_v42, %v5968_v42  ;;  %v5524_v17 = vpop.f32.mrb[2].mxu0  ;;  %3881 = vst [vmem:[%s7588_s27 + $0x18] sm:$0xff] %v5604_v37  ;;  %v3729_v22 = vpop.f32.mrb[35].mxu1  ;;  %v3951_v11 = vmul.f32 %v5604_v37, %v5604_v37 }
 0x212   : > { %v5969_v27 = vadd.f32 %v5524_v17, %v5124_v54  ;;  %v3284_v7 = vpop.f32.mrb[3].mxu0  ;;  %3880 = vst [vmem:[%s7588_s27 + $0x10] sm:$0xff] %v3729_v22  ;;  %v3911_v3 = vadd.f32 %v3910_v55, %v3729_v22  ;;  %v3950_v10 = vmul.f32 %v3729_v22, %v3729_v22 }
 0x213   : > { %v3567_v26 = vadd.f32 %v3536_v9, %v3535_v21  ;;  %v5970_v1 = vadd.f32 %v3284_v7, %v1753_v60 }
 0x214   : > { %3468 = vst [vmem:[%s7594_s30 + $0x18] sm:$0xff] %v5969_v27  ;;  %v3981_v20 = vadd.f32 %v3980_v52, %v3950_v10  ;;  %v5607_v46 = vpop.f32.mrb[36].mxu1  ;;  %v3912_v19 = vadd.f32 %v5604_v37, %v3911_v3  ;;  %v3538_v40 = vmul.f32 %v5969_v27, %v5969_v27 }
 0x215   : > { %3467 = vst [vmem:[%s7594_s30 + $0x10] sm:$0xff] %v5970_v1  ;;  %v3498_v32 = vadd.f32 %v5970_v1, %v3497_v50  ;;  %v3537_v57 = vmul.f32 %v5970_v1, %v5970_v1  ;;  %v5527_v58 = vpop.f32.mrb[4].mxu0  ;;  %3883 = vst [vmem:[%s7588_s27 + $0x28] sm:$0xff] %v5607_v46  ;;  %v3953_v43 = vmul.f32 %v5607_v46, %v5607_v46  ;;  %v3739_v45 = vpop.f32.mrb[37].mxu1 }
 0x216   : > { %v5971_v48 = vadd.f32 %v5527_v58, %v7528_v13  ;;  %v3294_v34 = vpop.f32.mrb[5].mxu0  ;;  %3882 = vst [vmem:[%s7588_s27 + $0x20] sm:$0xff] %v3739_v45  ;;  %v3913_v61 = vadd.f32 %v3912_v19, %v3739_v45  ;;  %v3952_v54 = vmul.f32 %v3739_v45, %v3739_v45  ;;  %v3982_v60 = vadd.f32 %v3981_v20, %v3951_v11 }
 0x217   : > { %v3568_v62 = vadd.f32 %v3567_v26, %v3537_v57  ;;  %v5972_v39 = vadd.f32 %v3294_v34, %v7530_v56  ;;  %v3499_v12 = vadd.f32 %v5969_v27, %v3498_v32 }
 0x218   : > { %3470 = vst [vmem:[%s7594_s30 + $0x28] sm:$0xff] %v5971_v48  ;;  %v3983_v2 = vadd.f32 %v3982_v60, %v3952_v54  ;;  %v5610_v0 = vpop.f32.mrb[38].mxu1  ;;  %v3914_v55 = vadd.f32 %v5607_v46, %v3913_v61  ;;  %v3540_v27 = vmul.f32 %v5971_v48, %v5971_v48 }
 0x219   : > { %3469 = vst [vmem:[%s7594_s30 + $0x20] sm:$0xff] %v5972_v39  ;;  %v3500_v44 = vadd.f32 %v5972_v39, %v3499_v12  ;;  %v3539_v42 = vmul.f32 %v5972_v39, %v5972_v39  ;;  %v3569_v13 = vadd.f32 %v3568_v62, %v3538_v40  ;;  %v5530_v9 = vpop.f32.mrb[6].mxu0  ;;  %3885 = vst [vmem:[%s7588_s27 + $0x38] sm:$0xff] %v5610_v0  ;;  %v3749_v37 = vpop.f32.mrb[39].mxu1 }
 0x21a   : > { %v3955_v52 = vmul.f32 %v5610_v0, %v5610_v0  ;;  %v5973_v50 = vadd.f32 %v5530_v9, %v7532_v25  ;;  %v3304_v21 = vpop.f32.mrb[7].mxu0  ;;  %3884 = vst [vmem:[%s7588_s27 + $0x30] sm:$0xff] %v3749_v37  ;;  %v3915_v56 = vadd.f32 %v3914_v55, %v3749_v37  ;;  %v3954_v17 = vmul.f32 %v3749_v37, %v3749_v37 }
 0x21b   : > { %v3984_v22 = vadd.f32 %v3983_v2, %v3953_v43  ;;  %v3570_v11 = vadd.f32 %v3569_v13, %v3539_v42  ;;  %v5974_v7 = vadd.f32 %v3304_v21, %v7534_v29  ;;  %v3501_v3 = vadd.f32 %v5971_v48, %v3500_v44 }
 0x21c   : > { %3472 = vst [vmem:[%s7594_s30 + $0x38] sm:$0xff] %v5973_v50  ;;  %v5613_v26 = vpop.f32.mrb[40].mxu1  ;;  %v3916_v1 = vadd.f32 %v5610_v0, %v3915_v56  ;;  %v3542_v34 = vmul.f32 %v5973_v50, %v5973_v50 }
 0x21d   : > { %v3985_v10 = vadd.f32 %v3984_v22, %v3954_v17  ;;  %3471 = vst [vmem:[%s7594_s30 + $0x30] sm:$0xff] %v5974_v7  ;;  %v3502_v20 = vadd.f32 %v5974_v7, %v3501_v3  ;;  %v3541_v46 = vmul.f32 %v5974_v7, %v5974_v7  ;;  %v3571_v25 = vadd.f32 %v3570_v11, %v3540_v27  ;;  %v5533_v19 = vpop.f32.mrb[8].mxu0  ;;  %v3759_v57 = vpop.f32.mrb[41].mxu1 }
 0x21e   : > { %3887 = vst [vmem:[%s7588_s27 + $0x48] sm:$0xff] %v5613_v26  ;;  %v3957_v32 = vmul.f32 %v5613_v26, %v5613_v26  ;;  %v5975_v58 = vadd.f32 %v5533_v19, %v7536_v53  ;;  %v3314_v43 = vpop.f32.mrb[9].mxu0  ;;  %3886 = vst [vmem:[%s7588_s27 + $0x40] sm:$0xff] %v3759_v57  ;;  %v3917_v29 = vadd.f32 %v3916_v1, %v3759_v57 }
 0x21f   : > { %v3956_v45 = vmul.f32 %v3759_v57, %v3759_v57  ;;  %v3986_v48 = vadd.f32 %v3985_v10, %v3955_v52  ;;  %v3572_v61 = vadd.f32 %v3571_v25, %v3541_v46  ;;  %v5976_v54 = vadd.f32 %v3314_v43, %v7538_v4 }
 0x220   : > { %v3503_v60 = vadd.f32 %v5973_v50, %v3502_v20  ;;  %3474 = vst [vmem:[%s7594_s30 + $0x48] sm:$0xff] %v5975_v58  ;;  %v5616_v62 = vpop.f32.mrb[42].mxu1  ;;  %v3918_v39 = vadd.f32 %v5613_v26, %v3917_v29  ;;  %v3544_v37 = vmul.f32 %v5975_v58, %v5975_v58 }
 0x221   : > { %v3987_v40 = vadd.f32 %v3986_v48, %v3956_v45  ;;  %3473 = vst [vmem:[%s7594_s30 + $0x40] sm:$0xff] %v5976_v54  ;;  %v3543_v2 = vmul.f32 %v5976_v54, %v5976_v54  ;;  %v3573_v53 = vadd.f32 %v3572_v61, %v3542_v34  ;;  %v5536_v0 = vpop.f32.mrb[10].mxu0  ;;  %3889 = vst [vmem:[%s7588_s27 + $0x58] sm:$0xff] %v5616_v62  ;;  %v3769_v44 = vpop.f32.mrb[43].mxu1 }
 0x222   : > { %v3504_v12 = vadd.f32 %v5976_v54, %v3503_v60  ;;  %v3959_v55 = vmul.f32 %v5616_v62, %v5616_v62  ;;  %v5977_v42 = vadd.f32 %v5536_v0, %v7540_v5  ;;  %v3324_v13 = vpop.f32.mrb[11].mxu0  ;;  %3888 = vst [vmem:[%s7588_s27 + $0x50] sm:$0xff] %v3769_v44  ;;  %v3919_v4 = vadd.f32 %v3918_v39, %v3769_v44 }
 0x223   : > { %v3958_v9 = vmul.f32 %v3769_v44, %v3769_v44  ;;  %v3988_v52 = vadd.f32 %v3987_v40, %v3957_v32  ;;  %v3574_v50 = vadd.f32 %v3573_v53, %v3543_v2  ;;  %v5978_v21 = vadd.f32 %v3324_v13, %v7542_v35 }
 0x224   : > { %v3505_v56 = vadd.f32 %v5975_v58, %v3504_v12  ;;  %3476 = vst [vmem:[%s7594_s30 + $0x58] sm:$0xff] %v5977_v42  ;;  %v5619_v22 = vpop.f32.mrb[44].mxu1  ;;  %v3920_v27 = vadd.f32 %v5616_v62, %v3919_v4  ;;  %v3546_v19 = vmul.f32 %v5977_v42, %v5977_v42 }
 0x225   : > { %v3989_v17 = vadd.f32 %v3988_v52, %v3958_v9  ;;  %3475 = vst [vmem:[%s7594_s30 + $0x50] sm:$0xff] %v5978_v21  ;;  %v3545_v7 = vmul.f32 %v5978_v21, %v5978_v21  ;;  %v3575_v5 = vadd.f32 %v3574_v50, %v3544_v37  ;;  %v5539_v3 = vpop.f32.mrb[12].mxu0  ;;  %3891 = vst [vmem:[%s7588_s27 + $0x68] sm:$0xff] %v5619_v22  ;;  %v3779_v26 = vpop.f32.mrb[45].mxu1 }
 0x226   : > { %v3506_v11 = vadd.f32 %v5978_v21, %v3505_v56  ;;  %v3961_v10 = vmul.f32 %v5619_v22, %v5619_v22  ;;  %v5979_v1 = vadd.f32 %v5539_v3, %v7544_v18  ;;  %v3334_v20 = vpop.f32.mrb[13].mxu0  ;;  %3890 = vst [vmem:[%s7588_s27 + $0x60] sm:$0xff] %v3779_v26  ;;  %v3921_v35 = vadd.f32 %v3920_v27, %v3779_v26 }
 0x227   : > { %v3960_v46 = vmul.f32 %v3779_v26, %v3779_v26  ;;  %v3990_v25 = vadd.f32 %v3989_v17, %v3959_v55  ;;  %v3576_v32 = vadd.f32 %v3575_v5, %v3545_v7  ;;  %v5980_v57 = vadd.f32 %v3334_v20, %v7546_v49 }
 0x228   : > { %v3507_v58 = vadd.f32 %v5977_v42, %v3506_v11  ;;  %3478 = vst [vmem:[%s7594_s30 + $0x68] sm:$0xff] %v5979_v1  ;;  %v5622_v29 = vpop.f32.mrb[46].mxu1  ;;  %v3922_v45 = vadd.f32 %v5619_v22, %v3921_v35  ;;  %v3548_v2 = vmul.f32 %v5979_v1, %v5979_v1 }
 0x229   : > { %v3991_v43 = vadd.f32 %v3990_v25, %v3960_v46  ;;  %3477 = vst [vmem:[%s7594_s30 + $0x60] sm:$0xff] %v5980_v57  ;;  %v3547_v34 = vmul.f32 %v5980_v57, %v5980_v57  ;;  %v3577_v18 = vadd.f32 %v3576_v32, %v3546_v19  ;;  %v5542_v61 = vpop.f32.mrb[14].mxu0  ;;  %3893 = vst [vmem:[%s7588_s27 + $0x78] sm:$0xff] %v5622_v29  ;;  %v3789_v60 = vpop.f32.mrb[47].mxu1 }
 0x22a   : > { %v3508_v48 = vadd.f32 %v5980_v57, %v3507_v58  ;;  %v3963_v54 = vmul.f32 %v5622_v29, %v5622_v29  ;;  %v5981_v40 = vadd.f32 %v5542_v61, %v7548_v59  ;;  %v3344_v62 = vpop.f32.mrb[15].mxu0  ;;  %3892 = vst [vmem:[%s7588_s27 + $0x70] sm:$0xff] %v3789_v60  ;;  %v3923_v49 = vadd.f32 %v3922_v45, %v3789_v60 }
 0x22b   : > { %v3962_v39 = vmul.f32 %v3789_v60, %v3789_v60  ;;  %v3992_v12 = vadd.f32 %v3991_v43, %v3961_v10  ;;  %v3578_v53 = vadd.f32 %v3577_v18, %v3547_v34  ;;  %v5982_v0 = vadd.f32 %v3344_v62, %v7550_v8 }
 0x22c   : > { %v3509_v55 = vadd.f32 %v5979_v1, %v3508_v48  ;;  %3480 = vst [vmem:[%s7594_s30 + $0x78] sm:$0xff] %v5981_v40  ;;  %v5625_v42 = vpop.f32.mrb[48].mxu1  ;;  %v3924_v13 = vadd.f32 %v5622_v29, %v3923_v49  ;;  %v3550_v27 = vmul.f32 %v5981_v40, %v5981_v40 }
 0x22d   : > { %v3993_v44 = vadd.f32 %v3992_v12, %v3962_v39  ;;  %3479 = vst [vmem:[%s7594_s30 + $0x70] sm:$0xff] %v5982_v0  ;;  %v3549_v9 = vmul.f32 %v5982_v0, %v5982_v0  ;;  %v3579_v59 = vadd.f32 %v3578_v53, %v3548_v2  ;;  %v5545_v52 = vpop.f32.mrb[16].mxu0  ;;  %3895 = vst [vmem:[%s7588_s27 + $0x88] sm:$0xff] %v5625_v42  ;;  %v3799_v50 = vpop.f32.mrb[49].mxu1 }
 0x22e   : > { %v3510_v4 = vadd.f32 %v5982_v0, %v3509_v55  ;;  %v3965_v37 = vmul.f32 %v5625_v42, %v5625_v42  ;;  %v5983_v21 = vadd.f32 %v5545_v52, %v7552_v16  ;;  %v3354_v56 = vpop.f32.mrb[17].mxu0  ;;  %3894 = vst [vmem:[%s7588_s27 + $0x80] sm:$0xff] %v3799_v50  ;;  %v3925_v8 = vadd.f32 %v3924_v13, %v3799_v50 }
 0x22f   : > { %v3964_v17 = vmul.f32 %v3799_v50, %v3799_v50  ;;  %v3994_v22 = vadd.f32 %v3993_v44, %v3963_v54  ;;  %v3580_v11 = vadd.f32 %v3579_v59, %v3549_v9  ;;  %v5984_v7 = vadd.f32 %v3354_v56, %v7554_v63 }
 0x230   : > { %v3511_v5 = vadd.f32 %v5981_v40, %v3510_v4  ;;  %3482 = vst [vmem:[%s7594_s30 + $0x88] sm:$0xff] %v5983_v21  ;;  %v5628_v10 = vpop.f32.mrb[50].mxu1  ;;  %v3926_v26 = vadd.f32 %v5625_v42, %v3925_v8  ;;  %v3552_v43 = vmul.f32 %v5983_v21, %v5983_v21 }
 0x231   : > { %v3995_v3 = vadd.f32 %v3994_v22, %v3964_v17  ;;  %3481 = vst [vmem:[%s7594_s30 + $0x80] sm:$0xff] %v5984_v7  ;;  %v3551_v20 = vmul.f32 %v5984_v7, %v5984_v7  ;;  %v3581_v16 = vadd.f32 %v3580_v11, %v3550_v27  ;;  %v5548_v35 = vpop.f32.mrb[18].mxu0  ;;  %3897 = vst [vmem:[%s7588_s27 + $0x98] sm:$0xff] %v5628_v10  ;;  %v3809_v25 = vpop.f32.mrb[51].mxu1 }
 0x232   : > { %v3512_v1 = vadd.f32 %v5984_v7, %v3511_v5  ;;  %v3967_v46 = vmul.f32 %v5628_v10, %v5628_v10  ;;  %v5985_v19 = vadd.f32 %v5548_v35, %v7556_v15  ;;  %v3364_v32 = vpop.f32.mrb[19].mxu0  ;;  %3896 = vst [vmem:[%s7588_s27 + $0x90] sm:$0xff] %v3809_v25  ;;  %v3927_v63 = vadd.f32 %v3926_v26, %v3809_v25 }
 0x233   : > { %v3966_v57 = vmul.f32 %v3809_v25, %v3809_v25  ;;  %v3996_v58 = vadd.f32 %v3995_v3, %v3965_v37  ;;  %v3582_v29 = vadd.f32 %v3581_v16, %v3551_v20  ;;  %v5986_v45 = vadd.f32 %v3364_v32, %v7558_v33 }
 0x234   : > { %v3513_v48 = vadd.f32 %v5983_v21, %v3512_v1  ;;  %3484 = vst [vmem:[%s7594_s30 + $0x98] sm:$0xff] %v5985_v19  ;;  %v5631_v18 = vpop.f32.mrb[52].mxu1  ;;  %v3928_v61 = vadd.f32 %v5628_v10, %v3927_v63  ;;  %v3554_v0 = vmul.f32 %v5985_v19, %v5985_v19 }
 0x235   : > { %v3997_v34 = vadd.f32 %v3996_v58, %v3966_v57  ;;  %3483 = vst [vmem:[%s7594_s30 + $0x90] sm:$0xff] %v5986_v45  ;;  %v3553_v60 = vmul.f32 %v5986_v45, %v5986_v45  ;;  %v3583_v15 = vadd.f32 %v3582_v29, %v3552_v43  ;;  %v5551_v40 = vpop.f32.mrb[20].mxu0  ;;  %3899 = vst [vmem:[%s7588_s27 + $0xa8] sm:$0xff] %v5631_v18  ;;  %v3819_v49 = vpop.f32.mrb[53].mxu1 }
 0x236   : > { %v3514_v54 = vadd.f32 %v5986_v45, %v3513_v48  ;;  %v3969_v62 = vmul.f32 %v5631_v18, %v5631_v18  ;;  %v5987_v39 = vadd.f32 %v5551_v40, %v7560_v51  ;;  %v3374_v12 = vpop.f32.mrb[21].mxu0  ;;  %3898 = vst [vmem:[%s7588_s27 + $0xa0] sm:$0xff] %v3819_v49  ;;  %v3929_v33 = vadd.f32 %v3928_v61, %v3819_v49 }
 0x237   : > { %v3968_v2 = vmul.f32 %v3819_v49, %v3819_v49  ;;  %v3998_v53 = vadd.f32 %v3997_v34, %v3967_v46  ;;  %v3584_v55 = vadd.f32 %v3583_v15, %v3553_v60  ;;  %v5988_v44 = vadd.f32 %v3374_v12, %v7562_v47 }
 0x238   : > { %v3515_v42 = vadd.f32 %v5985_v19, %v3514_v54  ;;  %3486 = vst [vmem:[%s7594_s30 + $0xa8] sm:$0xff] %v5987_v39  ;;  %v5634_v4 = vpop.f32.mrb[54].mxu1  ;;  %v3930_v9 = vadd.f32 %v5631_v18, %v3929_v33  ;;  %v3556_v27 = vmul.f32 %v5987_v39, %v5987_v39 }
 0x239   : > { %v3999_v13 = vadd.f32 %v3998_v53, %v3968_v2  ;;  %3485 = vst [vmem:[%s7594_s30 + $0xa0] sm:$0xff] %v5988_v44  ;;  %v3555_v52 = vmul.f32 %v5988_v44, %v5988_v44  ;;  %v3585_v51 = vadd.f32 %v3584_v55, %v3554_v0  ;;  %v5554_v37 = vpop.f32.mrb[22].mxu0  ;;  %3901 = vst [vmem:[%s7588_s27 + $0xb8] sm:$0xff] %v5634_v4  ;;  %v3829_v21 = vpop.f32.mrb[55].mxu1 }
 0x23a   : > { %v3516_v59 = vadd.f32 %v5988_v44, %v3515_v42  ;;  %v3971_v50 = vmul.f32 %v5634_v4, %v5634_v4  ;;  %v5989_v56 = vadd.f32 %v5554_v37, %v7564_v14  ;;  %v3384_v8 = vpop.f32.mrb[23].mxu0  ;;  %3900 = vst [vmem:[%s7588_s27 + $0xb0] sm:$0xff] %v3829_v21  ;;  %v3931_v47 = vadd.f32 %v3930_v9, %v3829_v21 }
 0x23b   : > { %v3970_v17 = vmul.f32 %v3829_v21, %v3829_v21  ;;  %v4000_v22 = vadd.f32 %v3999_v13, %v3969_v62  ;;  %v3586_v11 = vadd.f32 %v3585_v51, %v3555_v52  ;;  %v5990_v7 = vadd.f32 %v3384_v8, %v7566_v23 }
 0x23c   : > { %v3517_v5 = vadd.f32 %v5987_v39, %v3516_v59  ;;  %3488 = vst [vmem:[%s7594_s30 + $0xb8] sm:$0xff] %v5989_v56  ;;  %v5637_v10 = vpop.f32.mrb[56].mxu1  ;;  %v3932_v26 = vadd.f32 %v5634_v4, %v3931_v47  ;;  %v3558_v57 = vmul.f32 %v5989_v56, %v5989_v56 }
 0x23d   : > { %v4001_v3 = vadd.f32 %v4000_v22, %v3970_v17  ;;  %3487 = vst [vmem:[%s7594_s30 + $0xb0] sm:$0xff] %v5990_v7  ;;  %v3557_v20 = vmul.f32 %v5990_v7, %v5990_v7  ;;  %v3587_v14 = vadd.f32 %v3586_v11, %v3556_v27  ;;  %v5557_v16 = vpop.f32.mrb[24].mxu0  ;;  %3903 = vst [vmem:[%s7588_s27 + $0xc8] sm:$0xff] %v5637_v10  ;;  %v3839_v46 = vpop.f32.mrb[57].mxu1 }
 0x23e   : > { %v3518_v1 = vadd.f32 %v5990_v7, %v3517_v5  ;;  %v3973_v35 = vmul.f32 %v5637_v10, %v5637_v10  ;;  %v5991_v25 = vadd.f32 %v5557_v16, %v7568_v38  ;;  %v3394_v19 = vpop.f32.mrb[25].mxu0  ;;  %3902 = vst [vmem:[%s7588_s27 + $0xc0] sm:$0xff] %v3839_v46  ;;  %v3933_v23 = vadd.f32 %v3932_v26, %v3839_v46 }
 0x23f   : > { %v3972_v32 = vmul.f32 %v3839_v46, %v3839_v46  ;;  %v4002_v63 = vadd.f32 %v4001_v3, %v3971_v50  ;;  %v3588_v58 = vadd.f32 %v3587_v14, %v3557_v20  ;;  %v5992_v43 = vadd.f32 %v3394_v19, %v7570_v41 }
 0x240   : > { %v3519_v29 = vadd.f32 %v5989_v56, %v3518_v1  ;;  %3490 = vst [vmem:[%s7594_s30 + $0xc8] sm:$0xff] %v5991_v25  ;;  %v5640_v48 = vpop.f32.mrb[58].mxu1  ;;  %v3934_v34 = vadd.f32 %v5637_v10, %v3933_v23  ;;  %v3560_v12 = vmul.f32 %v5991_v25, %v5991_v25 }
 0x241   : > { %v4003_v45 = vadd.f32 %v4002_v63, %v3972_v32  ;;  %3489 = vst [vmem:[%s7594_s30 + $0xc0] sm:$0xff] %v5992_v43  ;;  %v3559_v61 = vmul.f32 %v5992_v43, %v5992_v43  ;;  %v3589_v38 = vadd.f32 %v3588_v58, %v3558_v57  ;;  %v5560_v54 = vpop.f32.mrb[26].mxu0  ;;  %3905 = vst [vmem:[%s7588_s27 + $0xd8] sm:$0xff] %v5640_v48  ;;  %v3849_v15 = vpop.f32.mrb[59].mxu1 }
 0x242   : > { %v3520_v18 = vadd.f32 %v5992_v43, %v3519_v29  ;;  %v3975_v60 = vmul.f32 %v5640_v48, %v5640_v48  ;;  %v5993_v40 = vadd.f32 %v5560_v54, %v7572_v6  ;;  %v3404_v62 = vpop.f32.mrb[27].mxu0  ;;  %3904 = vst [vmem:[%s7588_s27 + $0xd0] sm:$0xff] %v3849_v15  ;;  %v3935_v41 = vadd.f32 %v3934_v34, %v3849_v15 }
 0x243   : > { %v3974_v49 = vmul.f32 %v3849_v15, %v3849_v15  ;;  %v4004_v39 = vadd.f32 %v4003_v45, %v3973_v35  ;;  %v3590_v33 = vadd.f32 %v3589_v38, %v3559_v61  ;;  %v5994_v2 = vadd.f32 %v3404_v62, %v7574_v24 }
 0x244   : > { %v3521_v53 = vadd.f32 %v5991_v25, %v3520_v18  ;;  %3492 = vst [vmem:[%s7594_s30 + $0xd8] sm:$0xff] %v5993_v40  ;;  %v5643_v55 = vpop.f32.mrb[60].mxu1  ;;  %v3936_v44 = vadd.f32 %v5640_v48, %v3935_v41  ;;  %v3562_v21 = vmul.f32 %v5993_v40, %v5993_v40 }
 0x245   : > { %v4005_v0 = vadd.f32 %v4004_v39, %v3974_v49  ;;  %3491 = vst [vmem:[%s7594_s30 + $0xd0] sm:$0xff] %v5994_v2  ;;  %v3561_v13 = vmul.f32 %v5994_v2, %v5994_v2  ;;  %v3591_v6 = vadd.f32 %v3590_v33, %v3560_v12  ;;  %v5563_v4 = vpop.f32.mrb[28].mxu0  ;;  %3907 = vst [vmem:[%s7588_s27 + $0xe8] sm:$0xff] %v5643_v55  ;;  %v3859_v59 = vpop.f32.mrb[61].mxu1 }
 0x246   : > { %v3522_v42 = vadd.f32 %v5994_v2, %v3521_v53  ;;  %v3977_v9 = vmul.f32 %v5643_v55, %v5643_v55  ;;  %v5995_v52 = vadd.f32 %v5563_v4, %v7576_v28  ;;  %v3414_v51 = vpop.f32.mrb[29].mxu0  ;;  %3906 = vst [vmem:[%s7588_s27 + $0xe0] sm:$0xff] %v3859_v59  ;;  %v3937_v24 = vadd.f32 %v3936_v44, %v3859_v59 }
 0x247   : > { %v3976_v37 = vmul.f32 %v3859_v59, %v3859_v59  ;;  %v4006_v50 = vadd.f32 %v4005_v0, %v3975_v60  ;;  %v3592_v56 = vadd.f32 %v3591_v6, %v3561_v13  ;;  %v5996_v8 = vadd.f32 %v3414_v51, %v7578_v31 }
 0x248   : > { %v3523_v47 = vadd.f32 %v5993_v40, %v3522_v42  ;;  %3494 = vst [vmem:[%s7594_s30 + $0xe8] sm:$0xff] %v5995_v52  ;;  %v5646_v22 = vpop.f32.mrb[62].mxu1  ;;  %v3938_v27 = vadd.f32 %v5643_v55, %v3937_v24  ;;  %v3564_v16 = vmul.f32 %v5995_v52, %v5995_v52 }
 0x249   : > { %v4007_v17 = vadd.f32 %v4006_v50, %v3976_v37  ;;  %3493 = vst [vmem:[%s7594_s30 + $0xe0] sm:$0xff] %v5996_v8  ;;  %v3563_v7 = vmul.f32 %v5996_v8, %v5996_v8  ;;  %v3593_v28 = vadd.f32 %v3592_v56, %v3562_v21  ;;  %v5566_v5 = vpop.f32.mrb[30].mxu0  ;;  %3909 = vst [vmem:[%s7588_s27 + $0xf8] sm:$0xff] %v5646_v22  ;;  %v3869_v10 = vpop.f32.mrb[63].mxu1 }
 0x24a   : > { %v3524_v11 = vadd.f32 %v5996_v8, %v3523_v47  ;;  %v3979_v3 = vmul.f32 %v5646_v22, %v5646_v22  ;;  %v5997_v26 = vadd.f32 %v5566_v5, %v7580_v36  ;;  %v3424_v1 = vpop.f32.mrb[31].mxu0  ;;  %3908 = vst [vmem:[%s7588_s27 + $0xf0] sm:$0xff] %v3869_v10  ;;  %v3939_v31 = vadd.f32 %v3938_v27, %v3869_v10 }
 0x24b   : > { %v3978_v20 = vmul.f32 %v3869_v10, %v3869_v10  ;;  %v4008_v14 = vadd.f32 %v4007_v17, %v3977_v9  ;;  %v3594_v35 = vadd.f32 %v3593_v28, %v3563_v7  ;;  %v5998_v46 = vadd.f32 %v3424_v1, %v7582_v30 }
 0x24c   : > { %v3525_v25 = vadd.f32 %v5995_v52, %v3524_v11  ;;  %3496 = vst [vmem:[%s7594_s30 + $0xf8] sm:$0xff] %v5997_v26  ;;  %v3940_v19 = vadd.f32 %v5646_v22, %v3939_v31  ;;  %v3566_v36 = vmul.f32 %v5997_v26, %v5997_v26 }
 0x24d   : > { %v4009_v23 = vadd.f32 %v4008_v14, %v3978_v20  ;;  %3495 = vst [vmem:[%s7594_s30 + $0xf0] sm:$0xff] %v5998_v46  ;;  %v3565_v63 = vmul.f32 %v5998_v46, %v5998_v46  ;;  %v3595_v57 = vadd.f32 %v3594_v35, %v3564_v16 }
 0x24e   : > { %v3526_v32 = vadd.f32 %v5998_v46, %v3525_v25  ;;  %v3941_v58 = vrot.slane %v3940_v19, 4 }
 0x24f   : > { %v4010_v43 = vadd.f32 %v4009_v23, %v3979_v3  ;;  %v3596_v45 = vadd.f32 %v3595_v57, %v3565_v63 }
 0x250   : > { %v3527_v29 = vadd.f32 %v5997_v26, %v3526_v32  ;;  %v3942_v48 = vadd.f32 %v3941_v58, %v3940_v19 }
 0x251   : > { %v4011_v34 = vrot.slane %v4010_v43, 4  ;;  %v3597_v61 = vadd.f32 %v3596_v45, %v3566_v36 }
 0x252   : > { %v3528_v18 = vrot.slane %v3527_v29, 4  ;;  %v3943_v38 = vrot.slane %v3942_v48, 2 }
 0x253   : > { %v4012_v30 = vadd.f32 %v4011_v34, %v4010_v43  ;;  %v3598_v60 = vrot.slane %v3597_v61, 4 }
 0x254   : > { %v3529_v54 = vadd.f32 %v3528_v18, %v3527_v29  ;;  %v3944_v15 = vadd.f32 %v3943_v38, %v3942_v48 }
 0x255   : > { %v4013_v40 = vrot.slane %v4012_v30, 2  ;;  %v3599_v41 = vadd.f32 %v3598_v60, %v3597_v61 }
 0x256   : > { %v3530_v62 = vrot.slane %v3529_v54, 2  ;;  %v3945_v49 = vrot.slane %v3944_v15, 1 }
 0x257   : > { %v4014_v39 = vadd.f32 %v4013_v40, %v4012_v30  ;;  %v3600_v33 = vrot.slane %v3599_v41, 2 }
 0x258   : > { %v3531_v12 = vadd.f32 %v3530_v62, %v3529_v54  ;;  %v3946_v2 = vadd.f32 %v3945_v49, %v3944_v15 }
 0x259   : > { %v4015_v53 = vrot.slane %v4014_v39, 1  ;;  %v3601_v55 = vadd.f32 %v3600_v33, %v3599_v41 }
 0x25a   : > { %v3532_v0 = vrot.slane %v3531_v12, 1  ;;  %3947 = vst [vmem:[%s476_s14] sm:$0x1] %v3946_v2 }
 0x25b   : > { %v4016_v44 = vadd.f32 %v4015_v53, %v4014_v39  ;;  %v3602_v13 = vrot.slane %v3601_v55, 1 }
 0x25c   : > { %v3533_v42 = vadd.f32 %v3532_v0, %v3531_v12 }
 0x25d   : > { %4017 = vst [vmem:[%s479_s19] sm:$0x1] %v4016_v44  ;;  %v3603_v6 = vadd.f32 %v3602_v13, %v3601_v55 }
 0x25e   : > { %3534 = vst [vmem:[%s465_s22] sm:$0x1] %v3533_v42 }
 0x25f   : > { %3604 = vst [vmem:[%s468_s26] sm:$0x1] %v3603_v6 }
 0x260 PF: > { %s24_s23 = sadd.s32 1, %s6239_s23  }
 0x261   : > { %p21_p4 = scmp.ge.s32.totalorder %s24_s23, 4  }
 0x263   :  { %23 = sbr.rel (!%p21_p4) target bundleno = 2 (0x2), region = 151 }

</bundles_post_ra>
